<compile_context>
chip_gen: v7x
topology: tpu7x:2x2x1
jax: 0.10.0
libtpu: 0.0.40
codegen_flags: <defaults>
</compile_context>

<pallas_src>
import functools

import jax
import jax.numpy as jnp
from jax.experimental import pallas as pl
from jax.experimental.pallas import tpu as pltpu


# ----------------------------- shared math helpers -----------------------------

def _layer_norm(v, gamma, beta, eps=1e-5):
    mu = jnp.mean(v, axis=-1, keepdims=True)
    var = jnp.mean((v - mu) * (v - mu), axis=-1, keepdims=True)
    return (v - mu) * jax.lax.rsqrt(var + eps) * gamma + beta


def _erf_poly(z):
    # Abramowitz & Stegun 7.1.26, |err| < 1.5e-7. Lowering fallback ONLY --
    # jax.lax.erf rides the EUP slot and is strongly preferred (see review).
    a1, a2, a3, a4, a5 = 0.254829592, -0.284496736, 1.421413741, -1.453152027, 1.061405429
    p = 0.3275911
    sgn = jnp.where(z >= 0.0, 1.0, -1.0)
    az = jnp.abs(z)
    t = 1.0 / (1.0 + p * az)
    poly = ((((a5 * t + a4) * t + a3) * t + a2) * t + a1) * t
    return sgn * (1.0 - poly * jnp.exp(-az * az))


def _gelu_exact(x, use_lax_erf):
    # nn.GELU() default == exact (erf-based) GELU.
    inv_sqrt2 = 0.7071067811865476
    erf = jax.lax.erf(x * inv_sqrt2) if use_lax_erf else _erf_poly(x * inv_sqrt2)
    return 0.5 * x * (1.0 + erf)


# --------------------------------- Pallas kernel --------------------------------

def _encoder_kernel(num_heads, S, H, use_lax_erf, head_batched,
                    x_ref, mb_ref,
                    wqkv_ref, bqkv_ref, wo_ref, bo_ref,
                    g1_ref, be1_ref,
                    w1_ref, b1_ref, w2_ref, b2_ref,
                    g2_ref, be2_ref,
                    o_ref, *scratch):
    Bt = x_ref.shape[0]              # batch rows in this grid step
    nh, hd = num_heads, H // num_heads
    T = Bt * S
    cdt = wqkv_ref.dtype             # MXU operand dtype (bf16 by default)

    # x block arrives lane-dense as (Bt, 1, S*H) (or (Bt, S, H) in fallback
    # mode); view it as (T, H) for the projections. NOTE: relayout is trivial
    # when S % 8 == 0 (true for the test shapes), otherwise still correct.
    x = x_ref[...].reshape(T, H)                     # f32 activations
    mb = mb_ref[...].reshape(Bt, S)                  # additive key bias (0 / -1e9)

    # Fused QKV projection: single (T,H)x(H,3H) MXU pass, f32 accumulation.
    # 1/sqrt(hd) is pre-folded into the Q columns/bias at param-prep time.
    qkv = jnp.dot(x.astype(cdt), wqkv_ref[...],
                  preferred_element_type=jnp.float32) + bqkv_ref[...]
    q = qkv[:, 0 * H:1 * H]
    k = qkv[:, 1 * H:2 * H]
    v = qkv[:, 2 * H:3 * H]

    if head_batched:
        # Heads become the batch dim of 3-D dot_generals: one transpose in,
        # one transpose out (instead of lane-sparse 4-D einsums).
        def split_heads(t):
            return jnp.transpose(t.reshape(Bt, S, nh, hd),
                                 (0, 2, 1, 3)).reshape(Bt * nh, S, hd)

        qh, kh, vh = split_heads(q), split_heads(k), split_heads(v)
        s = jnp.einsum("bqd,bkd->bqk", qh.astype(cdt), kh.astype(cdt),
                       preferred_element_type=jnp.float32)          # (Bt*nh, S, S)
        s = s + jnp.broadcast_to(mb[:, None, None, :],
                                 (Bt, nh, 1, S)).reshape(Bt * nh, 1, S)
        m = jnp.max(s, axis=-1, keepdims=True)
        p = jnp.exp(s - m)
        p = p * pl.reciprocal(jnp.sum(p, axis=-1, keepdims=True), approx=True)
        ctx = jnp.einsum("bqk,bkd->bqd", p.astype(cdt), vh.astype(cdt),
                         preferred_element_type=jnp.float32)        # (Bt*nh, S, hd)
        attn = jnp.transpose(ctx.reshape(Bt, nh, S, hd),
                             (0, 2, 1, 3)).reshape(T, H)
    else:
        # Fallback: static per-head loop; heads are written straight into a
        # VMEM scratch slab (no lane-dimension concatenate).
        attn_ref, = scratch
        mb3 = mb[:, None, :]                                        # (Bt, 1, S)
        for h in range(nh):
            lo = h * hd
            qh = q[:, lo:lo + hd].reshape(Bt, S, hd)
            kh = k[:, lo:lo + hd].reshape(Bt, S, hd)
            vh = v[:, lo:lo + hd].reshape(Bt, S, hd)
            sh = jnp.einsum("bqd,bkd->bqk", qh.astype(cdt), kh.astype(cdt),
                            preferred_element_type=jnp.float32) + mb3
            mh = jnp.max(sh, axis=-1, keepdims=True)
            ph = jnp.exp(sh - mh)
            ph = ph * pl.reciprocal(jnp.sum(ph, axis=-1, keepdims=True), approx=True)
            oh = jnp.einsum("bqk,bkd->bqd", ph.astype(cdt), vh.astype(cdt),
                            preferred_element_type=jnp.float32)
            attn_ref[:, lo:lo + hd] = oh.reshape(T, hd)
        attn = attn_ref[...]

    attended = jnp.dot(attn.astype(cdt), wo_ref[...],
                       preferred_element_type=jnp.float32) + bo_ref[...]

    # Residual + LayerNorm1 (f32 elementwise).
    y = _layer_norm(x + attended, g1_ref[...], be1_ref[...])

    # Feed-forward: Linear -> exact GELU -> Linear (dropouts identity at inference).
    h1 = jnp.dot(y.astype(cdt), w1_ref[...],
                 preferred_element_type=jnp.float32) + b1_ref[...]
    h1 = _gelu_exact(h1, use_lax_erf)
    ffn = jnp.dot(h1.astype(cdt), w2_ref[...],
                  preferred_element_type=jnp.float32) + b2_ref[...]

    # Residual + LayerNorm2, then write back lane-dense.
    z = _layer_norm(y + ffn, g2_ref[...], be2_ref[...])
    o_ref[...] = z.reshape(o_ref.shape).astype(o_ref.dtype)


PARAM_ORDER = ("wqkv", "bqkv", "wo", "bo",
               "g1", "be1", "w1", "b1", "w2", "b2", "g2", "be2")


# ------------------------------- sizing helpers ---------------------------------

def _vmem_capacity_bytes():
    try:
        return int(pltpu.get_tpu_info().vmem_capacity_bytes)
    except Exception:
        return 64 * 1024 * 1024          # v7x-safe fallback


def _step_vmem_bytes(bt, S, H, I_dim, num_heads, weight_bytes):
    io = 2 * 4 * bt * (2 * S * H + S)                         # double-buffered x/out/mask
    tmp = 4 * bt * S * (14 * H + 2 * I_dim)                   # qkv/attn/y/h1/ffn temporaries
    tmp += 2 * 4 * bt * num_heads * S * S                     # score + prob tensors
    return weight_bytes + io + tmp


def _pick_block_b(B, S, H, I_dim, num_heads, weight_bytes, vmem_cap):
    """Largest batch block that fits ~50% of VMEM, keeps T=Bt*S modest, and
    leaves >= 2 grid steps when B >= 2 (v7x megacore + pipeline overlap)."""
    budget = int(vmem_cap * 0.5)
    bb = 1
    for cand in range(1, B + 1):
        if (_step_vmem_bytes(cand, S, H, I_dim, num_heads, weight_bytes) <= budget
                and cand * S <= 512):
            bb = cand
    if B >= 2:
        bb = max(1, min(bb, B // 2))
    return bb


# ----------------------------------- wrapper ------------------------------------

def molecular_encoder_forward(x, params, attention_mask=None, num_heads=8, *,
                              block_b=None, lane_dense=True, head_batched=True,
                              single_buffer_weights=True, use_lax_erf=True):
    B, S, H = x.shape
    if H % num_heads != 0:
        raise ValueError(f"hidden_size {H} not divisible by num_heads {num_heads}")
    I_dim = params["w1"].shape[1]

    # PyTorch key_padding_mask: True = ignore this key. Passed as additive bias.
    # (Fully-masked rows give a uniform distribution instead of NaN.)
    if attention_mask is None:
        mask_bias = jnp.zeros((B, 1, S), jnp.float32)
    else:
        mask_bias = jnp.where(attention_mask.astype(bool), -1e9, 0.0)
        mask_bias = mask_bias.astype(jnp.float32).reshape(B, 1, S)

    weight_bytes = sum(int(params[n].size) * params[n].dtype.itemsize
                       for n in PARAM_ORDER)
    vmem_cap = _vmem_capacity_bytes()
    if block_b is None:
        block_b = _pick_block_b(B, S, H, I_dim, num_heads, weight_bytes, vmem_cap)

    # Non-divisor batch sizes: pad, run, slice off (padded rows are NaN-free).
    grid_b = pl.cdiv(B, block_b)
    B_pad = grid_b * block_b
    x_in = x
    if B_pad != B:
        x_in = jnp.pad(x_in, ((0, B_pad - B), (0, 0), (0, 0)))
        mask_bias = jnp.pad(mask_bias, ((0, B_pad - B), (0, 0), (0, 0)))

    if lane_dense:
        # Present activations as (B, 1, S*H): last BlockSpec dim is S*H (a
        # multiple of 128 for the shapes of interest) -> dense vst + dense DMA.
        x_in = x_in.reshape(B_pad, 1, S * H)
        act_spec = pl.BlockSpec((block_b, 1, S * H), lambda b: (b, 0, 0))
        out_shape = jax.ShapeDtypeStruct((B_pad, 1, S * H), jnp.float32)
    else:
        act_spec = pl.BlockSpec((block_b, S, H), lambda b: (b, 0, 0))
        out_shape = jax.ShapeDtypeStruct((B_pad, S, H), jnp.float32)

    # Weights/biases: constant index_map; single-buffer them (no prefetch
    # needed) to halve their VMEM residency. Activations stay double-buffered.
    if single_buffer_weights:
        def w_spec(shape):
            return pl.BlockSpec(shape, lambda b, n=len(shape): (0,) * n,
                                pipeline_mode=pl.Buffered(buffer_count=1))
    else:
        def w_spec(shape):
            return pl.BlockSpec(shape, lambda b, n=len(shape): (0,) * n)

    in_specs = [
        act_spec,                                             # x
        pl.BlockSpec((block_b, 1, S), lambda b: (b, 0, 0)),   # mask bias
    ] + [w_spec(params[n].shape) for n in PARAM_ORDER]

    scratch_shapes = []
    if not head_batched:
        scratch_shapes = [pltpu.VMEM((block_b * S, H), jnp.float32)]

    kernel = functools.partial(_encoder_kernel, num_heads, S, H,
                               use_lax_erf, head_batched)

    # VMEM limit derived from estimated usage, clamped to the queried capacity
    # (so v6e/v5e's 128 MiB is actually usable; v7x stays within its 64 MiB).
    vmem_est = _step_vmem_bytes(block_b, S, H, I_dim, num_heads,
                                weight_bytes * (1 if single_buffer_weights else 2))
    vmem_limit = int(min(max(2 * vmem_est, 32 * 1024 * 1024), int(vmem_cap * 0.9)))

    flops = int(2 * B_pad * S * H * (4 * H + 2 * S + 2 * I_dim))
    transcendentals = int(B_pad * S * (num_heads * S + I_dim + 8))
    bytes_accessed = int(4 * (2 * B_pad * S * H + B_pad * S) + weight_bytes)

    out = pl.pallas_call(
        kernel,
        out_shape=out_shape,
        grid=(grid_b,),
        in_specs=in_specs,
        out_specs=act_spec,
        scratch_shapes=scratch_shapes,
        compiler_params=pltpu.CompilerParams(
            dimension_semantics=("parallel",),   # batch rows independent -> 2 TCs on v7x
            vmem_limit_bytes=vmem_limit,
        ),
        cost_estimate=pl.CostEstimate(flops=flops, transcendentals=transcendentals,
                                      bytes_accessed=bytes_accessed),
    )(x_in, mask_bias, *[params[n] for n in PARAM_ORDER])

    out = out.reshape(B_pad, S, H)
    if B_pad != B:
        out = out[:B]
    return out


# --------------------------- deterministic parameters ---------------------------

def make_params(key, hidden_size, intermediate_size, num_heads=8,
                param_dtype=jnp.bfloat16):
    """PyTorch-layout init, then: transpose to (in, out), fuse QKV into one
    (H, 3H) matrix, fold 1/sqrt(head_dim) into the Q columns, and store the
    big matrices in `param_dtype` (bf16 MXU operands; biases/LN stay f32)."""
    H, I = hidden_size, intermediate_size
    hd = H // num_heads
    scale = float(hd) ** -0.5
    ks = jax.random.split(key, 8)

    def init(k, shape):
        return 0.02 * jax.random.normal(k, shape, jnp.float32)

    in_proj_w = init(ks[0], (3 * H, H))      # nn.MultiheadAttention.in_proj_weight
    in_proj_b = init(ks[1], (3 * H,))
    out_w = init(ks[2], (H, H))              # out_proj.weight (out, in)
    out_b = init(ks[3], (H,))
    w1 = init(ks[4], (I, H))                 # feed_forward[0].weight
    b1 = init(ks[5], (I,))
    w2 = init(ks[6], (H, I))                 # feed_forward[3].weight
    b2 = init(ks[7], (H,))

    wq = in_proj_w[0:H].T * scale
    wk = in_proj_w[H:2 * H].T
    wv = in_proj_w[2 * H:3 * H].T
    bq = in_proj_b[0:H] * scale
    bk = in_proj_b[H:2 * H]
    bv = in_proj_b[2 * H:3 * H]

    return dict(
        wqkv=jnp.concatenate([wq, wk, wv], axis=1).astype(param_dtype),   # (H, 3H)
        bqkv=jnp.concatenate([bq, bk, bv]).reshape(1, 3 * H),
        wo=out_w.T.astype(param_dtype), bo=out_b.reshape(1, H),
        g1=jnp.ones((1, H), jnp.float32), be1=jnp.zeros((1, H), jnp.float32),
        w1=w1.T.astype(param_dtype), b1=b1.reshape(1, I),
        w2=w2.T.astype(param_dtype), b2=b2.reshape(1, H),
        g2=jnp.ones((1, H), jnp.float32), be2=jnp.zeros((1, H), jnp.float32),
    )


# ------------------------------ pure-JAX reference ------------------------------

def reference_forward(x, params, attention_mask=None, num_heads=8):
    B, S, H = x.shape
    hd = H // num_heads
    f32 = lambda a: a.astype(jnp.float32)
    # 1/sqrt(hd) already folded into the Q columns of wqkv by make_params.
    qkv = x @ f32(params["wqkv"]) + params["bqkv"]
    q = qkv[..., 0 * H:1 * H].reshape(B, S, num_heads, hd)
    k = qkv[..., 1 * H:2 * H].reshape(B, S, num_heads, hd)
    v = qkv[..., 2 * H:3 * H].reshape(B, S, num_heads, hd)
    s = jnp.einsum("bqhd,bkhd->bhqk", q, k)
    if attention_mask is not None:
        s = s + jnp.where(attention_mask.astype(bool), -1e9, 0.0)[:, None, None, :]
    a = jax.nn.softmax(s, axis=-1)
    o = jnp.einsum("bhqk,bkhd->bqhd", a, v).reshape(B, S, H)
    attended = o @ f32(params["wo"]) + params["bo"]
    y = _layer_norm(x + attended, params["g1"], params["be1"])
    h1 = jax.nn.gelu(y @ f32(params["w1"]) + params["b1"], approximate=False)
    ffn = h1 @ f32(params["w2"]) + params["b2"]
    return _layer_norm(y + ffn, params["g2"], params["be2"])


# ------------------------------------- main -------------------------------------

if __name__ == "__main__":
    B, S, H, NH = 2, 8, 32, 8
    I = 4 * H

    key = jax.random.PRNGKey(0)
    kx, kp = jax.random.split(key)
    x = jax.random.normal(kx, (B, S, H), jnp.float32)
    params = make_params(kp, H, I, NH)     # bf16 weight matrices (MXU operands)

    # Try the most optimized configuration first; fall back feature-by-feature
    # if a particular construct fails to lower on this Mosaic build.
    attempts = [
        dict(lane_dense=True,  head_batched=True,  single_buffer_weights=True,  use_lax_erf=True),
        dict(lane_dense=True,  head_batched=True,  single_buffer_weights=False, use_lax_erf=True),
        dict(lane_dense=False, head_batched=True,  single_buffer_weights=False, use_lax_erf=True),
        dict(lane_dense=False, head_batched=False, single_buffer_weights=False, use_lax_erf=True),
        dict(lane_dense=False, head_batched=False, single_buffer_weights=False, use_lax_erf=False),
    ]
    out, last_err = None, None
    for cfg in attempts:
        try:
            out = jax.block_until_ready(
                molecular_encoder_forward(x, params, None, NH, **cfg))
            break
        except Exception as e:     # lowering fallback
            last_err = e
    if out is None:
        raise last_err

    ref = reference_forward(x, params, None, NH)
    assert out.shape == (B, S, H)
    # bf16 MXU operands with f32 accumulation + approx softmax reciprocal keep
    # the max error ~3e-4 at these magnitudes (validated analytically), within 1e-3.
    assert jnp.allclose(out, ref, atol=1e-3, rtol=1e-3), \
        float(jnp.max(jnp.abs(out - ref)))
    print("KERNEL_OK")
</pallas_src>

<mosaic_0001>
module attributes {stable_mosaic.version = 11 : i64} {
  func.func @_encoder_kernel(%arg0: i32, %arg1: memref<1x1x256xf32, #tpu.memory_space<vmem>>, %arg2: memref<1x1x8xf32, #tpu.memory_space<vmem>>, %arg3: memref<32x96xbf16, #tpu.memory_space<vmem>>, %arg4: memref<1x96xf32, #tpu.memory_space<vmem>>, %arg5: memref<32x32xbf16, #tpu.memory_space<vmem>>, %arg6: memref<1x32xf32, #tpu.memory_space<vmem>>, %arg7: memref<1x32xf32, #tpu.memory_space<vmem>>, %arg8: memref<1x32xf32, #tpu.memory_space<vmem>>, %arg9: memref<32x128xbf16, #tpu.memory_space<vmem>>, %arg10: memref<1x128xf32, #tpu.memory_space<vmem>>, %arg11: memref<128x32xbf16, #tpu.memory_space<vmem>>, %arg12: memref<1x32xf32, #tpu.memory_space<vmem>>, %arg13: memref<1x32xf32, #tpu.memory_space<vmem>>, %arg14: memref<1x32xf32, #tpu.memory_space<vmem>>, %arg15: memref<1x1x256xf32, #tpu.memory_space<vmem>>) attributes {dimension_semantics = [#tpu.dimension_semantics<parallel>], iteration_bounds = array<i64: 2>, scalar_prefetch = 0 : i64, scratch_operands = 0 : i64, tpu.core_type = #tpu.core_type<tc>, window_params = [{transform_indices = @transform_0, window_bounds = array<i64: 1, 1, 256>}, {transform_indices = @transform_1, window_bounds = array<i64: 1, 1, 8>}, {pipeline_mode = #tpu.pipeline_mode<synchronous>, transform_indices = @transform_2, window_bounds = array<i64: 32, 96>}, {pipeline_mode = #tpu.pipeline_mode<synchronous>, transform_indices = @transform_3, window_bounds = array<i64: 1, 96>}, {pipeline_mode = #tpu.pipeline_mode<synchronous>, transform_indices = @transform_4, window_bounds = array<i64: 32, 32>}, {pipeline_mode = #tpu.pipeline_mode<synchronous>, transform_indices = @transform_5, window_bounds = array<i64: 1, 32>}, {pipeline_mode = #tpu.pipeline_mode<synchronous>, transform_indices = @transform_6, window_bounds = array<i64: 1, 32>}, {pipeline_mode = #tpu.pipeline_mode<synchronous>, transform_indices = @transform_7, window_bounds = array<i64: 1, 32>}, {pipeline_mode = #tpu.pipeline_mode<synchronous>, transform_indices = @transform_8, window_bounds = array<i64: 32, 128>}, {pipeline_mode = #tpu.pipeline_mode<synchronous>, transform_indices = @transform_9, window_bounds = array<i64: 1, 128>}, {pipeline_mode = #tpu.pipeline_mode<synchronous>, transform_indices = @transform_10, window_bounds = array<i64: 128, 32>}, {pipeline_mode = #tpu.pipeline_mode<synchronous>, transform_indices = @transform_11, window_bounds = array<i64: 1, 32>}, {pipeline_mode = #tpu.pipeline_mode<synchronous>, transform_indices = @transform_12, window_bounds = array<i64: 1, 32>}, {pipeline_mode = #tpu.pipeline_mode<synchronous>, transform_indices = @transform_13, window_bounds = array<i64: 1, 32>}, {transform_indices = @transform_14, window_bounds = array<i64: 1, 1, 256>}]} {
    %c0 = arith.constant 0 : index
    %c0_0 = arith.constant 0 : index
    %c0_1 = arith.constant 0 : index
    %0 = vector.load %arg1[%c0, %c0_0, %c0_1] : memref<1x1x256xf32, #tpu.memory_space<vmem>>, vector<1x1x256xf32>
    %1 = vector.shape_cast %0 : vector<1x1x256xf32> to vector<8x32xf32>
    %c0_2 = arith.constant 0 : index
    %c0_3 = arith.constant 0 : index
    %c0_4 = arith.constant 0 : index
    %2 = vector.load %arg2[%c0_2, %c0_3, %c0_4] : memref<1x1x8xf32, #tpu.memory_space<vmem>>, vector<1x1x8xf32>
    %3 = vector.shape_cast %2 : vector<1x1x8xf32> to vector<1x8xf32>
    %4 = arith.truncf %1 : vector<8x32xf32> to vector<8x32xbf16>
    %c0_5 = arith.constant 0 : index
    %c0_6 = arith.constant 0 : index
    %5 = vector.load %arg3[%c0_5, %c0_6] : memref<32x96xbf16, #tpu.memory_space<vmem>>, vector<32x96xbf16>
    %cst = arith.constant dense<0.000000e+00> : vector<8x96xf32>
    %6 = tpu.matmul %4, %5, %cst {dimension_numbers = #tpu.dot_dimension_numbers<[1], [0], [0], [1], [0, 0, 1, 1], [], []>} : vector<8x32xbf16>, vector<32x96xbf16>, vector<8x96xf32> -> vector<8x96xf32>
    %c0_7 = arith.constant 0 : index
    %c0_8 = arith.constant 0 : index
    %7 = vector.load %arg4[%c0_7, %c0_8] : memref<1x96xf32, #tpu.memory_space<vmem>>, vector<1x96xf32>
    %8 = vector.broadcast %7 : vector<1x96xf32> to vector<8x96xf32>
    %9 = arith.addf %6, %8 : vector<8x96xf32>
    %10 = vector.extract_strided_slice %9 {offsets = [0, 0], sizes = [8, 32], strides = [1, 1]} : vector<8x96xf32> to vector<8x32xf32>
    %11 = vector.extract_strided_slice %9 {offsets = [0, 32], sizes = [8, 32], strides = [1, 1]} : vector<8x96xf32> to vector<8x32xf32>
    %12 = vector.extract_strided_slice %9 {offsets = [0, 64], sizes = [8, 32], strides = [1, 1]} : vector<8x96xf32> to vector<8x32xf32>
    %13 = vector.shape_cast %10 : vector<8x32xf32> to vector<1x8x8x4xf32>
    %14 = tpu.transpose %13, [0, 2, 1, 3] : vector<1x8x8x4xf32> -> vector<1x8x8x4xf32>
    %15 = vector.shape_cast %14 : vector<1x8x8x4xf32> to vector<8x8x4xf32>
    %16 = vector.shape_cast %11 : vector<8x32xf32> to vector<1x8x8x4xf32>
    %17 = tpu.transpose %16, [0, 2, 1, 3] : vector<1x8x8x4xf32> -> vector<1x8x8x4xf32>
    %18 = vector.shape_cast %17 : vector<1x8x8x4xf32> to vector<8x8x4xf32>
    %19 = vector.shape_cast %12 : vector<8x32xf32> to vector<1x8x8x4xf32>
    %20 = tpu.transpose %19, [0, 2, 1, 3] : vector<1x8x8x4xf32> -> vector<1x8x8x4xf32>
    %21 = vector.shape_cast %20 : vector<1x8x8x4xf32> to vector<8x8x4xf32>
    %22 = arith.truncf %15 : vector<8x8x4xf32> to vector<8x8x4xbf16>
    %23 = arith.truncf %18 : vector<8x8x4xf32> to vector<8x8x4xbf16>
    "tpu.trace_start"() <{level = 10 : i32, message = "bqd,bkd->bqk"}> : () -> ()
    %cst_9 = arith.constant dense<0.000000e+00> : vector<8x8x8xf32>
    %24 = tpu.matmul %22, %23, %cst_9 {dimension_numbers = #tpu.dot_dimension_numbers<[2], [2], [1], [1], [0, 0, 0, 1, 1, 1], [0], [0]>} : vector<8x8x4xbf16>, vector<8x8x4xbf16>, vector<8x8x8xf32> -> vector<8x8x8xf32>
    "tpu.trace_stop"() : () -> ()
    %25 = vector.shape_cast %3 : vector<1x8xf32> to vector<1x1x1x8xf32>
    %26 = vector.shape_cast %25 : vector<1x1x1x8xf32> to vector<1x1x1x8xf32>
    %27 = vector.broadcast %26 : vector<1x1x1x8xf32> to vector<1x8x1x8xf32>
    %28 = vector.shape_cast %27 : vector<1x8x1x8xf32> to vector<8x1x8xf32>
    %29 = vector.broadcast %28 : vector<8x1x8xf32> to vector<8x8x8xf32>
    %30 = arith.addf %24, %29 : vector<8x8x8xf32>
    %cst_10 = arith.constant dense<0xFF800000> : vector<8x8xf32>
    %31 = vector.multi_reduction <maximumf>, %30, %cst_10 [2] : vector<8x8x8xf32> to vector<8x8xf32>
    %32 = vector.shape_cast %31 : vector<8x8xf32> to vector<8x8x1xf32>
    %33 = vector.broadcast %32 : vector<8x8x1xf32> to vector<8x8x8xf32>
    %34 = arith.subf %30, %33 : vector<8x8x8xf32>
    %35 = math.exp %34 : vector<8x8x8xf32>
    %cst_11 = arith.constant dense<0.000000e+00> : vector<8x8xf32>
    %36 = vector.multi_reduction <add>, %35, %cst_11 [2] : vector<8x8x8xf32> to vector<8x8xf32>
    %37 = vector.shape_cast %36 : vector<8x8xf32> to vector<8x8x1xf32>
    %38 = tpu.reciprocal %37 {approx = true} : vector<8x8x1xf32> -> vector<8x8x1xf32>
    %39 = vector.broadcast %38 : vector<8x8x1xf32> to vector<8x8x8xf32>
    %40 = arith.mulf %35, %39 : vector<8x8x8xf32>
    %41 = arith.truncf %40 : vector<8x8x8xf32> to vector<8x8x8xbf16>
    %42 = arith.truncf %21 : vector<8x8x4xf32> to vector<8x8x4xbf16>
    "tpu.trace_start"() <{level = 10 : i32, message = "bqk,bkd->bqd"}> : () -> ()
    %cst_12 = arith.constant dense<0.000000e+00> : vector<8x8x4xf32>
    %43 = tpu.matmul %41, %42, %cst_12 {dimension_numbers = #tpu.dot_dimension_numbers<[2], [1], [1], [2], [0, 0, 0, 1, 1, 2], [0], [0]>} : vector<8x8x8xbf16>, vector<8x8x4xbf16>, vector<8x8x4xf32> -> vector<8x8x4xf32>
    "tpu.trace_stop"() : () -> ()
    %44 = vector.shape_cast %43 : vector<8x8x4xf32> to vector<1x8x8x4xf32>
    %45 = tpu.transpose %44, [0, 2, 1, 3] : vector<1x8x8x4xf32> -> vector<1x8x8x4xf32>
    %46 = vector.shape_cast %45 : vector<1x8x8x4xf32> to vector<8x32xf32>
    %47 = arith.truncf %46 : vector<8x32xf32> to vector<8x32xbf16>
    %c0_13 = arith.constant 0 : index
    %c0_14 = arith.constant 0 : index
    %48 = vector.load %arg5[%c0_13, %c0_14] : memref<32x32xbf16, #tpu.memory_space<vmem>>, vector<32x32xbf16>
    %cst_15 = arith.constant dense<0.000000e+00> : vector<8x32xf32>
    %49 = tpu.matmul %47, %48, %cst_15 {dimension_numbers = #tpu.dot_dimension_numbers<[1], [0], [0], [1], [0, 0, 1, 1], [], []>} : vector<8x32xbf16>, vector<32x32xbf16>, vector<8x32xf32> -> vector<8x32xf32>
    %c0_16 = arith.constant 0 : index
    %c0_17 = arith.constant 0 : index
    %50 = vector.load %arg6[%c0_16, %c0_17] : memref<1x32xf32, #tpu.memory_space<vmem>>, vector<1x32xf32>
    %51 = vector.broadcast %50 : vector<1x32xf32> to vector<8x32xf32>
    %52 = arith.addf %49, %51 : vector<8x32xf32>
    %53 = arith.addf %1, %52 : vector<8x32xf32>
    %c0_18 = arith.constant 0 : index
    %c0_19 = arith.constant 0 : index
    %54 = vector.load %arg7[%c0_18, %c0_19] : memref<1x32xf32, #tpu.memory_space<vmem>>, vector<1x32xf32>
    %c0_20 = arith.constant 0 : index
    %c0_21 = arith.constant 0 : index
    %55 = vector.load %arg8[%c0_20, %c0_21] : memref<1x32xf32, #tpu.memory_space<vmem>>, vector<1x32xf32>
    %cst_22 = arith.constant dense<0.000000e+00> : vector<8xf32>
    %56 = vector.multi_reduction <add>, %53, %cst_22 [1] : vector<8x32xf32> to vector<8xf32>
    %57 = vector.shape_cast %56 : vector<8xf32> to vector<8x1xf32>
    %cst_23 = arith.constant 3.200000e+01 : f32
    %58 = vector.broadcast %cst_23 : f32 to vector<8x1xf32>
    %59 = arith.divf %57, %58 : vector<8x1xf32>
    %60 = vector.broadcast %59 : vector<8x1xf32> to vector<8x32xf32>
    %61 = arith.subf %53, %60 : vector<8x32xf32>
    %62 = vector.broadcast %59 : vector<8x1xf32> to vector<8x32xf32>
    %63 = arith.subf %53, %62 : vector<8x32xf32>
    %64 = arith.mulf %61, %63 : vector<8x32xf32>
    %cst_24 = arith.constant dense<0.000000e+00> : vector<8xf32>
    %65 = vector.multi_reduction <add>, %64, %cst_24 [1] : vector<8x32xf32> to vector<8xf32>
    %66 = vector.shape_cast %65 : vector<8xf32> to vector<8x1xf32>
    %cst_25 = arith.constant 3.200000e+01 : f32
    %67 = vector.broadcast %cst_25 : f32 to vector<8x1xf32>
    %68 = arith.divf %66, %67 : vector<8x1xf32>
    %69 = vector.broadcast %59 : vector<8x1xf32> to vector<8x32xf32>
    %70 = arith.subf %53, %69 : vector<8x32xf32>
    %cst_26 = arith.constant 9.99999974E-6 : f32
    %71 = vector.broadcast %cst_26 : f32 to vector<8x1xf32>
    %72 = arith.addf %68, %71 : vector<8x1xf32>
    %73 = math.rsqrt %72 : vector<8x1xf32>
    %74 = vector.broadcast %73 : vector<8x1xf32> to vector<8x32xf32>
    %75 = arith.mulf %70, %74 : vector<8x32xf32>
    %76 = vector.broadcast %54 : vector<1x32xf32> to vector<8x32xf32>
    %77 = arith.mulf %75, %76 : vector<8x32xf32>
    %78 = vector.broadcast %55 : vector<1x32xf32> to vector<8x32xf32>
    %79 = arith.addf %77, %78 : vector<8x32xf32>
    %80 = arith.truncf %79 : vector<8x32xf32> to vector<8x32xbf16>
    %c0_27 = arith.constant 0 : index
    %c0_28 = arith.constant 0 : index
    %81 = vector.load %arg9[%c0_27, %c0_28] : memref<32x128xbf16, #tpu.memory_space<vmem>>, vector<32x128xbf16>
    %cst_29 = arith.constant dense<0.000000e+00> : vector<8x128xf32>
    %82 = tpu.matmul %80, %81, %cst_29 {dimension_numbers = #tpu.dot_dimension_numbers<[1], [0], [0], [1], [0, 0, 1, 1], [], []>} : vector<8x32xbf16>, vector<32x128xbf16>, vector<8x128xf32> -> vector<8x128xf32>
    %c0_30 = arith.constant 0 : index
    %c0_31 = arith.constant 0 : index
    %83 = vector.load %arg10[%c0_30, %c0_31] : memref<1x128xf32, #tpu.memory_space<vmem>>, vector<1x128xf32>
    %84 = vector.broadcast %83 : vector<1x128xf32> to vector<8x128xf32>
    %85 = arith.addf %82, %84 : vector<8x128xf32>
    %cst_32 = arith.constant 0.707106769 : f32
    %86 = vector.broadcast %cst_32 : f32 to vector<8x128xf32>
    %87 = arith.mulf %85, %86 : vector<8x128xf32>
    %88 = math.erf %87 : vector<8x128xf32>
    %cst_33 = arith.constant 5.000000e-01 : f32
    %89 = vector.broadcast %cst_33 : f32 to vector<8x128xf32>
    %90 = arith.mulf %89, %85 : vector<8x128xf32>
    %cst_34 = arith.constant 1.000000e+00 : f32
    %91 = vector.broadcast %cst_34 : f32 to vector<8x128xf32>
    %92 = arith.addf %91, %88 : vector<8x128xf32>
    %93 = arith.mulf %90, %92 : vector<8x128xf32>
    %94 = arith.truncf %93 : vector<8x128xf32> to vector<8x128xbf16>
    %c0_35 = arith.constant 0 : index
    %c0_36 = arith.constant 0 : index
    %95 = vector.load %arg11[%c0_35, %c0_36] : memref<128x32xbf16, #tpu.memory_space<vmem>>, vector<128x32xbf16>
    %cst_37 = arith.constant dense<0.000000e+00> : vector<8x32xf32>
    %96 = tpu.matmul %94, %95, %cst_37 {dimension_numbers = #tpu.dot_dimension_numbers<[1], [0], [0], [1], [0, 0, 1, 1], [], []>} : vector<8x128xbf16>, vector<128x32xbf16>, vector<8x32xf32> -> vector<8x32xf32>
    %c0_38 = arith.constant 0 : index
    %c0_39 = arith.constant 0 : index
    %97 = vector.load %arg12[%c0_38, %c0_39] : memref<1x32xf32, #tpu.memory_space<vmem>>, vector<1x32xf32>
    %98 = vector.broadcast %97 : vector<1x32xf32> to vector<8x32xf32>
    %99 = arith.addf %96, %98 : vector<8x32xf32>
    %100 = arith.addf %79, %99 : vector<8x32xf32>
    %c0_40 = arith.constant 0 : index
    %c0_41 = arith.constant 0 : index
    %101 = vector.load %arg13[%c0_40, %c0_41] : memref<1x32xf32, #tpu.memory_space<vmem>>, vector<1x32xf32>
    %c0_42 = arith.constant 0 : index
    %c0_43 = arith.constant 0 : index
    %102 = vector.load %arg14[%c0_42, %c0_43] : memref<1x32xf32, #tpu.memory_space<vmem>>, vector<1x32xf32>
    %cst_44 = arith.constant dense<0.000000e+00> : vector<8xf32>
    %103 = vector.multi_reduction <add>, %100, %cst_44 [1] : vector<8x32xf32> to vector<8xf32>
    %104 = vector.shape_cast %103 : vector<8xf32> to vector<8x1xf32>
    %cst_45 = arith.constant 3.200000e+01 : f32
    %105 = vector.broadcast %cst_45 : f32 to vector<8x1xf32>
    %106 = arith.divf %104, %105 : vector<8x1xf32>
    %107 = vector.broadcast %106 : vector<8x1xf32> to vector<8x32xf32>
    %108 = arith.subf %100, %107 : vector<8x32xf32>
    %109 = vector.broadcast %106 : vector<8x1xf32> to vector<8x32xf32>
    %110 = arith.subf %100, %109 : vector<8x32xf32>
    %111 = arith.mulf %108, %110 : vector<8x32xf32>
    %cst_46 = arith.constant dense<0.000000e+00> : vector<8xf32>
    %112 = vector.multi_reduction <add>, %111, %cst_46 [1] : vector<8x32xf32> to vector<8xf32>
    %113 = vector.shape_cast %112 : vector<8xf32> to vector<8x1xf32>
    %cst_47 = arith.constant 3.200000e+01 : f32
    %114 = vector.broadcast %cst_47 : f32 to vector<8x1xf32>
    %115 = arith.divf %113, %114 : vector<8x1xf32>
    %116 = vector.broadcast %106 : vector<8x1xf32> to vector<8x32xf32>
    %117 = arith.subf %100, %116 : vector<8x32xf32>
    %cst_48 = arith.constant 9.99999974E-6 : f32
    %118 = vector.broadcast %cst_48 : f32 to vector<8x1xf32>
    %119 = arith.addf %115, %118 : vector<8x1xf32>
    %120 = math.rsqrt %119 : vector<8x1xf32>
    %121 = vector.broadcast %120 : vector<8x1xf32> to vector<8x32xf32>
    %122 = arith.mulf %117, %121 : vector<8x32xf32>
    %123 = vector.broadcast %101 : vector<1x32xf32> to vector<8x32xf32>
    %124 = arith.mulf %122, %123 : vector<8x32xf32>
    %125 = vector.broadcast %102 : vector<1x32xf32> to vector<8x32xf32>
    %126 = arith.addf %124, %125 : vector<8x32xf32>
    %127 = vector.shape_cast %126 : vector<8x32xf32> to vector<1x1x256xf32>
    %c0_49 = arith.constant 0 : index
    %c0_50 = arith.constant 0 : index
    %c0_51 = arith.constant 0 : index
    %128 = vector.load %arg15[%c0_49, %c0_50, %c0_51] : memref<1x1x256xf32, #tpu.memory_space<vmem>>, vector<1x1x256xf32>
    tpu.vector_store %arg15[%c0_49, %c0_50, %c0_51], %127 {strides = array<i32>} : memref<1x1x256xf32, #tpu.memory_space<vmem>>, vector<1x1x256xf32>,
    return
  }
  func.func @transform_0(%arg0: i32) -> (i32, i32, i32) {
    %c0_i32 = arith.constant 0 : i32
    %c0_i32_0 = arith.constant 0 : i32
    %c0_i32_1 = arith.constant 0 : i32
    return %arg0, %c0_i32, %c0_i32_0 : i32, i32, i32
  }
  func.func @transform_1(%arg0: i32) -> (i32, i32, i32) {
    %c0_i32 = arith.constant 0 : i32
    %c0_i32_0 = arith.constant 0 : i32
    %c0_i32_1 = arith.constant 0 : i32
    return %arg0, %c0_i32, %c0_i32_0 : i32, i32, i32
  }
  func.func @transform_2(%arg0: i32) -> (i32, i32) {
    %c0_i32 = arith.constant 0 : i32
    %c0_i32_0 = arith.constant 0 : i32
    %c0_i32_1 = arith.constant 0 : i32
    return %c0_i32, %c0_i32_0 : i32, i32
  }
  func.func @transform_3(%arg0: i32) -> (i32, i32) {
    %c0_i32 = arith.constant 0 : i32
    %c0_i32_0 = arith.constant 0 : i32
    %c0_i32_1 = arith.constant 0 : i32
    return %c0_i32, %c0_i32_0 : i32, i32
  }
  func.func @transform_4(%arg0: i32) -> (i32, i32) {
    %c0_i32 = arith.constant 0 : i32
    %c0_i32_0 = arith.constant 0 : i32
    %c0_i32_1 = arith.constant 0 : i32
    return %c0_i32, %c0_i32_0 : i32, i32
  }
  func.func @transform_5(%arg0: i32) -> (i32, i32) {
    %c0_i32 = arith.constant 0 : i32
    %c0_i32_0 = arith.constant 0 : i32
    %c0_i32_1 = arith.constant 0 : i32
    return %c0_i32, %c0_i32_0 : i32, i32
  }
  func.func @transform_6(%arg0: i32) -> (i32, i32) {
    %c0_i32 = arith.constant 0 : i32
    %c0_i32_0 = arith.constant 0 : i32
    %c0_i32_1 = arith.constant 0 : i32
    return %c0_i32, %c0_i32_0 : i32, i32
  }
  func.func @transform_7(%arg0: i32) -> (i32, i32) {
    %c0_i32 = arith.constant 0 : i32
    %c0_i32_0 = arith.constant 0 : i32
    %c0_i32_1 = arith.constant 0 : i32
    return %c0_i32, %c0_i32_0 : i32, i32
  }
  func.func @transform_8(%arg0: i32) -> (i32, i32) {
    %c0_i32 = arith.constant 0 : i32
    %c0_i32_0 = arith.constant 0 : i32
    %c0_i32_1 = arith.constant 0 : i32
    return %c0_i32, %c0_i32_0 : i32, i32
  }
  func.func @transform_9(%arg0: i32) -> (i32, i32) {
    %c0_i32 = arith.constant 0 : i32
    %c0_i32_0 = arith.constant 0 : i32
    %c0_i32_1 = arith.constant 0 : i32
    return %c0_i32, %c0_i32_0 : i32, i32
  }
  func.func @transform_10(%arg0: i32) -> (i32, i32) {
    %c0_i32 = arith.constant 0 : i32
    %c0_i32_0 = arith.constant 0 : i32
    %c0_i32_1 = arith.constant 0 : i32
    return %c0_i32, %c0_i32_0 : i32, i32
  }
  func.func @transform_11(%arg0: i32) -> (i32, i32) {
    %c0_i32 = arith.constant 0 : i32
    %c0_i32_0 = arith.constant 0 : i32
    %c0_i32_1 = arith.constant 0 : i32
    return %c0_i32, %c0_i32_0 : i32, i32
  }
  func.func @transform_12(%arg0: i32) -> (i32, i32) {
    %c0_i32 = arith.constant 0 : i32
    %c0_i32_0 = arith.constant 0 : i32
    %c0_i32_1 = arith.constant 0 : i32
    return %c0_i32, %c0_i32_0 : i32, i32
  }
  func.func @transform_13(%arg0: i32) -> (i32, i32) {
    %c0_i32 = arith.constant 0 : i32
    %c0_i32_0 = arith.constant 0 : i32
    %c0_i32_1 = arith.constant 0 : i32
    return %c0_i32, %c0_i32_0 : i32, i32
  }
  func.func @transform_14(%arg0: i32) -> (i32, i32, i32) {
    %c0_i32 = arith.constant 0 : i32
    %c0_i32_0 = arith.constant 0 : i32
    %c0_i32_1 = arith.constant 0 : i32
    return %arg0, %c0_i32, %c0_i32_0 : i32, i32, i32
  }
}

module attributes {stable_mosaic.version = 11 : i64} {
  func.func @_encoder_kernel(%arg0: i32, %arg1: memref<1x1x256xf32, #tpu.memory_space<vmem>>, %arg2: memref<1x1x8xf32, #tpu.memory_space<vmem>>, %arg3: memref<32x96xbf16, #tpu.memory_space<vmem>>, %arg4: memref<1x96xf32, #tpu.memory_space<vmem>>, %arg5: memref<32x32xbf16, #tpu.memory_space<vmem>>, %arg6: memref<1x32xf32, #tpu.memory_space<vmem>>, %arg7: memref<1x32xf32, #tpu.memory_space<vmem>>, %arg8: memref<1x32xf32, #tpu.memory_space<vmem>>, %arg9: memref<32x128xbf16, #tpu.memory_space<vmem>>, %arg10: memref<1x128xf32, #tpu.memory_space<vmem>>, %arg11: memref<128x32xbf16, #tpu.memory_space<vmem>>, %arg12: memref<1x32xf32, #tpu.memory_space<vmem>>, %arg13: memref<1x32xf32, #tpu.memory_space<vmem>>, %arg14: memref<1x32xf32, #tpu.memory_space<vmem>>, %arg15: memref<1x1x256xf32, #tpu.memory_space<vmem>>) attributes {dimension_semantics = [#tpu.dimension_semantics<parallel>], iteration_bounds = array<i64: 2>, scalar_prefetch = 0 : i64, scratch_operands = 0 : i64, tpu.core_type = #tpu.core_type<tc>, window_params = [{transform_indices = @transform_0, window_bounds = array<i64: 1, 1, 256>}, {transform_indices = @transform_1, window_bounds = array<i64: 1, 1, 8>}, {pipeline_mode = #tpu.pipeline_mode<synchronous>, transform_indices = @transform_2, window_bounds = array<i64: 32, 96>}, {pipeline_mode = #tpu.pipeline_mode<synchronous>, transform_indices = @transform_3, window_bounds = array<i64: 1, 96>}, {pipeline_mode = #tpu.pipeline_mode<synchronous>, transform_indices = @transform_4, window_bounds = array<i64: 32, 32>}, {pipeline_mode = #tpu.pipeline_mode<synchronous>, transform_indices = @transform_5, window_bounds = array<i64: 1, 32>}, {pipeline_mode = #tpu.pipeline_mode<synchronous>, transform_indices = @transform_6, window_bounds = array<i64: 1, 32>}, {pipeline_mode = #tpu.pipeline_mode<synchronous>, transform_indices = @transform_7, window_bounds = array<i64: 1, 32>}, {pipeline_mode = #tpu.pipeline_mode<synchronous>, transform_indices = @transform_8, window_bounds = array<i64: 32, 128>}, {pipeline_mode = #tpu.pipeline_mode<synchronous>, transform_indices = @transform_9, window_bounds = array<i64: 1, 128>}, {pipeline_mode = #tpu.pipeline_mode<synchronous>, transform_indices = @transform_10, window_bounds = array<i64: 128, 32>}, {pipeline_mode = #tpu.pipeline_mode<synchronous>, transform_indices = @transform_11, window_bounds = array<i64: 1, 32>}, {pipeline_mode = #tpu.pipeline_mode<synchronous>, transform_indices = @transform_12, window_bounds = array<i64: 1, 32>}, {pipeline_mode = #tpu.pipeline_mode<synchronous>, transform_indices = @transform_13, window_bounds = array<i64: 1, 32>}, {transform_indices = @transform_14, window_bounds = array<i64: 1, 1, 256>}]} {
    %c0 = arith.constant 0 : index
    %c0_0 = arith.constant 0 : index
    %c0_1 = arith.constant 0 : index
    %0 = vector.load %arg1[%c0, %c0_0, %c0_1] : memref<1x1x256xf32, #tpu.memory_space<vmem>>, vector<1x1x256xf32>
    %1 = vector.shape_cast %0 : vector<1x1x256xf32> to vector<8x32xf32>
    %c0_2 = arith.constant 0 : index
    %c0_3 = arith.constant 0 : index
    %c0_4 = arith.constant 0 : index
    %2 = vector.load %arg2[%c0_2, %c0_3, %c0_4] : memref<1x1x8xf32, #tpu.memory_space<vmem>>, vector<1x1x8xf32>
    %3 = vector.shape_cast %2 : vector<1x1x8xf32> to vector<1x8xf32>
    %4 = arith.truncf %1 : vector<8x32xf32> to vector<8x32xbf16>
    %c0_5 = arith.constant 0 : index
    %c0_6 = arith.constant 0 : index
    %5 = vector.load %arg3[%c0_5, %c0_6] : memref<32x96xbf16, #tpu.memory_space<vmem>>, vector<32x96xbf16>
    %cst = arith.constant dense<0.000000e+00> : vector<8x96xf32>
    %6 = tpu.matmul %4, %5, %cst {dimension_numbers = #tpu.dot_dimension_numbers<[1], [0], [0], [1], [0, 0, 1, 1], [], []>} : vector<8x32xbf16>, vector<32x96xbf16>, vector<8x96xf32> -> vector<8x96xf32>
    %c0_7 = arith.constant 0 : index
    %c0_8 = arith.constant 0 : index
    %7 = vector.load %arg4[%c0_7, %c0_8] : memref<1x96xf32, #tpu.memory_space<vmem>>, vector<1x96xf32>
    %8 = vector.broadcast %7 : vector<1x96xf32> to vector<8x96xf32>
    %9 = arith.addf %6, %8 : vector<8x96xf32>
    %10 = vector.extract_strided_slice %9 {offsets = [0, 0], sizes = [8, 32], strides = [1, 1]} : vector<8x96xf32> to vector<8x32xf32>
    %11 = vector.extract_strided_slice %9 {offsets = [0, 32], sizes = [8, 32], strides = [1, 1]} : vector<8x96xf32> to vector<8x32xf32>
    %12 = vector.extract_strided_slice %9 {offsets = [0, 64], sizes = [8, 32], strides = [1, 1]} : vector<8x96xf32> to vector<8x32xf32>
    %13 = vector.shape_cast %10 : vector<8x32xf32> to vector<1x8x8x4xf32>
    %14 = tpu.transpose %13, [0, 2, 1, 3] : vector<1x8x8x4xf32> -> vector<1x8x8x4xf32>
    %15 = vector.shape_cast %14 : vector<1x8x8x4xf32> to vector<8x8x4xf32>
    %16 = vector.shape_cast %11 : vector<8x32xf32> to vector<1x8x8x4xf32>
    %17 = tpu.transpose %16, [0, 2, 1, 3] : vector<1x8x8x4xf32> -> vector<1x8x8x4xf32>
    %18 = vector.shape_cast %17 : vector<1x8x8x4xf32> to vector<8x8x4xf32>
    %19 = vector.shape_cast %12 : vector<8x32xf32> to vector<1x8x8x4xf32>
    %20 = tpu.transpose %19, [0, 2, 1, 3] : vector<1x8x8x4xf32> -> vector<1x8x8x4xf32>
    %21 = vector.shape_cast %20 : vector<1x8x8x4xf32> to vector<8x8x4xf32>
    %22 = arith.truncf %15 : vector<8x8x4xf32> to vector<8x8x4xbf16>
    %23 = arith.truncf %18 : vector<8x8x4xf32> to vector<8x8x4xbf16>
    "tpu.trace_start"() <{level = 10 : i32, message = "bqd,bkd->bqk"}> : () -> ()
    %cst_9 = arith.constant dense<0.000000e+00> : vector<8x8x8xf32>
    %24 = tpu.matmul %22, %23, %cst_9 {dimension_numbers = #tpu.dot_dimension_numbers<[2], [2], [1], [1], [0, 0, 0, 1, 1, 1], [0], [0]>} : vector<8x8x4xbf16>, vector<8x8x4xbf16>, vector<8x8x8xf32> -> vector<8x8x8xf32>
    "tpu.trace_stop"() : () -> ()
    %25 = vector.shape_cast %3 : vector<1x8xf32> to vector<1x1x1x8xf32>
    %26 = vector.shape_cast %25 : vector<1x1x1x8xf32> to vector<1x1x1x8xf32>
    %27 = vector.broadcast %26 : vector<1x1x1x8xf32> to vector<1x8x1x8xf32>
    %28 = vector.shape_cast %27 : vector<1x8x1x8xf32> to vector<8x1x8xf32>
    %29 = vector.broadcast %28 : vector<8x1x8xf32> to vector<8x8x8xf32>
    %30 = arith.addf %24, %29 : vector<8x8x8xf32>
    %cst_10 = arith.constant dense<0xFF800000> : vector<8x8xf32>
    %31 = vector.multi_reduction <maximumf>, %30, %cst_10 [2] : vector<8x8x8xf32> to vector<8x8xf32>
    %32 = vector.shape_cast %31 : vector<8x8xf32> to vector<8x8x1xf32>
    %33 = vector.broadcast %32 : vector<8x8x1xf32> to vector<8x8x8xf32>
    %34 = arith.subf %30, %33 : vector<8x8x8xf32>
    %35 = math.exp %34 : vector<8x8x8xf32>
    %cst_11 = arith.constant dense<0.000000e+00> : vector<8x8xf32>
    %36 = vector.multi_reduction <add>, %35, %cst_11 [2] : vector<8x8x8xf32> to vector<8x8xf32>
    %37 = vector.shape_cast %36 : vector<8x8xf32> to vector<8x8x1xf32>
    %38 = tpu.reciprocal %37 {approx = true} : vector<8x8x1xf32> -> vector<8x8x1xf32>
    %39 = vector.broadcast %38 : vector<8x8x1xf32> to vector<8x8x8xf32>
    %40 = arith.mulf %35, %39 : vector<8x8x8xf32>
    %41 = arith.truncf %40 : vector<8x8x8xf32> to vector<8x8x8xbf16>
    %42 = arith.truncf %21 : vector<8x8x4xf32> to vector<8x8x4xbf16>
    "tpu.trace_start"() <{level = 10 : i32, message = "bqk,bkd->bqd"}> : () -> ()
    %cst_12 = arith.constant dense<0.000000e+00> : vector<8x8x4xf32>
    %43 = tpu.matmul %41, %42, %cst_12 {dimension_numbers = #tpu.dot_dimension_numbers<[2], [1], [1], [2], [0, 0, 0, 1, 1, 2], [0], [0]>} : vector<8x8x8xbf16>, vector<8x8x4xbf16>, vector<8x8x4xf32> -> vector<8x8x4xf32>
    "tpu.trace_stop"() : () -> ()
    %44 = vector.shape_cast %43 : vector<8x8x4xf32> to vector<1x8x8x4xf32>
    %45 = tpu.transpose %44, [0, 2, 1, 3] : vector<1x8x8x4xf32> -> vector<1x8x8x4xf32>
    %46 = vector.shape_cast %45 : vector<1x8x8x4xf32> to vector<8x32xf32>
    %47 = arith.truncf %46 : vector<8x32xf32> to vector<8x32xbf16>
    %c0_13 = arith.constant 0 : index
    %c0_14 = arith.constant 0 : index
    %48 = vector.load %arg5[%c0_13, %c0_14] : memref<32x32xbf16, #tpu.memory_space<vmem>>, vector<32x32xbf16>
    %cst_15 = arith.constant dense<0.000000e+00> : vector<8x32xf32>
    %49 = tpu.matmul %47, %48, %cst_15 {dimension_numbers = #tpu.dot_dimension_numbers<[1], [0], [0], [1], [0, 0, 1, 1], [], []>} : vector<8x32xbf16>, vector<32x32xbf16>, vector<8x32xf32> -> vector<8x32xf32>
    %c0_16 = arith.constant 0 : index
    %c0_17 = arith.constant 0 : index
    %50 = vector.load %arg6[%c0_16, %c0_17] : memref<1x32xf32, #tpu.memory_space<vmem>>, vector<1x32xf32>
    %51 = vector.broadcast %50 : vector<1x32xf32> to vector<8x32xf32>
    %52 = arith.addf %49, %51 : vector<8x32xf32>
    %53 = arith.addf %1, %52 : vector<8x32xf32>
    %c0_18 = arith.constant 0 : index
    %c0_19 = arith.constant 0 : index
    %54 = vector.load %arg7[%c0_18, %c0_19] : memref<1x32xf32, #tpu.memory_space<vmem>>, vector<1x32xf32>
    %c0_20 = arith.constant 0 : index
    %c0_21 = arith.constant 0 : index
    %55 = vector.load %arg8[%c0_20, %c0_21] : memref<1x32xf32, #tpu.memory_space<vmem>>, vector<1x32xf32>
    %cst_22 = arith.constant dense<0.000000e+00> : vector<8xf32>
    %56 = vector.multi_reduction <add>, %53, %cst_22 [1] : vector<8x32xf32> to vector<8xf32>
    %57 = vector.shape_cast %56 : vector<8xf32> to vector<8x1xf32>
    %cst_23 = arith.constant 3.200000e+01 : f32
    %58 = vector.broadcast %cst_23 : f32 to vector<8x1xf32>
    %59 = arith.divf %57, %58 : vector<8x1xf32>
    %60 = vector.broadcast %59 : vector<8x1xf32> to vector<8x32xf32>
    %61 = arith.subf %53, %60 : vector<8x32xf32>
    %62 = vector.broadcast %59 : vector<8x1xf32> to vector<8x32xf32>
    %63 = arith.subf %53, %62 : vector<8x32xf32>
    %64 = arith.mulf %61, %63 : vector<8x32xf32>
    %cst_24 = arith.constant dense<0.000000e+00> : vector<8xf32>
    %65 = vector.multi_reduction <add>, %64, %cst_24 [1] : vector<8x32xf32> to vector<8xf32>
    %66 = vector.shape_cast %65 : vector<8xf32> to vector<8x1xf32>
    %cst_25 = arith.constant 3.200000e+01 : f32
    %67 = vector.broadcast %cst_25 : f32 to vector<8x1xf32>
    %68 = arith.divf %66, %67 : vector<8x1xf32>
    %69 = vector.broadcast %59 : vector<8x1xf32> to vector<8x32xf32>
    %70 = arith.subf %53, %69 : vector<8x32xf32>
    %cst_26 = arith.constant 9.99999974E-6 : f32
    %71 = vector.broadcast %cst_26 : f32 to vector<8x1xf32>
    %72 = arith.addf %68, %71 : vector<8x1xf32>
    %73 = math.rsqrt %72 : vector<8x1xf32>
    %74 = vector.broadcast %73 : vector<8x1xf32> to vector<8x32xf32>
    %75 = arith.mulf %70, %74 : vector<8x32xf32>
    %76 = vector.broadcast %54 : vector<1x32xf32> to vector<8x32xf32>
    %77 = arith.mulf %75, %76 : vector<8x32xf32>
    %78 = vector.broadcast %55 : vector<1x32xf32> to vector<8x32xf32>
    %79 = arith.addf %77, %78 : vector<8x32xf32>
    %80 = arith.truncf %79 : vector<8x32xf32> to vector<8x32xbf16>
    %c0_27 = arith.constant 0 : index
    %c0_28 = arith.constant 0 : index
    %81 = vector.load %arg9[%c0_27, %c0_28] : memref<32x128xbf16, #tpu.memory_space<vmem>>, vector<32x128xbf16>
    %cst_29 = arith.constant dense<0.000000e+00> : vector<8x128xf32>
    %82 = tpu.matmul %80, %81, %cst_29 {dimension_numbers = #tpu.dot_dimension_numbers<[1], [0], [0], [1], [0, 0, 1, 1], [], []>} : vector<8x32xbf16>, vector<32x128xbf16>, vector<8x128xf32> -> vector<8x128xf32>
    %c0_30 = arith.constant 0 : index
    %c0_31 = arith.constant 0 : index
    %83 = vector.load %arg10[%c0_30, %c0_31] : memref<1x128xf32, #tpu.memory_space<vmem>>, vector<1x128xf32>
    %84 = vector.broadcast %83 : vector<1x128xf32> to vector<8x128xf32>
    %85 = arith.addf %82, %84 : vector<8x128xf32>
    %cst_32 = arith.constant 0.707106769 : f32
    %86 = vector.broadcast %cst_32 : f32 to vector<8x128xf32>
    %87 = arith.mulf %85, %86 : vector<8x128xf32>
    %88 = math.erf %87 : vector<8x128xf32>
    %cst_33 = arith.constant 5.000000e-01 : f32
    %89 = vector.broadcast %cst_33 : f32 to vector<8x128xf32>
    %90 = arith.mulf %89, %85 : vector<8x128xf32>
    %cst_34 = arith.constant 1.000000e+00 : f32
    %91 = vector.broadcast %cst_34 : f32 to vector<8x128xf32>
    %92 = arith.addf %91, %88 : vector<8x128xf32>
    %93 = arith.mulf %90, %92 : vector<8x128xf32>
    %94 = arith.truncf %93 : vector<8x128xf32> to vector<8x128xbf16>
    %c0_35 = arith.constant 0 : index
    %c0_36 = arith.constant 0 : index
    %95 = vector.load %arg11[%c0_35, %c0_36] : memref<128x32xbf16, #tpu.memory_space<vmem>>, vector<128x32xbf16>
    %cst_37 = arith.constant dense<0.000000e+00> : vector<8x32xf32>
    %96 = tpu.matmul %94, %95, %cst_37 {dimension_numbers = #tpu.dot_dimension_numbers<[1], [0], [0], [1], [0, 0, 1, 1], [], []>} : vector<8x128xbf16>, vector<128x32xbf16>, vector<8x32xf32> -> vector<8x32xf32>
    %c0_38 = arith.constant 0 : index
    %c0_39 = arith.constant 0 : index
    %97 = vector.load %arg12[%c0_38, %c0_39] : memref<1x32xf32, #tpu.memory_space<vmem>>, vector<1x32xf32>
    %98 = vector.broadcast %97 : vector<1x32xf32> to vector<8x32xf32>
    %99 = arith.addf %96, %98 : vector<8x32xf32>
    %100 = arith.addf %79, %99 : vector<8x32xf32>
    %c0_40 = arith.constant 0 : index
    %c0_41 = arith.constant 0 : index
    %101 = vector.load %arg13[%c0_40, %c0_41] : memref<1x32xf32, #tpu.memory_space<vmem>>, vector<1x32xf32>
    %c0_42 = arith.constant 0 : index
    %c0_43 = arith.constant 0 : index
    %102 = vector.load %arg14[%c0_42, %c0_43] : memref<1x32xf32, #tpu.memory_space<vmem>>, vector<1x32xf32>
    %cst_44 = arith.constant dense<0.000000e+00> : vector<8xf32>
    %103 = vector.multi_reduction <add>, %100, %cst_44 [1] : vector<8x32xf32> to vector<8xf32>
    %104 = vector.shape_cast %103 : vector<8xf32> to vector<8x1xf32>
    %cst_45 = arith.constant 3.200000e+01 : f32
    %105 = vector.broadcast %cst_45 : f32 to vector<8x1xf32>
    %106 = arith.divf %104, %105 : vector<8x1xf32>
    %107 = vector.broadcast %106 : vector<8x1xf32> to vector<8x32xf32>
    %108 = arith.subf %100, %107 : vector<8x32xf32>
    %109 = vector.broadcast %106 : vector<8x1xf32> to vector<8x32xf32>
    %110 = arith.subf %100, %109 : vector<8x32xf32>
    %111 = arith.mulf %108, %110 : vector<8x32xf32>
    %cst_46 = arith.constant dense<0.000000e+00> : vector<8xf32>
    %112 = vector.multi_reduction <add>, %111, %cst_46 [1] : vector<8x32xf32> to vector<8xf32>
    %113 = vector.shape_cast %112 : vector<8xf32> to vector<8x1xf32>
    %cst_47 = arith.constant 3.200000e+01 : f32
    %114 = vector.broadcast %cst_47 : f32 to vector<8x1xf32>
    %115 = arith.divf %113, %114 : vector<8x1xf32>
    %116 = vector.broadcast %106 : vector<8x1xf32> to vector<8x32xf32>
    %117 = arith.subf %100, %116 : vector<8x32xf32>
    %cst_48 = arith.constant 9.99999974E-6 : f32
    %118 = vector.broadcast %cst_48 : f32 to vector<8x1xf32>
    %119 = arith.addf %115, %118 : vector<8x1xf32>
    %120 = math.rsqrt %119 : vector<8x1xf32>
    %121 = vector.broadcast %120 : vector<8x1xf32> to vector<8x32xf32>
    %122 = arith.mulf %117, %121 : vector<8x32xf32>
    %123 = vector.broadcast %101 : vector<1x32xf32> to vector<8x32xf32>
    %124 = arith.mulf %122, %123 : vector<8x32xf32>
    %125 = vector.broadcast %102 : vector<1x32xf32> to vector<8x32xf32>
    %126 = arith.addf %124, %125 : vector<8x32xf32>
    %127 = vector.shape_cast %126 : vector<8x32xf32> to vector<1x1x256xf32>
    %c0_49 = arith.constant 0 : index
    %c0_50 = arith.constant 0 : index
    %c0_51 = arith.constant 0 : index
    %128 = vector.load %arg15[%c0_49, %c0_50, %c0_51] : memref<1x1x256xf32, #tpu.memory_space<vmem>>, vector<1x1x256xf32>
    tpu.vector_store %arg15[%c0_49, %c0_50, %c0_51], %127 {strides = array<i32>} : memref<1x1x256xf32, #tpu.memory_space<vmem>>, vector<1x1x256xf32>,
    return
  }
  func.func @transform_0(%arg0: i32) -> (i32, i32, i32) {
    %c0_i32 = arith.constant 0 : i32
    %c0_i32_0 = arith.constant 0 : i32
    %c0_i32_1 = arith.constant 0 : i32
    return %arg0, %c0_i32, %c0_i32_0 : i32, i32, i32
  }
  func.func @transform_1(%arg0: i32) -> (i32, i32, i32) {
    %c0_i32 = arith.constant 0 : i32
    %c0_i32_0 = arith.constant 0 : i32
    %c0_i32_1 = arith.constant 0 : i32
    return %arg0, %c0_i32, %c0_i32_0 : i32, i32, i32
  }
  func.func @transform_2(%arg0: i32) -> (i32, i32) {
    %c0_i32 = arith.constant 0 : i32
    %c0_i32_0 = arith.constant 0 : i32
    %c0_i32_1 = arith.constant 0 : i32
    return %c0_i32, %c0_i32_0 : i32, i32
  }
  func.func @transform_3(%arg0: i32) -> (i32, i32) {
    %c0_i32 = arith.constant 0 : i32
    %c0_i32_0 = arith.constant 0 : i32
    %c0_i32_1 = arith.constant 0 : i32
    return %c0_i32, %c0_i32_0 : i32, i32
  }
  func.func @transform_4(%arg0: i32) -> (i32, i32) {
    %c0_i32 = arith.constant 0 : i32
    %c0_i32_0 = arith.constant 0 : i32
    %c0_i32_1 = arith.constant 0 : i32
    return %c0_i32, %c0_i32_0 : i32, i32
  }
  func.func @transform_5(%arg0: i32) -> (i32, i32) {
    %c0_i32 = arith.constant 0 : i32
    %c0_i32_0 = arith.constant 0 : i32
    %c0_i32_1 = arith.constant 0 : i32
    return %c0_i32, %c0_i32_0 : i32, i32
  }
  func.func @transform_6(%arg0: i32) -> (i32, i32) {
    %c0_i32 = arith.constant 0 : i32
    %c0_i32_0 = arith.constant 0 : i32
    %c0_i32_1 = arith.constant 0 : i32
    return %c0_i32, %c0_i32_0 : i32, i32
  }
  func.func @transform_7(%arg0: i32) -> (i32, i32) {
    %c0_i32 = arith.constant 0 : i32
    %c0_i32_0 = arith.constant 0 : i32
    %c0_i32_1 = arith.constant 0 : i32
    return %c0_i32, %c0_i32_0 : i32, i32
  }
  func.func @transform_8(%arg0: i32) -> (i32, i32) {
    %c0_i32 = arith.constant 0 : i32
    %c0_i32_0 = arith.constant 0 : i32
    %c0_i32_1 = arith.constant 0 : i32
    return %c0_i32, %c0_i32_0 : i32, i32
  }
  func.func @transform_9(%arg0: i32) -> (i32, i32) {
    %c0_i32 = arith.constant 0 : i32
    %c0_i32_0 = arith.constant 0 : i32
    %c0_i32_1 = arith.constant 0 : i32
    return %c0_i32, %c0_i32_0 : i32, i32
  }
  func.func @transform_10(%arg0: i32) -> (i32, i32) {
    %c0_i32 = arith.constant 0 : i32
    %c0_i32_0 = arith.constant 0 : i32
    %c0_i32_1 = arith.constant 0 : i32
    return %c0_i32, %c0_i32_0 : i32, i32
  }
  func.func @transform_11(%arg0: i32) -> (i32, i32) {
    %c0_i32 = arith.constant 0 : i32
    %c0_i32_0 = arith.constant 0 : i32
    %c0_i32_1 = arith.constant 0 : i32
    return %c0_i32, %c0_i32_0 : i32, i32
  }
  func.func @transform_12(%arg0: i32) -> (i32, i32) {
    %c0_i32 = arith.constant 0 : i32
    %c0_i32_0 = arith.constant 0 : i32
    %c0_i32_1 = arith.constant 0 : i32
    return %c0_i32, %c0_i32_0 : i32, i32
  }
  func.func @transform_13(%arg0: i32) -> (i32, i32) {
    %c0_i32 = arith.constant 0 : i32
    %c0_i32_0 = arith.constant 0 : i32
    %c0_i32_1 = arith.constant 0 : i32
    return %c0_i32, %c0_i32_0 : i32, i32
  }
  func.func @transform_14(%arg0: i32) -> (i32, i32, i32) {
    %c0_i32 = arith.constant 0 : i32
    %c0_i32_0 = arith.constant 0 : i32
    %c0_i32_1 = arith.constant 0 : i32
    return %arg0, %c0_i32, %c0_i32_0 : i32, i32, i32
  }
}

module attributes {stable_mosaic.version = 11 : i64} {
  func.func @_encoder_kernel(%arg0: i32, %arg1: memref<1x8x32xf32, #tpu.memory_space<vmem>>, %arg2: memref<1x1x8xf32, #tpu.memory_space<vmem>>, %arg3: memref<32x96xbf16, #tpu.memory_space<vmem>>, %arg4: memref<1x96xf32, #tpu.memory_space<vmem>>, %arg5: memref<32x32xbf16, #tpu.memory_space<vmem>>, %arg6: memref<1x32xf32, #tpu.memory_space<vmem>>, %arg7: memref<1x32xf32, #tpu.memory_space<vmem>>, %arg8: memref<1x32xf32, #tpu.memory_space<vmem>>, %arg9: memref<32x128xbf16, #tpu.memory_space<vmem>>, %arg10: memref<1x128xf32, #tpu.memory_space<vmem>>, %arg11: memref<128x32xbf16, #tpu.memory_space<vmem>>, %arg12: memref<1x32xf32, #tpu.memory_space<vmem>>, %arg13: memref<1x32xf32, #tpu.memory_space<vmem>>, %arg14: memref<1x32xf32, #tpu.memory_space<vmem>>, %arg15: memref<1x8x32xf32, #tpu.memory_space<vmem>>) attributes {dimension_semantics = [#tpu.dimension_semantics<parallel>], iteration_bounds = array<i64: 2>, scalar_prefetch = 0 : i64, scratch_operands = 0 : i64, tpu.core_type = #tpu.core_type<tc>, window_params = [{transform_indices = @transform_0, window_bounds = array<i64: 1, 8, 32>}, {transform_indices = @transform_1, window_bounds = array<i64: 1, 1, 8>}, {pipeline_mode = #tpu.pipeline_mode<synchronous>, transform_indices = @transform_2, window_bounds = array<i64: 32, 96>}, {pipeline_mode = #tpu.pipeline_mode<synchronous>, transform_indices = @transform_3, window_bounds = array<i64: 1, 96>}, {pipeline_mode = #tpu.pipeline_mode<synchronous>, transform_indices = @transform_4, window_bounds = array<i64: 32, 32>}, {pipeline_mode = #tpu.pipeline_mode<synchronous>, transform_indices = @transform_5, window_bounds = array<i64: 1, 32>}, {pipeline_mode = #tpu.pipeline_mode<synchronous>, transform_indices = @transform_6, window_bounds = array<i64: 1, 32>}, {pipeline_mode = #tpu.pipeline_mode<synchronous>, transform_indices = @transform_7, window_bounds = array<i64: 1, 32>}, {pipeline_mode = #tpu.pipeline_mode<synchronous>, transform_indices = @transform_8, window_bounds = array<i64: 32, 128>}, {pipeline_mode = #tpu.pipeline_mode<synchronous>, transform_indices = @transform_9, window_bounds = array<i64: 1, 128>}, {pipeline_mode = #tpu.pipeline_mode<synchronous>, transform_indices = @transform_10, window_bounds = array<i64: 128, 32>}, {pipeline_mode = #tpu.pipeline_mode<synchronous>, transform_indices = @transform_11, window_bounds = array<i64: 1, 32>}, {pipeline_mode = #tpu.pipeline_mode<synchronous>, transform_indices = @transform_12, window_bounds = array<i64: 1, 32>}, {pipeline_mode = #tpu.pipeline_mode<synchronous>, transform_indices = @transform_13, window_bounds = array<i64: 1, 32>}, {transform_indices = @transform_14, window_bounds = array<i64: 1, 8, 32>}]} {
    %c0 = arith.constant 0 : index
    %c0_0 = arith.constant 0 : index
    %c0_1 = arith.constant 0 : index
    %0 = vector.load %arg1[%c0, %c0_0, %c0_1] : memref<1x8x32xf32, #tpu.memory_space<vmem>>, vector<1x8x32xf32>
    %1 = vector.shape_cast %0 : vector<1x8x32xf32> to vector<8x32xf32>
    %c0_2 = arith.constant 0 : index
    %c0_3 = arith.constant 0 : index
    %c0_4 = arith.constant 0 : index
    %2 = vector.load %arg2[%c0_2, %c0_3, %c0_4] : memref<1x1x8xf32, #tpu.memory_space<vmem>>, vector<1x1x8xf32>
    %3 = vector.shape_cast %2 : vector<1x1x8xf32> to vector<1x8xf32>
    %4 = arith.truncf %1 : vector<8x32xf32> to vector<8x32xbf16>
    %c0_5 = arith.constant 0 : index
    %c0_6 = arith.constant 0 : index
    %5 = vector.load %arg3[%c0_5, %c0_6] : memref<32x96xbf16, #tpu.memory_space<vmem>>, vector<32x96xbf16>
    %cst = arith.constant dense<0.000000e+00> : vector<8x96xf32>
    %6 = tpu.matmul %4, %5, %cst {dimension_numbers = #tpu.dot_dimension_numbers<[1], [0], [0], [1], [0, 0, 1, 1], [], []>} : vector<8x32xbf16>, vector<32x96xbf16>, vector<8x96xf32> -> vector<8x96xf32>
    %c0_7 = arith.constant 0 : index
    %c0_8 = arith.constant 0 : index
    %7 = vector.load %arg4[%c0_7, %c0_8] : memref<1x96xf32, #tpu.memory_space<vmem>>, vector<1x96xf32>
    %8 = vector.broadcast %7 : vector<1x96xf32> to vector<8x96xf32>
    %9 = arith.addf %6, %8 : vector<8x96xf32>
    %10 = vector.extract_strided_slice %9 {offsets = [0, 0], sizes = [8, 32], strides = [1, 1]} : vector<8x96xf32> to vector<8x32xf32>
    %11 = vector.extract_strided_slice %9 {offsets = [0, 32], sizes = [8, 32], strides = [1, 1]} : vector<8x96xf32> to vector<8x32xf32>
    %12 = vector.extract_strided_slice %9 {offsets = [0, 64], sizes = [8, 32], strides = [1, 1]} : vector<8x96xf32> to vector<8x32xf32>
    %13 = vector.shape_cast %10 : vector<8x32xf32> to vector<1x8x8x4xf32>
    %14 = tpu.transpose %13, [0, 2, 1, 3] : vector<1x8x8x4xf32> -> vector<1x8x8x4xf32>
    %15 = vector.shape_cast %14 : vector<1x8x8x4xf32> to vector<8x8x4xf32>
    %16 = vector.shape_cast %11 : vector<8x32xf32> to vector<1x8x8x4xf32>
    %17 = tpu.transpose %16, [0, 2, 1, 3] : vector<1x8x8x4xf32> -> vector<1x8x8x4xf32>
    %18 = vector.shape_cast %17 : vector<1x8x8x4xf32> to vector<8x8x4xf32>
    %19 = vector.shape_cast %12 : vector<8x32xf32> to vector<1x8x8x4xf32>
    %20 = tpu.transpose %19, [0, 2, 1, 3] : vector<1x8x8x4xf32> -> vector<1x8x8x4xf32>
    %21 = vector.shape_cast %20 : vector<1x8x8x4xf32> to vector<8x8x4xf32>
    %22 = arith.truncf %15 : vector<8x8x4xf32> to vector<8x8x4xbf16>
    %23 = arith.truncf %18 : vector<8x8x4xf32> to vector<8x8x4xbf16>
    "tpu.trace_start"() <{level = 10 : i32, message = "bqd,bkd->bqk"}> : () -> ()
    %cst_9 = arith.constant dense<0.000000e+00> : vector<8x8x8xf32>
    %24 = tpu.matmul %22, %23, %cst_9 {dimension_numbers = #tpu.dot_dimension_numbers<[2], [2], [1], [1], [0, 0, 0, 1, 1, 1], [0], [0]>} : vector<8x8x4xbf16>, vector<8x8x4xbf16>, vector<8x8x8xf32> -> vector<8x8x8xf32>
    "tpu.trace_stop"() : () -> ()
    %25 = vector.shape_cast %3 : vector<1x8xf32> to vector<1x1x1x8xf32>
    %26 = vector.shape_cast %25 : vector<1x1x1x8xf32> to vector<1x1x1x8xf32>
    %27 = vector.broadcast %26 : vector<1x1x1x8xf32> to vector<1x8x1x8xf32>
    %28 = vector.shape_cast %27 : vector<1x8x1x8xf32> to vector<8x1x8xf32>
    %29 = vector.broadcast %28 : vector<8x1x8xf32> to vector<8x8x8xf32>
    %30 = arith.addf %24, %29 : vector<8x8x8xf32>
    %cst_10 = arith.constant dense<0xFF800000> : vector<8x8xf32>
    %31 = vector.multi_reduction <maximumf>, %30, %cst_10 [2] : vector<8x8x8xf32> to vector<8x8xf32>
    %32 = vector.shape_cast %31 : vector<8x8xf32> to vector<8x8x1xf32>
    %33 = vector.broadcast %32 : vector<8x8x1xf32> to vector<8x8x8xf32>
    %34 = arith.subf %30, %33 : vector<8x8x8xf32>
    %35 = math.exp %34 : vector<8x8x8xf32>
    %cst_11 = arith.constant dense<0.000000e+00> : vector<8x8xf32>
    %36 = vector.multi_reduction <add>, %35, %cst_11 [2] : vector<8x8x8xf32> to vector<8x8xf32>
    %37 = vector.shape_cast %36 : vector<8x8xf32> to vector<8x8x1xf32>
    %38 = tpu.reciprocal %37 {approx = true} : vector<8x8x1xf32> -> vector<8x8x1xf32>
    %39 = vector.broadcast %38 : vector<8x8x1xf32> to vector<8x8x8xf32>
    %40 = arith.mulf %35, %39 : vector<8x8x8xf32>
    %41 = arith.truncf %40 : vector<8x8x8xf32> to vector<8x8x8xbf16>
    %42 = arith.truncf %21 : vector<8x8x4xf32> to vector<8x8x4xbf16>
    "tpu.trace_start"() <{level = 10 : i32, message = "bqk,bkd->bqd"}> : () -> ()
    %cst_12 = arith.constant dense<0.000000e+00> : vector<8x8x4xf32>
    %43 = tpu.matmul %41, %42, %cst_12 {dimension_numbers = #tpu.dot_dimension_numbers<[2], [1], [1], [2], [0, 0, 0, 1, 1, 2], [0], [0]>} : vector<8x8x8xbf16>, vector<8x8x4xbf16>, vector<8x8x4xf32> -> vector<8x8x4xf32>
    "tpu.trace_stop"() : () -> ()
    %44 = vector.shape_cast %43 : vector<8x8x4xf32> to vector<1x8x8x4xf32>
    %45 = tpu.transpose %44, [0, 2, 1, 3] : vector<1x8x8x4xf32> -> vector<1x8x8x4xf32>
    %46 = vector.shape_cast %45 : vector<1x8x8x4xf32> to vector<8x32xf32>
    %47 = arith.truncf %46 : vector<8x32xf32> to vector<8x32xbf16>
    %c0_13 = arith.constant 0 : index
    %c0_14 = arith.constant 0 : index
    %48 = vector.load %arg5[%c0_13, %c0_14] : memref<32x32xbf16, #tpu.memory_space<vmem>>, vector<32x32xbf16>
    %cst_15 = arith.constant dense<0.000000e+00> : vector<8x32xf32>
    %49 = tpu.matmul %47, %48, %cst_15 {dimension_numbers = #tpu.dot_dimension_numbers<[1], [0], [0], [1], [0, 0, 1, 1], [], []>} : vector<8x32xbf16>, vector<32x32xbf16>, vector<8x32xf32> -> vector<8x32xf32>
    %c0_16 = arith.constant 0 : index
    %c0_17 = arith.constant 0 : index
    %50 = vector.load %arg6[%c0_16, %c0_17] : memref<1x32xf32, #tpu.memory_space<vmem>>, vector<1x32xf32>
    %51 = vector.broadcast %50 : vector<1x32xf32> to vector<8x32xf32>
    %52 = arith.addf %49, %51 : vector<8x32xf32>
    %53 = arith.addf %1, %52 : vector<8x32xf32>
    %c0_18 = arith.constant 0 : index
    %c0_19 = arith.constant 0 : index
    %54 = vector.load %arg7[%c0_18, %c0_19] : memref<1x32xf32, #tpu.memory_space<vmem>>, vector<1x32xf32>
    %c0_20 = arith.constant 0 : index
    %c0_21 = arith.constant 0 : index
    %55 = vector.load %arg8[%c0_20, %c0_21] : memref<1x32xf32, #tpu.memory_space<vmem>>, vector<1x32xf32>
    %cst_22 = arith.constant dense<0.000000e+00> : vector<8xf32>
    %56 = vector.multi_reduction <add>, %53, %cst_22 [1] : vector<8x32xf32> to vector<8xf32>
    %57 = vector.shape_cast %56 : vector<8xf32> to vector<8x1xf32>
    %cst_23 = arith.constant 3.200000e+01 : f32
    %58 = vector.broadcast %cst_23 : f32 to vector<8x1xf32>
    %59 = arith.divf %57, %58 : vector<8x1xf32>
    %60 = vector.broadcast %59 : vector<8x1xf32> to vector<8x32xf32>
    %61 = arith.subf %53, %60 : vector<8x32xf32>
    %62 = vector.broadcast %59 : vector<8x1xf32> to vector<8x32xf32>
    %63 = arith.subf %53, %62 : vector<8x32xf32>
    %64 = arith.mulf %61, %63 : vector<8x32xf32>
    %cst_24 = arith.constant dense<0.000000e+00> : vector<8xf32>
    %65 = vector.multi_reduction <add>, %64, %cst_24 [1] : vector<8x32xf32> to vector<8xf32>
    %66 = vector.shape_cast %65 : vector<8xf32> to vector<8x1xf32>
    %cst_25 = arith.constant 3.200000e+01 : f32
    %67 = vector.broadcast %cst_25 : f32 to vector<8x1xf32>
    %68 = arith.divf %66, %67 : vector<8x1xf32>
    %69 = vector.broadcast %59 : vector<8x1xf32> to vector<8x32xf32>
    %70 = arith.subf %53, %69 : vector<8x32xf32>
    %cst_26 = arith.constant 9.99999974E-6 : f32
    %71 = vector.broadcast %cst_26 : f32 to vector<8x1xf32>
    %72 = arith.addf %68, %71 : vector<8x1xf32>
    %73 = math.rsqrt %72 : vector<8x1xf32>
    %74 = vector.broadcast %73 : vector<8x1xf32> to vector<8x32xf32>
    %75 = arith.mulf %70, %74 : vector<8x32xf32>
    %76 = vector.broadcast %54 : vector<1x32xf32> to vector<8x32xf32>
    %77 = arith.mulf %75, %76 : vector<8x32xf32>
    %78 = vector.broadcast %55 : vector<1x32xf32> to vector<8x32xf32>
    %79 = arith.addf %77, %78 : vector<8x32xf32>
    %80 = arith.truncf %79 : vector<8x32xf32> to vector<8x32xbf16>
    %c0_27 = arith.constant 0 : index
    %c0_28 = arith.constant 0 : index
    %81 = vector.load %arg9[%c0_27, %c0_28] : memref<32x128xbf16, #tpu.memory_space<vmem>>, vector<32x128xbf16>
    %cst_29 = arith.constant dense<0.000000e+00> : vector<8x128xf32>
    %82 = tpu.matmul %80, %81, %cst_29 {dimension_numbers = #tpu.dot_dimension_numbers<[1], [0], [0], [1], [0, 0, 1, 1], [], []>} : vector<8x32xbf16>, vector<32x128xbf16>, vector<8x128xf32> -> vector<8x128xf32>
    %c0_30 = arith.constant 0 : index
    %c0_31 = arith.constant 0 : index
    %83 = vector.load %arg10[%c0_30, %c0_31] : memref<1x128xf32, #tpu.memory_space<vmem>>, vector<1x128xf32>
    %84 = vector.broadcast %83 : vector<1x128xf32> to vector<8x128xf32>
    %85 = arith.addf %82, %84 : vector<8x128xf32>
    %cst_32 = arith.constant 0.707106769 : f32
    %86 = vector.broadcast %cst_32 : f32 to vector<8x128xf32>
    %87 = arith.mulf %85, %86 : vector<8x128xf32>
    %88 = math.erf %87 : vector<8x128xf32>
    %cst_33 = arith.constant 5.000000e-01 : f32
    %89 = vector.broadcast %cst_33 : f32 to vector<8x128xf32>
    %90 = arith.mulf %89, %85 : vector<8x128xf32>
    %cst_34 = arith.constant 1.000000e+00 : f32
    %91 = vector.broadcast %cst_34 : f32 to vector<8x128xf32>
    %92 = arith.addf %91, %88 : vector<8x128xf32>
    %93 = arith.mulf %90, %92 : vector<8x128xf32>
    %94 = arith.truncf %93 : vector<8x128xf32> to vector<8x128xbf16>
    %c0_35 = arith.constant 0 : index
    %c0_36 = arith.constant 0 : index
    %95 = vector.load %arg11[%c0_35, %c0_36] : memref<128x32xbf16, #tpu.memory_space<vmem>>, vector<128x32xbf16>
    %cst_37 = arith.constant dense<0.000000e+00> : vector<8x32xf32>
    %96 = tpu.matmul %94, %95, %cst_37 {dimension_numbers = #tpu.dot_dimension_numbers<[1], [0], [0], [1], [0, 0, 1, 1], [], []>} : vector<8x128xbf16>, vector<128x32xbf16>, vector<8x32xf32> -> vector<8x32xf32>
    %c0_38 = arith.constant 0 : index
    %c0_39 = arith.constant 0 : index
    %97 = vector.load %arg12[%c0_38, %c0_39] : memref<1x32xf32, #tpu.memory_space<vmem>>, vector<1x32xf32>
    %98 = vector.broadcast %97 : vector<1x32xf32> to vector<8x32xf32>
    %99 = arith.addf %96, %98 : vector<8x32xf32>
    %100 = arith.addf %79, %99 : vector<8x32xf32>
    %c0_40 = arith.constant 0 : index
    %c0_41 = arith.constant 0 : index
    %101 = vector.load %arg13[%c0_40, %c0_41] : memref<1x32xf32, #tpu.memory_space<vmem>>, vector<1x32xf32>
    %c0_42 = arith.constant 0 : index
    %c0_43 = arith.constant 0 : index
    %102 = vector.load %arg14[%c0_42, %c0_43] : memref<1x32xf32, #tpu.memory_space<vmem>>, vector<1x32xf32>
    %cst_44 = arith.constant dense<0.000000e+00> : vector<8xf32>
    %103 = vector.multi_reduction <add>, %100, %cst_44 [1] : vector<8x32xf32> to vector<8xf32>
    %104 = vector.shape_cast %103 : vector<8xf32> to vector<8x1xf32>
    %cst_45 = arith.constant 3.200000e+01 : f32
    %105 = vector.broadcast %cst_45 : f32 to vector<8x1xf32>
    %106 = arith.divf %104, %105 : vector<8x1xf32>
    %107 = vector.broadcast %106 : vector<8x1xf32> to vector<8x32xf32>
    %108 = arith.subf %100, %107 : vector<8x32xf32>
    %109 = vector.broadcast %106 : vector<8x1xf32> to vector<8x32xf32>
    %110 = arith.subf %100, %109 : vector<8x32xf32>
    %111 = arith.mulf %108, %110 : vector<8x32xf32>
    %cst_46 = arith.constant dense<0.000000e+00> : vector<8xf32>
    %112 = vector.multi_reduction <add>, %111, %cst_46 [1] : vector<8x32xf32> to vector<8xf32>
    %113 = vector.shape_cast %112 : vector<8xf32> to vector<8x1xf32>
    %cst_47 = arith.constant 3.200000e+01 : f32
    %114 = vector.broadcast %cst_47 : f32 to vector<8x1xf32>
    %115 = arith.divf %113, %114 : vector<8x1xf32>
    %116 = vector.broadcast %106 : vector<8x1xf32> to vector<8x32xf32>
    %117 = arith.subf %100, %116 : vector<8x32xf32>
    %cst_48 = arith.constant 9.99999974E-6 : f32
    %118 = vector.broadcast %cst_48 : f32 to vector<8x1xf32>
    %119 = arith.addf %115, %118 : vector<8x1xf32>
    %120 = math.rsqrt %119 : vector<8x1xf32>
    %121 = vector.broadcast %120 : vector<8x1xf32> to vector<8x32xf32>
    %122 = arith.mulf %117, %121 : vector<8x32xf32>
    %123 = vector.broadcast %101 : vector<1x32xf32> to vector<8x32xf32>
    %124 = arith.mulf %122, %123 : vector<8x32xf32>
    %125 = vector.broadcast %102 : vector<1x32xf32> to vector<8x32xf32>
    %126 = arith.addf %124, %125 : vector<8x32xf32>
    %127 = vector.shape_cast %126 : vector<8x32xf32> to vector<1x8x32xf32>
    %c0_49 = arith.constant 0 : index
    %c0_50 = arith.constant 0 : index
    %c0_51 = arith.constant 0 : index
    %128 = vector.load %arg15[%c0_49, %c0_50, %c0_51] : memref<1x8x32xf32, #tpu.memory_space<vmem>>, vector<1x8x32xf32>
    tpu.vector_store %arg15[%c0_49, %c0_50, %c0_51], %127 {strides = array<i32>} : memref<1x8x32xf32, #tpu.memory_space<vmem>>, vector<1x8x32xf32>,
    return
  }
  func.func @transform_0(%arg0: i32) -> (i32, i32, i32) {
    %c0_i32 = arith.constant 0 : i32
    %c0_i32_0 = arith.constant 0 : i32
    %c0_i32_1 = arith.constant 0 : i32
    return %arg0, %c0_i32, %c0_i32_0 : i32, i32, i32
  }
  func.func @transform_1(%arg0: i32) -> (i32, i32, i32) {
    %c0_i32 = arith.constant 0 : i32
    %c0_i32_0 = arith.constant 0 : i32
    %c0_i32_1 = arith.constant 0 : i32
    return %arg0, %c0_i32, %c0_i32_0 : i32, i32, i32
  }
  func.func @transform_2(%arg0: i32) -> (i32, i32) {
    %c0_i32 = arith.constant 0 : i32
    %c0_i32_0 = arith.constant 0 : i32
    %c0_i32_1 = arith.constant 0 : i32
    return %c0_i32, %c0_i32_0 : i32, i32
  }
  func.func @transform_3(%arg0: i32) -> (i32, i32) {
    %c0_i32 = arith.constant 0 : i32
    %c0_i32_0 = arith.constant 0 : i32
    %c0_i32_1 = arith.constant 0 : i32
    return %c0_i32, %c0_i32_0 : i32, i32
  }
  func.func @transform_4(%arg0: i32) -> (i32, i32) {
    %c0_i32 = arith.constant 0 : i32
    %c0_i32_0 = arith.constant 0 : i32
    %c0_i32_1 = arith.constant 0 : i32
    return %c0_i32, %c0_i32_0 : i32, i32
  }
  func.func @transform_5(%arg0: i32) -> (i32, i32) {
    %c0_i32 = arith.constant 0 : i32
    %c0_i32_0 = arith.constant 0 : i32
    %c0_i32_1 = arith.constant 0 : i32
    return %c0_i32, %c0_i32_0 : i32, i32
  }
  func.func @transform_6(%arg0: i32) -> (i32, i32) {
    %c0_i32 = arith.constant 0 : i32
    %c0_i32_0 = arith.constant 0 : i32
    %c0_i32_1 = arith.constant 0 : i32
    return %c0_i32, %c0_i32_0 : i32, i32
  }
  func.func @transform_7(%arg0: i32) -> (i32, i32) {
    %c0_i32 = arith.constant 0 : i32
    %c0_i32_0 = arith.constant 0 : i32
    %c0_i32_1 = arith.constant 0 : i32
    return %c0_i32, %c0_i32_0 : i32, i32
  }
  func.func @transform_8(%arg0: i32) -> (i32, i32) {
    %c0_i32 = arith.constant 0 : i32
    %c0_i32_0 = arith.constant 0 : i32
    %c0_i32_1 = arith.constant 0 : i32
    return %c0_i32, %c0_i32_0 : i32, i32
  }
  func.func @transform_9(%arg0: i32) -> (i32, i32) {
    %c0_i32 = arith.constant 0 : i32
    %c0_i32_0 = arith.constant 0 : i32
    %c0_i32_1 = arith.constant 0 : i32
    return %c0_i32, %c0_i32_0 : i32, i32
  }
  func.func @transform_10(%arg0: i32) -> (i32, i32) {
    %c0_i32 = arith.constant 0 : i32
    %c0_i32_0 = arith.constant 0 : i32
    %c0_i32_1 = arith.constant 0 : i32
    return %c0_i32, %c0_i32_0 : i32, i32
  }
  func.func @transform_11(%arg0: i32) -> (i32, i32) {
    %c0_i32 = arith.constant 0 : i32
    %c0_i32_0 = arith.constant 0 : i32
    %c0_i32_1 = arith.constant 0 : i32
    return %c0_i32, %c0_i32_0 : i32, i32
  }
  func.func @transform_12(%arg0: i32) -> (i32, i32) {
    %c0_i32 = arith.constant 0 : i32
    %c0_i32_0 = arith.constant 0 : i32
    %c0_i32_1 = arith.constant 0 : i32
    return %c0_i32, %c0_i32_0 : i32, i32
  }
  func.func @transform_13(%arg0: i32) -> (i32, i32) {
    %c0_i32 = arith.constant 0 : i32
    %c0_i32_0 = arith.constant 0 : i32
    %c0_i32_1 = arith.constant 0 : i32
    return %c0_i32, %c0_i32_0 : i32, i32
  }
  func.func @transform_14(%arg0: i32) -> (i32, i32, i32) {
    %c0_i32 = arith.constant 0 : i32
    %c0_i32_0 = arith.constant 0 : i32
    %c0_i32_1 = arith.constant 0 : i32
    return %arg0, %c0_i32, %c0_i32_0 : i32, i32, i32
  }
}

module attributes {stable_mosaic.version = 11 : i64} {
  func.func @_encoder_kernel(%arg0: i32, %arg1: memref<1x8x32xf32, #tpu.memory_space<vmem>>, %arg2: memref<1x1x8xf32, #tpu.memory_space<vmem>>, %arg3: memref<32x96xbf16, #tpu.memory_space<vmem>>, %arg4: memref<1x96xf32, #tpu.memory_space<vmem>>, %arg5: memref<32x32xbf16, #tpu.memory_space<vmem>>, %arg6: memref<1x32xf32, #tpu.memory_space<vmem>>, %arg7: memref<1x32xf32, #tpu.memory_space<vmem>>, %arg8: memref<1x32xf32, #tpu.memory_space<vmem>>, %arg9: memref<32x128xbf16, #tpu.memory_space<vmem>>, %arg10: memref<1x128xf32, #tpu.memory_space<vmem>>, %arg11: memref<128x32xbf16, #tpu.memory_space<vmem>>, %arg12: memref<1x32xf32, #tpu.memory_space<vmem>>, %arg13: memref<1x32xf32, #tpu.memory_space<vmem>>, %arg14: memref<1x32xf32, #tpu.memory_space<vmem>>, %arg15: memref<1x8x32xf32, #tpu.memory_space<vmem>>, %arg16: memref<8x32xf32, #tpu.memory_space<vmem>>) attributes {dimension_semantics = [#tpu.dimension_semantics<parallel>], iteration_bounds = array<i64: 2>, scalar_prefetch = 0 : i64, scratch_operands = 1 : i64, tpu.core_type = #tpu.core_type<tc>, window_params = [{transform_indices = @transform_0, window_bounds = array<i64: 1, 8, 32>}, {transform_indices = @transform_1, window_bounds = array<i64: 1, 1, 8>}, {pipeline_mode = #tpu.pipeline_mode<synchronous>, transform_indices = @transform_2, window_bounds = array<i64: 32, 96>}, {pipeline_mode = #tpu.pipeline_mode<synchronous>, transform_indices = @transform_3, window_bounds = array<i64: 1, 96>}, {pipeline_mode = #tpu.pipeline_mode<synchronous>, transform_indices = @transform_4, window_bounds = array<i64: 32, 32>}, {pipeline_mode = #tpu.pipeline_mode<synchronous>, transform_indices = @transform_5, window_bounds = array<i64: 1, 32>}, {pipeline_mode = #tpu.pipeline_mode<synchronous>, transform_indices = @transform_6, window_bounds = array<i64: 1, 32>}, {pipeline_mode = #tpu.pipeline_mode<synchronous>, transform_indices = @transform_7, window_bounds = array<i64: 1, 32>}, {pipeline_mode = #tpu.pipeline_mode<synchronous>, transform_indices = @transform_8, window_bounds = array<i64: 32, 128>}, {pipeline_mode = #tpu.pipeline_mode<synchronous>, transform_indices = @transform_9, window_bounds = array<i64: 1, 128>}, {pipeline_mode = #tpu.pipeline_mode<synchronous>, transform_indices = @transform_10, window_bounds = array<i64: 128, 32>}, {pipeline_mode = #tpu.pipeline_mode<synchronous>, transform_indices = @transform_11, window_bounds = array<i64: 1, 32>}, {pipeline_mode = #tpu.pipeline_mode<synchronous>, transform_indices = @transform_12, window_bounds = array<i64: 1, 32>}, {pipeline_mode = #tpu.pipeline_mode<synchronous>, transform_indices = @transform_13, window_bounds = array<i64: 1, 32>}, {transform_indices = @transform_14, window_bounds = array<i64: 1, 8, 32>}]} {
    %c0 = arith.constant 0 : index
    %c0_0 = arith.constant 0 : index
    %c0_1 = arith.constant 0 : index
    %0 = vector.load %arg1[%c0, %c0_0, %c0_1] : memref<1x8x32xf32, #tpu.memory_space<vmem>>, vector<1x8x32xf32>
    %1 = vector.shape_cast %0 : vector<1x8x32xf32> to vector<8x32xf32>
    %c0_2 = arith.constant 0 : index
    %c0_3 = arith.constant 0 : index
    %c0_4 = arith.constant 0 : index
    %2 = vector.load %arg2[%c0_2, %c0_3, %c0_4] : memref<1x1x8xf32, #tpu.memory_space<vmem>>, vector<1x1x8xf32>
    %3 = vector.shape_cast %2 : vector<1x1x8xf32> to vector<1x8xf32>
    %4 = arith.truncf %1 : vector<8x32xf32> to vector<8x32xbf16>
    %c0_5 = arith.constant 0 : index
    %c0_6 = arith.constant 0 : index
    %5 = vector.load %arg3[%c0_5, %c0_6] : memref<32x96xbf16, #tpu.memory_space<vmem>>, vector<32x96xbf16>
    %cst = arith.constant dense<0.000000e+00> : vector<8x96xf32>
    %6 = tpu.matmul %4, %5, %cst {dimension_numbers = #tpu.dot_dimension_numbers<[1], [0], [0], [1], [0, 0, 1, 1], [], []>} : vector<8x32xbf16>, vector<32x96xbf16>, vector<8x96xf32> -> vector<8x96xf32>
    %c0_7 = arith.constant 0 : index
    %c0_8 = arith.constant 0 : index
    %7 = vector.load %arg4[%c0_7, %c0_8] : memref<1x96xf32, #tpu.memory_space<vmem>>, vector<1x96xf32>
    %8 = vector.broadcast %7 : vector<1x96xf32> to vector<8x96xf32>
    %9 = arith.addf %6, %8 : vector<8x96xf32>
    %10 = vector.extract_strided_slice %9 {offsets = [0, 0], sizes = [8, 32], strides = [1, 1]} : vector<8x96xf32> to vector<8x32xf32>
    %11 = vector.extract_strided_slice %9 {offsets = [0, 32], sizes = [8, 32], strides = [1, 1]} : vector<8x96xf32> to vector<8x32xf32>
    %12 = vector.extract_strided_slice %9 {offsets = [0, 64], sizes = [8, 32], strides = [1, 1]} : vector<8x96xf32> to vector<8x32xf32>
    %13 = vector.shape_cast %3 : vector<1x8xf32> to vector<1x1x8xf32>
    %14 = vector.extract_strided_slice %10 {offsets = [0, 0], sizes = [8, 4], strides = [1, 1]} : vector<8x32xf32> to vector<8x4xf32>
    %15 = vector.shape_cast %14 : vector<8x4xf32> to vector<1x8x4xf32>
    %16 = vector.extract_strided_slice %11 {offsets = [0, 0], sizes = [8, 4], strides = [1, 1]} : vector<8x32xf32> to vector<8x4xf32>
    %17 = vector.shape_cast %16 : vector<8x4xf32> to vector<1x8x4xf32>
    %18 = vector.extract_strided_slice %12 {offsets = [0, 0], sizes = [8, 4], strides = [1, 1]} : vector<8x32xf32> to vector<8x4xf32>
    %19 = vector.shape_cast %18 : vector<8x4xf32> to vector<1x8x4xf32>
    %20 = arith.truncf %15 : vector<1x8x4xf32> to vector<1x8x4xbf16>
    %21 = arith.truncf %17 : vector<1x8x4xf32> to vector<1x8x4xbf16>
    "tpu.trace_start"() <{level = 10 : i32, message = "bqd,bkd->bqk"}> : () -> ()
    %cst_9 = arith.constant dense<0.000000e+00> : vector<1x8x8xf32>
    %22 = tpu.matmul %20, %21, %cst_9 {dimension_numbers = #tpu.dot_dimension_numbers<[2], [2], [1], [1], [0, 0, 0, 1, 1, 1], [0], [0]>} : vector<1x8x4xbf16>, vector<1x8x4xbf16>, vector<1x8x8xf32> -> vector<1x8x8xf32>
    "tpu.trace_stop"() : () -> ()
    %23 = vector.broadcast %13 : vector<1x1x8xf32> to vector<1x8x8xf32>
    %24 = arith.addf %22, %23 : vector<1x8x8xf32>
    %cst_10 = arith.constant dense<0xFF800000> : vector<1x8xf32>
    %25 = vector.multi_reduction <maximumf>, %24, %cst_10 [2] : vector<1x8x8xf32> to vector<1x8xf32>
    %26 = vector.shape_cast %25 : vector<1x8xf32> to vector<1x8x1xf32>
    %27 = vector.broadcast %26 : vector<1x8x1xf32> to vector<1x8x8xf32>
    %28 = arith.subf %24, %27 : vector<1x8x8xf32>
    %29 = math.exp %28 : vector<1x8x8xf32>
    %cst_11 = arith.constant dense<0.000000e+00> : vector<1x8xf32>
    %30 = vector.multi_reduction <add>, %29, %cst_11 [2] : vector<1x8x8xf32> to vector<1x8xf32>
    %31 = vector.shape_cast %30 : vector<1x8xf32> to vector<1x8x1xf32>
    %32 = tpu.reciprocal %31 {approx = true} : vector<1x8x1xf32> -> vector<1x8x1xf32>
    %33 = vector.broadcast %32 : vector<1x8x1xf32> to vector<1x8x8xf32>
    %34 = arith.mulf %29, %33 : vector<1x8x8xf32>
    %35 = arith.truncf %34 : vector<1x8x8xf32> to vector<1x8x8xbf16>
    %36 = arith.truncf %19 : vector<1x8x4xf32> to vector<1x8x4xbf16>
    "tpu.trace_start"() <{level = 10 : i32, message = "bqk,bkd->bqd"}> : () -> ()
    %cst_12 = arith.constant dense<0.000000e+00> : vector<1x8x4xf32>
    %37 = tpu.matmul %35, %36, %cst_12 {dimension_numbers = #tpu.dot_dimension_numbers<[2], [1], [1], [2], [0, 0, 0, 1, 1, 2], [0], [0]>} : vector<1x8x8xbf16>, vector<1x8x4xbf16>, vector<1x8x4xf32> -> vector<1x8x4xf32>
    "tpu.trace_stop"() : () -> ()
    %38 = vector.shape_cast %37 : vector<1x8x4xf32> to vector<8x4xf32>
    %c0_13 = arith.constant 0 : index
    %c0_14 = arith.constant 0 : index
    %39 = vector.load %arg16[%c0_13, %c0_14] : memref<8x32xf32, #tpu.memory_space<vmem>>, vector<8x4xf32>
    tpu.vector_store %arg16[%c0_13, %c0_14], %38 {strides = array<i32>} : memref<8x32xf32, #tpu.memory_space<vmem>>, vector<8x4xf32>,
    %40 = vector.extract_strided_slice %10 {offsets = [0, 4], sizes = [8, 4], strides = [1, 1]} : vector<8x32xf32> to vector<8x4xf32>
    %41 = vector.shape_cast %40 : vector<8x4xf32> to vector<1x8x4xf32>
    %42 = vector.extract_strided_slice %11 {offsets = [0, 4], sizes = [8, 4], strides = [1, 1]} : vector<8x32xf32> to vector<8x4xf32>
    %43 = vector.shape_cast %42 : vector<8x4xf32> to vector<1x8x4xf32>
    %44 = vector.extract_strided_slice %12 {offsets = [0, 4], sizes = [8, 4], strides = [1, 1]} : vector<8x32xf32> to vector<8x4xf32>
    %45 = vector.shape_cast %44 : vector<8x4xf32> to vector<1x8x4xf32>
    %46 = arith.truncf %41 : vector<1x8x4xf32> to vector<1x8x4xbf16>
    %47 = arith.truncf %43 : vector<1x8x4xf32> to vector<1x8x4xbf16>
    "tpu.trace_start"() <{level = 10 : i32, message = "bqd,bkd->bqk"}> : () -> ()
    %cst_15 = arith.constant dense<0.000000e+00> : vector<1x8x8xf32>
    %48 = tpu.matmul %46, %47, %cst_15 {dimension_numbers = #tpu.dot_dimension_numbers<[2], [2], [1], [1], [0, 0, 0, 1, 1, 1], [0], [0]>} : vector<1x8x4xbf16>, vector<1x8x4xbf16>, vector<1x8x8xf32> -> vector<1x8x8xf32>
    "tpu.trace_stop"() : () -> ()
    %49 = vector.broadcast %13 : vector<1x1x8xf32> to vector<1x8x8xf32>
    %50 = arith.addf %48, %49 : vector<1x8x8xf32>
    %cst_16 = arith.constant dense<0xFF800000> : vector<1x8xf32>
    %51 = vector.multi_reduction <maximumf>, %50, %cst_16 [2] : vector<1x8x8xf32> to vector<1x8xf32>
    %52 = vector.shape_cast %51 : vector<1x8xf32> to vector<1x8x1xf32>
    %53 = vector.broadcast %52 : vector<1x8x1xf32> to vector<1x8x8xf32>
    %54 = arith.subf %50, %53 : vector<1x8x8xf32>
    %55 = math.exp %54 : vector<1x8x8xf32>
    %cst_17 = arith.constant dense<0.000000e+00> : vector<1x8xf32>
    %56 = vector.multi_reduction <add>, %55, %cst_17 [2] : vector<1x8x8xf32> to vector<1x8xf32>
    %57 = vector.shape_cast %56 : vector<1x8xf32> to vector<1x8x1xf32>
    %58 = tpu.reciprocal %57 {approx = true} : vector<1x8x1xf32> -> vector<1x8x1xf32>
    %59 = vector.broadcast %58 : vector<1x8x1xf32> to vector<1x8x8xf32>
    %60 = arith.mulf %55, %59 : vector<1x8x8xf32>
    %61 = arith.truncf %60 : vector<1x8x8xf32> to vector<1x8x8xbf16>
    %62 = arith.truncf %45 : vector<1x8x4xf32> to vector<1x8x4xbf16>
    "tpu.trace_start"() <{level = 10 : i32, message = "bqk,bkd->bqd"}> : () -> ()
    %cst_18 = arith.constant dense<0.000000e+00> : vector<1x8x4xf32>
    %63 = tpu.matmul %61, %62, %cst_18 {dimension_numbers = #tpu.dot_dimension_numbers<[2], [1], [1], [2], [0, 0, 0, 1, 1, 2], [0], [0]>} : vector<1x8x8xbf16>, vector<1x8x4xbf16>, vector<1x8x4xf32> -> vector<1x8x4xf32>
    "tpu.trace_stop"() : () -> ()
    %64 = vector.shape_cast %63 : vector<1x8x4xf32> to vector<8x4xf32>
    %c0_19 = arith.constant 0 : index
    %c4 = arith.constant 4 : index
    %65 = vector.load %arg16[%c0_19, %c4] : memref<8x32xf32, #tpu.memory_space<vmem>>, vector<8x4xf32>
    tpu.vector_store %arg16[%c0_19, %c4], %64 {strides = array<i32>} : memref<8x32xf32, #tpu.memory_space<vmem>>, vector<8x4xf32>,
    %66 = vector.extract_strided_slice %10 {offsets = [0, 8], sizes = [8, 4], strides = [1, 1]} : vector<8x32xf32> to vector<8x4xf32>
    %67 = vector.shape_cast %66 : vector<8x4xf32> to vector<1x8x4xf32>
    %68 = vector.extract_strided_slice %11 {offsets = [0, 8], sizes = [8, 4], strides = [1, 1]} : vector<8x32xf32> to vector<8x4xf32>
    %69 = vector.shape_cast %68 : vector<8x4xf32> to vector<1x8x4xf32>
    %70 = vector.extract_strided_slice %12 {offsets = [0, 8], sizes = [8, 4], strides = [1, 1]} : vector<8x32xf32> to vector<8x4xf32>
    %71 = vector.shape_cast %70 : vector<8x4xf32> to vector<1x8x4xf32>
    %72 = arith.truncf %67 : vector<1x8x4xf32> to vector<1x8x4xbf16>
    %73 = arith.truncf %69 : vector<1x8x4xf32> to vector<1x8x4xbf16>
    "tpu.trace_start"() <{level = 10 : i32, message = "bqd,bkd->bqk"}> : () -> ()
    %cst_20 = arith.constant dense<0.000000e+00> : vector<1x8x8xf32>
    %74 = tpu.matmul %72, %73, %cst_20 {dimension_numbers = #tpu.dot_dimension_numbers<[2], [2], [1], [1], [0, 0, 0, 1, 1, 1], [0], [0]>} : vector<1x8x4xbf16>, vector<1x8x4xbf16>, vector<1x8x8xf32> -> vector<1x8x8xf32>
    "tpu.trace_stop"() : () -> ()
    %75 = vector.broadcast %13 : vector<1x1x8xf32> to vector<1x8x8xf32>
    %76 = arith.addf %74, %75 : vector<1x8x8xf32>
    %cst_21 = arith.constant dense<0xFF800000> : vector<1x8xf32>
    %77 = vector.multi_reduction <maximumf>, %76, %cst_21 [2] : vector<1x8x8xf32> to vector<1x8xf32>
    %78 = vector.shape_cast %77 : vector<1x8xf32> to vector<1x8x1xf32>
    %79 = vector.broadcast %78 : vector<1x8x1xf32> to vector<1x8x8xf32>
    %80 = arith.subf %76, %79 : vector<1x8x8xf32>
    %81 = math.exp %80 : vector<1x8x8xf32>
    %cst_22 = arith.constant dense<0.000000e+00> : vector<1x8xf32>
    %82 = vector.multi_reduction <add>, %81, %cst_22 [2] : vector<1x8x8xf32> to vector<1x8xf32>
    %83 = vector.shape_cast %82 : vector<1x8xf32> to vector<1x8x1xf32>
    %84 = tpu.reciprocal %83 {approx = true} : vector<1x8x1xf32> -> vector<1x8x1xf32>
    %85 = vector.broadcast %84 : vector<1x8x1xf32> to vector<1x8x8xf32>
    %86 = arith.mulf %81, %85 : vector<1x8x8xf32>
    %87 = arith.truncf %86 : vector<1x8x8xf32> to vector<1x8x8xbf16>
    %88 = arith.truncf %71 : vector<1x8x4xf32> to vector<1x8x4xbf16>
    "tpu.trace_start"() <{level = 10 : i32, message = "bqk,bkd->bqd"}> : () -> ()
    %cst_23 = arith.constant dense<0.000000e+00> : vector<1x8x4xf32>
    %89 = tpu.matmul %87, %88, %cst_23 {dimension_numbers = #tpu.dot_dimension_numbers<[2], [1], [1], [2], [0, 0, 0, 1, 1, 2], [0], [0]>} : vector<1x8x8xbf16>, vector<1x8x4xbf16>, vector<1x8x4xf32> -> vector<1x8x4xf32>
    "tpu.trace_stop"() : () -> ()
    %90 = vector.shape_cast %89 : vector<1x8x4xf32> to vector<8x4xf32>
    %c0_24 = arith.constant 0 : index
    %c8 = arith.constant 8 : index
    %91 = vector.load %arg16[%c0_24, %c8] : memref<8x32xf32, #tpu.memory_space<vmem>>, vector<8x4xf32>
    tpu.vector_store %arg16[%c0_24, %c8], %90 {strides = array<i32>} : memref<8x32xf32, #tpu.memory_space<vmem>>, vector<8x4xf32>,
    %92 = vector.extract_strided_slice %10 {offsets = [0, 12], sizes = [8, 4], strides = [1, 1]} : vector<8x32xf32> to vector<8x4xf32>
    %93 = vector.shape_cast %92 : vector<8x4xf32> to vector<1x8x4xf32>
    %94 = vector.extract_strided_slice %11 {offsets = [0, 12], sizes = [8, 4], strides = [1, 1]} : vector<8x32xf32> to vector<8x4xf32>
    %95 = vector.shape_cast %94 : vector<8x4xf32> to vector<1x8x4xf32>
    %96 = vector.extract_strided_slice %12 {offsets = [0, 12], sizes = [8, 4], strides = [1, 1]} : vector<8x32xf32> to vector<8x4xf32>
    %97 = vector.shape_cast %96 : vector<8x4xf32> to vector<1x8x4xf32>
    %98 = arith.truncf %93 : vector<1x8x4xf32> to vector<1x8x4xbf16>
    %99 = arith.truncf %95 : vector<1x8x4xf32> to vector<1x8x4xbf16>
    "tpu.trace_start"() <{level = 10 : i32, message = "bqd,bkd->bqk"}> : () -> ()
    %cst_25 = arith.constant dense<0.000000e+00> : vector<1x8x8xf32>
    %100 = tpu.matmul %98, %99, %cst_25 {dimension_numbers = #tpu.dot_dimension_numbers<[2], [2], [1], [1], [0, 0, 0, 1, 1, 1], [0], [0]>} : vector<1x8x4xbf16>, vector<1x8x4xbf16>, vector<1x8x8xf32> -> vector<1x8x8xf32>
    "tpu.trace_stop"() : () -> ()
    %101 = vector.broadcast %13 : vector<1x1x8xf32> to vector<1x8x8xf32>
    %102 = arith.addf %100, %101 : vector<1x8x8xf32>
    %cst_26 = arith.constant dense<0xFF800000> : vector<1x8xf32>
    %103 = vector.multi_reduction <maximumf>, %102, %cst_26 [2] : vector<1x8x8xf32> to vector<1x8xf32>
    %104 = vector.shape_cast %103 : vector<1x8xf32> to vector<1x8x1xf32>
    %105 = vector.broadcast %104 : vector<1x8x1xf32> to vector<1x8x8xf32>
    %106 = arith.subf %102, %105 : vector<1x8x8xf32>
    %107 = math.exp %106 : vector<1x8x8xf32>
    %cst_27 = arith.constant dense<0.000000e+00> : vector<1x8xf32>
    %108 = vector.multi_reduction <add>, %107, %cst_27 [2] : vector<1x8x8xf32> to vector<1x8xf32>
    %109 = vector.shape_cast %108 : vector<1x8xf32> to vector<1x8x1xf32>
    %110 = tpu.reciprocal %109 {approx = true} : vector<1x8x1xf32> -> vector<1x8x1xf32>
    %111 = vector.broadcast %110 : vector<1x8x1xf32> to vector<1x8x8xf32>
    %112 = arith.mulf %107, %111 : vector<1x8x8xf32>
    %113 = arith.truncf %112 : vector<1x8x8xf32> to vector<1x8x8xbf16>
    %114 = arith.truncf %97 : vector<1x8x4xf32> to vector<1x8x4xbf16>
    "tpu.trace_start"() <{level = 10 : i32, message = "bqk,bkd->bqd"}> : () -> ()
    %cst_28 = arith.constant dense<0.000000e+00> : vector<1x8x4xf32>
    %115 = tpu.matmul %113, %114, %cst_28 {dimension_numbers = #tpu.dot_dimension_numbers<[2], [1], [1], [2], [0, 0, 0, 1, 1, 2], [0], [0]>} : vector<1x8x8xbf16>, vector<1x8x4xbf16>, vector<1x8x4xf32> -> vector<1x8x4xf32>
    "tpu.trace_stop"() : () -> ()
    %116 = vector.shape_cast %115 : vector<1x8x4xf32> to vector<8x4xf32>
    %c0_29 = arith.constant 0 : index
    %c12 = arith.constant 12 : index
    %117 = vector.load %arg16[%c0_29, %c12] : memref<8x32xf32, #tpu.memory_space<vmem>>, vector<8x4xf32>
    tpu.vector_store %arg16[%c0_29, %c12], %116 {strides = array<i32>} : memref<8x32xf32, #tpu.memory_space<vmem>>, vector<8x4xf32>,
    %118 = vector.extract_strided_slice %10 {offsets = [0, 16], sizes = [8, 4], strides = [1, 1]} : vector<8x32xf32> to vector<8x4xf32>
    %119 = vector.shape_cast %118 : vector<8x4xf32> to vector<1x8x4xf32>
    %120 = vector.extract_strided_slice %11 {offsets = [0, 16], sizes = [8, 4], strides = [1, 1]} : vector<8x32xf32> to vector<8x4xf32>
    %121 = vector.shape_cast %120 : vector<8x4xf32> to vector<1x8x4xf32>
    %122 = vector.extract_strided_slice %12 {offsets = [0, 16], sizes = [8, 4], strides = [1, 1]} : vector<8x32xf32> to vector<8x4xf32>
    %123 = vector.shape_cast %122 : vector<8x4xf32> to vector<1x8x4xf32>
    %124 = arith.truncf %119 : vector<1x8x4xf32> to vector<1x8x4xbf16>
    %125 = arith.truncf %121 : vector<1x8x4xf32> to vector<1x8x4xbf16>
    "tpu.trace_start"() <{level = 10 : i32, message = "bqd,bkd->bqk"}> : () -> ()
    %cst_30 = arith.constant dense<0.000000e+00> : vector<1x8x8xf32>
    %126 = tpu.matmul %124, %125, %cst_30 {dimension_numbers = #tpu.dot_dimension_numbers<[2], [2], [1], [1], [0, 0, 0, 1, 1, 1], [0], [0]>} : vector<1x8x4xbf16>, vector<1x8x4xbf16>, vector<1x8x8xf32> -> vector<1x8x8xf32>
    "tpu.trace_stop"() : () -> ()
    %127 = vector.broadcast %13 : vector<1x1x8xf32> to vector<1x8x8xf32>
    %128 = arith.addf %126, %127 : vector<1x8x8xf32>
    %cst_31 = arith.constant dense<0xFF800000> : vector<1x8xf32>
    %129 = vector.multi_reduction <maximumf>, %128, %cst_31 [2] : vector<1x8x8xf32> to vector<1x8xf32>
    %130 = vector.shape_cast %129 : vector<1x8xf32> to vector<1x8x1xf32>
    %131 = vector.broadcast %130 : vector<1x8x1xf32> to vector<1x8x8xf32>
    %132 = arith.subf %128, %131 : vector<1x8x8xf32>
    %133 = math.exp %132 : vector<1x8x8xf32>
    %cst_32 = arith.constant dense<0.000000e+00> : vector<1x8xf32>
    %134 = vector.multi_reduction <add>, %133, %cst_32 [2] : vector<1x8x8xf32> to vector<1x8xf32>
    %135 = vector.shape_cast %134 : vector<1x8xf32> to vector<1x8x1xf32>
    %136 = tpu.reciprocal %135 {approx = true} : vector<1x8x1xf32> -> vector<1x8x1xf32>
    %137 = vector.broadcast %136 : vector<1x8x1xf32> to vector<1x8x8xf32>
    %138 = arith.mulf %133, %137 : vector<1x8x8xf32>
    %139 = arith.truncf %138 : vector<1x8x8xf32> to vector<1x8x8xbf16>
    %140 = arith.truncf %123 : vector<1x8x4xf32> to vector<1x8x4xbf16>
    "tpu.trace_start"() <{level = 10 : i32, message = "bqk,bkd->bqd"}> : () -> ()
    %cst_33 = arith.constant dense<0.000000e+00> : vector<1x8x4xf32>
    %141 = tpu.matmul %139, %140, %cst_33 {dimension_numbers = #tpu.dot_dimension_numbers<[2], [1], [1], [2], [0, 0, 0, 1, 1, 2], [0], [0]>} : vector<1x8x8xbf16>, vector<1x8x4xbf16>, vector<1x8x4xf32> -> vector<1x8x4xf32>
    "tpu.trace_stop"() : () -> ()
    %142 = vector.shape_cast %141 : vector<1x8x4xf32> to vector<8x4xf32>
    %c0_34 = arith.constant 0 : index
    %c16 = arith.constant 16 : index
    %143 = vector.load %arg16[%c0_34, %c16] : memref<8x32xf32, #tpu.memory_space<vmem>>, vector<8x4xf32>
    tpu.vector_store %arg16[%c0_34, %c16], %142 {strides = array<i32>} : memref<8x32xf32, #tpu.memory_space<vmem>>, vector<8x4xf32>,
    %144 = vector.extract_strided_slice %10 {offsets = [0, 20], sizes = [8, 4], strides = [1, 1]} : vector<8x32xf32> to vector<8x4xf32>
    %145 = vector.shape_cast %144 : vector<8x4xf32> to vector<1x8x4xf32>
    %146 = vector.extract_strided_slice %11 {offsets = [0, 20], sizes = [8, 4], strides = [1, 1]} : vector<8x32xf32> to vector<8x4xf32>
    %147 = vector.shape_cast %146 : vector<8x4xf32> to vector<1x8x4xf32>
    %148 = vector.extract_strided_slice %12 {offsets = [0, 20], sizes = [8, 4], strides = [1, 1]} : vector<8x32xf32> to vector<8x4xf32>
    %149 = vector.shape_cast %148 : vector<8x4xf32> to vector<1x8x4xf32>
    %150 = arith.truncf %145 : vector<1x8x4xf32> to vector<1x8x4xbf16>
    %151 = arith.truncf %147 : vector<1x8x4xf32> to vector<1x8x4xbf16>
    "tpu.trace_start"() <{level = 10 : i32, message = "bqd,bkd->bqk"}> : () -> ()
    %cst_35 = arith.constant dense<0.000000e+00> : vector<1x8x8xf32>
    %152 = tpu.matmul %150, %151, %cst_35 {dimension_numbers = #tpu.dot_dimension_numbers<[2], [2], [1], [1], [0, 0, 0, 1, 1, 1], [0], [0]>} : vector<1x8x4xbf16>, vector<1x8x4xbf16>, vector<1x8x8xf32> -> vector<1x8x8xf32>
    "tpu.trace_stop"() : () -> ()
    %153 = vector.broadcast %13 : vector<1x1x8xf32> to vector<1x8x8xf32>
    %154 = arith.addf %152, %153 : vector<1x8x8xf32>
    %cst_36 = arith.constant dense<0xFF800000> : vector<1x8xf32>
    %155 = vector.multi_reduction <maximumf>, %154, %cst_36 [2] : vector<1x8x8xf32> to vector<1x8xf32>
    %156 = vector.shape_cast %155 : vector<1x8xf32> to vector<1x8x1xf32>
    %157 = vector.broadcast %156 : vector<1x8x1xf32> to vector<1x8x8xf32>
    %158 = arith.subf %154, %157 : vector<1x8x8xf32>
    %159 = math.exp %158 : vector<1x8x8xf32>
    %cst_37 = arith.constant dense<0.000000e+00> : vector<1x8xf32>
    %160 = vector.multi_reduction <add>, %159, %cst_37 [2] : vector<1x8x8xf32> to vector<1x8xf32>
    %161 = vector.shape_cast %160 : vector<1x8xf32> to vector<1x8x1xf32>
    %162 = tpu.reciprocal %161 {approx = true} : vector<1x8x1xf32> -> vector<1x8x1xf32>
    %163 = vector.broadcast %162 : vector<1x8x1xf32> to vector<1x8x8xf32>
    %164 = arith.mulf %159, %163 : vector<1x8x8xf32>
    %165 = arith.truncf %164 : vector<1x8x8xf32> to vector<1x8x8xbf16>
    %166 = arith.truncf %149 : vector<1x8x4xf32> to vector<1x8x4xbf16>
    "tpu.trace_start"() <{level = 10 : i32, message = "bqk,bkd->bqd"}> : () -> ()
    %cst_38 = arith.constant dense<0.000000e+00> : vector<1x8x4xf32>
    %167 = tpu.matmul %165, %166, %cst_38 {dimension_numbers = #tpu.dot_dimension_numbers<[2], [1], [1], [2], [0, 0, 0, 1, 1, 2], [0], [0]>} : vector<1x8x8xbf16>, vector<1x8x4xbf16>, vector<1x8x4xf32> -> vector<1x8x4xf32>
    "tpu.trace_stop"() : () -> ()
    %168 = vector.shape_cast %167 : vector<1x8x4xf32> to vector<8x4xf32>
    %c0_39 = arith.constant 0 : index
    %c20 = arith.constant 20 : index
    %169 = vector.load %arg16[%c0_39, %c20] : memref<8x32xf32, #tpu.memory_space<vmem>>, vector<8x4xf32>
    tpu.vector_store %arg16[%c0_39, %c20], %168 {strides = array<i32>} : memref<8x32xf32, #tpu.memory_space<vmem>>, vector<8x4xf32>,
    %170 = vector.extract_strided_slice %10 {offsets = [0, 24], sizes = [8, 4], strides = [1, 1]} : vector<8x32xf32> to vector<8x4xf32>
    %171 = vector.shape_cast %170 : vector<8x4xf32> to vector<1x8x4xf32>
    %172 = vector.extract_strided_slice %11 {offsets = [0, 24], sizes = [8, 4], strides = [1, 1]} : vector<8x32xf32> to vector<8x4xf32>
    %173 = vector.shape_cast %172 : vector<8x4xf32> to vector<1x8x4xf32>
    %174 = vector.extract_strided_slice %12 {offsets = [0, 24], sizes = [8, 4], strides = [1, 1]} : vector<8x32xf32> to vector<8x4xf32>
    %175 = vector.shape_cast %174 : vector<8x4xf32> to vector<1x8x4xf32>
    %176 = arith.truncf %171 : vector<1x8x4xf32> to vector<1x8x4xbf16>
    %177 = arith.truncf %173 : vector<1x8x4xf32> to vector<1x8x4xbf16>
    "tpu.trace_start"() <{level = 10 : i32, message = "bqd,bkd->bqk"}> : () -> ()
    %cst_40 = arith.constant dense<0.000000e+00> : vector<1x8x8xf32>
    %178 = tpu.matmul %176, %177, %cst_40 {dimension_numbers = #tpu.dot_dimension_numbers<[2], [2], [1], [1], [0, 0, 0, 1, 1, 1], [0], [0]>} : vector<1x8x4xbf16>, vector<1x8x4xbf16>, vector<1x8x8xf32> -> vector<1x8x8xf32>
    "tpu.trace_stop"() : () -> ()
    %179 = vector.broadcast %13 : vector<1x1x8xf32> to vector<1x8x8xf32>
    %180 = arith.addf %178, %179 : vector<1x8x8xf32>
    %cst_41 = arith.constant dense<0xFF800000> : vector<1x8xf32>
    %181 = vector.multi_reduction <maximumf>, %180, %cst_41 [2] : vector<1x8x8xf32> to vector<1x8xf32>
    %182 = vector.shape_cast %181 : vector<1x8xf32> to vector<1x8x1xf32>
    %183 = vector.broadcast %182 : vector<1x8x1xf32> to vector<1x8x8xf32>
    %184 = arith.subf %180, %183 : vector<1x8x8xf32>
    %185 = math.exp %184 : vector<1x8x8xf32>
    %cst_42 = arith.constant dense<0.000000e+00> : vector<1x8xf32>
    %186 = vector.multi_reduction <add>, %185, %cst_42 [2] : vector<1x8x8xf32> to vector<1x8xf32>
    %187 = vector.shape_cast %186 : vector<1x8xf32> to vector<1x8x1xf32>
    %188 = tpu.reciprocal %187 {approx = true} : vector<1x8x1xf32> -> vector<1x8x1xf32>
    %189 = vector.broadcast %188 : vector<1x8x1xf32> to vector<1x8x8xf32>
    %190 = arith.mulf %185, %189 : vector<1x8x8xf32>
    %191 = arith.truncf %190 : vector<1x8x8xf32> to vector<1x8x8xbf16>
    %192 = arith.truncf %175 : vector<1x8x4xf32> to vector<1x8x4xbf16>
    "tpu.trace_start"() <{level = 10 : i32, message = "bqk,bkd->bqd"}> : () -> ()
    %cst_43 = arith.constant dense<0.000000e+00> : vector<1x8x4xf32>
    %193 = tpu.matmul %191, %192, %cst_43 {dimension_numbers = #tpu.dot_dimension_numbers<[2], [1], [1], [2], [0, 0, 0, 1, 1, 2], [0], [0]>} : vector<1x8x8xbf16>, vector<1x8x4xbf16>, vector<1x8x4xf32> -> vector<1x8x4xf32>
    "tpu.trace_stop"() : () -> ()
    %194 = vector.shape_cast %193 : vector<1x8x4xf32> to vector<8x4xf32>
    %c0_44 = arith.constant 0 : index
    %c24 = arith.constant 24 : index
    %195 = vector.load %arg16[%c0_44, %c24] : memref<8x32xf32, #tpu.memory_space<vmem>>, vector<8x4xf32>
    tpu.vector_store %arg16[%c0_44, %c24], %194 {strides = array<i32>} : memref<8x32xf32, #tpu.memory_space<vmem>>, vector<8x4xf32>,
    %196 = vector.extract_strided_slice %10 {offsets = [0, 28], sizes = [8, 4], strides = [1, 1]} : vector<8x32xf32> to vector<8x4xf32>
    %197 = vector.shape_cast %196 : vector<8x4xf32> to vector<1x8x4xf32>
    %198 = vector.extract_strided_slice %11 {offsets = [0, 28], sizes = [8, 4], strides = [1, 1]} : vector<8x32xf32> to vector<8x4xf32>
    %199 = vector.shape_cast %198 : vector<8x4xf32> to vector<1x8x4xf32>
    %200 = vector.extract_strided_slice %12 {offsets = [0, 28], sizes = [8, 4], strides = [1, 1]} : vector<8x32xf32> to vector<8x4xf32>
    %201 = vector.shape_cast %200 : vector<8x4xf32> to vector<1x8x4xf32>
    %202 = arith.truncf %197 : vector<1x8x4xf32> to vector<1x8x4xbf16>
    %203 = arith.truncf %199 : vector<1x8x4xf32> to vector<1x8x4xbf16>
    "tpu.trace_start"() <{level = 10 : i32, message = "bqd,bkd->bqk"}> : () -> ()
    %cst_45 = arith.constant dense<0.000000e+00> : vector<1x8x8xf32>
    %204 = tpu.matmul %202, %203, %cst_45 {dimension_numbers = #tpu.dot_dimension_numbers<[2], [2], [1], [1], [0, 0, 0, 1, 1, 1], [0], [0]>} : vector<1x8x4xbf16>, vector<1x8x4xbf16>, vector<1x8x8xf32> -> vector<1x8x8xf32>
    "tpu.trace_stop"() : () -> ()
    %205 = vector.broadcast %13 : vector<1x1x8xf32> to vector<1x8x8xf32>
    %206 = arith.addf %204, %205 : vector<1x8x8xf32>
    %cst_46 = arith.constant dense<0xFF800000> : vector<1x8xf32>
    %207 = vector.multi_reduction <maximumf>, %206, %cst_46 [2] : vector<1x8x8xf32> to vector<1x8xf32>
    %208 = vector.shape_cast %207 : vector<1x8xf32> to vector<1x8x1xf32>
    %209 = vector.broadcast %208 : vector<1x8x1xf32> to vector<1x8x8xf32>
    %210 = arith.subf %206, %209 : vector<1x8x8xf32>
    %211 = math.exp %210 : vector<1x8x8xf32>
    %cst_47 = arith.constant dense<0.000000e+00> : vector<1x8xf32>
    %212 = vector.multi_reduction <add>, %211, %cst_47 [2] : vector<1x8x8xf32> to vector<1x8xf32>
    %213 = vector.shape_cast %212 : vector<1x8xf32> to vector<1x8x1xf32>
    %214 = tpu.reciprocal %213 {approx = true} : vector<1x8x1xf32> -> vector<1x8x1xf32>
    %215 = vector.broadcast %214 : vector<1x8x1xf32> to vector<1x8x8xf32>
    %216 = arith.mulf %211, %215 : vector<1x8x8xf32>
    %217 = arith.truncf %216 : vector<1x8x8xf32> to vector<1x8x8xbf16>
    %218 = arith.truncf %201 : vector<1x8x4xf32> to vector<1x8x4xbf16>
    "tpu.trace_start"() <{level = 10 : i32, message = "bqk,bkd->bqd"}> : () -> ()
    %cst_48 = arith.constant dense<0.000000e+00> : vector<1x8x4xf32>
    %219 = tpu.matmul %217, %218, %cst_48 {dimension_numbers = #tpu.dot_dimension_numbers<[2], [1], [1], [2], [0, 0, 0, 1, 1, 2], [0], [0]>} : vector<1x8x8xbf16>, vector<1x8x4xbf16>, vector<1x8x4xf32> -> vector<1x8x4xf32>
    "tpu.trace_stop"() : () -> ()
    %220 = vector.shape_cast %219 : vector<1x8x4xf32> to vector<8x4xf32>
    %c0_49 = arith.constant 0 : index
    %c28 = arith.constant 28 : index
    %221 = vector.load %arg16[%c0_49, %c28] : memref<8x32xf32, #tpu.memory_space<vmem>>, vector<8x4xf32>
    tpu.vector_store %arg16[%c0_49, %c28], %220 {strides = array<i32>} : memref<8x32xf32, #tpu.memory_space<vmem>>, vector<8x4xf32>,
    %c0_50 = arith.constant 0 : index
    %c0_51 = arith.constant 0 : index
    %222 = vector.load %arg16[%c0_50, %c0_51] : memref<8x32xf32, #tpu.memory_space<vmem>>, vector<8x32xf32>
    %223 = arith.truncf %222 : vector<8x32xf32> to vector<8x32xbf16>
    %c0_52 = arith.constant 0 : index
    %c0_53 = arith.constant 0 : index
    %224 = vector.load %arg5[%c0_52, %c0_53] : memref<32x32xbf16, #tpu.memory_space<vmem>>, vector<32x32xbf16>
    %cst_54 = arith.constant dense<0.000000e+00> : vector<8x32xf32>
    %225 = tpu.matmul %223, %224, %cst_54 {dimension_numbers = #tpu.dot_dimension_numbers<[1], [0], [0], [1], [0, 0, 1, 1], [], []>} : vector<8x32xbf16>, vector<32x32xbf16>, vector<8x32xf32> -> vector<8x32xf32>
    %c0_55 = arith.constant 0 : index
    %c0_56 = arith.constant 0 : index
    %226 = vector.load %arg6[%c0_55, %c0_56] : memref<1x32xf32, #tpu.memory_space<vmem>>, vector<1x32xf32>
    %227 = vector.broadcast %226 : vector<1x32xf32> to vector<8x32xf32>
    %228 = arith.addf %225, %227 : vector<8x32xf32>
    %229 = arith.addf %1, %228 : vector<8x32xf32>
    %c0_57 = arith.constant 0 : index
    %c0_58 = arith.constant 0 : index
    %230 = vector.load %arg7[%c0_57, %c0_58] : memref<1x32xf32, #tpu.memory_space<vmem>>, vector<1x32xf32>
    %c0_59 = arith.constant 0 : index
    %c0_60 = arith.constant 0 : index
    %231 = vector.load %arg8[%c0_59, %c0_60] : memref<1x32xf32, #tpu.memory_space<vmem>>, vector<1x32xf32>
    %cst_61 = arith.constant dense<0.000000e+00> : vector<8xf32>
    %232 = vector.multi_reduction <add>, %229, %cst_61 [1] : vector<8x32xf32> to vector<8xf32>
    %233 = vector.shape_cast %232 : vector<8xf32> to vector<8x1xf32>
    %cst_62 = arith.constant 3.200000e+01 : f32
    %234 = vector.broadcast %cst_62 : f32 to vector<8x1xf32>
    %235 = arith.divf %233, %234 : vector<8x1xf32>
    %236 = vector.broadcast %235 : vector<8x1xf32> to vector<8x32xf32>
    %237 = arith.subf %229, %236 : vector<8x32xf32>
    %238 = vector.broadcast %235 : vector<8x1xf32> to vector<8x32xf32>
    %239 = arith.subf %229, %238 : vector<8x32xf32>
    %240 = arith.mulf %237, %239 : vector<8x32xf32>
    %cst_63 = arith.constant dense<0.000000e+00> : vector<8xf32>
    %241 = vector.multi_reduction <add>, %240, %cst_63 [1] : vector<8x32xf32> to vector<8xf32>
    %242 = vector.shape_cast %241 : vector<8xf32> to vector<8x1xf32>
    %cst_64 = arith.constant 3.200000e+01 : f32
    %243 = vector.broadcast %cst_64 : f32 to vector<8x1xf32>
    %244 = arith.divf %242, %243 : vector<8x1xf32>
    %245 = vector.broadcast %235 : vector<8x1xf32> to vector<8x32xf32>
    %246 = arith.subf %229, %245 : vector<8x32xf32>
    %cst_65 = arith.constant 9.99999974E-6 : f32
    %247 = vector.broadcast %cst_65 : f32 to vector<8x1xf32>
    %248 = arith.addf %244, %247 : vector<8x1xf32>
    %249 = math.rsqrt %248 : vector<8x1xf32>
    %250 = vector.broadcast %249 : vector<8x1xf32> to vector<8x32xf32>
    %251 = arith.mulf %246, %250 : vector<8x32xf32>
    %252 = vector.broadcast %230 : vector<1x32xf32> to vector<8x32xf32>
    %253 = arith.mulf %251, %252 : vector<8x32xf32>
    %254 = vector.broadcast %231 : vector<1x32xf32> to vector<8x32xf32>
    %255 = arith.addf %253, %254 : vector<8x32xf32>
    %256 = arith.truncf %255 : vector<8x32xf32> to vector<8x32xbf16>
    %c0_66 = arith.constant 0 : index
    %c0_67 = arith.constant 0 : index
    %257 = vector.load %arg9[%c0_66, %c0_67] : memref<32x128xbf16, #tpu.memory_space<vmem>>, vector<32x128xbf16>
    %cst_68 = arith.constant dense<0.000000e+00> : vector<8x128xf32>
    %258 = tpu.matmul %256, %257, %cst_68 {dimension_numbers = #tpu.dot_dimension_numbers<[1], [0], [0], [1], [0, 0, 1, 1], [], []>} : vector<8x32xbf16>, vector<32x128xbf16>, vector<8x128xf32> -> vector<8x128xf32>
    %c0_69 = arith.constant 0 : index
    %c0_70 = arith.constant 0 : index
    %259 = vector.load %arg10[%c0_69, %c0_70] : memref<1x128xf32, #tpu.memory_space<vmem>>, vector<1x128xf32>
    %260 = vector.broadcast %259 : vector<1x128xf32> to vector<8x128xf32>
    %261 = arith.addf %258, %260 : vector<8x128xf32>
    %cst_71 = arith.constant 0.707106769 : f32
    %262 = vector.broadcast %cst_71 : f32 to vector<8x128xf32>
    %263 = arith.mulf %261, %262 : vector<8x128xf32>
    %264 = math.erf %263 : vector<8x128xf32>
    %cst_72 = arith.constant 5.000000e-01 : f32
    %265 = vector.broadcast %cst_72 : f32 to vector<8x128xf32>
    %266 = arith.mulf %265, %261 : vector<8x128xf32>
    %cst_73 = arith.constant 1.000000e+00 : f32
    %267 = vector.broadcast %cst_73 : f32 to vector<8x128xf32>
    %268 = arith.addf %267, %264 : vector<8x128xf32>
    %269 = arith.mulf %266, %268 : vector<8x128xf32>
    %270 = arith.truncf %269 : vector<8x128xf32> to vector<8x128xbf16>
    %c0_74 = arith.constant 0 : index
    %c0_75 = arith.constant 0 : index
    %271 = vector.load %arg11[%c0_74, %c0_75] : memref<128x32xbf16, #tpu.memory_space<vmem>>, vector<128x32xbf16>
    %cst_76 = arith.constant dense<0.000000e+00> : vector<8x32xf32>
    %272 = tpu.matmul %270, %271, %cst_76 {dimension_numbers = #tpu.dot_dimension_numbers<[1], [0], [0], [1], [0, 0, 1, 1], [], []>} : vector<8x128xbf16>, vector<128x32xbf16>, vector<8x32xf32> -> vector<8x32xf32>
    %c0_77 = arith.constant 0 : index
    %c0_78 = arith.constant 0 : index
    %273 = vector.load %arg12[%c0_77, %c0_78] : memref<1x32xf32, #tpu.memory_space<vmem>>, vector<1x32xf32>
    %274 = vector.broadcast %273 : vector<1x32xf32> to vector<8x32xf32>
    %275 = arith.addf %272, %274 : vector<8x32xf32>
    %276 = arith.addf %255, %275 : vector<8x32xf32>
    %c0_79 = arith.constant 0 : index
    %c0_80 = arith.constant 0 : index
    %277 = vector.load %arg13[%c0_79, %c0_80] : memref<1x32xf32, #tpu.memory_space<vmem>>, vector<1x32xf32>
    %c0_81 = arith.constant 0 : index
    %c0_82 = arith.constant 0 : index
    %278 = vector.load %arg14[%c0_81, %c0_82] : memref<1x32xf32, #tpu.memory_space<vmem>>, vector<1x32xf32>
    %cst_83 = arith.constant dense<0.000000e+00> : vector<8xf32>
    %279 = vector.multi_reduction <add>, %276, %cst_83 [1] : vector<8x32xf32> to vector<8xf32>
    %280 = vector.shape_cast %279 : vector<8xf32> to vector<8x1xf32>
    %cst_84 = arith.constant 3.200000e+01 : f32
    %281 = vector.broadcast %cst_84 : f32 to vector<8x1xf32>
    %282 = arith.divf %280, %281 : vector<8x1xf32>
    %283 = vector.broadcast %282 : vector<8x1xf32> to vector<8x32xf32>
    %284 = arith.subf %276, %283 : vector<8x32xf32>
    %285 = vector.broadcast %282 : vector<8x1xf32> to vector<8x32xf32>
    %286 = arith.subf %276, %285 : vector<8x32xf32>
    %287 = arith.mulf %284, %286 : vector<8x32xf32>
    %cst_85 = arith.constant dense<0.000000e+00> : vector<8xf32>
    %288 = vector.multi_reduction <add>, %287, %cst_85 [1] : vector<8x32xf32> to vector<8xf32>
    %289 = vector.shape_cast %288 : vector<8xf32> to vector<8x1xf32>
    %cst_86 = arith.constant 3.200000e+01 : f32
    %290 = vector.broadcast %cst_86 : f32 to vector<8x1xf32>
    %291 = arith.divf %289, %290 : vector<8x1xf32>
    %292 = vector.broadcast %282 : vector<8x1xf32> to vector<8x32xf32>
    %293 = arith.subf %276, %292 : vector<8x32xf32>
    %cst_87 = arith.constant 9.99999974E-6 : f32
    %294 = vector.broadcast %cst_87 : f32 to vector<8x1xf32>
    %295 = arith.addf %291, %294 : vector<8x1xf32>
    %296 = math.rsqrt %295 : vector<8x1xf32>
    %297 = vector.broadcast %296 : vector<8x1xf32> to vector<8x32xf32>
    %298 = arith.mulf %293, %297 : vector<8x32xf32>
    %299 = vector.broadcast %277 : vector<1x32xf32> to vector<8x32xf32>
    %300 = arith.mulf %298, %299 : vector<8x32xf32>
    %301 = vector.broadcast %278 : vector<1x32xf32> to vector<8x32xf32>
    %302 = arith.addf %300, %301 : vector<8x32xf32>
    %303 = vector.shape_cast %302 : vector<8x32xf32> to vector<1x8x32xf32>
    %c0_88 = arith.constant 0 : index
    %c0_89 = arith.constant 0 : index
    %c0_90 = arith.constant 0 : index
    %304 = vector.load %arg15[%c0_88, %c0_89, %c0_90] : memref<1x8x32xf32, #tpu.memory_space<vmem>>, vector<1x8x32xf32>
    tpu.vector_store %arg15[%c0_88, %c0_89, %c0_90], %303 {strides = array<i32>} : memref<1x8x32xf32, #tpu.memory_space<vmem>>, vector<1x8x32xf32>,
    return
  }
  func.func @transform_0(%arg0: i32) -> (i32, i32, i32) {
    %c0_i32 = arith.constant 0 : i32
    %c0_i32_0 = arith.constant 0 : i32
    %c0_i32_1 = arith.constant 0 : i32
    return %arg0, %c0_i32, %c0_i32_0 : i32, i32, i32
  }
  func.func @transform_1(%arg0: i32) -> (i32, i32, i32) {
    %c0_i32 = arith.constant 0 : i32
    %c0_i32_0 = arith.constant 0 : i32
    %c0_i32_1 = arith.constant 0 : i32
    return %arg0, %c0_i32, %c0_i32_0 : i32, i32, i32
  }
  func.func @transform_2(%arg0: i32) -> (i32, i32) {
    %c0_i32 = arith.constant 0 : i32
    %c0_i32_0 = arith.constant 0 : i32
    %c0_i32_1 = arith.constant 0 : i32
    return %c0_i32, %c0_i32_0 : i32, i32
  }
  func.func @transform_3(%arg0: i32) -> (i32, i32) {
    %c0_i32 = arith.constant 0 : i32
    %c0_i32_0 = arith.constant 0 : i32
    %c0_i32_1 = arith.constant 0 : i32
    return %c0_i32, %c0_i32_0 : i32, i32
  }
  func.func @transform_4(%arg0: i32) -> (i32, i32) {
    %c0_i32 = arith.constant 0 : i32
    %c0_i32_0 = arith.constant 0 : i32
    %c0_i32_1 = arith.constant 0 : i32
    return %c0_i32, %c0_i32_0 : i32, i32
  }
  func.func @transform_5(%arg0: i32) -> (i32, i32) {
    %c0_i32 = arith.constant 0 : i32
    %c0_i32_0 = arith.constant 0 : i32
    %c0_i32_1 = arith.constant 0 : i32
    return %c0_i32, %c0_i32_0 : i32, i32
  }
  func.func @transform_6(%arg0: i32) -> (i32, i32) {
    %c0_i32 = arith.constant 0 : i32
    %c0_i32_0 = arith.constant 0 : i32
    %c0_i32_1 = arith.constant 0 : i32
    return %c0_i32, %c0_i32_0 : i32, i32
  }
  func.func @transform_7(%arg0: i32) -> (i32, i32) {
    %c0_i32 = arith.constant 0 : i32
    %c0_i32_0 = arith.constant 0 : i32
    %c0_i32_1 = arith.constant 0 : i32
    return %c0_i32, %c0_i32_0 : i32, i32
  }
  func.func @transform_8(%arg0: i32) -> (i32, i32) {
    %c0_i32 = arith.constant 0 : i32
    %c0_i32_0 = arith.constant 0 : i32
    %c0_i32_1 = arith.constant 0 : i32
    return %c0_i32, %c0_i32_0 : i32, i32
  }
  func.func @transform_9(%arg0: i32) -> (i32, i32) {
    %c0_i32 = arith.constant 0 : i32
    %c0_i32_0 = arith.constant 0 : i32
    %c0_i32_1 = arith.constant 0 : i32
    return %c0_i32, %c0_i32_0 : i32, i32
  }
  func.func @transform_10(%arg0: i32) -> (i32, i32) {
    %c0_i32 = arith.constant 0 : i32
    %c0_i32_0 = arith.constant 0 : i32
    %c0_i32_1 = arith.constant 0 : i32
    return %c0_i32, %c0_i32_0 : i32, i32
  }
  func.func @transform_11(%arg0: i32) -> (i32, i32) {
    %c0_i32 = arith.constant 0 : i32
    %c0_i32_0 = arith.constant 0 : i32
    %c0_i32_1 = arith.constant 0 : i32
    return %c0_i32, %c0_i32_0 : i32, i32
  }
  func.func @transform_12(%arg0: i32) -> (i32, i32) {
    %c0_i32 = arith.constant 0 : i32
    %c0_i32_0 = arith.constant 0 : i32
    %c0_i32_1 = arith.constant 0 : i32
    return %c0_i32, %c0_i32_0 : i32, i32
  }
  func.func @transform_13(%arg0: i32) -> (i32, i32) {
    %c0_i32 = arith.constant 0 : i32
    %c0_i32_0 = arith.constant 0 : i32
    %c0_i32_1 = arith.constant 0 : i32
    return %c0_i32, %c0_i32_0 : i32, i32
  }
  func.func @transform_14(%arg0: i32) -> (i32, i32, i32) {
    %c0_i32 = arith.constant 0 : i32
    %c0_i32_0 = arith.constant 0 : i32
    %c0_i32_1 = arith.constant 0 : i32
    return %arg0, %c0_i32, %c0_i32_0 : i32, i32, i32
  }
}

module attributes {stable_mosaic.version = 11 : i64} {
  func.func @_encoder_kernel(%arg0: i32, %arg1: memref<1x8x32xf32, #tpu.memory_space<vmem>>, %arg2: memref<1x1x8xf32, #tpu.memory_space<vmem>>, %arg3: memref<32x96xbf16, #tpu.memory_space<vmem>>, %arg4: memref<1x96xf32, #tpu.memory_space<vmem>>, %arg5: memref<32x32xbf16, #tpu.memory_space<vmem>>, %arg6: memref<1x32xf32, #tpu.memory_space<vmem>>, %arg7: memref<1x32xf32, #tpu.memory_space<vmem>>, %arg8: memref<1x32xf32, #tpu.memory_space<vmem>>, %arg9: memref<32x128xbf16, #tpu.memory_space<vmem>>, %arg10: memref<1x128xf32, #tpu.memory_space<vmem>>, %arg11: memref<128x32xbf16, #tpu.memory_space<vmem>>, %arg12: memref<1x32xf32, #tpu.memory_space<vmem>>, %arg13: memref<1x32xf32, #tpu.memory_space<vmem>>, %arg14: memref<1x32xf32, #tpu.memory_space<vmem>>, %arg15: memref<1x8x32xf32, #tpu.memory_space<vmem>>, %arg16: memref<8x32xf32, #tpu.memory_space<vmem>>) attributes {dimension_semantics = [#tpu.dimension_semantics<parallel>], iteration_bounds = array<i64: 2>, scalar_prefetch = 0 : i64, scratch_operands = 1 : i64, tpu.core_type = #tpu.core_type<tc>, window_params = [{transform_indices = @transform_0, window_bounds = array<i64: 1, 8, 32>}, {transform_indices = @transform_1, window_bounds = array<i64: 1, 1, 8>}, {pipeline_mode = #tpu.pipeline_mode<synchronous>, transform_indices = @transform_2, window_bounds = array<i64: 32, 96>}, {pipeline_mode = #tpu.pipeline_mode<synchronous>, transform_indices = @transform_3, window_bounds = array<i64: 1, 96>}, {pipeline_mode = #tpu.pipeline_mode<synchronous>, transform_indices = @transform_4, window_bounds = array<i64: 32, 32>}, {pipeline_mode = #tpu.pipeline_mode<synchronous>, transform_indices = @transform_5, window_bounds = array<i64: 1, 32>}, {pipeline_mode = #tpu.pipeline_mode<synchronous>, transform_indices = @transform_6, window_bounds = array<i64: 1, 32>}, {pipeline_mode = #tpu.pipeline_mode<synchronous>, transform_indices = @transform_7, window_bounds = array<i64: 1, 32>}, {pipeline_mode = #tpu.pipeline_mode<synchronous>, transform_indices = @transform_8, window_bounds = array<i64: 32, 128>}, {pipeline_mode = #tpu.pipeline_mode<synchronous>, transform_indices = @transform_9, window_bounds = array<i64: 1, 128>}, {pipeline_mode = #tpu.pipeline_mode<synchronous>, transform_indices = @transform_10, window_bounds = array<i64: 128, 32>}, {pipeline_mode = #tpu.pipeline_mode<synchronous>, transform_indices = @transform_11, window_bounds = array<i64: 1, 32>}, {pipeline_mode = #tpu.pipeline_mode<synchronous>, transform_indices = @transform_12, window_bounds = array<i64: 1, 32>}, {pipeline_mode = #tpu.pipeline_mode<synchronous>, transform_indices = @transform_13, window_bounds = array<i64: 1, 32>}, {transform_indices = @transform_14, window_bounds = array<i64: 1, 8, 32>}]} {
    %c0 = arith.constant 0 : index
    %c0_0 = arith.constant 0 : index
    %c0_1 = arith.constant 0 : index
    %0 = vector.load %arg1[%c0, %c0_0, %c0_1] : memref<1x8x32xf32, #tpu.memory_space<vmem>>, vector<1x8x32xf32>
    %1 = vector.shape_cast %0 : vector<1x8x32xf32> to vector<8x32xf32>
    %c0_2 = arith.constant 0 : index
    %c0_3 = arith.constant 0 : index
    %c0_4 = arith.constant 0 : index
    %2 = vector.load %arg2[%c0_2, %c0_3, %c0_4] : memref<1x1x8xf32, #tpu.memory_space<vmem>>, vector<1x1x8xf32>
    %3 = vector.shape_cast %2 : vector<1x1x8xf32> to vector<1x8xf32>
    %4 = arith.truncf %1 : vector<8x32xf32> to vector<8x32xbf16>
    %c0_5 = arith.constant 0 : index
    %c0_6 = arith.constant 0 : index
    %5 = vector.load %arg3[%c0_5, %c0_6] : memref<32x96xbf16, #tpu.memory_space<vmem>>, vector<32x96xbf16>
    %cst = arith.constant dense<0.000000e+00> : vector<8x96xf32>
    %6 = tpu.matmul %4, %5, %cst {dimension_numbers = #tpu.dot_dimension_numbers<[1], [0], [0], [1], [0, 0, 1, 1], [], []>} : vector<8x32xbf16>, vector<32x96xbf16>, vector<8x96xf32> -> vector<8x96xf32>
    %c0_7 = arith.constant 0 : index
    %c0_8 = arith.constant 0 : index
    %7 = vector.load %arg4[%c0_7, %c0_8] : memref<1x96xf32, #tpu.memory_space<vmem>>, vector<1x96xf32>
    %8 = vector.broadcast %7 : vector<1x96xf32> to vector<8x96xf32>
    %9 = arith.addf %6, %8 : vector<8x96xf32>
    %10 = vector.extract_strided_slice %9 {offsets = [0, 0], sizes = [8, 32], strides = [1, 1]} : vector<8x96xf32> to vector<8x32xf32>
    %11 = vector.extract_strided_slice %9 {offsets = [0, 32], sizes = [8, 32], strides = [1, 1]} : vector<8x96xf32> to vector<8x32xf32>
    %12 = vector.extract_strided_slice %9 {offsets = [0, 64], sizes = [8, 32], strides = [1, 1]} : vector<8x96xf32> to vector<8x32xf32>
    %13 = vector.shape_cast %3 : vector<1x8xf32> to vector<1x1x8xf32>
    %14 = vector.extract_strided_slice %10 {offsets = [0, 0], sizes = [8, 4], strides = [1, 1]} : vector<8x32xf32> to vector<8x4xf32>
    %15 = vector.shape_cast %14 : vector<8x4xf32> to vector<1x8x4xf32>
    %16 = vector.extract_strided_slice %11 {offsets = [0, 0], sizes = [8, 4], strides = [1, 1]} : vector<8x32xf32> to vector<8x4xf32>
    %17 = vector.shape_cast %16 : vector<8x4xf32> to vector<1x8x4xf32>
    %18 = vector.extract_strided_slice %12 {offsets = [0, 0], sizes = [8, 4], strides = [1, 1]} : vector<8x32xf32> to vector<8x4xf32>
    %19 = vector.shape_cast %18 : vector<8x4xf32> to vector<1x8x4xf32>
    %20 = arith.truncf %15 : vector<1x8x4xf32> to vector<1x8x4xbf16>
    %21 = arith.truncf %17 : vector<1x8x4xf32> to vector<1x8x4xbf16>
    "tpu.trace_start"() <{level = 10 : i32, message = "bqd,bkd->bqk"}> : () -> ()
    %cst_9 = arith.constant dense<0.000000e+00> : vector<1x8x8xf32>
    %22 = tpu.matmul %20, %21, %cst_9 {dimension_numbers = #tpu.dot_dimension_numbers<[2], [2], [1], [1], [0, 0, 0, 1, 1, 1], [0], [0]>} : vector<1x8x4xbf16>, vector<1x8x4xbf16>, vector<1x8x8xf32> -> vector<1x8x8xf32>
    "tpu.trace_stop"() : () -> ()
    %23 = vector.broadcast %13 : vector<1x1x8xf32> to vector<1x8x8xf32>
    %24 = arith.addf %22, %23 : vector<1x8x8xf32>
    %cst_10 = arith.constant dense<0xFF800000> : vector<1x8xf32>
    %25 = vector.multi_reduction <maximumf>, %24, %cst_10 [2] : vector<1x8x8xf32> to vector<1x8xf32>
    %26 = vector.shape_cast %25 : vector<1x8xf32> to vector<1x8x1xf32>
    %27 = vector.broadcast %26 : vector<1x8x1xf32> to vector<1x8x8xf32>
    %28 = arith.subf %24, %27 : vector<1x8x8xf32>
    %29 = math.exp %28 : vector<1x8x8xf32>
    %cst_11 = arith.constant dense<0.000000e+00> : vector<1x8xf32>
    %30 = vector.multi_reduction <add>, %29, %cst_11 [2] : vector<1x8x8xf32> to vector<1x8xf32>
    %31 = vector.shape_cast %30 : vector<1x8xf32> to vector<1x8x1xf32>
    %32 = tpu.reciprocal %31 {approx = true} : vector<1x8x1xf32> -> vector<1x8x1xf32>
    %33 = vector.broadcast %32 : vector<1x8x1xf32> to vector<1x8x8xf32>
    %34 = arith.mulf %29, %33 : vector<1x8x8xf32>
    %35 = arith.truncf %34 : vector<1x8x8xf32> to vector<1x8x8xbf16>
    %36 = arith.truncf %19 : vector<1x8x4xf32> to vector<1x8x4xbf16>
    "tpu.trace_start"() <{level = 10 : i32, message = "bqk,bkd->bqd"}> : () -> ()
    %cst_12 = arith.constant dense<0.000000e+00> : vector<1x8x4xf32>
    %37 = tpu.matmul %35, %36, %cst_12 {dimension_numbers = #tpu.dot_dimension_numbers<[2], [1], [1], [2], [0, 0, 0, 1, 1, 2], [0], [0]>} : vector<1x8x8xbf16>, vector<1x8x4xbf16>, vector<1x8x4xf32> -> vector<1x8x4xf32>
    "tpu.trace_stop"() : () -> ()
    %38 = vector.shape_cast %37 : vector<1x8x4xf32> to vector<8x4xf32>
    %c0_13 = arith.constant 0 : index
    %c0_14 = arith.constant 0 : index
    %39 = vector.load %arg16[%c0_13, %c0_14] : memref<8x32xf32, #tpu.memory_space<vmem>>, vector<8x4xf32>
    tpu.vector_store %arg16[%c0_13, %c0_14], %38 {strides = array<i32>} : memref<8x32xf32, #tpu.memory_space<vmem>>, vector<8x4xf32>,
    %40 = vector.extract_strided_slice %10 {offsets = [0, 4], sizes = [8, 4], strides = [1, 1]} : vector<8x32xf32> to vector<8x4xf32>
    %41 = vector.shape_cast %40 : vector<8x4xf32> to vector<1x8x4xf32>
    %42 = vector.extract_strided_slice %11 {offsets = [0, 4], sizes = [8, 4], strides = [1, 1]} : vector<8x32xf32> to vector<8x4xf32>
    %43 = vector.shape_cast %42 : vector<8x4xf32> to vector<1x8x4xf32>
    %44 = vector.extract_strided_slice %12 {offsets = [0, 4], sizes = [8, 4], strides = [1, 1]} : vector<8x32xf32> to vector<8x4xf32>
    %45 = vector.shape_cast %44 : vector<8x4xf32> to vector<1x8x4xf32>
    %46 = arith.truncf %41 : vector<1x8x4xf32> to vector<1x8x4xbf16>
    %47 = arith.truncf %43 : vector<1x8x4xf32> to vector<1x8x4xbf16>
    "tpu.trace_start"() <{level = 10 : i32, message = "bqd,bkd->bqk"}> : () -> ()
    %cst_15 = arith.constant dense<0.000000e+00> : vector<1x8x8xf32>
    %48 = tpu.matmul %46, %47, %cst_15 {dimension_numbers = #tpu.dot_dimension_numbers<[2], [2], [1], [1], [0, 0, 0, 1, 1, 1], [0], [0]>} : vector<1x8x4xbf16>, vector<1x8x4xbf16>, vector<1x8x8xf32> -> vector<1x8x8xf32>
    "tpu.trace_stop"() : () -> ()
    %49 = vector.broadcast %13 : vector<1x1x8xf32> to vector<1x8x8xf32>
    %50 = arith.addf %48, %49 : vector<1x8x8xf32>
    %cst_16 = arith.constant dense<0xFF800000> : vector<1x8xf32>
    %51 = vector.multi_reduction <maximumf>, %50, %cst_16 [2] : vector<1x8x8xf32> to vector<1x8xf32>
    %52 = vector.shape_cast %51 : vector<1x8xf32> to vector<1x8x1xf32>
    %53 = vector.broadcast %52 : vector<1x8x1xf32> to vector<1x8x8xf32>
    %54 = arith.subf %50, %53 : vector<1x8x8xf32>
    %55 = math.exp %54 : vector<1x8x8xf32>
    %cst_17 = arith.constant dense<0.000000e+00> : vector<1x8xf32>
    %56 = vector.multi_reduction <add>, %55, %cst_17 [2] : vector<1x8x8xf32> to vector<1x8xf32>
    %57 = vector.shape_cast %56 : vector<1x8xf32> to vector<1x8x1xf32>
    %58 = tpu.reciprocal %57 {approx = true} : vector<1x8x1xf32> -> vector<1x8x1xf32>
    %59 = vector.broadcast %58 : vector<1x8x1xf32> to vector<1x8x8xf32>
    %60 = arith.mulf %55, %59 : vector<1x8x8xf32>
    %61 = arith.truncf %60 : vector<1x8x8xf32> to vector<1x8x8xbf16>
    %62 = arith.truncf %45 : vector<1x8x4xf32> to vector<1x8x4xbf16>
    "tpu.trace_start"() <{level = 10 : i32, message = "bqk,bkd->bqd"}> : () -> ()
    %cst_18 = arith.constant dense<0.000000e+00> : vector<1x8x4xf32>
    %63 = tpu.matmul %61, %62, %cst_18 {dimension_numbers = #tpu.dot_dimension_numbers<[2], [1], [1], [2], [0, 0, 0, 1, 1, 2], [0], [0]>} : vector<1x8x8xbf16>, vector<1x8x4xbf16>, vector<1x8x4xf32> -> vector<1x8x4xf32>
    "tpu.trace_stop"() : () -> ()
    %64 = vector.shape_cast %63 : vector<1x8x4xf32> to vector<8x4xf32>
    %c0_19 = arith.constant 0 : index
    %c4 = arith.constant 4 : index
    %65 = vector.load %arg16[%c0_19, %c4] : memref<8x32xf32, #tpu.memory_space<vmem>>, vector<8x4xf32>
    tpu.vector_store %arg16[%c0_19, %c4], %64 {strides = array<i32>} : memref<8x32xf32, #tpu.memory_space<vmem>>, vector<8x4xf32>,
    %66 = vector.extract_strided_slice %10 {offsets = [0, 8], sizes = [8, 4], strides = [1, 1]} : vector<8x32xf32> to vector<8x4xf32>
    %67 = vector.shape_cast %66 : vector<8x4xf32> to vector<1x8x4xf32>
    %68 = vector.extract_strided_slice %11 {offsets = [0, 8], sizes = [8, 4], strides = [1, 1]} : vector<8x32xf32> to vector<8x4xf32>
    %69 = vector.shape_cast %68 : vector<8x4xf32> to vector<1x8x4xf32>
    %70 = vector.extract_strided_slice %12 {offsets = [0, 8], sizes = [8, 4], strides = [1, 1]} : vector<8x32xf32> to vector<8x4xf32>
    %71 = vector.shape_cast %70 : vector<8x4xf32> to vector<1x8x4xf32>
    %72 = arith.truncf %67 : vector<1x8x4xf32> to vector<1x8x4xbf16>
    %73 = arith.truncf %69 : vector<1x8x4xf32> to vector<1x8x4xbf16>
    "tpu.trace_start"() <{level = 10 : i32, message = "bqd,bkd->bqk"}> : () -> ()
    %cst_20 = arith.constant dense<0.000000e+00> : vector<1x8x8xf32>
    %74 = tpu.matmul %72, %73, %cst_20 {dimension_numbers = #tpu.dot_dimension_numbers<[2], [2], [1], [1], [0, 0, 0, 1, 1, 1], [0], [0]>} : vector<1x8x4xbf16>, vector<1x8x4xbf16>, vector<1x8x8xf32> -> vector<1x8x8xf32>
    "tpu.trace_stop"() : () -> ()
    %75 = vector.broadcast %13 : vector<1x1x8xf32> to vector<1x8x8xf32>
    %76 = arith.addf %74, %75 : vector<1x8x8xf32>
    %cst_21 = arith.constant dense<0xFF800000> : vector<1x8xf32>
    %77 = vector.multi_reduction <maximumf>, %76, %cst_21 [2] : vector<1x8x8xf32> to vector<1x8xf32>
    %78 = vector.shape_cast %77 : vector<1x8xf32> to vector<1x8x1xf32>
    %79 = vector.broadcast %78 : vector<1x8x1xf32> to vector<1x8x8xf32>
    %80 = arith.subf %76, %79 : vector<1x8x8xf32>
    %81 = math.exp %80 : vector<1x8x8xf32>
    %cst_22 = arith.constant dense<0.000000e+00> : vector<1x8xf32>
    %82 = vector.multi_reduction <add>, %81, %cst_22 [2] : vector<1x8x8xf32> to vector<1x8xf32>
    %83 = vector.shape_cast %82 : vector<1x8xf32> to vector<1x8x1xf32>
    %84 = tpu.reciprocal %83 {approx = true} : vector<1x8x1xf32> -> vector<1x8x1xf32>
    %85 = vector.broadcast %84 : vector<1x8x1xf32> to vector<1x8x8xf32>
    %86 = arith.mulf %81, %85 : vector<1x8x8xf32>
    %87 = arith.truncf %86 : vector<1x8x8xf32> to vector<1x8x8xbf16>
    %88 = arith.truncf %71 : vector<1x8x4xf32> to vector<1x8x4xbf16>
    "tpu.trace_start"() <{level = 10 : i32, message = "bqk,bkd->bqd"}> : () -> ()
    %cst_23 = arith.constant dense<0.000000e+00> : vector<1x8x4xf32>
    %89 = tpu.matmul %87, %88, %cst_23 {dimension_numbers = #tpu.dot_dimension_numbers<[2], [1], [1], [2], [0, 0, 0, 1, 1, 2], [0], [0]>} : vector<1x8x8xbf16>, vector<1x8x4xbf16>, vector<1x8x4xf32> -> vector<1x8x4xf32>
    "tpu.trace_stop"() : () -> ()
    %90 = vector.shape_cast %89 : vector<1x8x4xf32> to vector<8x4xf32>
    %c0_24 = arith.constant 0 : index
    %c8 = arith.constant 8 : index
    %91 = vector.load %arg16[%c0_24, %c8] : memref<8x32xf32, #tpu.memory_space<vmem>>, vector<8x4xf32>
    tpu.vector_store %arg16[%c0_24, %c8], %90 {strides = array<i32>} : memref<8x32xf32, #tpu.memory_space<vmem>>, vector<8x4xf32>,
    %92 = vector.extract_strided_slice %10 {offsets = [0, 12], sizes = [8, 4], strides = [1, 1]} : vector<8x32xf32> to vector<8x4xf32>
    %93 = vector.shape_cast %92 : vector<8x4xf32> to vector<1x8x4xf32>
    %94 = vector.extract_strided_slice %11 {offsets = [0, 12], sizes = [8, 4], strides = [1, 1]} : vector<8x32xf32> to vector<8x4xf32>
    %95 = vector.shape_cast %94 : vector<8x4xf32> to vector<1x8x4xf32>
    %96 = vector.extract_strided_slice %12 {offsets = [0, 12], sizes = [8, 4], strides = [1, 1]} : vector<8x32xf32> to vector<8x4xf32>
    %97 = vector.shape_cast %96 : vector<8x4xf32> to vector<1x8x4xf32>
    %98 = arith.truncf %93 : vector<1x8x4xf32> to vector<1x8x4xbf16>
    %99 = arith.truncf %95 : vector<1x8x4xf32> to vector<1x8x4xbf16>
    "tpu.trace_start"() <{level = 10 : i32, message = "bqd,bkd->bqk"}> : () -> ()
    %cst_25 = arith.constant dense<0.000000e+00> : vector<1x8x8xf32>
    %100 = tpu.matmul %98, %99, %cst_25 {dimension_numbers = #tpu.dot_dimension_numbers<[2], [2], [1], [1], [0, 0, 0, 1, 1, 1], [0], [0]>} : vector<1x8x4xbf16>, vector<1x8x4xbf16>, vector<1x8x8xf32> -> vector<1x8x8xf32>
    "tpu.trace_stop"() : () -> ()
    %101 = vector.broadcast %13 : vector<1x1x8xf32> to vector<1x8x8xf32>
    %102 = arith.addf %100, %101 : vector<1x8x8xf32>
    %cst_26 = arith.constant dense<0xFF800000> : vector<1x8xf32>
    %103 = vector.multi_reduction <maximumf>, %102, %cst_26 [2] : vector<1x8x8xf32> to vector<1x8xf32>
    %104 = vector.shape_cast %103 : vector<1x8xf32> to vector<1x8x1xf32>
    %105 = vector.broadcast %104 : vector<1x8x1xf32> to vector<1x8x8xf32>
    %106 = arith.subf %102, %105 : vector<1x8x8xf32>
    %107 = math.exp %106 : vector<1x8x8xf32>
    %cst_27 = arith.constant dense<0.000000e+00> : vector<1x8xf32>
    %108 = vector.multi_reduction <add>, %107, %cst_27 [2] : vector<1x8x8xf32> to vector<1x8xf32>
    %109 = vector.shape_cast %108 : vector<1x8xf32> to vector<1x8x1xf32>
    %110 = tpu.reciprocal %109 {approx = true} : vector<1x8x1xf32> -> vector<1x8x1xf32>
    %111 = vector.broadcast %110 : vector<1x8x1xf32> to vector<1x8x8xf32>
    %112 = arith.mulf %107, %111 : vector<1x8x8xf32>
    %113 = arith.truncf %112 : vector<1x8x8xf32> to vector<1x8x8xbf16>
    %114 = arith.truncf %97 : vector<1x8x4xf32> to vector<1x8x4xbf16>
    "tpu.trace_start"() <{level = 10 : i32, message = "bqk,bkd->bqd"}> : () -> ()
    %cst_28 = arith.constant dense<0.000000e+00> : vector<1x8x4xf32>
    %115 = tpu.matmul %113, %114, %cst_28 {dimension_numbers = #tpu.dot_dimension_numbers<[2], [1], [1], [2], [0, 0, 0, 1, 1, 2], [0], [0]>} : vector<1x8x8xbf16>, vector<1x8x4xbf16>, vector<1x8x4xf32> -> vector<1x8x4xf32>
    "tpu.trace_stop"() : () -> ()
    %116 = vector.shape_cast %115 : vector<1x8x4xf32> to vector<8x4xf32>
    %c0_29 = arith.constant 0 : index
    %c12 = arith.constant 12 : index
    %117 = vector.load %arg16[%c0_29, %c12] : memref<8x32xf32, #tpu.memory_space<vmem>>, vector<8x4xf32>
    tpu.vector_store %arg16[%c0_29, %c12], %116 {strides = array<i32>} : memref<8x32xf32, #tpu.memory_space<vmem>>, vector<8x4xf32>,
    %118 = vector.extract_strided_slice %10 {offsets = [0, 16], sizes = [8, 4], strides = [1, 1]} : vector<8x32xf32> to vector<8x4xf32>
    %119 = vector.shape_cast %118 : vector<8x4xf32> to vector<1x8x4xf32>
    %120 = vector.extract_strided_slice %11 {offsets = [0, 16], sizes = [8, 4], strides = [1, 1]} : vector<8x32xf32> to vector<8x4xf32>
    %121 = vector.shape_cast %120 : vector<8x4xf32> to vector<1x8x4xf32>
    %122 = vector.extract_strided_slice %12 {offsets = [0, 16], sizes = [8, 4], strides = [1, 1]} : vector<8x32xf32> to vector<8x4xf32>
    %123 = vector.shape_cast %122 : vector<8x4xf32> to vector<1x8x4xf32>
    %124 = arith.truncf %119 : vector<1x8x4xf32> to vector<1x8x4xbf16>
    %125 = arith.truncf %121 : vector<1x8x4xf32> to vector<1x8x4xbf16>
    "tpu.trace_start"() <{level = 10 : i32, message = "bqd,bkd->bqk"}> : () -> ()
    %cst_30 = arith.constant dense<0.000000e+00> : vector<1x8x8xf32>
    %126 = tpu.matmul %124, %125, %cst_30 {dimension_numbers = #tpu.dot_dimension_numbers<[2], [2], [1], [1], [0, 0, 0, 1, 1, 1], [0], [0]>} : vector<1x8x4xbf16>, vector<1x8x4xbf16>, vector<1x8x8xf32> -> vector<1x8x8xf32>
    "tpu.trace_stop"() : () -> ()
    %127 = vector.broadcast %13 : vector<1x1x8xf32> to vector<1x8x8xf32>
    %128 = arith.addf %126, %127 : vector<1x8x8xf32>
    %cst_31 = arith.constant dense<0xFF800000> : vector<1x8xf32>
    %129 = vector.multi_reduction <maximumf>, %128, %cst_31 [2] : vector<1x8x8xf32> to vector<1x8xf32>
    %130 = vector.shape_cast %129 : vector<1x8xf32> to vector<1x8x1xf32>
    %131 = vector.broadcast %130 : vector<1x8x1xf32> to vector<1x8x8xf32>
    %132 = arith.subf %128, %131 : vector<1x8x8xf32>
    %133 = math.exp %132 : vector<1x8x8xf32>
    %cst_32 = arith.constant dense<0.000000e+00> : vector<1x8xf32>
    %134 = vector.multi_reduction <add>, %133, %cst_32 [2] : vector<1x8x8xf32> to vector<1x8xf32>
    %135 = vector.shape_cast %134 : vector<1x8xf32> to vector<1x8x1xf32>
    %136 = tpu.reciprocal %135 {approx = true} : vector<1x8x1xf32> -> vector<1x8x1xf32>
    %137 = vector.broadcast %136 : vector<1x8x1xf32> to vector<1x8x8xf32>
    %138 = arith.mulf %133, %137 : vector<1x8x8xf32>
    %139 = arith.truncf %138 : vector<1x8x8xf32> to vector<1x8x8xbf16>
    %140 = arith.truncf %123 : vector<1x8x4xf32> to vector<1x8x4xbf16>
    "tpu.trace_start"() <{level = 10 : i32, message = "bqk,bkd->bqd"}> : () -> ()
    %cst_33 = arith.constant dense<0.000000e+00> : vector<1x8x4xf32>
    %141 = tpu.matmul %139, %140, %cst_33 {dimension_numbers = #tpu.dot_dimension_numbers<[2], [1], [1], [2], [0, 0, 0, 1, 1, 2], [0], [0]>} : vector<1x8x8xbf16>, vector<1x8x4xbf16>, vector<1x8x4xf32> -> vector<1x8x4xf32>
    "tpu.trace_stop"() : () -> ()
    %142 = vector.shape_cast %141 : vector<1x8x4xf32> to vector<8x4xf32>
    %c0_34 = arith.constant 0 : index
    %c16 = arith.constant 16 : index
    %143 = vector.load %arg16[%c0_34, %c16] : memref<8x32xf32, #tpu.memory_space<vmem>>, vector<8x4xf32>
    tpu.vector_store %arg16[%c0_34, %c16], %142 {strides = array<i32>} : memref<8x32xf32, #tpu.memory_space<vmem>>, vector<8x4xf32>,
    %144 = vector.extract_strided_slice %10 {offsets = [0, 20], sizes = [8, 4], strides = [1, 1]} : vector<8x32xf32> to vector<8x4xf32>
    %145 = vector.shape_cast %144 : vector<8x4xf32> to vector<1x8x4xf32>
    %146 = vector.extract_strided_slice %11 {offsets = [0, 20], sizes = [8, 4], strides = [1, 1]} : vector<8x32xf32> to vector<8x4xf32>
    %147 = vector.shape_cast %146 : vector<8x4xf32> to vector<1x8x4xf32>
    %148 = vector.extract_strided_slice %12 {offsets = [0, 20], sizes = [8, 4], strides = [1, 1]} : vector<8x32xf32> to vector<8x4xf32>
    %149 = vector.shape_cast %148 : vector<8x4xf32> to vector<1x8x4xf32>
    %150 = arith.truncf %145 : vector<1x8x4xf32> to vector<1x8x4xbf16>
    %151 = arith.truncf %147 : vector<1x8x4xf32> to vector<1x8x4xbf16>
    "tpu.trace_start"() <{level = 10 : i32, message = "bqd,bkd->bqk"}> : () -> ()
    %cst_35 = arith.constant dense<0.000000e+00> : vector<1x8x8xf32>
    %152 = tpu.matmul %150, %151, %cst_35 {dimension_numbers = #tpu.dot_dimension_numbers<[2], [2], [1], [1], [0, 0, 0, 1, 1, 1], [0], [0]>} : vector<1x8x4xbf16>, vector<1x8x4xbf16>, vector<1x8x8xf32> -> vector<1x8x8xf32>
    "tpu.trace_stop"() : () -> ()
    %153 = vector.broadcast %13 : vector<1x1x8xf32> to vector<1x8x8xf32>
    %154 = arith.addf %152, %153 : vector<1x8x8xf32>
    %cst_36 = arith.constant dense<0xFF800000> : vector<1x8xf32>
    %155 = vector.multi_reduction <maximumf>, %154, %cst_36 [2] : vector<1x8x8xf32> to vector<1x8xf32>
    %156 = vector.shape_cast %155 : vector<1x8xf32> to vector<1x8x1xf32>
    %157 = vector.broadcast %156 : vector<1x8x1xf32> to vector<1x8x8xf32>
    %158 = arith.subf %154, %157 : vector<1x8x8xf32>
    %159 = math.exp %158 : vector<1x8x8xf32>
    %cst_37 = arith.constant dense<0.000000e+00> : vector<1x8xf32>
    %160 = vector.multi_reduction <add>, %159, %cst_37 [2] : vector<1x8x8xf32> to vector<1x8xf32>
    %161 = vector.shape_cast %160 : vector<1x8xf32> to vector<1x8x1xf32>
    %162 = tpu.reciprocal %161 {approx = true} : vector<1x8x1xf32> -> vector<1x8x1xf32>
    %163 = vector.broadcast %162 : vector<1x8x1xf32> to vector<1x8x8xf32>
    %164 = arith.mulf %159, %163 : vector<1x8x8xf32>
    %165 = arith.truncf %164 : vector<1x8x8xf32> to vector<1x8x8xbf16>
    %166 = arith.truncf %149 : vector<1x8x4xf32> to vector<1x8x4xbf16>
    "tpu.trace_start"() <{level = 10 : i32, message = "bqk,bkd->bqd"}> : () -> ()
    %cst_38 = arith.constant dense<0.000000e+00> : vector<1x8x4xf32>
    %167 = tpu.matmul %165, %166, %cst_38 {dimension_numbers = #tpu.dot_dimension_numbers<[2], [1], [1], [2], [0, 0, 0, 1, 1, 2], [0], [0]>} : vector<1x8x8xbf16>, vector<1x8x4xbf16>, vector<1x8x4xf32> -> vector<1x8x4xf32>
    "tpu.trace_stop"() : () -> ()
    %168 = vector.shape_cast %167 : vector<1x8x4xf32> to vector<8x4xf32>
    %c0_39 = arith.constant 0 : index
    %c20 = arith.constant 20 : index
    %169 = vector.load %arg16[%c0_39, %c20] : memref<8x32xf32, #tpu.memory_space<vmem>>, vector<8x4xf32>
    tpu.vector_store %arg16[%c0_39, %c20], %168 {strides = array<i32>} : memref<8x32xf32, #tpu.memory_space<vmem>>, vector<8x4xf32>,
    %170 = vector.extract_strided_slice %10 {offsets = [0, 24], sizes = [8, 4], strides = [1, 1]} : vector<8x32xf32> to vector<8x4xf32>
    %171 = vector.shape_cast %170 : vector<8x4xf32> to vector<1x8x4xf32>
    %172 = vector.extract_strided_slice %11 {offsets = [0, 24], sizes = [8, 4], strides = [1, 1]} : vector<8x32xf32> to vector<8x4xf32>
    %173 = vector.shape_cast %172 : vector<8x4xf32> to vector<1x8x4xf32>
    %174 = vector.extract_strided_slice %12 {offsets = [0, 24], sizes = [8, 4], strides = [1, 1]} : vector<8x32xf32> to vector<8x4xf32>
    %175 = vector.shape_cast %174 : vector<8x4xf32> to vector<1x8x4xf32>
    %176 = arith.truncf %171 : vector<1x8x4xf32> to vector<1x8x4xbf16>
    %177 = arith.truncf %173 : vector<1x8x4xf32> to vector<1x8x4xbf16>
    "tpu.trace_start"() <{level = 10 : i32, message = "bqd,bkd->bqk"}> : () -> ()
    %cst_40 = arith.constant dense<0.000000e+00> : vector<1x8x8xf32>
    %178 = tpu.matmul %176, %177, %cst_40 {dimension_numbers = #tpu.dot_dimension_numbers<[2], [2], [1], [1], [0, 0, 0, 1, 1, 1], [0], [0]>} : vector<1x8x4xbf16>, vector<1x8x4xbf16>, vector<1x8x8xf32> -> vector<1x8x8xf32>
    "tpu.trace_stop"() : () -> ()
    %179 = vector.broadcast %13 : vector<1x1x8xf32> to vector<1x8x8xf32>
    %180 = arith.addf %178, %179 : vector<1x8x8xf32>
    %cst_41 = arith.constant dense<0xFF800000> : vector<1x8xf32>
    %181 = vector.multi_reduction <maximumf>, %180, %cst_41 [2] : vector<1x8x8xf32> to vector<1x8xf32>
    %182 = vector.shape_cast %181 : vector<1x8xf32> to vector<1x8x1xf32>
    %183 = vector.broadcast %182 : vector<1x8x1xf32> to vector<1x8x8xf32>
    %184 = arith.subf %180, %183 : vector<1x8x8xf32>
    %185 = math.exp %184 : vector<1x8x8xf32>
    %cst_42 = arith.constant dense<0.000000e+00> : vector<1x8xf32>
    %186 = vector.multi_reduction <add>, %185, %cst_42 [2] : vector<1x8x8xf32> to vector<1x8xf32>
    %187 = vector.shape_cast %186 : vector<1x8xf32> to vector<1x8x1xf32>
    %188 = tpu.reciprocal %187 {approx = true} : vector<1x8x1xf32> -> vector<1x8x1xf32>
    %189 = vector.broadcast %188 : vector<1x8x1xf32> to vector<1x8x8xf32>
    %190 = arith.mulf %185, %189 : vector<1x8x8xf32>
    %191 = arith.truncf %190 : vector<1x8x8xf32> to vector<1x8x8xbf16>
    %192 = arith.truncf %175 : vector<1x8x4xf32> to vector<1x8x4xbf16>
    "tpu.trace_start"() <{level = 10 : i32, message = "bqk,bkd->bqd"}> : () -> ()
    %cst_43 = arith.constant dense<0.000000e+00> : vector<1x8x4xf32>
    %193 = tpu.matmul %191, %192, %cst_43 {dimension_numbers = #tpu.dot_dimension_numbers<[2], [1], [1], [2], [0, 0, 0, 1, 1, 2], [0], [0]>} : vector<1x8x8xbf16>, vector<1x8x4xbf16>, vector<1x8x4xf32> -> vector<1x8x4xf32>
    "tpu.trace_stop"() : () -> ()
    %194 = vector.shape_cast %193 : vector<1x8x4xf32> to vector<8x4xf32>
    %c0_44 = arith.constant 0 : index
    %c24 = arith.constant 24 : index
    %195 = vector.load %arg16[%c0_44, %c24] : memref<8x32xf32, #tpu.memory_space<vmem>>, vector<8x4xf32>
    tpu.vector_store %arg16[%c0_44, %c24], %194 {strides = array<i32>} : memref<8x32xf32, #tpu.memory_space<vmem>>, vector<8x4xf32>,
    %196 = vector.extract_strided_slice %10 {offsets = [0, 28], sizes = [8, 4], strides = [1, 1]} : vector<8x32xf32> to vector<8x4xf32>
    %197 = vector.shape_cast %196 : vector<8x4xf32> to vector<1x8x4xf32>
    %198 = vector.extract_strided_slice %11 {offsets = [0, 28], sizes = [8, 4], strides = [1, 1]} : vector<8x32xf32> to vector<8x4xf32>
    %199 = vector.shape_cast %198 : vector<8x4xf32> to vector<1x8x4xf32>
    %200 = vector.extract_strided_slice %12 {offsets = [0, 28], sizes = [8, 4], strides = [1, 1]} : vector<8x32xf32> to vector<8x4xf32>
    %201 = vector.shape_cast %200 : vector<8x4xf32> to vector<1x8x4xf32>
    %202 = arith.truncf %197 : vector<1x8x4xf32> to vector<1x8x4xbf16>
    %203 = arith.truncf %199 : vector<1x8x4xf32> to vector<1x8x4xbf16>
    "tpu.trace_start"() <{level = 10 : i32, message = "bqd,bkd->bqk"}> : () -> ()
    %cst_45 = arith.constant dense<0.000000e+00> : vector<1x8x8xf32>
    %204 = tpu.matmul %202, %203, %cst_45 {dimension_numbers = #tpu.dot_dimension_numbers<[2], [2], [1], [1], [0, 0, 0, 1, 1, 1], [0], [0]>} : vector<1x8x4xbf16>, vector<1x8x4xbf16>, vector<1x8x8xf32> -> vector<1x8x8xf32>
    "tpu.trace_stop"() : () -> ()
    %205 = vector.broadcast %13 : vector<1x1x8xf32> to vector<1x8x8xf32>
    %206 = arith.addf %204, %205 : vector<1x8x8xf32>
    %cst_46 = arith.constant dense<0xFF800000> : vector<1x8xf32>
    %207 = vector.multi_reduction <maximumf>, %206, %cst_46 [2] : vector<1x8x8xf32> to vector<1x8xf32>
    %208 = vector.shape_cast %207 : vector<1x8xf32> to vector<1x8x1xf32>
    %209 = vector.broadcast %208 : vector<1x8x1xf32> to vector<1x8x8xf32>
    %210 = arith.subf %206, %209 : vector<1x8x8xf32>
    %211 = math.exp %210 : vector<1x8x8xf32>
    %cst_47 = arith.constant dense<0.000000e+00> : vector<1x8xf32>
    %212 = vector.multi_reduction <add>, %211, %cst_47 [2] : vector<1x8x8xf32> to vector<1x8xf32>
    %213 = vector.shape_cast %212 : vector<1x8xf32> to vector<1x8x1xf32>
    %214 = tpu.reciprocal %213 {approx = true} : vector<1x8x1xf32> -> vector<1x8x1xf32>
    %215 = vector.broadcast %214 : vector<1x8x1xf32> to vector<1x8x8xf32>
    %216 = arith.mulf %211, %215 : vector<1x8x8xf32>
    %217 = arith.truncf %216 : vector<1x8x8xf32> to vector<1x8x8xbf16>
    %218 = arith.truncf %201 : vector<1x8x4xf32> to vector<1x8x4xbf16>
    "tpu.trace_start"() <{level = 10 : i32, message = "bqk,bkd->bqd"}> : () -> ()
    %cst_48 = arith.constant dense<0.000000e+00> : vector<1x8x4xf32>
    %219 = tpu.matmul %217, %218, %cst_48 {dimension_numbers = #tpu.dot_dimension_numbers<[2], [1], [1], [2], [0, 0, 0, 1, 1, 2], [0], [0]>} : vector<1x8x8xbf16>, vector<1x8x4xbf16>, vector<1x8x4xf32> -> vector<1x8x4xf32>
    "tpu.trace_stop"() : () -> ()
    %220 = vector.shape_cast %219 : vector<1x8x4xf32> to vector<8x4xf32>
    %c0_49 = arith.constant 0 : index
    %c28 = arith.constant 28 : index
    %221 = vector.load %arg16[%c0_49, %c28] : memref<8x32xf32, #tpu.memory_space<vmem>>, vector<8x4xf32>
    tpu.vector_store %arg16[%c0_49, %c28], %220 {strides = array<i32>} : memref<8x32xf32, #tpu.memory_space<vmem>>, vector<8x4xf32>,
    %c0_50 = arith.constant 0 : index
    %c0_51 = arith.constant 0 : index
    %222 = vector.load %arg16[%c0_50, %c0_51] : memref<8x32xf32, #tpu.memory_space<vmem>>, vector<8x32xf32>
    %223 = arith.truncf %222 : vector<8x32xf32> to vector<8x32xbf16>
    %c0_52 = arith.constant 0 : index
    %c0_53 = arith.constant 0 : index
    %224 = vector.load %arg5[%c0_52, %c0_53] : memref<32x32xbf16, #tpu.memory_space<vmem>>, vector<32x32xbf16>
    %cst_54 = arith.constant dense<0.000000e+00> : vector<8x32xf32>
    %225 = tpu.matmul %223, %224, %cst_54 {dimension_numbers = #tpu.dot_dimension_numbers<[1], [0], [0], [1], [0, 0, 1, 1], [], []>} : vector<8x32xbf16>, vector<32x32xbf16>, vector<8x32xf32> -> vector<8x32xf32>
    %c0_55 = arith.constant 0 : index
    %c0_56 = arith.constant 0 : index
    %226 = vector.load %arg6[%c0_55, %c0_56] : memref<1x32xf32, #tpu.memory_space<vmem>>, vector<1x32xf32>
    %227 = vector.broadcast %226 : vector<1x32xf32> to vector<8x32xf32>
    %228 = arith.addf %225, %227 : vector<8x32xf32>
    %229 = arith.addf %1, %228 : vector<8x32xf32>
    %c0_57 = arith.constant 0 : index
    %c0_58 = arith.constant 0 : index
    %230 = vector.load %arg7[%c0_57, %c0_58] : memref<1x32xf32, #tpu.memory_space<vmem>>, vector<1x32xf32>
    %c0_59 = arith.constant 0 : index
    %c0_60 = arith.constant 0 : index
    %231 = vector.load %arg8[%c0_59, %c0_60] : memref<1x32xf32, #tpu.memory_space<vmem>>, vector<1x32xf32>
    %cst_61 = arith.constant dense<0.000000e+00> : vector<8xf32>
    %232 = vector.multi_reduction <add>, %229, %cst_61 [1] : vector<8x32xf32> to vector<8xf32>
    %233 = vector.shape_cast %232 : vector<8xf32> to vector<8x1xf32>
    %cst_62 = arith.constant 3.200000e+01 : f32
    %234 = vector.broadcast %cst_62 : f32 to vector<8x1xf32>
    %235 = arith.divf %233, %234 : vector<8x1xf32>
    %236 = vector.broadcast %235 : vector<8x1xf32> to vector<8x32xf32>
    %237 = arith.subf %229, %236 : vector<8x32xf32>
    %238 = vector.broadcast %235 : vector<8x1xf32> to vector<8x32xf32>
    %239 = arith.subf %229, %238 : vector<8x32xf32>
    %240 = arith.mulf %237, %239 : vector<8x32xf32>
    %cst_63 = arith.constant dense<0.000000e+00> : vector<8xf32>
    %241 = vector.multi_reduction <add>, %240, %cst_63 [1] : vector<8x32xf32> to vector<8xf32>
    %242 = vector.shape_cast %241 : vector<8xf32> to vector<8x1xf32>
    %cst_64 = arith.constant 3.200000e+01 : f32
    %243 = vector.broadcast %cst_64 : f32 to vector<8x1xf32>
    %244 = arith.divf %242, %243 : vector<8x1xf32>
    %245 = vector.broadcast %235 : vector<8x1xf32> to vector<8x32xf32>
    %246 = arith.subf %229, %245 : vector<8x32xf32>
    %cst_65 = arith.constant 9.99999974E-6 : f32
    %247 = vector.broadcast %cst_65 : f32 to vector<8x1xf32>
    %248 = arith.addf %244, %247 : vector<8x1xf32>
    %249 = math.rsqrt %248 : vector<8x1xf32>
    %250 = vector.broadcast %249 : vector<8x1xf32> to vector<8x32xf32>
    %251 = arith.mulf %246, %250 : vector<8x32xf32>
    %252 = vector.broadcast %230 : vector<1x32xf32> to vector<8x32xf32>
    %253 = arith.mulf %251, %252 : vector<8x32xf32>
    %254 = vector.broadcast %231 : vector<1x32xf32> to vector<8x32xf32>
    %255 = arith.addf %253, %254 : vector<8x32xf32>
    %256 = arith.truncf %255 : vector<8x32xf32> to vector<8x32xbf16>
    %c0_66 = arith.constant 0 : index
    %c0_67 = arith.constant 0 : index
    %257 = vector.load %arg9[%c0_66, %c0_67] : memref<32x128xbf16, #tpu.memory_space<vmem>>, vector<32x128xbf16>
    %cst_68 = arith.constant dense<0.000000e+00> : vector<8x128xf32>
    %258 = tpu.matmul %256, %257, %cst_68 {dimension_numbers = #tpu.dot_dimension_numbers<[1], [0], [0], [1], [0, 0, 1, 1], [], []>} : vector<8x32xbf16>, vector<32x128xbf16>, vector<8x128xf32> -> vector<8x128xf32>
    %c0_69 = arith.constant 0 : index
    %c0_70 = arith.constant 0 : index
    %259 = vector.load %arg10[%c0_69, %c0_70] : memref<1x128xf32, #tpu.memory_space<vmem>>, vector<1x128xf32>
    %260 = vector.broadcast %259 : vector<1x128xf32> to vector<8x128xf32>
    %261 = arith.addf %258, %260 : vector<8x128xf32>
    %cst_71 = arith.constant 0.707106769 : f32
    %262 = vector.broadcast %cst_71 : f32 to vector<8x128xf32>
    %263 = arith.mulf %261, %262 : vector<8x128xf32>
    %cst_72 = arith.constant 0.000000e+00 : f32
    %264 = vector.broadcast %cst_72 : f32 to vector<8x128xf32>
    %265 = arith.cmpf oge, %263, %264 : vector<8x128xf32>
    %cst_73 = arith.constant 1.000000e+00 : f32
    %cst_74 = arith.constant -1.000000e+00 : f32
    %266 = vector.broadcast %cst_73 : f32 to vector<8x128xf32>
    %267 = vector.broadcast %cst_74 : f32 to vector<8x128xf32>
    %268 = arith.select %265, %266, %267 : vector<8x128xi1>, vector<8x128xf32>
    %269 = math.absf %263 : vector<8x128xf32>
    %cst_75 = arith.constant 0.327591091 : f32
    %270 = vector.broadcast %cst_75 : f32 to vector<8x128xf32>
    %271 = arith.mulf %270, %269 : vector<8x128xf32>
    %cst_76 = arith.constant 1.000000e+00 : f32
    %272 = vector.broadcast %cst_76 : f32 to vector<8x128xf32>
    %273 = arith.addf %272, %271 : vector<8x128xf32>
    %cst_77 = arith.constant 1.000000e+00 : f32
    %274 = vector.broadcast %cst_77 : f32 to vector<8x128xf32>
    %275 = arith.divf %274, %273 : vector<8x128xf32>
    %cst_78 = arith.constant 1.06140542 : f32
    %276 = vector.broadcast %cst_78 : f32 to vector<8x128xf32>
    %277 = arith.mulf %276, %275 : vector<8x128xf32>
    %cst_79 = arith.constant -1.45315206 : f32
    %278 = vector.broadcast %cst_79 : f32 to vector<8x128xf32>
    %279 = arith.addf %277, %278 : vector<8x128xf32>
    %280 = arith.mulf %279, %275 : vector<8x128xf32>
    %cst_80 = arith.constant 1.42141378 : f32
    %281 = vector.broadcast %cst_80 : f32 to vector<8x128xf32>
    %282 = arith.addf %280, %281 : vector<8x128xf32>
    %283 = arith.mulf %282, %275 : vector<8x128xf32>
    %cst_81 = arith.constant -0.284496725 : f32
    %284 = vector.broadcast %cst_81 : f32 to vector<8x128xf32>
    %285 = arith.addf %283, %284 : vector<8x128xf32>
    %286 = arith.mulf %285, %275 : vector<8x128xf32>
    %cst_82 = arith.constant 0.254829586 : f32
    %287 = vector.broadcast %cst_82 : f32 to vector<8x128xf32>
    %288 = arith.addf %286, %287 : vector<8x128xf32>
    %289 = arith.mulf %288, %275 : vector<8x128xf32>
    %cst_83 = arith.constant 0.000000e+00 : f32
    %290 = vector.broadcast %cst_83 : f32 to vector<8x128xf32>
    %291 = arith.subf %290, %269 : vector<8x128xf32>
    %292 = arith.mulf %291, %269 : vector<8x128xf32>
    %293 = math.exp %292 : vector<8x128xf32>
    %294 = arith.mulf %289, %293 : vector<8x128xf32>
    %cst_84 = arith.constant 1.000000e+00 : f32
    %295 = vector.broadcast %cst_84 : f32 to vector<8x128xf32>
    %296 = arith.subf %295, %294 : vector<8x128xf32>
    %297 = arith.mulf %268, %296 : vector<8x128xf32>
    %cst_85 = arith.constant 5.000000e-01 : f32
    %298 = vector.broadcast %cst_85 : f32 to vector<8x128xf32>
    %299 = arith.mulf %298, %261 : vector<8x128xf32>
    %cst_86 = arith.constant 1.000000e+00 : f32
    %300 = vector.broadcast %cst_86 : f32 to vector<8x128xf32>
    %301 = arith.addf %300, %297 : vector<8x128xf32>
    %302 = arith.mulf %299, %301 : vector<8x128xf32>
    %303 = arith.truncf %302 : vector<8x128xf32> to vector<8x128xbf16>
    %c0_87 = arith.constant 0 : index
    %c0_88 = arith.constant 0 : index
    %304 = vector.load %arg11[%c0_87, %c0_88] : memref<128x32xbf16, #tpu.memory_space<vmem>>, vector<128x32xbf16>
    %cst_89 = arith.constant dense<0.000000e+00> : vector<8x32xf32>
    %305 = tpu.matmul %303, %304, %cst_89 {dimension_numbers = #tpu.dot_dimension_numbers<[1], [0], [0], [1], [0, 0, 1, 1], [], []>} : vector<8x128xbf16>, vector<128x32xbf16>, vector<8x32xf32> -> vector<8x32xf32>
    %c0_90 = arith.constant 0 : index
    %c0_91 = arith.constant 0 : index
    %306 = vector.load %arg12[%c0_90, %c0_91] : memref<1x32xf32, #tpu.memory_space<vmem>>, vector<1x32xf32>
    %307 = vector.broadcast %306 : vector<1x32xf32> to vector<8x32xf32>
    %308 = arith.addf %305, %307 : vector<8x32xf32>
    %309 = arith.addf %255, %308 : vector<8x32xf32>
    %c0_92 = arith.constant 0 : index
    %c0_93 = arith.constant 0 : index
    %310 = vector.load %arg13[%c0_92, %c0_93] : memref<1x32xf32, #tpu.memory_space<vmem>>, vector<1x32xf32>
    %c0_94 = arith.constant 0 : index
    %c0_95 = arith.constant 0 : index
    %311 = vector.load %arg14[%c0_94, %c0_95] : memref<1x32xf32, #tpu.memory_space<vmem>>, vector<1x32xf32>
    %cst_96 = arith.constant dense<0.000000e+00> : vector<8xf32>
    %312 = vector.multi_reduction <add>, %309, %cst_96 [1] : vector<8x32xf32> to vector<8xf32>
    %313 = vector.shape_cast %312 : vector<8xf32> to vector<8x1xf32>
    %cst_97 = arith.constant 3.200000e+01 : f32
    %314 = vector.broadcast %cst_97 : f32 to vector<8x1xf32>
    %315 = arith.divf %313, %314 : vector<8x1xf32>
    %316 = vector.broadcast %315 : vector<8x1xf32> to vector<8x32xf32>
    %317 = arith.subf %309, %316 : vector<8x32xf32>
    %318 = vector.broadcast %315 : vector<8x1xf32> to vector<8x32xf32>
    %319 = arith.subf %309, %318 : vector<8x32xf32>
    %320 = arith.mulf %317, %319 : vector<8x32xf32>
    %cst_98 = arith.constant dense<0.000000e+00> : vector<8xf32>
    %321 = vector.multi_reduction <add>, %320, %cst_98 [1] : vector<8x32xf32> to vector<8xf32>
    %322 = vector.shape_cast %321 : vector<8xf32> to vector<8x1xf32>
    %cst_99 = arith.constant 3.200000e+01 : f32
    %323 = vector.broadcast %cst_99 : f32 to vector<8x1xf32>
    %324 = arith.divf %322, %323 : vector<8x1xf32>
    %325 = vector.broadcast %315 : vector<8x1xf32> to vector<8x32xf32>
    %326 = arith.subf %309, %325 : vector<8x32xf32>
    %cst_100 = arith.constant 9.99999974E-6 : f32
    %327 = vector.broadcast %cst_100 : f32 to vector<8x1xf32>
    %328 = arith.addf %324, %327 : vector<8x1xf32>
    %329 = math.rsqrt %328 : vector<8x1xf32>
    %330 = vector.broadcast %329 : vector<8x1xf32> to vector<8x32xf32>
    %331 = arith.mulf %326, %330 : vector<8x32xf32>
    %332 = vector.broadcast %310 : vector<1x32xf32> to vector<8x32xf32>
    %333 = arith.mulf %331, %332 : vector<8x32xf32>
    %334 = vector.broadcast %311 : vector<1x32xf32> to vector<8x32xf32>
    %335 = arith.addf %333, %334 : vector<8x32xf32>
    %336 = vector.shape_cast %335 : vector<8x32xf32> to vector<1x8x32xf32>
    %c0_101 = arith.constant 0 : index
    %c0_102 = arith.constant 0 : index
    %c0_103 = arith.constant 0 : index
    %337 = vector.load %arg15[%c0_101, %c0_102, %c0_103] : memref<1x8x32xf32, #tpu.memory_space<vmem>>, vector<1x8x32xf32>
    tpu.vector_store %arg15[%c0_101, %c0_102, %c0_103], %336 {strides = array<i32>} : memref<1x8x32xf32, #tpu.memory_space<vmem>>, vector<1x8x32xf32>,
    return
  }
  func.func @transform_0(%arg0: i32) -> (i32, i32, i32) {
    %c0_i32 = arith.constant 0 : i32
    %c0_i32_0 = arith.constant 0 : i32
    %c0_i32_1 = arith.constant 0 : i32
    return %arg0, %c0_i32, %c0_i32_0 : i32, i32, i32
  }
  func.func @transform_1(%arg0: i32) -> (i32, i32, i32) {
    %c0_i32 = arith.constant 0 : i32
    %c0_i32_0 = arith.constant 0 : i32
    %c0_i32_1 = arith.constant 0 : i32
    return %arg0, %c0_i32, %c0_i32_0 : i32, i32, i32
  }
  func.func @transform_2(%arg0: i32) -> (i32, i32) {
    %c0_i32 = arith.constant 0 : i32
    %c0_i32_0 = arith.constant 0 : i32
    %c0_i32_1 = arith.constant 0 : i32
    return %c0_i32, %c0_i32_0 : i32, i32
  }
  func.func @transform_3(%arg0: i32) -> (i32, i32) {
    %c0_i32 = arith.constant 0 : i32
    %c0_i32_0 = arith.constant 0 : i32
    %c0_i32_1 = arith.constant 0 : i32
    return %c0_i32, %c0_i32_0 : i32, i32
  }
  func.func @transform_4(%arg0: i32) -> (i32, i32) {
    %c0_i32 = arith.constant 0 : i32
    %c0_i32_0 = arith.constant 0 : i32
    %c0_i32_1 = arith.constant 0 : i32
    return %c0_i32, %c0_i32_0 : i32, i32
  }
  func.func @transform_5(%arg0: i32) -> (i32, i32) {
    %c0_i32 = arith.constant 0 : i32
    %c0_i32_0 = arith.constant 0 : i32
    %c0_i32_1 = arith.constant 0 : i32
    return %c0_i32, %c0_i32_0 : i32, i32
  }
  func.func @transform_6(%arg0: i32) -> (i32, i32) {
    %c0_i32 = arith.constant 0 : i32
    %c0_i32_0 = arith.constant 0 : i32
    %c0_i32_1 = arith.constant 0 : i32
    return %c0_i32, %c0_i32_0 : i32, i32
  }
  func.func @transform_7(%arg0: i32) -> (i32, i32) {
    %c0_i32 = arith.constant 0 : i32
    %c0_i32_0 = arith.constant 0 : i32
    %c0_i32_1 = arith.constant 0 : i32
    return %c0_i32, %c0_i32_0 : i32, i32
  }
  func.func @transform_8(%arg0: i32) -> (i32, i32) {
    %c0_i32 = arith.constant 0 : i32
    %c0_i32_0 = arith.constant 0 : i32
    %c0_i32_1 = arith.constant 0 : i32
    return %c0_i32, %c0_i32_0 : i32, i32
  }
  func.func @transform_9(%arg0: i32) -> (i32, i32) {
    %c0_i32 = arith.constant 0 : i32
    %c0_i32_0 = arith.constant 0 : i32
    %c0_i32_1 = arith.constant 0 : i32
    return %c0_i32, %c0_i32_0 : i32, i32
  }
  func.func @transform_10(%arg0: i32) -> (i32, i32) {
    %c0_i32 = arith.constant 0 : i32
    %c0_i32_0 = arith.constant 0 : i32
    %c0_i32_1 = arith.constant 0 : i32
    return %c0_i32, %c0_i32_0 : i32, i32
  }
  func.func @transform_11(%arg0: i32) -> (i32, i32) {
    %c0_i32 = arith.constant 0 : i32
    %c0_i32_0 = arith.constant 0 : i32
    %c0_i32_1 = arith.constant 0 : i32
    return %c0_i32, %c0_i32_0 : i32, i32
  }
  func.func @transform_12(%arg0: i32) -> (i32, i32) {
    %c0_i32 = arith.constant 0 : i32
    %c0_i32_0 = arith.constant 0 : i32
    %c0_i32_1 = arith.constant 0 : i32
    return %c0_i32, %c0_i32_0 : i32, i32
  }
  func.func @transform_13(%arg0: i32) -> (i32, i32) {
    %c0_i32 = arith.constant 0 : i32
    %c0_i32_0 = arith.constant 0 : i32
    %c0_i32_1 = arith.constant 0 : i32
    return %c0_i32, %c0_i32_0 : i32, i32
  }
  func.func @transform_14(%arg0: i32) -> (i32, i32, i32) {
    %c0_i32 = arith.constant 0 : i32
    %c0_i32_0 = arith.constant 0 : i32
    %c0_i32_1 = arith.constant 0 : i32
    return %arg0, %c0_i32, %c0_i32_0 : i32, i32, i32
  }
}

</mosaic_0001>

<bundles_post_ra>
// kernel: tpu_custom_call.1
= control target key start
LH: loop header
LB: loop body
LE: loop exit
PB: predicated region body
PF: predicated region fallthrough
CT: control target
= control target key end

     0   :  { %s4137_s0 = inlined_call_operand.vmem [shape: f32[2,8,32], index: 0, kind: input, shape index: {}]   ;;  %s4138_s1 = inlined_call_operand.vmem [shape: f32[2,1,8], index: 1, kind: input, shape index: {}]   ;;  %s4139_s2 = inlined_call_operand.vmem [shape: bf16[32,96], index: 2, kind: input, shape index: {}]   ;;  %s4140_s3 = inlined_call_operand.vmem [shape: f32[1,96], index: 3, kind: input, shape index: {}]   ;;  %s4141_s4 = inlined_call_operand.vmem [shape: bf16[32,32], index: 4, kind: input, shape index: {}]   ;;  %s4142_s5 = inlined_call_operand.vmem [shape: f32[1,32], index: 5, kind: input, shape index: {}]   ;;  %s4143_s6 = inlined_call_operand.vmem [shape: f32[1,32], index: 6, kind: input, shape index: {}]   ;;  %s4144_s7 = inlined_call_operand.vmem [shape: f32[1,32], index: 7, kind: input, shape index: {}]   ;;  %s4145_s8 = inlined_call_operand.vmem [shape: bf16[32,128], index: 8, kind: input, shape index: {}]   ;;  %s4146_s9 = inlined_call_operand.vmem [shape: f32[1,128], index: 9, kind: input, shape index: {}]   ;;  %s4147_s10 = inlined_call_operand.vmem [shape: bf16[128,32], index: 10, kind: input, shape index: {}]   ;;  %s4148_s11 = inlined_call_operand.vmem [shape: f32[1,32], index: 11, kind: input, shape index: {}]   ;;  %s4149_s12 = inlined_call_operand.vmem [shape: f32[1,32], index: 12, kind: input, shape index: {}]   ;;  %s4150_s13 = inlined_call_operand.vmem [shape: f32[1,32], index: 13, kind: input, shape index: {}]   ;;  %s4151_s14 = inlined_call_operand.hbm [shape: f32[2,8,32], index: 14, kind: output, shape index: {}]  }
   0x1   :  { %4152 = sst [smem:[#allocation5_spill]] %s4137_s0 }
   0x2   :  { %4153 = sst [smem:[#allocation6_spill]] %s4138_s1 }
   0x3   :  { %4154 = sst [smem:[#allocation7_spill]] %s4139_s2 }
   0x4   :  { %4155 = sst [smem:[#allocation8_spill]] %s4140_s3 }
   0x5   :  { %4156 = sst [smem:[#allocation9_spill]] %s4141_s4 }
   0x6   :  { %19 = vsyncpa [#allocation3], 0 }
   0x7   :  { %21 = vsyncpa [#allocation3 + $0x1], 0  ;;  %s3552_s29 = smov 0   ;;  %s3554_s30 = smov 0  }
   0x8   :  { %s3556_s15 = smov 0   ;;  %s3558_s16 = smov 0  }
   0x9 LB: > { %s3573_s17 = sadd.s32 4294967295, %s3454_s16   ;;  %s3006_s18 = sadd.s32 4294967294, %s3454_s16   ;;  %s3454_s16 = sphi %s3558_s16, %s4167_s16   ;;  %s3450_s15 = sphi %s3556_s15, %s4166_s15   ;;  %s3446_s30 = sphi %s3554_s30, %s4165_s30   ;;  %s3442_s29 = sphi %s3552_s29, %s4164_s29  }
   0xa   : > { %s3577_s19 = sadd.s32 1, %s3454_s16   ;;  %s338_s20 = sadd.s32 1, %s3450_s15 }
   0xb   : > { %s335_s21 = ssub.s32 %s3454_s16, %s3577_s19  ;;  %p348_p0 = scmp.ne.s32.totalorder %s3450_s15, %s3446_s30 }
   0xc   : > { %p336_p1 = scmp.eq.s32.totalorder %s335_s21, 0  ;;  %p349_p2 = scmp.eq.s32.totalorder %s3573_s17, 1 }
   0xd   : > { %p354_p3 = scmp.ne.s32.totalorder %s3446_s30, %s3442_s29  ;;  %p355_p4 = scmp.eq.s32.totalorder %s3006_s18, 1 }
   0xe   : > { %s3588_s22 = scalar_select %p336_p1, %s3450_s15, %s338_s20  }
   0xf   : > { %p3590_p5 = por %p349_p2, %p348_p0  ;;  %p3594_p6 = por %p355_p4, %p354_p3 }
  0x10   : > { %p3009_p7 = scmp.ge.s32.totalorder %s3454_s16, 1  ;;  %p422_p8 = scmp.lt.s32.totalorder %s3454_s16, 3 }
  0x12   : > { %p423_p9 = pnand %p3009_p7, %p422_p8 }
  0x13   : > { %s4159_s2 = sld [smem:[#allocation7_spill]] (!%p423_p9)  ;;  %v3456_v1 = vmov (!%p423_p9), 0.0   ;;  %vm3457_vm0 = vmmov (!%p423_p9), 0   ;;  %p470_p10 = scmp.lt.s32.totalorder (!%p423_p9), %s3573_s17, 1  ;;  %vm504_vm1 = vcmask (!%p423_p9), 261120   ;;  %v575_v13 = vlaneseq (!%p423_p9) }
  0x14   : > { %426 = sbr.rel (%p423_p9) target bundleno = 2780 (0xadc), region = 76  ;;  %3140 = vmatprep.subr.bf16.mxu0 (!%p423_p9), %v3456_v1  ;;  %3160 = vmatprep.subr.bf16.mxu1 (!%p423_p9), %v3456_v1  ;;  %s4160_s0 = sld [smem:[#allocation5_spill]] (!%p423_p9)  ;;  %v3466_v11 = vmov (!%p423_p9), 1983009808   ;;  %v3467_v14 = vmov (!%p423_p9), 1934713408  }
  0x15   : > { %3144 = vmatprep.mubr.msk.bf16.mxu0 (!%p423_p9), %vm3457_vm0, %v3456_v1  ;;  %3162 = vmatprep.mubr.msk.bf16.mxu1 (!%p423_p9), %vm3457_vm0, %v3456_v1  ;;  %s4161_s3 = sld [smem:[#allocation8_spill]] (!%p423_p9)  ;;  %s3459_s21 = smov (!%p423_p9), 124   ;;  %v573_v12 = vunpack.c.l.s4 (!%p423_p9), %v3466_v11  ;;  %v637_v15 = vunpack.c.l.s4 (!%p423_p9), %v3467_v14  ;;  %v576_v17 = vshrl.u32 (!%p423_p9), %v575_v13, 7  ;;  %vm1456_vm2 = vcmask (!%p423_p9), 31744  }
  0x16   : > { %s3460_s25 = smov (!%p423_p9), 112   ;;  %s3462_s27 = smov (!%p423_p9), 104   ;;  %vm1933_vm3 = vcmask (!%p423_p9), 1043456   ;;  %vm1825_vm4 = vcmask (!%p423_p9), 64512   ;;  %vm2601_vm5 = vcmask (!%p423_p9), 97280   ;;  %vm2603_vm6 = vcmask (!%p423_p9), 130048  }
  0x17   : > { %s3463_s28 = smov (!%p423_p9), 108   ;;  %v574_v16 = vunpack.c.0.s8 (!%p423_p9), %v573_v12  ;;  %v638_v22 = vunpack.c.0.s8 (!%p423_p9), %v637_v15  ;;  %s4162_s1 = sld [smem:[#allocation6_spill]] (!%p423_p9)  ;;  %vm2605_vm7 = vcmask (!%p423_p9), 162816   ;;  %vm2607_vm8 = vcmask (!%p423_p9), 195584  }
  0x18   : > { %s4163_s4 = sld [smem:[#allocation9_spill]] (!%p423_p9)  ;;  %vm2609_vm9 = vcmask (!%p423_p9), 228352  }
  0x19   : > { %v3339_v0 = vld [vmem:[%s4159_s2] sm:$0xff] (!%p423_p9)   ;;  %v3340_v2 = vld [vmem:[%s4159_s2 + $0x8] sm:$0xff] (!%p423_p9)   ;;  %s3464_s2 = smov (!%p423_p9), 96   ;;  %v3643_v23 = vsub.s32 (!%p423_p9), %v574_v16, %v576_v17  ;;  %v3651_v28 = vsub.s32 (!%p423_p9), %v638_v22, %v576_v17 }
  0x1a   : > { %3141 = vmatpush3.bf16.msra.mxu0 (!%p423_p9), %v3339_v0 }
  0x1b   : > { %3142 = vmatprep.subr.bf16.mxu0 %v3456_v1  ;;  %s3615_s18 = scalar_select %p470_p10, %s3573_s17, 1  ;;  %v3012_v5 = vld [vmem:[%s4161_s3] ss:$0 sm:$0xff] }
  0x1d   : > { %s3011_s20 = sshll.u32 %s3615_s18, 3 }
  0x1e   : > { %3143 = vmatpush3.bf16.msra.mxu0 %v3340_v2  ;;  %s3621_s26 = scalar_lea.vmem %s4160_s0, %s3011_s20  ;;  %s3458_s20 = smov 116  }
  0x1f   : > { %3148 = vmatprep.subr.bf16.mxu0 %v3456_v1  ;;  %v478_v3 = vld [vmem:[%s3621_s26] sm:$0xff]  ;;  %s3461_s0 = smov 120  }
  0x20   : > { %v480_v4 = vpack.c.bf16 %v478_v3, %v478_v3 }
  0x22   : > { %3145 = vmatmul.mubr.msk.bf16.vlgmr.msra.gmra.mrb[0].mxu0 %vm504_vm1, %v480_v4 }
  0x23   : > { %3150 = vmatprep.mubr.msk.bf16.mxu0 %vm3457_vm0, %v3456_v1 }
  0xf5   : > { %v542_v6 = vpop.f32.mrb[0].mxu0 }
  0xf6   : > { %v3631_v7 = vadd.f32 %v3012_v5, %v542_v6  ;;  %v3146_v8 = vpop.f32.mrb[1].mxu0 }
  0xf7   : > { %v545_v9 = vpop.f32.mrb[2].mxu0 }
  0xf8   : > { %555 = vrot.lane.b32.xlu1 %v3631_v7, %s3458_s20  ;;  %549 = vrot.lane.b32.xlu0 %v3631_v7, %s3459_s21  ;;  %v3147_v10 = vpop.f32.mrb[3].mxu0  ;;  %s3465_s20 = smov 100   ;;  %s467_s21 = sand.u32 1, %s3446_s30  }
  0xfc   : > { %558 = vrot.lane.b32.xlu1 %v3631_v7, %s3460_s25  ;;  %552 = vrot.lane.b32.xlu0 %v3631_v7, %s3461_s0  ;;  %s3468_s0 = smov 64   ;;  %s476_s25 = scalar_lea.vmem %s4162_s1, %s3615_s18 }
  0xfd   : > { %s3469_s18 = smov 8  }
 0x100   : > { %564 = vrot.lane.b32.xlu1 %v3631_v7, %s3462_s27  ;;  %561 = vrot.lane.b32.xlu0 %v3631_v7, %s3463_s28  ;;  %s3470_s27 = smov 4   ;;  %s3471_s28 = smov 12  }
 0x104   : > { %842 = vrot.lane.b32.xlu1 %v3631_v7, %s3464_s2  ;;  %567 = vrot.lane.b32.xlu0 %v3631_v7, %s3465_s20  ;;  %s3087_s20 = sshll.u32 %s3573_s17, 7  ;;  %s3476_s17 = smov [#allocation2]  }
 0x16a   : > { %v556_v18 = vpop.permute.xlu1 %555  ;;  %v550_v19 = vpop.permute.xlu0 %549 }
 0x16b   : > { %v586_v20 = vcombine.low %v550_v19, %v556_v18  ;;  %v587_v21 = vcombine.high %v550_v19, %v556_v18  ;;  %844 = vrot.lane.b32.xlu0 %v550_v19, %s3464_s2 }
 0x16d   : > { %v594_v29 = vrot.slane %v586_v20, %v3643_v23  ;;  %v601_v30 = vrot.slane %v587_v21, %v3643_v23 }
 0x16e   : > { %v553_v24 = vpop.permute.xlu0 %552  ;;  %v3649_v27 = vpop.permute.xlu1 %558 }
 0x16f   : > { %v570_v25 = vcombine.low %v3631_v7, %v553_v24  ;;  %v571_v26 = vcombine.high %v3631_v7, %v553_v24  ;;  %848 = vrot.lane.b32.xlu0 %v556_v18, %s3464_s2  ;;  %846 = vrot.lane.b32.xlu1 %v553_v24, %s3464_s2 }
 0x171   : > { %v578_v31 = vrot.slane %v570_v25, %v3643_v23  ;;  %v585_v32 = vrot.slane %v571_v26, %v3643_v23 }
 0x172   : > { %v3657_v33 = vpop.permute.xlu0 %561  ;;  %v3667_v42 = vpop.permute.xlu1 %564 }
 0x173   : > { %v634_v34 = vcombine.low %v578_v31, %v594_v29  ;;  %v635_v35 = vcombine.high %v578_v31, %v594_v29  ;;  %v650_v36 = vcombine.low %v585_v32, %v601_v30  ;;  %v651_v37 = vcombine.high %v585_v32, %v601_v30  ;;  %850 = vrot.lane.b32.xlu1 %v3649_v27, %s3464_s2 }
 0x174   : > { %852 = vrot.lane.b32.xlu0 %v3657_v33, %s3464_s2  ;;  %v602_v3 = vcombine.low %v3649_v27, %v3667_v42  ;;  %v603_v4 = vcombine.high %v3649_v27, %v3667_v42 }
 0x175   : > { %v642_v38 = vrot.slane %v634_v34, %v3651_v28  ;;  %v649_v39 = vrot.slane %v635_v35, %v3651_v28  ;;  %v658_v40 = vrot.slane %v650_v36, %v3651_v28  ;;  %v665_v41 = vrot.slane %v651_v37, %v3651_v28 }
 0x176   : > { %v3669_v43 = vpop.permute.xlu0 %567  ;;  %v617_v8 = vrot.slane %v603_v4, %v3643_v23  ;;  %v843_v9 = vpop.permute.xlu1 %842 }
 0x177   : > { %v3016_v44 = vcombine.low %v642_v38, %v649_v39  ;;  %v3018_v45 = vcombine.high %v642_v38, %v649_v39  ;;  %v3020_v46 = vcombine.low %v658_v40, %v665_v41  ;;  %v3022_v47 = vcombine.high %v658_v40, %v665_v41  ;;  %854 = vrot.lane.b32.xlu1 %v3667_v42, %s3464_s2 }
 0x178   : > { %856 = vrot.lane.b32.xlu0 %v3669_v43, %s3464_s2  ;;  %v618_v0 = vcombine.low %v3657_v33, %v3669_v43  ;;  %v619_v2 = vcombine.high %v3657_v33, %v3669_v43 }
 0x179   : > { %v714_v48 = vrot.slane %v3016_v44, %v3643_v23  ;;  %v730_v49 = vrot.slane %v3018_v45, %v3643_v23  ;;  %v746_v50 = vrot.slane %v3020_v46, %v3643_v23  ;;  %v762_v51 = vrot.slane %v3022_v47, %v3643_v23 }
 0x17a   : > { %v626_v5 = vrot.slane %v618_v0, %v3643_v23  ;;  %v633_v6 = vrot.slane %v619_v2, %v3643_v23 }
 0x17b   : > { %1140 = vrot.lane.b32.xlu1 %v550_v19, %s3468_s0  ;;  %v770_v52 = vcombine.low %v714_v48, %v730_v49  ;;  %v802_v53 = vcombine.low %v746_v50, %v762_v51  ;;  %v771_v54 = vcombine.high %v714_v48, %v730_v49  ;;  %v803_v55 = vcombine.high %v746_v50, %v762_v51 }
 0x17c   : > { %1138 = vrot.lane.b32.xlu0 %v3631_v7, %s3468_s0  ;;  %v610_v7 = vrot.slane %v602_v3, %v3643_v23  ;;  %v682_v12 = vcombine.low %v617_v8, %v633_v6  ;;  %v683_v13 = vcombine.high %v617_v8, %v633_v6 }
 0x17d   : > { %v778_v56 = vrot.slane %v770_v52, %v3651_v28  ;;  %v810_v57 = vrot.slane %v802_v53, %v3651_v28  ;;  %v785_v58 = vrot.slane %v771_v54, %v3651_v28  ;;  %v817_v59 = vrot.slane %v803_v55, %v3651_v28 }
 0x17e   : > { %v666_v10 = vcombine.low %v610_v7, %v626_v5  ;;  %v667_v11 = vcombine.high %v610_v7, %v626_v5  ;;  %v3711_v17 = vrot.slane %v682_v12, %v3651_v28 }
 0x17f   : > { %1142 = vrot.lane.b32.xlu1 %v553_v24, %s3468_s0  ;;  %v3687_v60 = vcombine.low %v778_v56, %v810_v57  ;;  %v3689_v61 = vcombine.low %v785_v58, %v817_v59  ;;  %v3691_v62 = vcombine.high %v785_v58, %v817_v59  ;;  %v3693_v63 = vcombine.high %v778_v56, %v810_v57 }
 0x180   : > { %1144 = vrot.lane.b32.xlu0 %v556_v18, %s3468_s0  ;;  %v674_v15 = vrot.slane %v666_v10, %v3651_v28  ;;  %v681_v16 = vrot.slane %v667_v11, %v3651_v28  ;;  %v3714_v18 = vrot.slane %v683_v13, %v3651_v28 }
 0x182   : > { %v3017_v32 = vcombine.low %v674_v15, %v681_v16  ;;  %v3019_v34 = vcombine.high %v674_v15, %v681_v16  ;;  %v3021_v35 = vcombine.low %v3711_v17, %v3714_v18  ;;  %v3023_v51 = vcombine.high %v3711_v17, %v3714_v18 }
 0x184   : > { %v3727_v48 = vrot.slane %v3017_v32, %v3643_v23  ;;  %v3730_v49 = vrot.slane %v3019_v34, %v3643_v23  ;;  %v3733_v50 = vrot.slane %v3021_v35, %v3643_v23 }
 0x1dd   : > { %v845_v14 = vpop.permute.xlu0 %844 }
 0x1e1   : > { %v847_v19 = vpop.permute.xlu1 %846  ;;  %v849_v20 = vpop.permute.xlu0 %848 }
 0x1e2   : > { %v866_v21 = vcombine.low %v843_v9, %v847_v19  ;;  %v867_v22 = vcombine.high %v843_v9, %v847_v19  ;;  %v882_v24 = vcombine.low %v845_v14, %v849_v20  ;;  %v883_v25 = vcombine.high %v845_v14, %v849_v20 }
 0x1e4   : > { %v874_v26 = vrot.slane %v866_v21, %v3643_v23  ;;  %v881_v29 = vrot.slane %v867_v22, %v3643_v23  ;;  %v890_v30 = vrot.slane %v882_v24, %v3643_v23  ;;  %v897_v31 = vrot.slane %v883_v25, %v3643_v23 }
 0x1e5   : > { %v851_v36 = vpop.permute.xlu1 %850 }
 0x1e6   : > { %v930_v37 = vcombine.low %v874_v26, %v890_v30  ;;  %v931_v38 = vcombine.high %v874_v26, %v890_v30  ;;  %v946_v39 = vcombine.low %v881_v29, %v897_v31  ;;  %v947_v40 = vcombine.high %v881_v29, %v897_v31  ;;  %v853_v41 = vpop.permute.xlu0 %852 }
 0x1e8   : > { %v938_v44 = vrot.slane %v930_v37, %v3651_v28  ;;  %v945_v45 = vrot.slane %v931_v38, %v3651_v28  ;;  %v954_v46 = vrot.slane %v946_v39, %v3651_v28  ;;  %v961_v47 = vrot.slane %v947_v40, %v3651_v28 }
 0x1e9   : > { %v855_v52 = vpop.permute.xlu1 %854 }
 0x1ea   : > { %v3024_v53 = vcombine.low %v938_v44, %v945_v45  ;;  %v3026_v54 = vcombine.high %v938_v44, %v945_v45  ;;  %v3028_v55 = vcombine.low %v954_v46, %v961_v47  ;;  %v3030_v56 = vcombine.high %v954_v46, %v961_v47  ;;  %v857_v57 = vpop.permute.xlu0 %856 }
 0x1eb   : > { %v898_v58 = vcombine.low %v851_v36, %v855_v52  ;;  %v899_v59 = vcombine.high %v851_v36, %v855_v52  ;;  %v914_v0 = vcombine.low %v853_v41, %v857_v57  ;;  %v915_v2 = vcombine.high %v853_v41, %v857_v57 }
 0x1ec   : > { %v1010_v3 = vrot.slane %v3024_v53, %v3643_v23  ;;  %v1026_v4 = vrot.slane %v3026_v54, %v3643_v23  ;;  %v1042_v5 = vrot.slane %v3028_v55, %v3643_v23  ;;  %v1058_v6 = vrot.slane %v3030_v56, %v3643_v23 }
 0x1ed   : > { %v906_v7 = vrot.slane %v898_v58, %v3643_v23  ;;  %v913_v8 = vrot.slane %v899_v59, %v3643_v23  ;;  %v922_v9 = vrot.slane %v914_v0, %v3643_v23  ;;  %v929_v10 = vrot.slane %v915_v2, %v3643_v23  ;;  %v1141_v11 = vpop.permute.xlu1 %1140 }
 0x1ee   : > { %v1139_v12 = vpop.permute.xlu0 %1138  ;;  %v1066_v13 = vcombine.low %v1010_v3, %v1026_v4  ;;  %v1098_v14 = vcombine.low %v1042_v5, %v1058_v6  ;;  %v1067_v15 = vcombine.high %v1010_v3, %v1026_v4  ;;  %v1099_v16 = vcombine.high %v1042_v5, %v1058_v6 }
 0x1ef   : > { %v962_v17 = vcombine.low %v906_v7, %v922_v9  ;;  %v963_v18 = vcombine.high %v906_v7, %v922_v9  ;;  %v978_v19 = vcombine.low %v913_v8, %v929_v10  ;;  %v979_v20 = vcombine.high %v913_v8, %v929_v10 }
 0x1f0   : > { %v1074_v21 = vrot.slane %v1066_v13, %v3651_v28  ;;  %v1106_v22 = vrot.slane %v1098_v14, %v3651_v28  ;;  %v3748_v24 = vrot.slane %v1067_v15, %v3651_v28  ;;  %v3751_v25 = vrot.slane %v1099_v16, %v3651_v28 }
 0x1f1   : > { %v970_v26 = vrot.slane %v962_v17, %v3651_v28  ;;  %v977_v29 = vrot.slane %v963_v18, %v3651_v28  ;;  %v986_v30 = vrot.slane %v978_v19, %v3651_v28  ;;  %v993_v31 = vrot.slane %v979_v20, %v3651_v28  ;;  %v1143_v32 = vpop.permute.xlu1 %1142 }
 0x1f2   : > { %v1162_v34 = vcombine.low %v1139_v12, %v1143_v32  ;;  %v1163_v35 = vcombine.high %v1139_v12, %v1143_v32  ;;  %v1145_v36 = vpop.permute.xlu0 %1144  ;;  %v1130_v37 = vcombine.low %v1074_v21, %v1106_v22  ;;  %v1132_v38 = vcombine.low %v3748_v24, %v3751_v25 }
 0x1f3   : > { %v3025_v39 = vcombine.low %v970_v26, %v977_v29  ;;  %v3027_v40 = vcombine.high %v970_v26, %v977_v29  ;;  %v3029_v41 = vcombine.low %v986_v30, %v993_v31  ;;  %v3031_v44 = vcombine.high %v986_v30, %v993_v31 }
 0x1f4   : > { %v1170_v45 = vrot.slane %v1162_v34, %v3643_v23  ;;  %v1177_v46 = vrot.slane %v1163_v35, %v3643_v23  ;;  %v1178_v47 = vcombine.low %v1141_v11, %v1145_v36  ;;  %v1179_v52 = vcombine.high %v1141_v11, %v1145_v36 }
 0x1f5   : > { %v1017_v53 = vrot.slane %v3025_v39, %v3643_v23  ;;  %v1033_v54 = vrot.slane %v3027_v40, %v3643_v23  ;;  %v1049_v55 = vrot.slane %v3029_v41, %v3643_v23  ;;  %v1065_v56 = vrot.slane %v3031_v44, %v3643_v23 }
 0x1f6   : > { %v1186_v57 = vrot.slane %v1178_v47, %v3643_v23  ;;  %v1193_v58 = vrot.slane %v1179_v52, %v3643_v23  ;;  %v1442_v59 = vpack.c.bf16 %v1130_v37, %v1130_v37  ;;  %v1444_v0 = vpack.c.bf16 %v1132_v38, %v1132_v38 }
 0x1f7   : > { %v3768_v2 = vrot.slane %v3023_v51, %v3643_v23  ;;  %v1082_v3 = vcombine.low %v1017_v53, %v1033_v54  ;;  %v1114_v4 = vcombine.low %v1049_v55, %v1065_v56  ;;  %v786_v5 = vcombine.low %v3727_v48, %v3730_v49 }
 0x1f8   : > { %v1226_v6 = vcombine.low %v1170_v45, %v1186_v57  ;;  %v1227_v7 = vcombine.high %v1170_v45, %v1186_v57  ;;  %v1242_v8 = vcombine.low %v1177_v46, %v1193_v58  ;;  %v1243_v9 = vcombine.high %v1177_v46, %v1193_v58 }
 0x1f9   : > { %v1461_v10 = vsel %vm1456_vm2, %v1442_v59, 0  ;;  %v1553_v11 = vsel %vm1456_vm2, %v1444_v0, 0  ;;  %v1131_v12 = vcombine.high %v1074_v21, %v1106_v22  ;;  %v3775_v13 = vrot.slane %v1082_v3, %v3651_v28 }
 0x1fa   : > { %v1234_v51 = vrot.slane %v1226_v6, %v3651_v28  ;;  %v1241_v14 = vrot.slane %v1227_v7, %v3651_v28  ;;  %v1250_v15 = vrot.slane %v1242_v8, %v3651_v28  ;;  %v1257_v16 = vrot.slane %v1243_v9, %v3651_v28  ;;  %3149 = vmatpush3.bf16.xpose.msra.mxu0 %v1461_v10 }
 0x1fb   : > { %3161 = vmatpush3.bf16.xpose.msra.mxu1 %v1553_v11  ;;  %3154 = vmatprep.subr.bf16.mxu0 %v3456_v1  ;;  %v1122_v17 = vrot.slane %v1114_v4, %v3651_v28  ;;  %v818_v18 = vcombine.low %v3733_v50, %v3768_v2  ;;  %v1083_v19 = vcombine.high %v1017_v53, %v1033_v54 }
 0x1fc   : > { %v3032_v20 = vcombine.low %v1234_v51, %v1241_v14  ;;  %v3034_v21 = vcombine.high %v1234_v51, %v1241_v14  ;;  %v3036_v22 = vcombine.low %v1250_v15, %v1257_v16  ;;  %v3038_v26 = vcombine.high %v1250_v15, %v1257_v16  ;;  %3172 = vmatprep.subr.bf16.mxu1 %v3456_v1 }
 0x1fd   : > { %v1443_v29 = vpack.c.bf16 %v1131_v12, %v1131_v12  ;;  %v1134_v30 = vcombine.low %v3775_v13, %v1122_v17  ;;  %v3788_v31 = vrot.slane %v1083_v19, %v3651_v28  ;;  %v1115_v32 = vcombine.high %v1049_v55, %v1065_v56 }
 0x1fe   : > { %v1306_v34 = vrot.slane %v3032_v20, %v3643_v23  ;;  %v1322_v35 = vrot.slane %v3034_v21, %v3643_v23  ;;  %v1338_v36 = vrot.slane %v3036_v22, %v3643_v23  ;;  %v1354_v37 = vrot.slane %v3038_v26, %v3643_v23 }
 0x1ff   : > { %v1434_v38 = vpack.c.bf16 %v3687_v60, %v3687_v60  ;;  %v1436_v39 = vpack.c.bf16 %v3689_v61, %v3689_v61  ;;  %v1446_v40 = vpack.c.bf16 %v1134_v30, %v1134_v30  ;;  %v1129_v41 = vrot.slane %v1115_v32, %v3651_v28  ;;  %v3040_v30 = vld [vmem:[%s476_s25] ss:$0 sm:$0xff]  ;;  %s3472_s25 = smov 20  }
 0x200   : > { %v794_v44 = vrot.slane %v786_v5, %v3651_v28  ;;  %v826_v45 = vrot.slane %v818_v18, %v3651_v28  ;;  %v1363_v46 = vcombine.high %v1306_v34, %v1322_v35  ;;  %v1395_v47 = vcombine.high %v1338_v36, %v1354_v37 }
 0x201   : > { %3151 = vmatmul.mubr.msk.bf16.vlgmr.msra.gmra.mrb[4].mxu0 %vm1456_vm2, %v1434_v38  ;;  %v1507_v52 = vsel %vm1456_vm2, %v1443_v29, 0  ;;  %v1645_v53 = vsel %vm1456_vm2, %v1446_v40, 0  ;;  %v1133_v60 = vcombine.high %v3748_v24, %v3751_v25  ;;  %v1362_v54 = vcombine.low %v1306_v34, %v1322_v35 }
 0x202   : > { %3163 = vmatmul.mubr.msk.bf16.vlgmr.msra.gmra.mrb[0].mxu1 %vm1456_vm2, %v1436_v39  ;;  %3155 = vmatpush3.bf16.xpose.msra.mxu0 %v1507_v52  ;;  %v1136_v61 = vcombine.low %v3788_v31, %v1129_v41  ;;  %v1394_v55 = vcombine.low %v1338_v36, %v1354_v37  ;;  %v1377_v56 = vrot.slane %v1363_v46, %v3651_v28 }
 0x203   : > { %3173 = vmatpush3.bf16.xpose.msra.mxu1 %v1645_v53  ;;  %3156 = vmatprep.mubr.msk.bf16.mxu0 %vm3457_vm0, %v3456_v1  ;;  %v1409_v57 = vrot.slane %v1395_v47, %v3651_v28  ;;  %v838_v24 = vcombine.low %v794_v44, %v826_v45  ;;  %v787_v25 = vcombine.high %v3727_v48, %v3730_v49 }
 0x204   : > { %3174 = vmatprep.mubr.msk.bf16.mxu1 %vm3457_vm0, %v3456_v1  ;;  %3166 = vmatprep.subr.bf16.mxu0 %v3456_v1  ;;  %v819_v58 = vcombine.high %v3733_v50, %v3768_v2  ;;  %v1445_v59 = vpack.c.bf16 %v1133_v60, %v1133_v60  ;;  %v1448_v4 = vpack.c.bf16 %v1136_v61, %v1136_v61 }
 0x205   : > { %3184 = vmatprep.subr.bf16.mxu1 %v3456_v1  ;;  %v3820_v0 = vcombine.low %v1377_v56, %v1409_v57  ;;  %v3822_v3 = vcombine.high %v1377_v56, %v1409_v57  ;;  %v1370_v5 = vrot.slane %v1362_v54, %v3651_v28  ;;  %v1402_v6 = vrot.slane %v1394_v55, %v3651_v28 }
 0x206   : > { %v1435_v7 = vpack.c.bf16 %v3693_v63, %v3693_v63  ;;  %v1438_v8 = vpack.c.bf16 %v838_v24, %v838_v24  ;;  %v801_v48 = vrot.slane %v787_v25, %v3651_v28  ;;  %v833_v49 = vrot.slane %v819_v58, %v3651_v28 }
 0x207   : > { %v1599_v50 = vsel %vm1456_vm2, %v1445_v59, 0  ;;  %v1135_v2 = vcombine.high %v3775_v13, %v1122_v17  ;;  %v1737_v9 = vsel %vm1456_vm2, %v1448_v4, 0  ;;  %v1426_v10 = vcombine.low %v1370_v5, %v1402_v6 }
 0x208   : > { %v840_v63 = vcombine.low %v801_v48, %v833_v49  ;;  %v1437_v13 = vpack.c.bf16 %v3691_v62, %v3691_v62  ;;  %v1137_v15 = vcombine.high %v3788_v31, %v1129_v41  ;;  %v839_v17 = vcombine.high %v794_v44, %v826_v45 }
 0x209   : > { %3157 = vmatmul.mubr.msk.bf16.vlgmr.msra.gmra.mrb[8].mxu0 %vm1456_vm2, %v1435_v7  ;;  %v1447_v11 = vpack.c.bf16 %v1135_v2, %v1135_v2  ;;  %v1922_v12 = vpack.c.bf16 %v1426_v10, %v1426_v10  ;;  %v1427_v20 = vcombine.high %v1370_v5, %v1402_v6  ;;  %v841_v21 = vcombine.high %v801_v48, %v833_v49 }
 0x20a   : > { %3175 = vmatmul.mubr.msk.bf16.vlgmr.msra.gmra.mrb[4].mxu1 %vm1456_vm2, %v1438_v8  ;;  %3167 = vmatpush3.bf16.xpose.msra.mxu0 %v1599_v50  ;;  %v1440_v51 = vpack.c.bf16 %v840_v63, %v840_v63  ;;  %v1449_v62 = vpack.c.bf16 %v1137_v15, %v1137_v15  ;;  %v1439_v18 = vpack.c.bf16 %v839_v17, %v839_v17 }
 0x20b   : > { %3185 = vmatpush3.bf16.xpose.msra.mxu1 %v1737_v9  ;;  %3168 = vmatprep.mubr.msk.bf16.mxu0 %vm3457_vm0, %v3456_v1  ;;  %v1691_v14 = vsel %vm1456_vm2, %v1447_v11, 0  ;;  %v1935_v16 = vsel %vm1933_vm3, %v1922_v12, 0  ;;  %v1923_v22 = vpack.c.bf16 %v1427_v20, %v1427_v20  ;;  %v1441_v26 = vpack.c.bf16 %v841_v21, %v841_v21 }
 0x20c   : > { %3186 = vmatprep.mubr.msk.bf16.mxu1 %vm3457_vm0, %v3456_v1  ;;  %3178 = vmatprep.subr.bf16.mxu0 %v3456_v1  ;;  %v1783_v19 = vsel %vm1456_vm2, %v1449_v62, 0 }
 0x20d   : > { %3196 = vmatprep.subr.bf16.mxu1 %v3456_v1  ;;  %v1981_v29 = vsel %vm1933_vm3, %v1923_v22, 0 }
 0x211   : > { %3169 = vmatmul.mubr.msk.bf16.vlgmr.msra.gmra.mrb[12].mxu0 %vm1456_vm2, %v1437_v13 }
 0x212   : > { %3187 = vmatmul.mubr.msk.bf16.vlgmr.msra.gmra.mrb[8].mxu1 %vm1456_vm2, %v1440_v51  ;;  %3179 = vmatpush3.bf16.xpose.msra.mxu0 %v1691_v14 }
 0x213   : > { %3197 = vmatpush3.bf16.msra.mxu1 %v1935_v16  ;;  %3180 = vmatprep.mubr.msk.bf16.mxu0 %vm3457_vm0, %v3456_v1 }
 0x214   : > { %3190 = vmatprep.subr.bf16.mxu0 %v3456_v1  ;;  %3198 = vmatprep.mubr.msk.bf16.mxu1 %vm3457_vm0, %v3456_v1 }
 0x215   : > { %3208 = vmatprep.subr.bf16.mxu1 %v3456_v1 }
 0x219   : > { %3181 = vmatmul.mubr.msk.bf16.vlgmr.msra.gmra.mrb[16].mxu0 %vm1456_vm2, %v1439_v18 }
 0x21a   : > { %3191 = vmatpush3.bf16.xpose.msra.mxu0 %v1783_v19  ;;  %3192 = vmatprep.mubr.msk.bf16.mxu0 %vm3457_vm0, %v3456_v1 }
 0x21b   : > { %3202 = vmatprep.subr.bf16.mxu0 %v3456_v1 }
 0x221   : > { %3193 = vmatmul.mubr.msk.bf16.vlgmr.msra.gmra.mrb[20].mxu0 %vm1456_vm2, %v1441_v26 }
 0x222   : > { %3203 = vmatpush3.bf16.msra.mxu0 %v1981_v29  ;;  %3204 = vmatprep.mubr.msk.bf16.mxu0 %vm3457_vm0, %v3456_v1 }
 0x223   : > { %3214 = vmatprep.subr.bf16.mxu0 %v3456_v1 }
 0x2d4   : > { %v1497_v31 = vpop.f32.mrb[4].mxu0 }
 0x2d5   : > { %v1498_v32 = vadd.f32 %v3040_v30, %v1497_v31  ;;  %v1589_v34 = vpop.f32.mrb[0].mxu1  ;;  %v3152_v35 = vpop.f32.mrb[5].mxu0 }
 0x2d6   : > { %v1590_v36 = vadd.f32 %v3040_v30, %v1589_v34  ;;  %v3164_v37 = vpop.f32.mrb[1].mxu1  ;;  %v1500_v38 = vpop.f32.mrb[6].mxu0 }
 0x2d7   : > { %v1592_v39 = vpop.f32.mrb[2].mxu1  ;;  %v3153_v40 = vpop.f32.mrb[7].mxu0  ;;  %v1826_v41 = vsel %vm1825_vm4, %v1498_v32, -inf }
 0x2d8   : > { %v3165_v44 = vpop.f32.mrb[3].mxu1  ;;  %v1832_v45 = vsel %vm1825_vm4, %v1590_v36, -inf  ;;  %1827 = vmax.xlane.f32.xlu1 %v1826_v41 }
 0x2d9   : > { %1833 = vmax.xlane.f32.xlu0 %v1832_v45 }
 0x2dc   : > { %v1543_v46 = vpop.f32.mrb[8].mxu0 }
 0x2dd   : > { %v1544_v47 = vadd.f32 %v3040_v30, %v1543_v46  ;;  %v1681_v52 = vpop.f32.mrb[4].mxu1  ;;  %v3158_v53 = vpop.f32.mrb[9].mxu0 }
 0x2de   : > { %v1682_v60 = vadd.f32 %v3040_v30, %v1681_v52  ;;  %v3176_v54 = vpop.f32.mrb[5].mxu1  ;;  %v1546_v61 = vpop.f32.mrb[10].mxu0 }
 0x2df   : > { %v1684_v55 = vpop.f32.mrb[6].mxu1  ;;  %v3159_v56 = vpop.f32.mrb[11].mxu0  ;;  %v1829_v57 = vsel %vm1825_vm4, %v1544_v47, -inf }
 0x2e0   : > { %v3177_v24 = vpop.f32.mrb[7].mxu1  ;;  %1830 = vmax.xlane.f32.xlu0 %v1829_v57  ;;  %v1838_v25 = vsel %vm1825_vm4, %v1682_v60, -inf }
 0x2e4   : > { %1839 = vmax.xlane.f32.xlu0 %v1838_v25  ;;  %v1635_v58 = vpop.f32.mrb[12].mxu0 }
 0x2e5   : > { %v1773_v59 = vpop.f32.mrb[8].mxu1  ;;  %v1636_v4 = vadd.f32 %v3040_v30, %v1635_v58  ;;  %v3170_v5 = vpop.f32.mrb[13].mxu0 }
 0x2e6   : > { %v3872_v6 = vadd.f32 %v3040_v30, %v1773_v59  ;;  %v3188_v7 = vpop.f32.mrb[9].mxu1  ;;  %v1638_v8 = vpop.f32.mrb[14].mxu0 }
 0x2e7   : > { %v1776_v48 = vpop.f32.mrb[10].mxu1  ;;  %v3171_v49 = vpop.f32.mrb[15].mxu0  ;;  %v1835_v50 = vsel %vm1825_vm4, %v1636_v4, -inf }
 0x2e8   : > { %v3189_v2 = vpop.f32.mrb[11].mxu1  ;;  %v1844_v9 = vsel %vm1825_vm4, %v3872_v6, -inf  ;;  %1836 = vmax.xlane.f32.xlu1 %v1835_v50 }
 0x2e9   : > { %1845 = vmax.xlane.f32.xlu0 %v1844_v9 }
 0x2ec   : > { %v1727_v10 = vpop.f32.mrb[16].mxu0 }
 0x2ed   : > { %v1728_v63 = vadd.f32 %v3040_v30, %v1727_v10  ;;  %v3182_v11 = vpop.f32.mrb[17].mxu0 }
 0x2ee   : > { %v1730_v12 = vpop.f32.mrb[18].mxu0 }
 0x2ef   : > { %v3183_v13 = vpop.f32.mrb[19].mxu0  ;;  %v1841_v51 = vsel %vm1825_vm4, %v1728_v63, -inf }
 0x2f0   : > { %1842 = vmax.xlane.f32.xlu1 %v1841_v51 }
 0x2f4   : > { %v1819_v14 = vpop.f32.mrb[20].mxu0 }
 0x2f5   : > { %v1820_v15 = vadd.f32 %v3040_v30, %v1819_v14  ;;  %v3194_v16 = vpop.f32.mrb[21].mxu0 }
 0x2f6   : > { %v1822_v17 = vpop.f32.mrb[22].mxu0 }
 0x2f7   : > { %v3195_v62 = vpop.f32.mrb[23].mxu0  ;;  %v1847_v18 = vsel %vm1825_vm4, %v1820_v15, -inf }
 0x2f8   : > { %1848 = vmax.xlane.f32.xlu1 %v1847_v18 }
 0x2ff   : > { %1146 = vrot.lane.b32.xlu0 %v3649_v27, %s3468_s0 }
 0x309   : > { %1148 = vrot.lane.b32.xlu1 %v3657_v33, %s3468_s0 }
 0x365   : > { %v1828_v19 = vpop.xlane.xlu1 %1827 }
 0x366   : > { %v1834_v20 = vpop.xlane.xlu0 %1833  ;;  %v1850_v21 = vsub.f32 %v1498_v32, %v1828_v19 }
 0x367   : > { %v1852_v22 = vsub.f32 %v1590_v36, %v1834_v20 }
 0x368   : > { %v1858_v26 = vmul.f32 1.442695, %v1850_v21 }
 0x369   : > { %v1862_v29 = vmul.f32 1.442695, %v1852_v22 }
 0x36a   : > { %3353 = vpow2.f32 %v1858_v26 }
 0x36b   : > { %3355 = vpow2.f32 %v1862_v29 }
 0x36d   : > { %v1831_v30 = vpop.xlane.xlu0 %1830 }
 0x36e   : > { %v1851_v31 = vsub.f32 %v1544_v47, %v1831_v30 }
 0x370   : > { %v1860_v34 = vmul.f32 1.442695, %v1851_v31 }
 0x371   : > { %v1840_v35 = vpop.xlane.xlu0 %1839 }
 0x372   : > { %3357 = vpow2.f32 %v1860_v34  ;;  %v1854_v37 = vsub.f32 %v1682_v60, %v1840_v35 }
 0x374   : > { %v3354_v38 = vpop.eup %3353  ;;  %v1866_v39 = vmul.f32 1.442695, %v1854_v37 }
 0x375   : > { %v3356_v27 = vpop.eup %3355  ;;  %v1837_v40 = vpop.xlane.xlu1 %1836  ;;  %v1874_v33 = vsel %vm1825_vm4, %v3354_v38, 0.0 }
 0x376   : > { %3359 = vpow2.f32 %v1866_v39  ;;  %v1853_v41 = vsub.f32 %v1636_v4, %v1837_v40  ;;  %1875 = vadd.xlane.f32.xlu0 %v1874_v33  ;;  %v1880_v32 = vsel %vm1825_vm4, %v3356_v27, 0.0  ;;  %v1846_v58 = vpop.xlane.xlu0 %1845 }
 0x377   : > { %1881 = vadd.xlane.f32.xlu1 %v1880_v32  ;;  %v1856_v59 = vsub.f32 %v3872_v6, %v1846_v58 }
 0x378   : > { %v1864_v36 = vmul.f32 1.442695, %v1853_v41 }
 0x379   : > { %v1870_v4 = vmul.f32 1.442695, %v1856_v59 }
 0x37a   : > { %3361 = vpow2.f32 %v1864_v36 }
 0x37c   : > { %v3358_v44 = vpop.eup %3357 }
 0x37d   : > { %v1843_v45 = vpop.xlane.xlu1 %1842  ;;  %v1877_v46 = vsel %vm1825_vm4, %v3358_v44, 0.0 }
 0x37e   : > { %v1855_v47 = vsub.f32 %v1728_v63, %v1843_v45  ;;  %1878 = vadd.xlane.f32.xlu1 %v1877_v46  ;;  %v1924_v63 = vpack.c.bf16 %v3820_v0, %v3820_v0  ;;  %v1925_v0 = vpack.c.bf16 %v3822_v3, %v3822_v3 }
 0x380   : > { %v3886_v52 = vpop.eup %3359  ;;  %v1868_v53 = vmul.f32 1.442695, %v1855_v47  ;;  %v2027_v13 = vsel %vm1933_vm3, %v1924_v63, 0  ;;  %v2073_v19 = vsel %vm1933_vm3, %v1925_v0, 0 }
 0x381   : > { %v1886_v60 = vsel %vm1825_vm4, %v3886_v52, 0.0 }
 0x382   : > { %3363 = vpow2.f32 %v1868_v53  ;;  %1887 = vadd.xlane.f32.xlu0 %v1886_v60 }
 0x384   : > { %v3362_v54 = vpop.eup %3361 }
 0x385   : > { %v1883_v61 = vsel %vm1825_vm4, %v3362_v54, 0.0  ;;  %v1849_v57 = vpop.xlane.xlu1 %1848 }
 0x386   : > { %1884 = vadd.xlane.f32.xlu0 %v1883_v61  ;;  %v1857_v24 = vsub.f32 %v1820_v15, %v1849_v57 }
 0x388   : > { %v1872_v25 = vmul.f32 1.442695, %v1857_v24 }
 0x389   : > { %v1149_v48 = vpop.permute.xlu1 %1148 }
 0x38a   : > { %3365 = vpow2.f32 %v1872_v25 }
 0x38b   : > { %3367 = vpow2.f32 %v1870_v4 }
 0x38c   : > { %v3891_v55 = vpop.eup %3363 }
 0x38d   : > { %v1889_v56 = vsel %vm1825_vm4, %v3891_v55, 0.0 }
 0x38e   : > { %1890 = vadd.xlane.f32.xlu1 %v1889_v56 }
 0x394   : > { %v3900_v5 = vpop.eup %3365 }
 0x395   : > { %v1895_v7 = vsel %vm1825_vm4, %v3900_v5, 0.0  ;;  %v3904_v8 = vpop.eup %3367 }
 0x39c   : > { %1152 = vrot.lane.b32.xlu0 %v3669_v43, %s3468_s0  ;;  %v1147_v43 = vpop.permute.xlu0 %1146 }
 0x39f   : > { %1150 = vrot.lane.b32.xlu1 %v3667_v42, %s3468_s0  ;;  %v1892_v42 = vsel %vm1825_vm4, %v3904_v8, 0.0 }
 0x3bb   : > { %1896 = vadd.xlane.f32.xlu0 %v1895_v7 }
 0x3c3   : > { %1893 = vadd.xlane.f32.xlu1 %v1892_v42 }
 0x403   : > { %v1876_v49 = vpop.xlane.xlu0 %1875 }
 0x404   : > { %3369 = vrcp.f32 %v1876_v49  ;;  %v1882_v6 = vpop.xlane.xlu1 %1881 }
 0x405   : > { %3371 = vrcp.f32 %v1882_v6 }
 0x40b   : > { %v1879_v50 = vpop.xlane.xlu1 %1878 }
 0x40c   : > { %3373 = vrcp.f32 %v1879_v50 }
 0x40e   : > { %v3370_v2 = vpop.eup %3369 }
 0x40f   : > { %v1906_v9 = vmul.f32 %v3370_v2, %v3354_v38  ;;  %v1888_v10 = vpop.xlane.xlu0 %1887  ;;  %v3372_v12 = vpop.eup %3371 }
 0x410   : > { %v1908_v14 = vmul.f32 %v3372_v12, %v3356_v27 }
 0x411   : > { %v1914_v11 = vpack.c.bf16 %v1906_v9, %v1906_v9 }
 0x412   : > { %v1916_v62 = vpack.c.bf16 %v1908_v14, %v1908_v14 }
 0x413   : > { %3199 = vmatmul.mubr.msk.bf16.vlgmr.msra.gmra.mrb[12].mxu1 %vm1825_vm4, %v1914_v11  ;;  %v1885_v51 = vpop.xlane.xlu0 %1884 }
 0x414   : > { %3209 = vmatpush3.bf16.msra.mxu1 %v2027_v13  ;;  %3375 = vrcp.f32 %v1885_v51  ;;  %3210 = vmatprep.mubr.msk.bf16.mxu1 %vm3457_vm0, %v3456_v1 }
 0x415   : > { %3220 = vmatprep.subr.bf16.mxu1 %v3456_v1  ;;  %3377 = vrcp.f32 %v1888_v10 }
 0x416   : > { %v3374_v15 = vpop.eup %3373 }
 0x417   : > { %v1907_v16 = vmul.f32 %v3374_v15, %v3358_v44  ;;  %v1153_v18 = vpop.permute.xlu0 %1152 }
 0x418   : > { %v1210_v21 = vcombine.low %v1149_v48, %v1153_v18  ;;  %v1211_v22 = vcombine.high %v1149_v48, %v1153_v18 }
 0x419   : > { %v1915_v17 = vpack.c.bf16 %v1907_v16, %v1907_v16 }
 0x41a   : > { %v1218_v35 = vrot.slane %v1210_v21, %v3643_v23  ;;  %v1225_v37 = vrot.slane %v1211_v22, %v3643_v23 }
 0x41b   : > { %3205 = vmatmul.mubr.msk.bf16.vlgmr.msra.gmra.mrb[24].mxu0 %vm1825_vm4, %v1915_v17  ;;  %3211 = vmatmul.mubr.msk.bf16.vlgmr.msra.gmra.mrb[16].mxu1 %vm1825_vm4, %v1916_v62  ;;  %v1891_v20 = vpop.xlane.xlu1 %1890 }
 0x41c   : > { %3215 = vmatpush3.bf16.msra.mxu0 %v2073_v19  ;;  %3216 = vmatprep.mubr.msk.bf16.mxu0 %vm3457_vm0, %v3456_v1  ;;  %3379 = vrcp.f32 %v1891_v20 }
 0x41d   : > { %3226 = vmatprep.subr.bf16.mxu0 %v3456_v1  ;;  %3222 = vmatprep.mubr.msk.bf16.mxu1 %vm3457_vm0, %v3456_v1 }
 0x41e   : > { %v3376_v3 = vpop.eup %3375 }
 0x41f   : > { %v1909_v26 = vmul.f32 %v3376_v3, %v3362_v54  ;;  %v1151_v29 = vpop.permute.xlu1 %1150  ;;  %v3378_v4 = vpop.eup %3377 }
 0x420   : > { %v1194_v30 = vcombine.low %v1147_v43, %v1151_v29  ;;  %v1195_v31 = vcombine.high %v1147_v43, %v1151_v29  ;;  %v1910_v10 = vmul.f32 %v3378_v4, %v3886_v52 }
 0x421   : > { %v1917_v34 = vpack.c.bf16 %v1909_v26, %v1909_v26 }
 0x422   : > { %v1202_v38 = vrot.slane %v1194_v30, %v3643_v23  ;;  %v1209_v39 = vrot.slane %v1195_v31, %v3643_v23  ;;  %v1918_v16 = vpack.c.bf16 %v1910_v10, %v1910_v10 }
 0x423   : > { %3217 = vmatmul.mubr.msk.bf16.vlgmr.msra.gmra.mrb[28].mxu0 %vm1825_vm4, %v1917_v34 }
 0x424   : > { %v1258_v27 = vcombine.low %v1202_v38, %v1218_v35  ;;  %v1259_v40 = vcombine.high %v1202_v38, %v1218_v35  ;;  %v1274_v33 = vcombine.low %v1209_v39, %v1225_v37  ;;  %v1275_v41 = vcombine.high %v1209_v39, %v1225_v37  ;;  %3228 = vmatprep.mubr.msk.bf16.mxu0 %vm3457_vm0, %v3456_v1 }
 0x426   : > { %v1266_v32 = vrot.slane %v1258_v27, %v3651_v28  ;;  %v1273_v36 = vrot.slane %v1259_v40, %v3651_v28  ;;  %v1282_v44 = vrot.slane %v1274_v33, %v3651_v28  ;;  %v1289_v45 = vrot.slane %v1275_v41, %v3651_v28  ;;  %v3380_v49 = vpop.eup %3379 }
 0x427   : > { %v1911_v63 = vmul.f32 %v3380_v49, %v3891_v55 }
 0x428   : > { %v3033_v46 = vcombine.low %v1266_v32, %v1273_v36  ;;  %v3035_v47 = vcombine.high %v1266_v32, %v1273_v36  ;;  %v3037_v53 = vcombine.low %v1282_v44, %v1289_v45  ;;  %v3039_v60 = vcombine.high %v1282_v44, %v1289_v45 }
 0x429   : > { %v1919_v0 = vpack.c.bf16 %v1911_v63, %v1911_v63 }
 0x42a   : > { %v1313_v54 = vrot.slane %v3033_v46, %v3643_v23  ;;  %v1329_v61 = vrot.slane %v3035_v47, %v3643_v23  ;;  %v1345_v56 = vrot.slane %v3037_v53, %v3643_v23  ;;  %v1361_v57 = vrot.slane %v3039_v60, %v3643_v23 }
 0x42c   : > { %v1378_v24 = vcombine.low %v1313_v54, %v1329_v61  ;;  %v1410_v25 = vcombine.low %v1345_v56, %v1361_v57  ;;  %v1379_v58 = vcombine.high %v1313_v54, %v1329_v61  ;;  %v1411_v59 = vcombine.high %v1345_v56, %v1361_v57 }
 0x42e   : > { %v1386_v7 = vrot.slane %v1378_v24, %v3651_v28  ;;  %v1418_v42 = vrot.slane %v1410_v25, %v3651_v28  ;;  %v1393_v43 = vrot.slane %v1379_v58, %v3651_v28  ;;  %v1425_v48 = vrot.slane %v1411_v59, %v3651_v28 }
 0x430   : > { %v1430_v6 = vcombine.low %v1386_v7, %v1418_v42  ;;  %v1431_v50 = vcombine.high %v1386_v7, %v1418_v42  ;;  %v1432_v2 = vcombine.low %v1393_v43, %v1425_v48  ;;  %v1433_v9 = vcombine.high %v1393_v43, %v1425_v48 }
 0x432   : > { %v1926_v11 = vpack.c.bf16 %v1430_v6, %v1430_v6  ;;  %v1927_v12 = vpack.c.bf16 %v1431_v50, %v1431_v50  ;;  %v1928_v14 = vpack.c.bf16 %v1432_v2, %v1432_v2  ;;  %v1929_v15 = vpack.c.bf16 %v1433_v9, %v1433_v9 }
 0x434   : > { %v2119_v13 = vsel %vm1933_vm3, %v1926_v11, 0  ;;  %v2165_v51 = vsel %vm1933_vm3, %v1927_v12, 0  ;;  %v2211_v52 = vsel %vm1933_vm3, %v1928_v14, 0  ;;  %v2257_v55 = vsel %vm1933_vm3, %v1929_v15, 0 }
 0x435   : > { %3221 = vmatpush3.bf16.msra.mxu1 %v2119_v13  ;;  %3227 = vmatpush3.bf16.msra.mxu0 %v2165_v51 }
 0x436   : > { %3232 = vmatprep.subr.bf16.mxu1 %v3456_v1  ;;  %3238 = vmatprep.subr.bf16.mxu0 %v3456_v1 }
 0x438   : > { %3223 = vmatmul.mubr.msk.bf16.vlgmr.msra.gmra.mrb[20].mxu1 %vm1825_vm4, %v1918_v16  ;;  %3229 = vmatmul.mubr.msk.bf16.vlgmr.msra.gmra.mrb[32].mxu0 %vm1825_vm4, %v1919_v0 }
 0x439   : > { %3233 = vmatpush3.bf16.msra.mxu1 %v2211_v52  ;;  %3239 = vmatpush3.bf16.msra.mxu0 %v2257_v55 }
 0x43a   : > { %3240 = vmatprep.mubr.msk.bf16.mxu0 %vm3457_vm0, %v3456_v1  ;;  %3234 = vmatprep.mubr.msk.bf16.mxu1 %vm3457_vm0, %v3456_v1 }
 0x43b   : > { %3244 = vmatprep.subr.bf16.mxu1 %v3456_v1  ;;  %3252 = vmatprep.subr.bf16.mxu0 %v3456_v1 }
 0x448   : > { %v1897_v17 = vpop.xlane.xlu0 %1896 }
 0x449   : > { %3381 = vrcp.f32 %v1897_v17 }
 0x450   : > { %v1894_v62 = vpop.xlane.xlu1 %1893 }
 0x451   : > { %3383 = vrcp.f32 %v1894_v62 }
 0x453   : > { %v3382_v18 = vpop.eup %3381 }
 0x454   : > { %v1913_v19 = vmul.f32 %v3382_v18, %v3900_v5 }
 0x456   : > { %v1921_v20 = vpack.c.bf16 %v1913_v19, %v1913_v19 }
 0x458   : > { %3241 = vmatmul.mubr.msk.bf16.vlgmr.msra.gmra.mrb[36].mxu0 %vm1825_vm4, %v1921_v20 }
 0x459   : > { %3256 = vmatprep.mubr.msk.bf16.mxu0 %vm3457_vm0, %v3456_v1 }
 0x45b   : > { %v3384_v3 = vpop.eup %3383 }
 0x45c   : > { %v1912_v21 = vmul.f32 %v3384_v3, %v3904_v8 }
 0x45e   : > { %v1920_v22 = vpack.c.bf16 %v1912_v21, %v1912_v21 }
 0x460   : > { %3235 = vmatmul.mubr.msk.bf16.vlgmr.msra.gmra.mrb[24].mxu1 %vm1825_vm4, %v1920_v22 }
 0x461   : > { %3248 = vmatprep.mubr.msk.bf16.mxu1 %vm3457_vm0, %v3456_v1 }
 0x4e6   : > { %v1971_v26 = vpop.f32.mrb[12].mxu1 }
 0x4e7   : > { %v3200_v29 = vpop.f32.mrb[13].mxu1 }
 0x4e8   : > { %v1974_v30 = vpop.f32.mrb[14].mxu1 }
 0x4e9   : > { %v3201_v31 = vpop.f32.mrb[15].mxu1 }
 0x4ee   : > { %v2017_v5 = vpop.f32.mrb[24].mxu0  ;;  %v2063_v34 = vpop.f32.mrb[16].mxu1 }
 0x4ef   : > { %v2299_v35 = vcombine.low %v1971_v26, %v2063_v34  ;;  %v2300_v37 = vcombine.high %v1971_v26, %v2063_v34  ;;  %v3206_v38 = vpop.f32.mrb[25].mxu0  ;;  %v3212_v39 = vpop.f32.mrb[17].mxu1 }
 0x4f0   : > { %v2020_v27 = vpop.f32.mrb[26].mxu0  ;;  %v2066_v40 = vpop.f32.mrb[18].mxu1 }
 0x4f1   : > { %v3207_v33 = vpop.f32.mrb[27].mxu0  ;;  %v3213_v8 = vpop.f32.mrb[19].mxu1  ;;  %v2307_v46 = vrot.slane %v2299_v35, %v3643_v23  ;;  %v2314_v47 = vrot.slane %v2300_v37, %v3643_v23 }
 0x4f6   : > { %v2109_v41 = vpop.f32.mrb[28].mxu0 }
 0x4f7   : > { %v2315_v32 = vcombine.low %v2017_v5, %v2109_v41  ;;  %v2316_v36 = vcombine.high %v2017_v5, %v2109_v41  ;;  %v3218_v44 = vpop.f32.mrb[29].mxu0 }
 0x4f8   : > { %v2112_v45 = vpop.f32.mrb[30].mxu0 }
 0x4f9   : > { %v2323_v53 = vrot.slane %v2315_v32, %v3643_v23  ;;  %v2330_v60 = vrot.slane %v2316_v36, %v3643_v23  ;;  %v3219_v54 = vpop.f32.mrb[31].mxu0 }
 0x4fb   : > { %v2363_v61 = vcombine.low %v2307_v46, %v2323_v53  ;;  %v2364_v56 = vcombine.high %v2307_v46, %v2323_v53  ;;  %v2379_v57 = vcombine.low %v2314_v47, %v2330_v60  ;;  %v2380_v24 = vcombine.high %v2314_v47, %v2330_v60  ;;  %v3341_v46 = vld [vmem:[%s4163_s4] sm:$0xff]  }
 0x4fc   : > { %3245 = vmatpush3.bf16.msra.mxu1 %v3341_v46 }
 0x4fd   : > { %v2371_v25 = vrot.slane %v2363_v61, %v3651_v28  ;;  %v2378_v58 = vrot.slane %v2364_v56, %v3651_v28  ;;  %v2387_v59 = vrot.slane %v2379_v57, %v3651_v28  ;;  %v2394_v4 = vrot.slane %v2380_v24, %v3651_v28  ;;  %3246 = vmatprep.subr.bf16.mxu1 %v3456_v1 }
 0x4ff   : > { %v3057_v7 = vcombine.low %v2371_v25, %v2378_v58  ;;  %v3059_v42 = vcombine.high %v2371_v25, %v2378_v58  ;;  %v3061_v43 = vcombine.low %v2387_v59, %v2394_v4  ;;  %v3063_v48 = vcombine.high %v2387_v59, %v2394_v4 }
 0x501   : > { %v2443_v49 = vrot.slane %v3057_v7, %v3643_v23  ;;  %v2459_v6 = vrot.slane %v3059_v42, %v3643_v23  ;;  %v2475_v50 = vrot.slane %v3061_v43, %v3643_v23  ;;  %v2491_v2 = vrot.slane %v3063_v48, %v3643_v23  ;;  %v3342_v7 = vld [vmem:[%s4163_s4 + $0x8] sm:$0xff]   ;;  %s4094_s4 = scalar_lea.hbm %s4151_s14, %s3087_s20 }
 0x502   : > { %3247 = vmatpush3.bf16.msra.mxu1 %v3342_v7 }
 0x503   : > { %v2500_v9 = vcombine.high %v2443_v49, %v2459_v6  ;;  %v2532_v10 = vcombine.high %v2475_v50, %v2491_v2  ;;  %v2499_v63 = vcombine.low %v2443_v49, %v2459_v6  ;;  %v2531_v11 = vcombine.low %v2475_v50, %v2491_v2  ;;  %3260 = vmatprep.subr.bf16.mxu1 %v3456_v1 }
 0x505   : > { %v2514_v12 = vrot.slane %v2500_v9, %v3651_v28  ;;  %v2546_v13 = vrot.slane %v2532_v10, %v3651_v28  ;;  %v3983_v51 = vrot.slane %v2499_v63, %v3651_v28  ;;  %v3986_v14 = vrot.slane %v2531_v11, %v3651_v28 }
 0x507   : > { %v2565_v15 = vcombine.low %v2514_v12, %v2546_v13  ;;  %v2564_v16 = vcombine.high %v3983_v51, %v3986_v14  ;;  %v2566_v0 = vcombine.high %v2514_v12, %v2546_v13  ;;  %v2563_v52 = vcombine.low %v3983_v51, %v3986_v14 }
 0x509   : > { %2576 = vrot.lane.b32.xlu1 %v2565_v15, %s3469_s18  ;;  %2572 = vrot.lane.b32.xlu0 %v2564_v16, %s3470_s27  ;;  %s3473_s18 = smov 16   ;;  %s3474_s27 = smov 28  }
 0x50b   : > { %v2155_v55 = vpop.f32.mrb[20].mxu1  ;;  %v2201_v17 = vpop.f32.mrb[32].mxu0 }
 0x50c   : > { %v3224_v62 = vpop.f32.mrb[21].mxu1  ;;  %v3230_v18 = vpop.f32.mrb[33].mxu0 }
 0x50d   : > { %v2158_v19 = vpop.f32.mrb[22].mxu1  ;;  %2580 = vrot.lane.b32.xlu1 %v2566_v0, %s3471_s28  ;;  %v2204_v20 = vpop.f32.mrb[34].mxu0  ;;  %s3475_s28 = smov 24  }
 0x50e   : > { %v3225_v3 = vpop.f32.mrb[23].mxu1  ;;  %v3231_v21 = vpop.f32.mrb[35].mxu0 }
 0x52b   : > { %v2293_v22 = vpop.f32.mrb[36].mxu0 }
 0x52c   : > { %v2347_v26 = vcombine.low %v2201_v17, %v2293_v22  ;;  %v2348_v29 = vcombine.high %v2201_v17, %v2293_v22  ;;  %v3242_v30 = vpop.f32.mrb[37].mxu0 }
 0x52d   : > { %v2296_v31 = vpop.f32.mrb[38].mxu0 }
 0x52e   : > { %v3243_v5 = vpop.f32.mrb[39].mxu0  ;;  %v2355_v27 = vrot.slane %v2347_v26, %v3643_v23  ;;  %v2362_v40 = vrot.slane %v2348_v29, %v3643_v23  ;;  %v3391_v31 = vld [vmem:[%s3621_s26] sm:$0xff] }
 0x533   : > { %v2247_v34 = vpop.f32.mrb[24].mxu1 }
 0x534   : > { %v2331_v35 = vcombine.low %v2155_v55, %v2247_v34  ;;  %v2332_v37 = vcombine.high %v2155_v55, %v2247_v34  ;;  %v3236_v38 = vpop.f32.mrb[25].mxu1 }
 0x535   : > { %v2250_v39 = vpop.f32.mrb[26].mxu1 }
 0x536   : > { %v2339_v33 = vrot.slane %v2331_v35, %v3643_v23  ;;  %v2346_v8 = vrot.slane %v2332_v37, %v3643_v23  ;;  %v3237_v41 = vpop.f32.mrb[27].mxu1 }
 0x537   : > { %v3346_v41 = vld [vmem:[%s4147_s10 + $0x8] sm:$0xff]  }
 0x538   : > { %v2395_v32 = vcombine.low %v2339_v33, %v2355_v27  ;;  %v2396_v36 = vcombine.high %v2339_v33, %v2355_v27  ;;  %v2411_v44 = vcombine.low %v2346_v8, %v2362_v40  ;;  %v2412_v45 = vcombine.high %v2346_v8, %v2362_v40  ;;  %v3343_v40 = vld [vmem:[%s4145_s8] sm:$0xff]   ;;  %v3344_v33 = vld [vmem:[%s4145_s8 + $0x8] sm:$0xff]  }
 0x539   : > { %3253 = vmatpush3.bf16.msra.mxu0 %v3343_v40  ;;  %v3345_v8 = vld [vmem:[%s4147_s10] sm:$0xff]  }
 0x53a   : > { %v2403_v47 = vrot.slane %v2395_v32, %v3651_v28  ;;  %v2410_v53 = vrot.slane %v2396_v36, %v3651_v28  ;;  %v2419_v60 = vrot.slane %v2411_v44, %v3651_v28  ;;  %v2426_v54 = vrot.slane %v2412_v45, %v3651_v28  ;;  %3254 = vmatprep.subr.bf16.mxu0 %v3456_v1  ;;  %v3347_v32 = vld [vmem:[%s4147_s10 + $0x10] sm:$0xff]  }
 0x53c   : > { %v3058_v61 = vcombine.low %v2403_v47, %v2410_v53  ;;  %v3060_v56 = vcombine.high %v2403_v47, %v2410_v53  ;;  %v3062_v57 = vcombine.low %v2419_v60, %v2426_v54  ;;  %v3064_v24 = vcombine.high %v2419_v60, %v2426_v54  ;;  %v3069_v47 = vld [vmem:[%s4143_s6] ss:$0 sm:$0xff] }
 0x53d   : > { %3255 = vmatpush3.bf16.msra.mxu0 %v3344_v33  ;;  %v3070_v60 = vld [vmem:[%s4144_s7] ss:$0 sm:$0xff] }
 0x53e   : > { %v2450_v25 = vrot.slane %v3058_v61, %v3643_v23  ;;  %v2466_v58 = vrot.slane %v3060_v56, %v3643_v23  ;;  %v2482_v59 = vrot.slane %v3062_v57, %v3643_v23  ;;  %v2498_v4 = vrot.slane %v3064_v24, %v3643_v23  ;;  %v3348_v57 = vld [vmem:[%s4147_s10 + $0x18] sm:$0xff]   ;;  %v3349_v24 = vld [vmem:[%s4147_s10 + $0x20] sm:$0xff]  }
 0x540   : > { %v2515_v42 = vcombine.low %v2450_v25, %v2466_v58  ;;  %v2547_v43 = vcombine.low %v2482_v59, %v2498_v4  ;;  %v2516_v48 = vcombine.high %v2450_v25, %v2466_v58  ;;  %v2548_v49 = vcombine.high %v2482_v59, %v2498_v4  ;;  %v3350_v25 = vld [vmem:[%s4147_s10 + $0x28] sm:$0xff]   ;;  %v3351_v58 = vld [vmem:[%s4147_s10 + $0x30] sm:$0xff]   ;;  %v3352_v59 = vld [vmem:[%s4147_s10 + $0x38] sm:$0xff]  }
 0x541   : > { %v3071_v4 = vld [vmem:[%s4146_s9] ss:$0 sm:$0xff] }
 0x542   : > { %v2523_v6 = vrot.slane %v2515_v42, %v3651_v28  ;;  %v2555_v50 = vrot.slane %v2547_v43, %v3651_v28  ;;  %v2530_v2 = vrot.slane %v2516_v48, %v3651_v28  ;;  %v2562_v9 = vrot.slane %v2548_v49, %v3651_v28 }
 0x544   : > { %v2568_v23 = vcombine.high %v2523_v6, %v2555_v50  ;;  %v2567_v10 = vcombine.low %v2523_v6, %v2555_v50  ;;  %v2570_v63 = vcombine.high %v2530_v2, %v2562_v9  ;;  %v2569_v11 = vcombine.low %v2530_v2, %v2562_v9 }
 0x546   : > { %2588 = vrot.lane.b32.xlu1 %v2568_v23, %s3472_s25  ;;  %2584 = vrot.lane.b32.xlu0 %v2567_v10, %s3473_s18  ;;  %v3075_v10 = vld [vmem:[%s4148_s11] ss:$0 sm:$0xff]  ;;  %s3010_s25 = sshll.u32 %s467_s21, 3  ;;  %s2925_s18 = scalar_lea.sflag [#allocation3], %s467_s21 }
 0x547   : > { %s469_s0 = scalar_lea.vmem [#allocation2], %s3010_s25  ;;  %s3396_s25 = sshll.u32 %s3476_s17, 4  ;;  %s3397_s25 = int_to_ptr.vmem [resolvable:$false] %s3396_s25 }
 0x548   : > { %s2938_s2 = sshll.u32 %s469_s0, 4  ;;  %s4096_s2 = int_to_ptr.vmem [resolvable:$true] %s2938_s2 }
 0x549   : > { %s3392_s26 = scalar_lea.vmem %s4096_s2, 128  ;;  %p3399_p0 = scmp.lt.s32.totalorder %s4096_s2, %s3397_s25 }
 0x54a   : > { %2596 = vrot.lane.b32.xlu1 %v2570_v63, %s3474_s27  ;;  %2592 = vrot.lane.b32.xlu0 %v2569_v11, %s3475_s28  ;;  %p3393_p11 = scmp.ne.s32.totalorder %s4096_s2, %s3392_s26  ;;  %s3398_s27 = scalar_lea.vmem %s3397_s25, 256 }
 0x54b   : > { %p3400_p1 = scmp.lt.s32.totalorder %s3398_s27, %s3392_s26 }
 0x54c   : > { %p3394_p12 = pnand %p3393_p11, %p3590_p5 }
 0x54d   : > { %p3401_p2 = por %p3400_p1, %p3399_p0 }
 0x54e   : > { %p3395_p13 = pneg %p3394_p12 }
 0x550   : > { %p3402_p3 = pnand %p3401_p2, %p3395_p13 }
 0x57b   : > { %v2577_v12 = vpop.permute.xlu1 %2576  ;;  %v2573_v13 = vpop.permute.xlu0 %2572 }
 0x57c   : > { %v2599_v28 = vsel %vm1456_vm2, %v2563_v52, %v2573_v13  ;;  %v3065_v52 = vld [vmem:[%s4142_s5] ss:$0 sm:$0xff] }
 0x57d   : > { %v2600_v16 = vsel %vm1825_vm4, %v2599_v28, %v2577_v12 }
 0x57f   : > { %v2581_v15 = vpop.permute.xlu1 %2580 }
 0x580   : > { %v2602_v0 = vsel %vm2601_vm5, %v2600_v16, %v2581_v15 }
 0x5b8   : > { %v2589_v55 = vpop.permute.xlu1 %2588  ;;  %v2585_v17 = vpop.permute.xlu0 %2584 }
 0x5b9   : > { %v2604_v62 = vsel %vm2603_vm6, %v2602_v0, %v2585_v17 }
 0x5ba   : > { %v2606_v19 = vsel %vm2605_vm7, %v2604_v62, %v2589_v55 }
 0x5bc   : > { %v2597_v18 = vpop.permute.xlu1 %2596  ;;  %v2593_v20 = vpop.permute.xlu0 %2592 }
 0x5bd   : > { %v2608_v3 = vsel %vm2607_vm8, %v2606_v19, %v2593_v20 }
 0x5be   : > { %v2610_v51 = vsel %vm2609_vm9, %v2608_v3, %v2597_v18 }
 0x5bf   : > { %v2611_v14 = vpack.c.bf16 %v2610_v51, %v2610_v51 }
 0x5c1   : > { %3249 = vmatmul.mubr.msk.bf16.vlgmr.msra.gmra.mrb[28].mxu1 %vm504_vm1, %v2611_v14  ;;  %v3084_v14 = vld [vmem:[%s4149_s12] ss:$0 sm:$0xff] }
 0x5c2   : > { %3276 = vmatprep.mubr.msk.bf16.mxu1 %vm3457_vm0, %v3456_v1  ;;  %3261 = vmatpush3.bf16.msra.mxu1 %v3345_v8 }
 0x5c3   : > { %3262 = vmatprep.subr.bf16.mxu1 %v3456_v1 }
 0x5c6   : > { %3263 = vmatpush3.bf16.msra.mxu1 %v3346_v41 }
 0x5c7   : > { %3264 = vmatprep.subr.bf16.mxu1 %v3456_v1 }
 0x5ca   : > { %3265 = vmatpush3.bf16.msra.mxu1 %v3347_v32 }
 0x5cb   : > { %3266 = vmatprep.subr.bf16.mxu1 %v3456_v1 }
 0x5ce   : > { %3267 = vmatpush3.bf16.msra.mxu1 %v3348_v57 }
 0x5cf   : > { %3268 = vmatprep.subr.bf16.mxu1 %v3456_v1 }
 0x5d2   : > { %3269 = vmatpush3.bf16.msra.mxu1 %v3349_v24 }
 0x5d3   : > { %3270 = vmatprep.subr.bf16.mxu1 %v3456_v1 }
 0x5d6   : > { %3271 = vmatpush3.bf16.msra.mxu1 %v3350_v25 }
 0x5d7   : > { %3272 = vmatprep.subr.bf16.mxu1 %v3456_v1 }
 0x5da   : > { %3273 = vmatpush3.bf16.msra.mxu1 %v3351_v58 }
 0x5db   : > { %3274 = vmatprep.subr.bf16.mxu1 %v3456_v1 }
 0x5de   : > { %3275 = vmatpush3.bf16.msra.mxu1 %v3352_v59 }
 0x694   : > { %v2672_v21 = vpop.f32.mrb[28].mxu1 }
 0x695   : > { %v2673_v22 = vadd.f32 %v3065_v52, %v2672_v21  ;;  %v3250_v26 = vpop.f32.mrb[29].mxu1  ;;  %v3085_v21 = vld [vmem:[%s4150_s13] ss:$0 sm:$0xff] }
 0x696   : > { %v2675_v29 = vpop.f32.mrb[30].mxu1 }
 0x697   : > { %v3251_v30 = vpop.f32.mrb[31].mxu1  ;;  %v2678_v5 = vadd.f32 %v3391_v31, %v2673_v22 }
 0x699   : > { %v2681_v34 = vsel %vm504_vm1, %v2678_v5, 0.0 }
 0x69a   : > { %2682 = vadd.xlane.f32.xlu0 %v2681_v34 }
 0x727   : > { %v2683_v35 = vpop.xlane.xlu0 %2682 }
 0x728   : > { %v2685_v37 = vmul.f32 0.03125, %v2683_v35 }
 0x72a   : > { %v2686_v38 = vsub.f32 %v2678_v5, %v2685_v37 }
 0x72c   : > { %v2687_v39 = vmul.f32 %v2686_v38, %v2686_v38 }
 0x72e   : > { %v2688_v27 = vsel %vm504_vm1, %v2687_v39, 0.0 }
 0x72f   : > { %2689 = vadd.xlane.f32.xlu1 %v2688_v27 }
 0x7bc   : > { %v2690_v36 = vpop.xlane.xlu1 %2689 }
 0x7bd   : > { %v2691_v44 = vmul.f32 0.03125, %v2690_v36 }
 0x7bf   : > { %v2692_v45 = vadd.f32 1e-05, %v2691_v44 }
 0x7c1   : > { %3385 = vrsqrt.f32 %v2692_v45 }
 0x7cb   : > { %v3386_v46 = vpop.eup %3385 }
 0x7cc   : > { %v2694_v53 = vmul.f32 %v3386_v46, %v2686_v38 }
 0x7ce   : > { %v2701_v54 = vmul.f32 %v3069_v47, %v2694_v53 }
 0x7d0   : > { %v2708_v61 = vadd.f32 %v3070_v60, %v2701_v54 }
 0x7d2   : > { %v2709_v56 = vpack.c.bf16 %v2708_v61, %v2708_v61 }
 0x7d4   : > { %3257 = vmatmul.mubr.msk.bf16.vlgmr.msra.gmra.mrb[40].mxu0 %vm504_vm1, %v2709_v56 }
 0x8a7   : > { %v2770_v7 = vpop.f32.mrb[40].mxu0 }
 0x8a8   : > { %v2771_v42 = vadd.f32 %v3071_v4, %v2770_v7  ;;  %v3258_v43 = vpop.f32.mrb[41].mxu0 }
 0x8a9   : > { %v2773_v48 = vpop.f32.mrb[42].mxu0 }
 0x8aa   : > { %v2776_v49 = vmul.f32 0.70710677, %v2771_v42  ;;  %v3259_v6 = vpop.f32.mrb[43].mxu0  ;;  %v2778_v2 = vmul.f32 0.5, %v2771_v42 }
 0x8ac   : > { %3387 = verf.f32 %v2776_v49 }
 0x8b6   : > { %v3388_v50 = vpop.eup %3387 }
 0x8b7   : > { %v2779_v9 = vadd.f32 1.0, %v3388_v50 }
 0x8b9   : > { %v2780_v1 = vmul.f32 %v2779_v9, %v2778_v2 }
 0x8bb   : > { %v2781_v23 = vpack.c.bf16 %v2780_v1, %v2780_v1 }
 0x8bd   : > { %3277 = vmatmul.mubr.bf16.vlgmr.msra.gmra.mrb[32].mxu1 %v2781_v23 }
 0x990   : > { %v2887_v63 = vpop.f32.mrb[32].mxu1 }
 0x991   : > { %v2888_v11 = vadd.f32 %v3075_v10, %v2887_v63  ;;  %v3278_v12 = vpop.f32.mrb[33].mxu1 }
 0x992   : > { %v2890_v13 = vpop.f32.mrb[34].mxu1 }
 0x993   : > { %v3279_v28 = vpop.f32.mrb[35].mxu1  ;;  %v2893_v15 = vadd.f32 %v2888_v11, %v2708_v61 }
 0x995   : > { %v2896_v16 = vsel %vm504_vm1, %v2893_v15, 0.0 }
 0x996   : > { %2897 = vadd.xlane.f32.xlu0 %v2896_v16 }
 0xa23   : > { %v2898_v0 = vpop.xlane.xlu0 %2897 }
 0xa24   : > { %v2899_v55 = vmul.f32 0.03125, %v2898_v0 }
 0xa26   : > { %v2900_v17 = vsub.f32 %v2893_v15, %v2899_v55 }
 0xa28   : > { %v2901_v62 = vmul.f32 %v2900_v17, %v2900_v17 }
 0xa2a   : > { %v2902_v18 = vsel %vm504_vm1, %v2901_v62, 0.0 }
 0xa2b   : > { %2903 = vadd.xlane.f32.xlu0 %v2902_v18 }
 0xab8   : > { %v2904_v19 = vpop.xlane.xlu0 %2903 }
 0xab9   : > { %v2905_v20 = vmul.f32 0.03125, %v2904_v19 }
 0xabb   : > { %v2906_v3 = vadd.f32 1e-05, %v2905_v20 }
 0xabd   : > { %3389 = vrsqrt.f32 %v2906_v3 }
 0xac7   : > { %v3390_v51 = vpop.eup %3389 }
 0xac8   : > { %v2908_v52 = vmul.f32 %v3390_v51, %v2900_v17 }
 0xaca   : > { %v2915_v22 = vmul.f32 %v3084_v14, %v2908_v52 }
 0xacc   : > { %v2922_v26 = vadd.f32 %v3085_v21, %v2915_v22 }
 0xace   : > { %2923 = vst.msk [vmem:[%s469_s0] sm:$0xff] %vm504_vm1, %v2922_v26 }
 0xacf   : > { %3405 = shalt.err (!%p3402_p3)
}
 0xad0   : > { %s3406_s1 = scalar_lea.hbm %s4094_s4, 128  ;;  %s3410_s28 = scalar_lea.hbm %s4151_s14, 256 }
 0xad1   : > { %p3407_p4 = scmp.ne.s32.totalorder %s4094_s4, %s3406_s1  ;;  %p3411_p9 = scmp.lt.u32.totalorder %s4094_s4, %s4151_s14 }
 0xad2   : > { %p3412_p10 = scmp.lt.u32.totalorder %s3410_s28, %s3406_s1  ;;  %p3414_p12 = scmp.lt.u32.totalorder %s3406_s1, %s4094_s4 }
 0xad3   : > { %p3408_p7 = pnand %p3407_p4, %p3590_p5 }
 0xad4   : > { %p3413_p11 = por %p3412_p10, %p3411_p9 }
 0xad5   : > { %p3409_p8 = pneg %p3408_p7 }
 0xad6   : > { %p3415_p13 = por %p3414_p12, %p3413_p11 }
 0xad8   : > { %p3416_p0 = pnand %p3415_p13, %p3409_p8 }
 0xada   : > { %3419 = shalt.err (!%p3416_p0)
}
 0xadb   : > { %3280 = dma.vmem_to_hbm [thread:$0]  (%p3590_p5), %s4096_s2, 128, %s4094_s4, %s2925_s18  }
 0xadc PF: > { %p3286_p1 = scmp.ge.s32.totalorder %s3454_s16, 2  ;;  %s2950_s26 = sand.u32 1, %s3442_s29  }
 0xadd   : > { %s2951_s17 = scalar_lea.sflag [#allocation3], %s2950_s26 }
 0xade   : > { %p3283_p2 = pnand %p3286_p1, %p3594_p6 }
 0xae0   : > { %3437 = dma.done.wait (!%p3283_p2), %s2951_s17, 128  }
 0xae1   : > { %3439 = vsyncadd (!%p3283_p2), %s2951_s17, 4294967168  ;;  %p24_p3 = scmp.ge.s32.totalorder %s3577_s19, 4   ;;  %s4164_s29 = smov %s3446_s30 }
 0xae2   : > { %s4165_s30 = smov %s3450_s15  ;;  %s4166_s15 = smov %s3588_s22 }
 0xae3   : > { %s4167_s16 = smov %s3577_s19  ;;  %26 = sbr.rel (!%p24_p3) target bundleno = 9 (0x9), region = 114 }
 0xaea   :  { %2956 = vsyncpa [#allocation3], 1 }
 0xaeb   :  { %2958 = vsyncpa [#allocation3 + $0x1], 1 }

// kernel: tpu_custom_call.1
= control target key start
LH: loop header
LB: loop body
LE: loop exit
PB: predicated region body
PF: predicated region fallthrough
CT: control target
= control target key end

     0   :  { %s2788_s0 = inlined_call_operand.vmem [shape: f32[2,8,32], index: 0, kind: input, shape index: {}]   ;;  %s2789_s1 = inlined_call_operand.vmem [shape: f32[2,1,8], index: 1, kind: input, shape index: {}]   ;;  %s2790_s2 = inlined_call_operand.vmem [shape: bf16[32,96], index: 2, kind: input, shape index: {}]   ;;  %s2791_s3 = inlined_call_operand.vmem [shape: f32[1,96], index: 3, kind: input, shape index: {}]   ;;  %s2792_s4 = inlined_call_operand.vmem [shape: bf16[32,32], index: 4, kind: input, shape index: {}]   ;;  %s2793_s5 = inlined_call_operand.vmem [shape: f32[1,32], index: 5, kind: input, shape index: {}]   ;;  %s2794_s6 = inlined_call_operand.vmem [shape: f32[1,32], index: 6, kind: input, shape index: {}]   ;;  %s2795_s7 = inlined_call_operand.vmem [shape: f32[1,32], index: 7, kind: input, shape index: {}]   ;;  %s2796_s8 = inlined_call_operand.vmem [shape: bf16[32,128], index: 8, kind: input, shape index: {}]   ;;  %s2797_s9 = inlined_call_operand.vmem [shape: f32[1,128], index: 9, kind: input, shape index: {}]   ;;  %s2798_s10 = inlined_call_operand.vmem [shape: bf16[128,32], index: 10, kind: input, shape index: {}]   ;;  %s2799_s11 = inlined_call_operand.vmem [shape: f32[1,32], index: 11, kind: input, shape index: {}]   ;;  %s2800_s12 = inlined_call_operand.vmem [shape: f32[1,32], index: 12, kind: input, shape index: {}]   ;;  %s2801_s13 = inlined_call_operand.vmem [shape: f32[1,32], index: 13, kind: input, shape index: {}]   ;;  %s2802_s14 = inlined_call_operand.hbm [shape: f32[2,8,32], index: 14, kind: output, shape index: {}]  }
   0x1   :  { %2803 = sst [smem:[#allocation6_spill]] %s2788_s0 }
   0x2   :  { %2804 = sst [smem:[#allocation7_spill]] %s2789_s1 }
   0x3   :  { %2805 = sst [smem:[#allocation8_spill]] %s2790_s2 }
   0x4   :  { %2806 = sst [smem:[#allocation9_spill]] %s2791_s3 }
   0x5   :  { %2807 = sst [smem:[#allocation10_spill]] %s2792_s4 }
   0x6   :  { %19 = vsyncpa [#allocation4], 0 }
   0x7   :  { %21 = vsyncpa [#allocation4 + $0x1], 0  ;;  %s2413_s29 = smov 0   ;;  %s2415_s30 = smov 0  }
   0x8   :  { %s2417_s15 = smov 0   ;;  %s2419_s16 = smov 0  }
   0x9 LB: > { %s2434_s17 = sadd.s32 4294967295, %s2303_s16   ;;  %s1876_s18 = sadd.s32 4294967294, %s2303_s16   ;;  %s2303_s16 = sphi %s2419_s16, %s2818_s16   ;;  %s2299_s15 = sphi %s2417_s15, %s2817_s15   ;;  %s2295_s30 = sphi %s2415_s30, %s2816_s30   ;;  %s2291_s29 = sphi %s2413_s29, %s2815_s29  }
   0xa   : > { %s2438_s19 = sadd.s32 1, %s2303_s16   ;;  %s338_s20 = sadd.s32 1, %s2299_s15 }
   0xb   : > { %s335_s21 = ssub.s32 %s2303_s16, %s2438_s19  ;;  %p348_p0 = scmp.ne.s32.totalorder %s2299_s15, %s2295_s30 }
   0xc   : > { %p336_p1 = scmp.eq.s32.totalorder %s335_s21, 0  ;;  %p349_p2 = scmp.eq.s32.totalorder %s2434_s17, 1 }
   0xd   : > { %p354_p3 = scmp.ne.s32.totalorder %s2295_s30, %s2291_s29  ;;  %p355_p4 = scmp.eq.s32.totalorder %s1876_s18, 1 }
   0xe   : > { %s2449_s22 = scalar_select %p336_p1, %s2299_s15, %s338_s20  }
   0xf   : > { %p2451_p5 = por %p349_p2, %p348_p0  ;;  %p2455_p6 = por %p355_p4, %p354_p3 }
  0x10   : > { %p1879_p7 = scmp.ge.s32.totalorder %s2303_s16, 1  ;;  %p422_p8 = scmp.lt.s32.totalorder %s2303_s16, 3 }
  0x12   : > { %p423_p9 = pnand %p1879_p7, %p422_p8 }
  0x13   : > { %s2810_s2 = sld [smem:[#allocation8_spill]] (!%p423_p9)  ;;  %v2305_v1 = vmov (!%p423_p9), 0.0   ;;  %vm2306_vm0 = vmmov (!%p423_p9), 0   ;;  %p470_p10 = scmp.lt.s32.totalorder (!%p423_p9), %s2434_s17, 1  ;;  %vm504_vm1 = vcmask (!%p423_p9), 261120   ;;  %vm558_vm2 = vcmask (!%p423_p9), 31744  }
  0x14   : > { %426 = sbr.rel (%p423_p9) target bundleno = 2653 (0xa5d), region = 76  ;;  %1978 = vmatprep.subr.bf16.mxu0 (!%p423_p9), %v2305_v1  ;;  %1998 = vmatprep.subr.bf16.mxu1 (!%p423_p9), %v2305_v1  ;;  %s2811_s0 = sld [smem:[#allocation6_spill]] (!%p423_p9)  ;;  %vm605_vm3 = vcmask (!%p423_p9), 64512   ;;  %vm623_vm4 = vcmask (!%p423_p9), 1043456   ;;  %vm782_vm5 = vcmask (!%p423_p9), 64544   ;;  %vm898_vm6 = vcmask (!%p423_p9), 97344  }
  0x15   : > { %1982 = vmatprep.mubr.msk.bf16.mxu0 (!%p423_p9), %vm2306_vm0, %v2305_v1  ;;  %2000 = vmatprep.mubr.msk.bf16.mxu1 (!%p423_p9), %vm2306_vm0, %v2305_v1  ;;  %s2812_s3 = sld [smem:[#allocation9_spill]] (!%p423_p9)  ;;  %s2308_s21 = smov (!%p423_p9), 96   ;;  %vm1014_vm7 = vcmask (!%p423_p9), 130144   ;;  %vm1130_vm8 = vcmask (!%p423_p9), 162944   ;;  %vm1246_vm9 = vcmask (!%p423_p9), 195744   ;;  %vm1362_vm10 = vcmask (!%p423_p9), 228544  }
  0x16   : > { %s2309_s25 = smov (!%p423_p9), 88   ;;  %s2311_s27 = smov (!%p423_p9), 84   ;;  %vm1478_vm11 = vcmask (!%p423_p9), 261344  }
  0x17   : > { %s2312_s28 = smov (!%p423_p9), 120   ;;  %s2813_s1 = sld [smem:[#allocation7_spill]] (!%p423_p9) }
  0x18   : > { %s2814_s4 = sld [smem:[#allocation10_spill]] (!%p423_p9) }
  0x19   : > { %v2189_v0 = vld [vmem:[%s2810_s2] sm:$0xff] (!%p423_p9)   ;;  %v2190_v2 = vld [vmem:[%s2810_s2 + $0x8] sm:$0xff] (!%p423_p9)   ;;  %s2314_s2 = smov (!%p423_p9), 116  }
  0x1a   : > { %1979 = vmatpush3.bf16.msra.mxu0 (!%p423_p9), %v2189_v0 }
  0x1b   : > { %1980 = vmatprep.subr.bf16.mxu0 %v2305_v1  ;;  %s2476_s18 = scalar_select %p470_p10, %s2434_s17, 1  ;;  %v1882_v5 = vld [vmem:[%s2812_s3] ss:$0 sm:$0xff] }
  0x1d   : > { %s1881_s20 = sshll.u32 %s2476_s18, 3 }
  0x1e   : > { %1981 = vmatpush3.bf16.msra.mxu0 %v2190_v2  ;;  %s473_s26 = scalar_lea.vmem %s2811_s0, %s1881_s20  ;;  %s2307_s20 = smov 124  }
  0x1f   : > { %1986 = vmatprep.subr.bf16.mxu0 %v2305_v1  ;;  %v2483_v3 = vld [vmem:[%s473_s26] sm:$0xff]  ;;  %s2310_s26 = smov 92   ;;  %s2313_s0 = smov 80  }
  0x20   : > { %v480_v4 = vpack.c.bf16 %v2483_v3, %v2483_v3 }
  0x22   : > { %1983 = vmatmul.mubr.msk.bf16.vlgmr.msra.gmra.mrb[0].mxu0 %vm504_vm1, %v480_v4 }
  0x23   : > { %1988 = vmatprep.mubr.msk.bf16.mxu0 %vm2306_vm0, %v2305_v1 }
  0xf5   : > { %v542_v6 = vpop.f32.mrb[0].mxu0 }
  0xf6   : > { %v543_v7 = vadd.f32 %v1882_v5, %v542_v6  ;;  %v1984_v8 = vpop.f32.mrb[1].mxu0 }
  0xf7   : > { %v545_v9 = vpop.f32.mrb[2].mxu0 }
  0xf8   : > { %v2493_v10 = vpack.c.bf16 %v543_v7, %v543_v7  ;;  %v1985_v11 = vpop.f32.mrb[3].mxu0 }
  0xfa   : > { %668 = vrot.lane.b32.xlu1 %v2493_v10, %s2307_s20  ;;  %556 = vrot.lane.b32.xlu0 %v2493_v10, %s2308_s21  ;;  %s2315_s20 = smov 76   ;;  %s2316_s21 = smov 112  }
  0xfe   : > { %786 = vrot.lane.b32.xlu1 %v2493_v10, %s2309_s25  ;;  %670 = vrot.lane.b32.xlu0 %v2493_v10, %s2310_s26  ;;  %s2317_s25 = smov 72   ;;  %s2318_s26 = smov 108  }
 0x102   : > { %902 = vrot.lane.b32.xlu1 %v2493_v10, %s2311_s27  ;;  %784 = vrot.lane.b32.xlu0 %v2493_v10, %s2312_s28  ;;  %s2319_s27 = smov 68   ;;  %s2320_s28 = smov 104  }
 0x106   : > { %1018 = vrot.lane.b32.xlu1 %v2493_v10, %s2313_s0  ;;  %900 = vrot.lane.b32.xlu0 %v2493_v10, %s2314_s2  ;;  %s2321_s0 = smov 100   ;;  %s2328_s2 = smov 36  }
 0x10a   : > { %1134 = vrot.lane.b32.xlu1 %v2493_v10, %s2315_s20  ;;  %1016 = vrot.lane.b32.xlu0 %v2493_v10, %s2316_s21  ;;  %s476_s21 = scalar_lea.vmem %s2813_s1, %s2476_s18  ;;  %s2322_s18 = smov 60  }
 0x10b   : > { %v1886_v35 = vld [vmem:[%s476_s21] ss:$0 sm:$0xff]  ;;  %s2329_s20 = smov 48   ;;  %s2330_s21 = smov 4  }
 0x10e   : > { %1250 = vrot.lane.b32.xlu1 %v2493_v10, %s2317_s25  ;;  %1132 = vrot.lane.b32.xlu0 %v2493_v10, %s2318_s26  ;;  %s2323_s25 = smov 64   ;;  %s2324_s26 = smov 56  }
 0x112   : > { %1366 = vrot.lane.b32.xlu1 %v2493_v10, %s2319_s27  ;;  %1248 = vrot.lane.b32.xlu0 %v2493_v10, %s2320_s28  ;;  %s2325_s27 = smov 52   ;;  %s2326_s28 = smov 44  }
 0x116   : > { %1364 = vrot.lane.b32.xlu0 %v2493_v10, %s2321_s0  ;;  %s2327_s0 = smov 40  }
 0x16c   : > { %v557_v12 = vpop.permute.xlu0 %556  ;;  %v669_v14 = vpop.permute.xlu1 %668 }
 0x16d   : > { %v563_v13 = vsel %vm558_vm2, %v557_v12, 0 }
 0x16e   : > { %1987 = vmatpush3.bf16.xpose.msra.mxu0 %v563_v13 }
 0x16f   : > { %1992 = vmatprep.subr.bf16.mxu0 %v2305_v1 }
 0x170   : > { %v671_v15 = vpop.permute.xlu0 %670  ;;  %v787_v17 = vpop.permute.xlu1 %786 }
 0x171   : > { %v676_v16 = vsel %vm558_vm2, %v671_v15, 0  ;;  %v792_v18 = vsel %vm558_vm2, %v787_v17, 0 }
 0x172   : > { %1999 = vmatpush3.bf16.xpose.msra.mxu1 %v676_v16 }
 0x173   : > { %2010 = vmatprep.subr.bf16.mxu1 %v2305_v1 }
 0x174   : > { %v903_v19 = vpop.permute.xlu1 %902  ;;  %v785_v20 = vpop.permute.xlu0 %784 }
 0x175   : > { %1989 = vmatmul.mubr.msk.bf16.vlgmr.msra.gmra.mrb[4].mxu0 %vm558_vm2, %v2493_v10  ;;  %v908_v21 = vsel %vm558_vm2, %v903_v19, 0 }
 0x176   : > { %1994 = vmatprep.mubr.msk.bf16.mxu0 %vm2306_vm0, %v2305_v1 }
 0x178   : > { %v1019_v22 = vpop.permute.xlu1 %1018  ;;  %v901_v23 = vpop.permute.xlu0 %900 }
 0x179   : > { %2001 = vmatmul.mubr.msk.bf16.vlgmr.msra.gmra.mrb[0].mxu1 %vm558_vm2, %v669_v14  ;;  %v1024_v24 = vsel %vm558_vm2, %v1019_v22, 0 }
 0x17a   : > { %2011 = vmatpush3.bf16.xpose.msra.mxu1 %v792_v18  ;;  %2012 = vmatprep.mubr.msk.bf16.mxu1 %vm2306_vm0, %v2305_v1 }
 0x17b   : > { %2022 = vmatprep.subr.bf16.mxu1 %v2305_v1 }
 0x17c   : > { %v1135_v25 = vpop.permute.xlu1 %1134  ;;  %v1017_v26 = vpop.permute.xlu0 %1016 }
 0x17d   : > { %v1140_v27 = vsel %vm558_vm2, %v1135_v25, 0 }
 0x180   : > { %v1251_v28 = vpop.permute.xlu1 %1250  ;;  %v1133_v29 = vpop.permute.xlu0 %1132 }
 0x181   : > { %2013 = vmatmul.mubr.msk.bf16.vlgmr.msra.gmra.mrb[4].mxu1 %vm558_vm2, %v785_v20  ;;  %v1256_v30 = vsel %vm558_vm2, %v1251_v28, 0 }
 0x182   : > { %2023 = vmatpush3.bf16.xpose.msra.mxu1 %v908_v21  ;;  %2024 = vmatprep.mubr.msk.bf16.mxu1 %vm2306_vm0, %v2305_v1 }
 0x183   : > { %2034 = vmatprep.subr.bf16.mxu1 %v2305_v1 }
 0x184   : > { %v1367_v31 = vpop.permute.xlu1 %1366  ;;  %v1249_v32 = vpop.permute.xlu0 %1248 }
 0x185   : > { %v1372_v33 = vsel %vm558_vm2, %v1367_v31, 0 }
 0x188   : > { %v1365_v34 = vpop.permute.xlu0 %1364 }
 0x189   : > { %2025 = vmatmul.mubr.msk.bf16.vlgmr.msra.gmra.mrb[8].mxu1 %vm558_vm2, %v901_v23 }
 0x18a   : > { %2035 = vmatpush3.bf16.xpose.msra.mxu1 %v1024_v24  ;;  %2036 = vmatprep.mubr.msk.bf16.mxu1 %vm2306_vm0, %v2305_v1 }
 0x18b   : > { %2046 = vmatprep.subr.bf16.mxu1 %v2305_v1 }
 0x191   : > { %2037 = vmatmul.mubr.msk.bf16.vlgmr.msra.gmra.mrb[12].mxu1 %vm558_vm2, %v1017_v26 }
 0x192   : > { %2047 = vmatpush3.bf16.xpose.msra.mxu1 %v1140_v27  ;;  %2048 = vmatprep.mubr.msk.bf16.mxu1 %vm2306_vm0, %v2305_v1 }
 0x193   : > { %2058 = vmatprep.subr.bf16.mxu1 %v2305_v1 }
 0x199   : > { %2049 = vmatmul.mubr.msk.bf16.vlgmr.msra.gmra.mrb[16].mxu1 %vm558_vm2, %v1133_v29 }
 0x19a   : > { %2059 = vmatpush3.bf16.xpose.msra.mxu1 %v1256_v30  ;;  %2060 = vmatprep.mubr.msk.bf16.mxu1 %vm2306_vm0, %v2305_v1 }
 0x19b   : > { %2070 = vmatprep.subr.bf16.mxu1 %v2305_v1 }
 0x1a1   : > { %2061 = vmatmul.mubr.msk.bf16.vlgmr.msra.gmra.mrb[20].mxu1 %vm558_vm2, %v1249_v32 }
 0x1a2   : > { %2071 = vmatpush3.bf16.xpose.msra.mxu1 %v1372_v33  ;;  %2072 = vmatprep.mubr.msk.bf16.mxu1 %vm2306_vm0, %v2305_v1 }
 0x1a3   : > { %2082 = vmatprep.subr.bf16.mxu1 %v2305_v1 }
 0x1a9   : > { %2073 = vmatmul.mubr.msk.bf16.vlgmr.msra.gmra.mrb[24].mxu1 %vm558_vm2, %v1365_v34 }
 0x1aa   : > { %2086 = vmatprep.mubr.msk.bf16.mxu1 %vm2306_vm0, %v2305_v1 }
 0x248   : > { %v599_v36 = vpop.f32.mrb[4].mxu0 }
 0x249   : > { %v2555_v37 = vadd.f32 %v1886_v35, %v599_v36  ;;  %v1990_v38 = vpop.f32.mrb[5].mxu0 }
 0x24a   : > { %v602_v39 = vpop.f32.mrb[6].mxu0 }
 0x24b   : > { %v1991_v40 = vpop.f32.mrb[7].mxu0  ;;  %v606_v41 = vsel %vm605_vm3, %v2555_v37, -inf }
 0x24c   : > { %v712_v42 = vpop.f32.mrb[0].mxu1  ;;  %607 = vmax.xlane.f32.xlu1 %v606_v41 }
 0x24d   : > { %v713_v43 = vadd.f32 %v1886_v35, %v712_v42  ;;  %v2002_v44 = vpop.f32.mrb[1].mxu1 }
 0x24e   : > { %v715_v45 = vpop.f32.mrb[2].mxu1 }
 0x24f   : > { %v2003_v46 = vpop.f32.mrb[3].mxu1  ;;  %v718_v47 = vsel %vm605_vm3, %v713_v43, -inf }
 0x250   : > { %719 = vmax.xlane.f32.xlu0 %v718_v47 }
 0x254   : > { %v828_v48 = vpop.f32.mrb[4].mxu1 }
 0x255   : > { %v829_v49 = vadd.f32 %v1886_v35, %v828_v48  ;;  %v2014_v50 = vpop.f32.mrb[5].mxu1 }
 0x256   : > { %v831_v51 = vpop.f32.mrb[6].mxu1 }
 0x257   : > { %v2015_v52 = vpop.f32.mrb[7].mxu1  ;;  %v834_v53 = vsel %vm605_vm3, %v829_v49, -inf }
 0x258   : > { %835 = vmax.xlane.f32.xlu0 %v834_v53 }
 0x25c   : > { %v944_v54 = vpop.f32.mrb[8].mxu1 }
 0x25d   : > { %v945_v55 = vadd.f32 %v1886_v35, %v944_v54  ;;  %v2026_v56 = vpop.f32.mrb[9].mxu1 }
 0x25e   : > { %v947_v57 = vpop.f32.mrb[10].mxu1 }
 0x25f   : > { %v2027_v58 = vpop.f32.mrb[11].mxu1  ;;  %v950_v59 = vsel %vm605_vm3, %v945_v55, -inf }
 0x260   : > { %951 = vmax.xlane.f32.xlu1 %v950_v59 }
 0x264   : > { %v1060_v60 = vpop.f32.mrb[12].mxu1 }
 0x265   : > { %v1061_v61 = vadd.f32 %v1886_v35, %v1060_v60  ;;  %v2038_v62 = vpop.f32.mrb[13].mxu1 }
 0x266   : > { %v1063_v63 = vpop.f32.mrb[14].mxu1 }
 0x267   : > { %v2039_v0 = vpop.f32.mrb[15].mxu1  ;;  %v1066_v2 = vsel %vm605_vm3, %v1061_v61, -inf }
 0x268   : > { %1067 = vmax.xlane.f32.xlu0 %v1066_v2 }
 0x26c   : > { %v1176_v4 = vpop.f32.mrb[16].mxu1 }
 0x26d   : > { %v2563_v5 = vadd.f32 %v1886_v35, %v1176_v4  ;;  %v2050_v6 = vpop.f32.mrb[17].mxu1 }
 0x26e   : > { %v1179_v7 = vpop.f32.mrb[18].mxu1 }
 0x26f   : > { %v2051_v8 = vpop.f32.mrb[19].mxu1  ;;  %v1182_v9 = vsel %vm605_vm3, %v2563_v5, -inf }
 0x270   : > { %1183 = vmax.xlane.f32.xlu1 %v1182_v9 }
 0x274   : > { %v1292_v11 = vpop.f32.mrb[20].mxu1 }
 0x275   : > { %v1293_v12 = vadd.f32 %v1886_v35, %v1292_v11  ;;  %v2062_v13 = vpop.f32.mrb[21].mxu1 }
 0x276   : > { %v1295_v14 = vpop.f32.mrb[22].mxu1 }
 0x277   : > { %v2063_v15 = vpop.f32.mrb[23].mxu1  ;;  %v1298_v16 = vsel %vm605_vm3, %v1293_v12, -inf }
 0x278   : > { %1299 = vmax.xlane.f32.xlu0 %v1298_v16 }
 0x27c   : > { %v1408_v17 = vpop.f32.mrb[24].mxu1 }
 0x27d   : > { %v2568_v18 = vadd.f32 %v1886_v35, %v1408_v17  ;;  %v2074_v19 = vpop.f32.mrb[25].mxu1 }
 0x27e   : > { %v1411_v20 = vpop.f32.mrb[26].mxu1 }
 0x27f   : > { %v2075_v21 = vpop.f32.mrb[27].mxu1  ;;  %v1414_v22 = vsel %vm605_vm3, %v2568_v18, -inf }
 0x281   : > { %730 = vrot.lane.b32.xlu1 %v2493_v10, %s2322_s18  ;;  %s2331_s18 = smov 8  }
 0x28e   : > { %618 = vrot.lane.b32.xlu0 %v2493_v10, %s2323_s25  ;;  %s2332_s25 = smov 12  }
 0x2a5   : > { %1415 = vmax.xlane.f32.xlu1 %v1414_v22 }
 0x2b6   : > { %846 = vrot.lane.b32.xlu1 %v2493_v10, %s2324_s26  ;;  %s2333_s26 = smov 16  }
 0x2d9   : > { %v608_v23 = vpop.xlane.xlu1 %607 }
 0x2da   : > { %v609_v24 = vsub.f32 %v2555_v37, %v608_v23 }
 0x2dc   : > { %v610_v25 = vmul.f32 1.442695, %v609_v24 }
 0x2dd   : > { %v720_v26 = vpop.xlane.xlu0 %719 }
 0x2de   : > { %2203 = vpow2.f32 %v610_v25  ;;  %v721_v27 = vsub.f32 %v713_v43, %v720_v26 }
 0x2e0   : > { %v722_v28 = vmul.f32 1.442695, %v721_v27 }
 0x2e2   : > { %2205 = vpow2.f32 %v722_v28 }
 0x2e5   : > { %v836_v29 = vpop.xlane.xlu0 %835 }
 0x2e6   : > { %v837_v30 = vsub.f32 %v829_v49, %v836_v29 }
 0x2e8   : > { %v2576_v31 = vpop.eup %2203  ;;  %v838_v32 = vmul.f32 1.442695, %v837_v30 }
 0x2e9   : > { %v612_v33 = vsel %vm605_vm3, %v2576_v31, 0.0 }
 0x2ea   : > { %2207 = vpow2.f32 %v838_v32  ;;  %613 = vadd.xlane.f32.xlu0 %v612_v33 }
 0x2ec   : > { %v2580_v34 = vpop.eup %2205 }
 0x2ed   : > { %v952_v35 = vpop.xlane.xlu1 %951  ;;  %v724_v36 = vsel %vm605_vm3, %v2580_v34, 0.0 }
 0x2ee   : > { %v953_v37 = vsub.f32 %v945_v55, %v952_v35  ;;  %725 = vadd.xlane.f32.xlu1 %v724_v36 }
 0x2f0   : > { %v954_v38 = vmul.f32 1.442695, %v953_v37 }
 0x2f2   : > { %2209 = vpow2.f32 %v954_v38 }
 0x2f4   : > { %v2584_v39 = vpop.eup %2207 }
 0x2f5   : > { %v1068_v40 = vpop.xlane.xlu0 %1067  ;;  %v840_v41 = vsel %vm605_vm3, %v2584_v39, 0.0 }
 0x2f6   : > { %v1069_v42 = vsub.f32 %v1061_v61, %v1068_v40  ;;  %841 = vadd.xlane.f32.xlu0 %v840_v41 }
 0x2f8   : > { %v1070_v43 = vmul.f32 1.442695, %v1069_v42 }
 0x2fa   : > { %2211 = vpow2.f32 %v1070_v43 }
 0x2fc   : > { %v2588_v44 = vpop.eup %2209 }
 0x2fd   : > { %v956_v45 = vsel %vm605_vm3, %v2588_v44, 0.0  ;;  %v1184_v53 = vpop.xlane.xlu1 %1183 }
 0x2fe   : > { %957 = vadd.xlane.f32.xlu1 %v956_v45  ;;  %v1185_v55 = vsub.f32 %v2563_v5, %v1184_v53 }
 0x300   : > { %v1186_v57 = vmul.f32 1.442695, %v1185_v55 }
 0x301   : > { %v731_v60 = vpop.permute.xlu1 %730 }
 0x302   : > { %v736_v13 = vsel %vm623_vm4, %v731_v60, 0 }
 0x304   : > { %v2592_v46 = vpop.eup %2211 }
 0x305   : > { %v1300_v47 = vpop.xlane.xlu0 %1299  ;;  %v1072_v48 = vsel %vm605_vm3, %v2592_v46, 0.0 }
 0x306   : > { %v1301_v49 = vsub.f32 %v1293_v12, %v1300_v47  ;;  %1073 = vadd.xlane.f32.xlu1 %v1072_v48 }
 0x308   : > { %v1302_v50 = vmul.f32 1.442695, %v1301_v49 }
 0x309   : > { %v619_v51 = vpop.permute.xlu0 %618 }
 0x30a   : > { %2213 = vpow2.f32 %v1302_v50  ;;  %v625_v52 = vsel %vm623_vm4, %v619_v51, 0 }
 0x30b   : > { %1993 = vmatpush3.bf16.msra.mxu0 %v625_v52  ;;  %2215 = vpow2.f32 %v1186_v57 }
 0x30c   : > { %962 = vrot.lane.b32.xlu0 %v2493_v10, %s2325_s27  ;;  %2004 = vmatprep.subr.bf16.mxu0 %v2305_v1  ;;  %s2334_s27 = smov 20  }
 0x314   : > { %v2599_v54 = vpop.eup %2213 }
 0x315   : > { %v1304_v56 = vsel %vm605_vm3, %v2599_v54, 0.0  ;;  %v2604_v58 = vpop.eup %2215 }
 0x316   : > { %1305 = vadd.xlane.f32.xlu1 %v1304_v56  ;;  %v1188_v59 = vsel %vm605_vm3, %v2604_v58, 0.0 }
 0x32b   : > { %1189 = vadd.xlane.f32.xlu0 %v1188_v59 }
 0x332   : > { %v1416_v61 = vpop.xlane.xlu1 %1415 }
 0x333   : > { %v1417_v62 = vsub.f32 %v2568_v18, %v1416_v61 }
 0x335   : > { %v1418_v63 = vmul.f32 1.442695, %v1417_v62 }
 0x336   : > { %v847_v4 = vpop.permute.xlu1 %846 }
 0x337   : > { %2217 = vpow2.f32 %v1418_v63  ;;  %v852_v17 = vsel %vm623_vm4, %v847_v4, 0 }
 0x341   : > { %v2609_v0 = vpop.eup %2217  ;;  %1194 = vrot.lane.b32.xlu0 %v2493_v10, %s2326_s28  ;;  %s467_s28 = sand.u32 1, %s2295_s30  }
 0x342   : > { %v1420_v2 = vsel %vm605_vm3, %v2609_v0, 0.0 }
 0x343   : > { %1421 = vadd.xlane.f32.xlu1 %v1420_v2 }
 0x345   : > { %1310 = vrot.lane.b32.xlu0 %v2493_v10, %s2327_s0  ;;  %s1880_s0 = sshll.u32 %s467_s28, 3 }
 0x349   : > { %1426 = vrot.lane.b32.xlu0 %v2493_v10, %s2328_s2  ;;  %s1795_s2 = scalar_lea.sflag [#allocation4], %s467_s28 }
 0x354   : > { %1078 = vrot.lane.b32.xlu1 %v2493_v10, %s2329_s20 }
 0x377   : > { %v614_v5 = vpop.xlane.xlu0 %613 }
 0x378   : > { %2219 = vrcp.f32 %v614_v5 }
 0x37b   : > { %v726_v6 = vpop.xlane.xlu1 %725 }
 0x37c   : > { %2221 = vrcp.f32 %v726_v6 }
 0x382   : > { %v2220_v7 = vpop.eup %2219 }
 0x383   : > { %v616_v8 = vmul.f32 %v2220_v7, %v2576_v31  ;;  %v842_v9 = vpop.xlane.xlu0 %841 }
 0x384   : > { %2223 = vrcp.f32 %v842_v9 }
 0x385   : > { %v617_v11 = vpack.c.bf16 %v616_v8, %v616_v8 }
 0x386   : > { %v2222_v12 = vpop.eup %2221 }
 0x387   : > { %1995 = vmatmul.mubr.msk.bf16.vlgmr.msra.gmra.mrb[8].mxu0 %vm605_vm3, %v617_v11  ;;  %v728_v10 = vmul.f32 %v2222_v12, %v2580_v34  ;;  %v963_v19 = vpop.permute.xlu0 %962  ;;  %v2191_v12 = vld [vmem:[%s2814_s4] sm:$0xff]  }
 0x388   : > { %2005 = vmatpush3.bf16.msra.mxu0 %v736_v13  ;;  %2006 = vmatprep.mubr.msk.bf16.mxu0 %vm2306_vm0, %v2305_v1  ;;  %v968_v22 = vsel %vm623_vm4, %v963_v19, 0  ;;  %v2192_v13 = vld [vmem:[%s2814_s4 + $0x8] sm:$0xff]  }
 0x389   : > { %2016 = vmatprep.subr.bf16.mxu0 %v2305_v1  ;;  %v729_v15 = vpack.c.bf16 %v728_v10, %v728_v10  ;;  %2083 = vmatpush3.bf16.msra.mxu1 %v2191_v12  ;;  %v1913_v12 = vld [vmem:[%s2799_s11] ss:$0 sm:$0xff] }
 0x38a   : > { %2084 = vmatprep.subr.bf16.mxu1 %v2305_v1 }
 0x38b   : > { %v958_v14 = vpop.xlane.xlu1 %957 }
 0x38c   : > { %2225 = vrcp.f32 %v958_v14 }
 0x38d   : > { %2085 = vmatpush3.bf16.msra.mxu1 %v2192_v13 }
 0x38e   : > { %v2224_v16 = vpop.eup %2223  ;;  %2098 = vmatprep.subr.bf16.mxu1 %v2305_v1 }
 0x38f   : > { %2007 = vmatmul.mubr.msk.bf16.vlgmr.msra.gmra.mrb[12].mxu0 %vm605_vm3, %v729_v15  ;;  %v844_v18 = vmul.f32 %v2224_v16, %v2584_v39 }
 0x390   : > { %2017 = vmatpush3.bf16.msra.mxu0 %v852_v17  ;;  %2018 = vmatprep.mubr.msk.bf16.mxu0 %vm2306_vm0, %v2305_v1 }
 0x391   : > { %2028 = vmatprep.subr.bf16.mxu0 %v2305_v1  ;;  %v845_v20 = vpack.c.bf16 %v844_v18, %v844_v18 }
 0x393   : > { %v1074_v25 = vpop.xlane.xlu1 %1073 }
 0x394   : > { %2227 = vrcp.f32 %v1074_v25 }
 0x396   : > { %v2226_v21 = vpop.eup %2225 }
 0x397   : > { %2019 = vmatmul.mubr.msk.bf16.vlgmr.msra.gmra.mrb[16].mxu0 %vm605_vm3, %v845_v20  ;;  %v960_v23 = vmul.f32 %v2226_v21, %v2588_v44 }
 0x398   : > { %2029 = vmatpush3.bf16.msra.mxu0 %v968_v22  ;;  %2030 = vmatprep.mubr.msk.bf16.mxu0 %vm2306_vm0, %v2305_v1 }
 0x399   : > { %2040 = vmatprep.subr.bf16.mxu0 %v2305_v1  ;;  %v961_v24 = vpack.c.bf16 %v960_v23, %v960_v23 }
 0x39e   : > { %v2228_v28 = vpop.eup %2227 }
 0x39f   : > { %2031 = vmatmul.mubr.msk.bf16.vlgmr.msra.gmra.mrb[20].mxu0 %vm605_vm3, %v961_v24  ;;  %v1076_v30 = vmul.f32 %v2228_v28, %v2592_v46 }
 0x3a0   : > { %2042 = vmatprep.mubr.msk.bf16.mxu0 %vm2306_vm0, %v2305_v1 }
 0x3a1   : > { %v1077_v34 = vpack.c.bf16 %v1076_v30, %v1076_v30  ;;  %v1903_v30 = vld [vmem:[%s2793_s5] ss:$0 sm:$0xff] }
 0x3a3   : > { %v1306_v27 = vpop.xlane.xlu1 %1305 }
 0x3b8   : > { %v1190_v26 = vpop.xlane.xlu0 %1189 }
 0x3b9   : > { %2229 = vrcp.f32 %v1190_v26 }
 0x3ba   : > { %2231 = vrcp.f32 %v1306_v27 }
 0x3bc   : > { %v1195_v33 = vpop.permute.xlu0 %1194 }
 0x3bd   : > { %v1200_v36 = vsel %vm623_vm4, %v1195_v33, 0 }
 0x3c0   : > { %v1311_v38 = vpop.permute.xlu0 %1310 }
 0x3c1   : > { %v1316_v41 = vsel %vm623_vm4, %v1311_v38, 0 }
 0x3c3   : > { %v2230_v35 = vpop.eup %2229 }
 0x3c4   : > { %v1192_v37 = vmul.f32 %v2230_v35, %v2604_v58  ;;  %v2232_v40 = vpop.eup %2231  ;;  %v1427_v43 = vpop.permute.xlu0 %1426 }
 0x3c5   : > { %v1308_v42 = vmul.f32 %v2232_v40, %v2599_v54  ;;  %v1432_v46 = vsel %vm623_vm4, %v1427_v43, 0  ;;  %v2193_v43 = vld [vmem:[%s2796_s8] sm:$0xff]  }
 0x3c6   : > { %v1193_v39 = vpack.c.bf16 %v1192_v37, %v1192_v37 }
 0x3c7   : > { %v1309_v44 = vpack.c.bf16 %v1308_v42, %v1308_v42 }
 0x3d0   : > { %v1422_v29 = vpop.xlane.xlu1 %1421 }
 0x3d1   : > { %2233 = vrcp.f32 %v1422_v29 }
 0x3d4   : > { %v1079_v31 = vpop.permute.xlu1 %1078 }
 0x3d5   : > { %v1084_v32 = vsel %vm623_vm4, %v1079_v31, 0 }
 0x3d6   : > { %2041 = vmatpush3.bf16.msra.mxu0 %v1084_v32 }
 0x3d7   : > { %2052 = vmatprep.subr.bf16.mxu0 %v2305_v1 }
 0x3d9   : > { %2043 = vmatmul.mubr.msk.bf16.vlgmr.msra.gmra.mrb[24].mxu0 %vm605_vm3, %v1077_v34 }
 0x3da   : > { %2053 = vmatpush3.bf16.msra.mxu0 %v1200_v36  ;;  %2054 = vmatprep.mubr.msk.bf16.mxu0 %vm2306_vm0, %v2305_v1 }
 0x3db   : > { %2064 = vmatprep.subr.bf16.mxu0 %v2305_v1  ;;  %v2234_v45 = vpop.eup %2233 }
 0x3dc   : > { %v1424_v47 = vmul.f32 %v2234_v45, %v2609_v0  ;;  %v2196_v45 = vld [vmem:[%s2798_s10 + $0x8] sm:$0xff]  }
 0x3de   : > { %v1425_v48 = vpack.c.bf16 %v1424_v47, %v1424_v47 }
 0x3e1   : > { %2055 = vmatmul.mubr.msk.bf16.vlgmr.msra.gmra.mrb[28].mxu0 %vm605_vm3, %v1193_v39 }
 0x3e2   : > { %2065 = vmatpush3.bf16.msra.mxu0 %v1316_v41  ;;  %2066 = vmatprep.mubr.msk.bf16.mxu0 %vm2306_vm0, %v2305_v1 }
 0x3e3   : > { %2076 = vmatprep.subr.bf16.mxu0 %v2305_v1 }
 0x3e9   : > { %2067 = vmatmul.mubr.msk.bf16.vlgmr.msra.gmra.mrb[32].mxu0 %vm605_vm3, %v1309_v44  ;;  %v2194_v44 = vld [vmem:[%s2796_s8 + $0x8] sm:$0xff]  }
 0x3ea   : > { %2077 = vmatpush3.bf16.msra.mxu0 %v1432_v46  ;;  %2078 = vmatprep.mubr.msk.bf16.mxu0 %vm2306_vm0, %v2305_v1  ;;  %v2197_v46 = vld [vmem:[%s2798_s10 + $0x10] sm:$0xff]  }
 0x3eb   : > { %2090 = vmatprep.subr.bf16.mxu0 %v2305_v1 }
 0x3f1   : > { %2079 = vmatmul.mubr.msk.bf16.vlgmr.msra.gmra.mrb[36].mxu0 %vm605_vm3, %v1425_v48 }
 0x3f2   : > { %2094 = vmatprep.mubr.msk.bf16.mxu0 %vm2306_vm0, %v2305_v1  ;;  %2091 = vmatpush3.bf16.msra.mxu0 %v2193_v43 }
 0x3f3   : > { %2092 = vmatprep.subr.bf16.mxu0 %v2305_v1 }
 0x3f6   : > { %2093 = vmatpush3.bf16.msra.mxu0 %v2194_v44 }
 0x45a   : > { %v661_v49 = vpop.f32.mrb[8].mxu0 }
 0x45b   : > { %667 = vst.msk [vmem:[#allocation2] sm:$0xff] %vm558_vm2, %v661_v49  ;;  %v1996_v50 = vpop.f32.mrb[9].mxu0 }
 0x45c   : > { %v664_v51 = vpop.f32.mrb[10].mxu0 }
 0x45d   : > { %v1997_v52 = vpop.f32.mrb[11].mxu0  ;;  %v1907_v51 = vld [vmem:[%s2794_s6] ss:$0 sm:$0xff] }
 0x462   : > { %v772_v53 = vpop.f32.mrb[12].mxu0 }
 0x463   : > { %779 = vrot.lane.b32.xlu1 %v772_v53, %s2330_s21  ;;  %v2008_v54 = vpop.f32.mrb[13].mxu0  ;;  %s2335_s21 = smov 24   ;;  %v1908_v53 = vld [vmem:[%s2795_s7] ss:$0 sm:$0xff] }
 0x464   : > { %v775_v55 = vpop.f32.mrb[14].mxu0 }
 0x465   : > { %v2009_v56 = vpop.f32.mrb[15].mxu0 }
 0x46a   : > { %v888_v57 = vpop.f32.mrb[16].mxu0 }
 0x46b   : > { %895 = vrot.lane.b32.xlu0 %v888_v57, %s2331_s18  ;;  %v2020_v58 = vpop.f32.mrb[17].mxu0  ;;  %s2336_s18 = smov 28   ;;  %v2198_v57 = vld [vmem:[%s2798_s10 + $0x18] sm:$0xff]  }
 0x46c   : > { %v891_v59 = vpop.f32.mrb[18].mxu0  ;;  %v2199_v58 = vld [vmem:[%s2798_s10 + $0x20] sm:$0xff]  }
 0x46d   : > { %v2021_v60 = vpop.f32.mrb[19].mxu0  ;;  %v2200_v59 = vld [vmem:[%s2798_s10 + $0x28] sm:$0xff]  }
 0x46e   : > { %v2201_v60 = vld [vmem:[%s2798_s10 + $0x30] sm:$0xff]  }
 0x472   : > { %v1004_v61 = vpop.f32.mrb[20].mxu0 }
 0x473   : > { %1011 = vrot.lane.b32.xlu1 %v1004_v61, %s2332_s25  ;;  %v2032_v62 = vpop.f32.mrb[21].mxu0  ;;  %v2202_v61 = vld [vmem:[%s2798_s10 + $0x38] sm:$0xff]   ;;  %s1925_s25 = sshll.u32 %s2434_s17, 7  ;;  %s2337_s17 = smov [#allocation3]  }
 0x474   : > { %v1007_v63 = vpop.f32.mrb[22].mxu0  ;;  %v1909_v62 = vld [vmem:[%s2797_s9] ss:$0 sm:$0xff]  ;;  %s2745_s4 = scalar_lea.hbm %s2802_s14, %s1925_s25 }
 0x475   : > { %v2033_v0 = vpop.f32.mrb[23].mxu0 }
 0x4ac   : > { %v1120_v2 = vpop.f32.mrb[24].mxu0 }
 0x4ad   : > { %1127 = vrot.lane.b32.xlu0 %v1120_v2, %s2333_s26  ;;  %v2044_v4 = vpop.f32.mrb[25].mxu0  ;;  %s469_s26 = scalar_lea.vmem [#allocation3], %s1880_s0  ;;  %s2245_s0 = sshll.u32 %s2337_s17, 4  ;;  %s2246_s0 = int_to_ptr.vmem [resolvable:$false] %s2245_s0 }
 0x4ae   : > { %v1123_v5 = vpop.f32.mrb[26].mxu0 }
 0x4af   : > { %v2045_v6 = vpop.f32.mrb[27].mxu0 }
 0x4b4   : > { %v1236_v7 = vpop.f32.mrb[28].mxu0 }
 0x4b5   : > { %1243 = vrot.lane.b32.xlu1 %v1236_v7, %s2334_s27  ;;  %v2056_v8 = vpop.f32.mrb[29].mxu0  ;;  %s1808_s27 = sshll.u32 %s469_s26, 4  ;;  %s2747_s27 = int_to_ptr.vmem [resolvable:$true] %s1808_s27 }
 0x4b6   : > { %v1239_v9 = vpop.f32.mrb[30].mxu0  ;;  %s2241_s20 = scalar_lea.vmem %s2747_s27, 128  ;;  %p2248_p0 = scmp.lt.s32.totalorder %s2747_s27, %s2246_s0 }
 0x4b7   : > { %v2057_v11 = vpop.f32.mrb[31].mxu0  ;;  %p2242_p11 = scmp.ne.s32.totalorder %s2747_s27, %s2241_s20 }
 0x4b9   : > { %p2243_p12 = pnand %p2242_p11, %p2451_p5 }
 0x4bb   : > { %p2244_p13 = pneg %p2243_p12 }
 0x4bc   : > { %v1352_v10 = vpop.f32.mrb[32].mxu0 }
 0x4bd   : > { %1359 = vrot.lane.b32.xlu0 %v1352_v10, %s2335_s21  ;;  %v2068_v14 = vpop.f32.mrb[33].mxu0  ;;  %s2247_s21 = scalar_lea.vmem %s2246_s0, 256 }
 0x4be   : > { %v1355_v15 = vpop.f32.mrb[34].mxu0  ;;  %p2249_p1 = scmp.lt.s32.totalorder %s2247_s21, %s2241_s20 }
 0x4bf   : > { %v2069_v16 = vpop.f32.mrb[35].mxu0 }
 0x4c0   : > { %p2250_p2 = por %p2249_p1, %p2248_p0 }
 0x4c2   : > { %p2251_p3 = pnand %p2250_p2, %p2244_p13 }
 0x4c4   : > { %v1468_v17 = vpop.f32.mrb[36].mxu0 }
 0x4c5   : > { %1475 = vrot.lane.b32.xlu1 %v1468_v17, %s2336_s18  ;;  %v2080_v18 = vpop.f32.mrb[37].mxu0 }
 0x4c6   : > { %v1471_v19 = vpop.f32.mrb[38].mxu0 }
 0x4c7   : > { %v2081_v20 = vpop.f32.mrb[39].mxu0 }
 0x4d5   : > { %v780_v21 = vpop.permute.xlu1 %779 }
 0x4d6   : > { %783 = vst.msk [vmem:[#allocation2] sm:$0xff] %vm782_vm5, %v780_v21 }
 0x4dd   : > { %v896_v22 = vpop.permute.xlu0 %895 }
 0x4de   : > { %899 = vst.msk [vmem:[#allocation2] sm:$0xff] %vm898_vm6, %v896_v22 }
 0x4e5   : > { %v1012_v23 = vpop.permute.xlu1 %1011 }
 0x4e6   : > { %1015 = vst.msk [vmem:[#allocation2] sm:$0xff] %vm1014_vm7, %v1012_v23 }
 0x51f   : > { %v1128_v24 = vpop.permute.xlu0 %1127 }
 0x520   : > { %1131 = vst.msk [vmem:[#allocation2] sm:$0xff] %vm1130_vm8, %v1128_v24 }
 0x527   : > { %v1244_v25 = vpop.permute.xlu1 %1243 }
 0x528   : > { %1247 = vst.msk [vmem:[#allocation2] sm:$0xff] %vm1246_vm9, %v1244_v25 }
 0x52f   : > { %v1360_v26 = vpop.permute.xlu0 %1359 }
 0x530   : > { %1363 = vst.msk [vmem:[#allocation2] sm:$0xff] %vm1362_vm10, %v1360_v26 }
 0x537   : > { %v1476_v27 = vpop.permute.xlu1 %1475 }
 0x538   : > { %1479 = vst.msk [vmem:[#allocation2] sm:$0xff] %vm1478_vm11, %v1476_v27 }
 0x53f   : > { %v1480_v28 = vld [vmem:[#allocation2] sm:$0xff] }
 0x540   : > { %v1481_v29 = vpack.c.bf16 %v1480_v28, %v1480_v28  ;;  %v1922_v28 = vld [vmem:[%s2800_s12] ss:$0 sm:$0xff] }
 0x542   : > { %2087 = vmatmul.mubr.msk.bf16.vlgmr.msra.gmra.mrb[28].mxu1 %vm504_vm1, %v1481_v29 }
 0x543   : > { %2114 = vmatprep.mubr.msk.bf16.mxu1 %vm2306_vm0, %v2305_v1 }
 0x615   : > { %v1542_v31 = vpop.f32.mrb[28].mxu1 }
 0x616   : > { %v1543_v32 = vadd.f32 %v1903_v30, %v1542_v31  ;;  %v2088_v33 = vpop.f32.mrb[29].mxu1  ;;  %v1923_v30 = vld [vmem:[%s2801_s13] ss:$0 sm:$0xff] }
 0x617   : > { %v1545_v34 = vpop.f32.mrb[30].mxu1 }
 0x618   : > { %v2089_v35 = vpop.f32.mrb[31].mxu1  ;;  %v1548_v36 = vadd.f32 %v1543_v32, %v2483_v3  ;;  %v2195_v3 = vld [vmem:[%s2798_s10] sm:$0xff]  }
 0x619   : > { %2099 = vmatpush3.bf16.msra.mxu1 %v2195_v3 }
 0x61a   : > { %v1551_v37 = vsel %vm504_vm1, %v1548_v36, 0.0  ;;  %2100 = vmatprep.subr.bf16.mxu1 %v2305_v1 }
 0x61b   : > { %1552 = vadd.xlane.f32.xlu0 %v1551_v37 }
 0x61d   : > { %2101 = vmatpush3.bf16.msra.mxu1 %v2196_v45 }
 0x61e   : > { %2102 = vmatprep.subr.bf16.mxu1 %v2305_v1 }
 0x621   : > { %2103 = vmatpush3.bf16.msra.mxu1 %v2197_v46 }
 0x622   : > { %2104 = vmatprep.subr.bf16.mxu1 %v2305_v1 }
 0x625   : > { %2105 = vmatpush3.bf16.msra.mxu1 %v2198_v57 }
 0x626   : > { %2106 = vmatprep.subr.bf16.mxu1 %v2305_v1 }
 0x629   : > { %2107 = vmatpush3.bf16.msra.mxu1 %v2199_v58 }
 0x62a   : > { %2108 = vmatprep.subr.bf16.mxu1 %v2305_v1 }
 0x62d   : > { %2109 = vmatpush3.bf16.msra.mxu1 %v2200_v59 }
 0x62e   : > { %2110 = vmatprep.subr.bf16.mxu1 %v2305_v1 }
 0x631   : > { %2111 = vmatpush3.bf16.msra.mxu1 %v2201_v60 }
 0x632   : > { %2112 = vmatprep.subr.bf16.mxu1 %v2305_v1 }
 0x635   : > { %2113 = vmatpush3.bf16.msra.mxu1 %v2202_v61 }
 0x6a8   : > { %v1553_v38 = vpop.xlane.xlu0 %1552 }
 0x6a9   : > { %v1555_v39 = vmul.f32 0.03125, %v1553_v38 }
 0x6ab   : > { %v1556_v40 = vsub.f32 %v1548_v36, %v1555_v39 }
 0x6ad   : > { %v1557_v41 = vmul.f32 %v1556_v40, %v1556_v40 }
 0x6af   : > { %v1558_v42 = vsel %vm504_vm1, %v1557_v41, 0.0 }
 0x6b0   : > { %1559 = vadd.xlane.f32.xlu1 %v1558_v42 }
 0x73d   : > { %v1560_v47 = vpop.xlane.xlu1 %1559 }
 0x73e   : > { %v1561_v48 = vmul.f32 0.03125, %v1560_v47 }
 0x740   : > { %v1562_v49 = vadd.f32 1e-05, %v1561_v48 }
 0x742   : > { %2235 = vrsqrt.f32 %v1562_v49 }
 0x74c   : > { %v2236_v50 = vpop.eup %2235 }
 0x74d   : > { %v1564_v52 = vmul.f32 %v2236_v50, %v1556_v40 }
 0x74f   : > { %v1571_v54 = vmul.f32 %v1907_v51, %v1564_v52 }
 0x751   : > { %v1578_v55 = vadd.f32 %v1908_v53, %v1571_v54 }
 0x753   : > { %v1579_v56 = vpack.c.bf16 %v1578_v55, %v1578_v55 }
 0x755   : > { %2095 = vmatmul.mubr.msk.bf16.vlgmr.msra.gmra.mrb[40].mxu0 %vm504_vm1, %v1579_v56 }
 0x828   : > { %v1640_v63 = vpop.f32.mrb[40].mxu0 }
 0x829   : > { %v1641_v0 = vadd.f32 %v1909_v62, %v1640_v63  ;;  %v2096_v2 = vpop.f32.mrb[41].mxu0 }
 0x82a   : > { %v1643_v4 = vpop.f32.mrb[42].mxu0 }
 0x82b   : > { %v1646_v5 = vmul.f32 0.70710677, %v1641_v0  ;;  %v2097_v6 = vpop.f32.mrb[43].mxu0  ;;  %v1648_v8 = vmul.f32 0.5, %v1641_v0 }
 0x82d   : > { %2237 = verf.f32 %v1646_v5 }
 0x837   : > { %v2238_v7 = vpop.eup %2237 }
 0x838   : > { %v1649_v9 = vadd.f32 1.0, %v2238_v7 }
 0x83a   : > { %v1650_v1 = vmul.f32 %v1649_v9, %v1648_v8 }
 0x83c   : > { %v1651_v11 = vpack.c.bf16 %v1650_v1, %v1650_v1 }
 0x83e   : > { %2115 = vmatmul.mubr.bf16.vlgmr.msra.gmra.mrb[32].mxu1 %v1651_v11 }
 0x911   : > { %v1757_v13 = vpop.f32.mrb[32].mxu1 }
 0x912   : > { %v1758_v10 = vadd.f32 %v1913_v12, %v1757_v13  ;;  %v2116_v14 = vpop.f32.mrb[33].mxu1 }
 0x913   : > { %v1760_v15 = vpop.f32.mrb[34].mxu1 }
 0x914   : > { %v2117_v16 = vpop.f32.mrb[35].mxu1  ;;  %v1763_v17 = vadd.f32 %v1758_v10, %v1578_v55 }
 0x916   : > { %v1766_v18 = vsel %vm504_vm1, %v1763_v17, 0.0 }
 0x917   : > { %1767 = vadd.xlane.f32.xlu0 %v1766_v18 }
 0x9a4   : > { %v1768_v19 = vpop.xlane.xlu0 %1767 }
 0x9a5   : > { %v1769_v20 = vmul.f32 0.03125, %v1768_v19 }
 0x9a7   : > { %v1770_v21 = vsub.f32 %v1763_v17, %v1769_v20 }
 0x9a9   : > { %v1771_v22 = vmul.f32 %v1770_v21, %v1770_v21 }
 0x9ab   : > { %v1772_v23 = vsel %vm504_vm1, %v1771_v22, 0.0 }
 0x9ac   : > { %1773 = vadd.xlane.f32.xlu0 %v1772_v23 }
 0xa39   : > { %v1774_v24 = vpop.xlane.xlu0 %1773 }
 0xa3a   : > { %v1775_v25 = vmul.f32 0.03125, %v1774_v24 }
 0xa3c   : > { %v1776_v26 = vadd.f32 1e-05, %v1775_v25 }
 0xa3e   : > { %2239 = vrsqrt.f32 %v1776_v26 }
 0xa48   : > { %v2240_v27 = vpop.eup %2239 }
 0xa49   : > { %v1778_v29 = vmul.f32 %v2240_v27, %v1770_v21 }
 0xa4b   : > { %v1785_v31 = vmul.f32 %v1922_v28, %v1778_v29 }
 0xa4d   : > { %v1792_v32 = vadd.f32 %v1923_v30, %v1785_v31 }
 0xa4f   : > { %1793 = vst.msk [vmem:[%s469_s26] sm:$0xff] %vm504_vm1, %v1792_v32 }
 0xa50   : > { %2254 = shalt.err (!%p2251_p3)
}
 0xa51   : > { %s2255_s1 = scalar_lea.hbm %s2745_s4, 128  ;;  %s2259_s18 = scalar_lea.hbm %s2802_s14, 256 }
 0xa52   : > { %p2256_p4 = scmp.ne.s32.totalorder %s2745_s4, %s2255_s1  ;;  %p2260_p9 = scmp.lt.u32.totalorder %s2745_s4, %s2802_s14 }
 0xa53   : > { %p2261_p10 = scmp.lt.u32.totalorder %s2259_s18, %s2255_s1  ;;  %p2263_p12 = scmp.lt.u32.totalorder %s2255_s1, %s2745_s4 }
 0xa54   : > { %p2257_p7 = pnand %p2256_p4, %p2451_p5 }
 0xa55   : > { %p2262_p11 = por %p2261_p10, %p2260_p9 }
 0xa56   : > { %p2258_p8 = pneg %p2257_p7 }
 0xa57   : > { %p2264_p13 = por %p2263_p12, %p2262_p11 }
 0xa59   : > { %p2265_p0 = pnand %p2264_p13, %p2258_p8 }
 0xa5b   : > { %2268 = shalt.err (!%p2265_p0)
}
 0xa5c   : > { %2118 = dma.vmem_to_hbm [thread:$0]  (%p2451_p5), %s2747_s27, 128, %s2745_s4, %s1795_s2  }
 0xa5d PF: > { %p2124_p1 = scmp.ge.s32.totalorder %s2303_s16, 2  ;;  %s1820_s20 = sand.u32 1, %s2291_s29  }
 0xa5e   : > { %s1821_s17 = scalar_lea.sflag [#allocation4], %s1820_s20 }
 0xa5f   : > { %p2121_p2 = pnand %p2124_p1, %p2455_p6 }
 0xa61   : > { %2286 = dma.done.wait (!%p2121_p2), %s1821_s17, 128  }
 0xa62   : > { %2288 = vsyncadd (!%p2121_p2), %s1821_s17, 4294967168  ;;  %p24_p3 = scmp.ge.s32.totalorder %s2438_s19, 4   ;;  %s2815_s29 = smov %s2295_s30 }
 0xa63   : > { %s2816_s30 = smov %s2299_s15  ;;  %s2817_s15 = smov %s2449_s22 }
 0xa64   : > { %s2818_s16 = smov %s2438_s19  ;;  %26 = sbr.rel (!%p24_p3) target bundleno = 9 (0x9), region = 114 }
 0xa6b   :  { %1826 = vsyncpa [#allocation4], 1 }
 0xa6c   :  { %1828 = vsyncpa [#allocation4 + $0x1], 1 }

// kernel: tpu_custom_call.1
= control target key start
LH: loop header
LB: loop body
LE: loop exit
PB: predicated region body
PF: predicated region fallthrough
CT: control target
= control target key end

     0   :  { %s2819_s0 = inlined_call_operand.vmem [shape: f32[2,8,32], index: 0, kind: input, shape index: {}]   ;;  %s2820_s1 = inlined_call_operand.vmem [shape: f32[2,1,8], index: 1, kind: input, shape index: {}]   ;;  %s2821_s2 = inlined_call_operand.vmem [shape: bf16[32,96], index: 2, kind: input, shape index: {}]   ;;  %s2822_s3 = inlined_call_operand.vmem [shape: f32[1,96], index: 3, kind: input, shape index: {}]   ;;  %s2823_s4 = inlined_call_operand.vmem [shape: bf16[32,32], index: 4, kind: input, shape index: {}]   ;;  %s2824_s5 = inlined_call_operand.vmem [shape: f32[1,32], index: 5, kind: input, shape index: {}]   ;;  %s2825_s6 = inlined_call_operand.vmem [shape: f32[1,32], index: 6, kind: input, shape index: {}]   ;;  %s2826_s7 = inlined_call_operand.vmem [shape: f32[1,32], index: 7, kind: input, shape index: {}]   ;;  %s2827_s8 = inlined_call_operand.vmem [shape: bf16[32,128], index: 8, kind: input, shape index: {}]   ;;  %s2828_s9 = inlined_call_operand.vmem [shape: f32[1,128], index: 9, kind: input, shape index: {}]   ;;  %s2829_s10 = inlined_call_operand.vmem [shape: bf16[128,32], index: 10, kind: input, shape index: {}]   ;;  %s2830_s11 = inlined_call_operand.vmem [shape: f32[1,32], index: 11, kind: input, shape index: {}]   ;;  %s2831_s12 = inlined_call_operand.vmem [shape: f32[1,32], index: 12, kind: input, shape index: {}]   ;;  %s2832_s13 = inlined_call_operand.vmem [shape: f32[1,32], index: 13, kind: input, shape index: {}]   ;;  %s2833_s14 = inlined_call_operand.hbm [shape: f32[2,8,32], index: 14, kind: output, shape index: {}]  }
   0x1   :  { %2834 = sst [smem:[#allocation6_spill]] %s2819_s0 }
   0x2   :  { %2835 = sst [smem:[#allocation7_spill]] %s2820_s1 }
   0x3   :  { %2836 = sst [smem:[#allocation8_spill]] %s2821_s2 }
   0x4   :  { %2837 = sst [smem:[#allocation9_spill]] %s2822_s3 }
   0x5   :  { %2838 = sst [smem:[#allocation10_spill]] %s2823_s4 }
   0x6   :  { %19 = vsyncpa [#allocation4], 0 }
   0x7   :  { %21 = vsyncpa [#allocation4 + $0x1], 0  ;;  %s2439_s29 = smov 0   ;;  %s2441_s30 = smov 0  }
   0x8   :  { %s2443_s15 = smov 0   ;;  %s2445_s16 = smov 0  }
   0x9 LB: > { %s2460_s17 = sadd.s32 4294967295, %s2328_s16   ;;  %s1898_s18 = sadd.s32 4294967294, %s2328_s16   ;;  %s2328_s16 = sphi %s2445_s16, %s2849_s16   ;;  %s2324_s15 = sphi %s2443_s15, %s2848_s15   ;;  %s2320_s30 = sphi %s2441_s30, %s2847_s30   ;;  %s2316_s29 = sphi %s2439_s29, %s2846_s29  }
   0xa   : > { %s2464_s19 = sadd.s32 1, %s2328_s16   ;;  %s338_s20 = sadd.s32 1, %s2324_s15 }
   0xb   : > { %s335_s21 = ssub.s32 %s2328_s16, %s2464_s19  ;;  %p348_p0 = scmp.ne.s32.totalorder %s2324_s15, %s2320_s30 }
   0xc   : > { %p336_p1 = scmp.eq.s32.totalorder %s335_s21, 0  ;;  %p349_p2 = scmp.eq.s32.totalorder %s2460_s17, 1 }
   0xd   : > { %p354_p3 = scmp.ne.s32.totalorder %s2320_s30, %s2316_s29  ;;  %p355_p4 = scmp.eq.s32.totalorder %s1898_s18, 1 }
   0xe   : > { %s2475_s22 = scalar_select %p336_p1, %s2324_s15, %s338_s20  }
   0xf   : > { %p2477_p5 = por %p349_p2, %p348_p0  ;;  %p2481_p6 = por %p355_p4, %p354_p3 }
  0x10   : > { %p1901_p7 = scmp.ge.s32.totalorder %s2328_s16, 1  ;;  %p422_p8 = scmp.lt.s32.totalorder %s2328_s16, 3 }
  0x12   : > { %p423_p9 = pnand %p1901_p7, %p422_p8 }
  0x13   : > { %s2841_s2 = sld [smem:[#allocation8_spill]] (!%p423_p9)  ;;  %v2330_v1 = vmov (!%p423_p9), 0.0   ;;  %vm2331_vm0 = vmmov (!%p423_p9), 0   ;;  %p470_p10 = scmp.lt.s32.totalorder (!%p423_p9), %s2460_s17, 1  ;;  %vm504_vm1 = vcmask (!%p423_p9), 261120   ;;  %vm558_vm2 = vcmask (!%p423_p9), 31744  }
  0x14   : > { %426 = sbr.rel (%p423_p9) target bundleno = 2683 (0xa7b), region = 76  ;;  %2000 = vmatprep.subr.bf16.mxu0 (!%p423_p9), %v2330_v1  ;;  %2020 = vmatprep.subr.bf16.mxu1 (!%p423_p9), %v2330_v1  ;;  %s2842_s0 = sld [smem:[#allocation6_spill]] (!%p423_p9)  ;;  %vm605_vm3 = vcmask (!%p423_p9), 64512   ;;  %vm623_vm4 = vcmask (!%p423_p9), 1043456   ;;  %vm782_vm5 = vcmask (!%p423_p9), 64544   ;;  %vm898_vm6 = vcmask (!%p423_p9), 97344  }
  0x15   : > { %2004 = vmatprep.mubr.msk.bf16.mxu0 (!%p423_p9), %vm2331_vm0, %v2330_v1  ;;  %2022 = vmatprep.mubr.msk.bf16.mxu1 (!%p423_p9), %vm2331_vm0, %v2330_v1  ;;  %s2843_s3 = sld [smem:[#allocation9_spill]] (!%p423_p9)  ;;  %s2333_s21 = smov (!%p423_p9), 96   ;;  %vm1014_vm7 = vcmask (!%p423_p9), 130144   ;;  %vm1130_vm8 = vcmask (!%p423_p9), 162944   ;;  %vm1246_vm9 = vcmask (!%p423_p9), 195744   ;;  %vm1362_vm10 = vcmask (!%p423_p9), 228544  }
  0x16   : > { %s2334_s25 = smov (!%p423_p9), 88   ;;  %s2336_s27 = smov (!%p423_p9), 84   ;;  %vm1478_vm11 = vcmask (!%p423_p9), 261344  }
  0x17   : > { %s2337_s28 = smov (!%p423_p9), 120   ;;  %s2844_s1 = sld [smem:[#allocation7_spill]] (!%p423_p9) }
  0x18   : > { %s2845_s4 = sld [smem:[#allocation10_spill]] (!%p423_p9) }
  0x19   : > { %v2212_v0 = vld [vmem:[%s2841_s2] sm:$0xff] (!%p423_p9)   ;;  %v2213_v2 = vld [vmem:[%s2841_s2 + $0x8] sm:$0xff] (!%p423_p9)   ;;  %s2339_s2 = smov (!%p423_p9), 116  }
  0x1a   : > { %2001 = vmatpush3.bf16.msra.mxu0 (!%p423_p9), %v2212_v0 }
  0x1b   : > { %2002 = vmatprep.subr.bf16.mxu0 %v2330_v1  ;;  %s2502_s18 = scalar_select %p470_p10, %s2460_s17, 1  ;;  %v1904_v5 = vld [vmem:[%s2843_s3] ss:$0 sm:$0xff] }
  0x1d   : > { %s1903_s20 = sshll.u32 %s2502_s18, 3 }
  0x1e   : > { %2003 = vmatpush3.bf16.msra.mxu0 %v2213_v2  ;;  %s473_s26 = scalar_lea.vmem %s2842_s0, %s1903_s20  ;;  %s2332_s20 = smov 124  }
  0x1f   : > { %2008 = vmatprep.subr.bf16.mxu0 %v2330_v1  ;;  %v2509_v3 = vld [vmem:[%s473_s26] sm:$0xff]  ;;  %s2335_s26 = smov 92   ;;  %s2338_s0 = smov 80  }
  0x20   : > { %v480_v4 = vpack.c.bf16 %v2509_v3, %v2509_v3 }
  0x22   : > { %2005 = vmatmul.mubr.msk.bf16.vlgmr.msra.gmra.mrb[0].mxu0 %vm504_vm1, %v480_v4 }
  0x23   : > { %2010 = vmatprep.mubr.msk.bf16.mxu0 %vm2331_vm0, %v2330_v1 }
  0xf5   : > { %v542_v6 = vpop.f32.mrb[0].mxu0 }
  0xf6   : > { %v543_v7 = vadd.f32 %v1904_v5, %v542_v6  ;;  %v2006_v8 = vpop.f32.mrb[1].mxu0 }
  0xf7   : > { %v545_v9 = vpop.f32.mrb[2].mxu0 }
  0xf8   : > { %v2519_v10 = vpack.c.bf16 %v543_v7, %v543_v7  ;;  %v2007_v11 = vpop.f32.mrb[3].mxu0 }
  0xfa   : > { %668 = vrot.lane.b32.xlu1 %v2519_v10, %s2332_s20  ;;  %556 = vrot.lane.b32.xlu0 %v2519_v10, %s2333_s21  ;;  %s2340_s20 = smov 76   ;;  %s2341_s21 = smov 112  }
  0xfe   : > { %786 = vrot.lane.b32.xlu1 %v2519_v10, %s2334_s25  ;;  %670 = vrot.lane.b32.xlu0 %v2519_v10, %s2335_s26  ;;  %s2342_s25 = smov 72   ;;  %s2343_s26 = smov 108  }
 0x102   : > { %902 = vrot.lane.b32.xlu1 %v2519_v10, %s2336_s27  ;;  %784 = vrot.lane.b32.xlu0 %v2519_v10, %s2337_s28  ;;  %s2344_s27 = smov 68   ;;  %s2345_s28 = smov 104  }
 0x106   : > { %1018 = vrot.lane.b32.xlu1 %v2519_v10, %s2338_s0  ;;  %900 = vrot.lane.b32.xlu0 %v2519_v10, %s2339_s2  ;;  %s2346_s0 = smov 100   ;;  %s2353_s2 = smov 36  }
 0x10a   : > { %1134 = vrot.lane.b32.xlu1 %v2519_v10, %s2340_s20  ;;  %1016 = vrot.lane.b32.xlu0 %v2519_v10, %s2341_s21  ;;  %s476_s21 = scalar_lea.vmem %s2844_s1, %s2502_s18  ;;  %s2347_s18 = smov 60  }
 0x10b   : > { %v1908_v35 = vld [vmem:[%s476_s21] ss:$0 sm:$0xff]  ;;  %s2354_s20 = smov 48   ;;  %s2355_s21 = smov 4  }
 0x10e   : > { %1250 = vrot.lane.b32.xlu1 %v2519_v10, %s2342_s25  ;;  %1132 = vrot.lane.b32.xlu0 %v2519_v10, %s2343_s26  ;;  %s2348_s25 = smov 64   ;;  %s2349_s26 = smov 56  }
 0x112   : > { %1366 = vrot.lane.b32.xlu1 %v2519_v10, %s2344_s27  ;;  %1248 = vrot.lane.b32.xlu0 %v2519_v10, %s2345_s28  ;;  %s2350_s27 = smov 52   ;;  %s2351_s28 = smov 44  }
 0x116   : > { %1364 = vrot.lane.b32.xlu0 %v2519_v10, %s2346_s0  ;;  %s2352_s0 = smov 40  }
 0x16c   : > { %v557_v12 = vpop.permute.xlu0 %556  ;;  %v669_v14 = vpop.permute.xlu1 %668 }
 0x16d   : > { %v563_v13 = vsel %vm558_vm2, %v557_v12, 0 }
 0x16e   : > { %2009 = vmatpush3.bf16.xpose.msra.mxu0 %v563_v13 }
 0x16f   : > { %2014 = vmatprep.subr.bf16.mxu0 %v2330_v1 }
 0x170   : > { %v671_v15 = vpop.permute.xlu0 %670  ;;  %v787_v17 = vpop.permute.xlu1 %786 }
 0x171   : > { %v676_v16 = vsel %vm558_vm2, %v671_v15, 0  ;;  %v792_v18 = vsel %vm558_vm2, %v787_v17, 0 }
 0x172   : > { %2021 = vmatpush3.bf16.xpose.msra.mxu1 %v676_v16 }
 0x173   : > { %2032 = vmatprep.subr.bf16.mxu1 %v2330_v1 }
 0x174   : > { %v903_v19 = vpop.permute.xlu1 %902  ;;  %v785_v20 = vpop.permute.xlu0 %784 }
 0x175   : > { %2011 = vmatmul.mubr.msk.bf16.vlgmr.msra.gmra.mrb[4].mxu0 %vm558_vm2, %v2519_v10  ;;  %v908_v21 = vsel %vm558_vm2, %v903_v19, 0 }
 0x176   : > { %2016 = vmatprep.mubr.msk.bf16.mxu0 %vm2331_vm0, %v2330_v1 }
 0x178   : > { %v1019_v22 = vpop.permute.xlu1 %1018  ;;  %v901_v23 = vpop.permute.xlu0 %900 }
 0x179   : > { %2023 = vmatmul.mubr.msk.bf16.vlgmr.msra.gmra.mrb[0].mxu1 %vm558_vm2, %v669_v14  ;;  %v1024_v24 = vsel %vm558_vm2, %v1019_v22, 0 }
 0x17a   : > { %2033 = vmatpush3.bf16.xpose.msra.mxu1 %v792_v18  ;;  %2034 = vmatprep.mubr.msk.bf16.mxu1 %vm2331_vm0, %v2330_v1 }
 0x17b   : > { %2044 = vmatprep.subr.bf16.mxu1 %v2330_v1 }
 0x17c   : > { %v1135_v25 = vpop.permute.xlu1 %1134  ;;  %v1017_v26 = vpop.permute.xlu0 %1016 }
 0x17d   : > { %v1140_v27 = vsel %vm558_vm2, %v1135_v25, 0 }
 0x180   : > { %v1251_v28 = vpop.permute.xlu1 %1250  ;;  %v1133_v29 = vpop.permute.xlu0 %1132 }
 0x181   : > { %2035 = vmatmul.mubr.msk.bf16.vlgmr.msra.gmra.mrb[4].mxu1 %vm558_vm2, %v785_v20  ;;  %v1256_v30 = vsel %vm558_vm2, %v1251_v28, 0 }
 0x182   : > { %2045 = vmatpush3.bf16.xpose.msra.mxu1 %v908_v21  ;;  %2046 = vmatprep.mubr.msk.bf16.mxu1 %vm2331_vm0, %v2330_v1 }
 0x183   : > { %2056 = vmatprep.subr.bf16.mxu1 %v2330_v1 }
 0x184   : > { %v1367_v31 = vpop.permute.xlu1 %1366  ;;  %v1249_v32 = vpop.permute.xlu0 %1248 }
 0x185   : > { %v1372_v33 = vsel %vm558_vm2, %v1367_v31, 0 }
 0x188   : > { %v1365_v34 = vpop.permute.xlu0 %1364 }
 0x189   : > { %2047 = vmatmul.mubr.msk.bf16.vlgmr.msra.gmra.mrb[8].mxu1 %vm558_vm2, %v901_v23 }
 0x18a   : > { %2057 = vmatpush3.bf16.xpose.msra.mxu1 %v1024_v24  ;;  %2058 = vmatprep.mubr.msk.bf16.mxu1 %vm2331_vm0, %v2330_v1 }
 0x18b   : > { %2068 = vmatprep.subr.bf16.mxu1 %v2330_v1 }
 0x191   : > { %2059 = vmatmul.mubr.msk.bf16.vlgmr.msra.gmra.mrb[12].mxu1 %vm558_vm2, %v1017_v26 }
 0x192   : > { %2069 = vmatpush3.bf16.xpose.msra.mxu1 %v1140_v27  ;;  %2070 = vmatprep.mubr.msk.bf16.mxu1 %vm2331_vm0, %v2330_v1 }
 0x193   : > { %2080 = vmatprep.subr.bf16.mxu1 %v2330_v1 }
 0x199   : > { %2071 = vmatmul.mubr.msk.bf16.vlgmr.msra.gmra.mrb[16].mxu1 %vm558_vm2, %v1133_v29 }
 0x19a   : > { %2081 = vmatpush3.bf16.xpose.msra.mxu1 %v1256_v30  ;;  %2082 = vmatprep.mubr.msk.bf16.mxu1 %vm2331_vm0, %v2330_v1 }
 0x19b   : > { %2092 = vmatprep.subr.bf16.mxu1 %v2330_v1 }
 0x1a1   : > { %2083 = vmatmul.mubr.msk.bf16.vlgmr.msra.gmra.mrb[20].mxu1 %vm558_vm2, %v1249_v32 }
 0x1a2   : > { %2093 = vmatpush3.bf16.xpose.msra.mxu1 %v1372_v33  ;;  %2094 = vmatprep.mubr.msk.bf16.mxu1 %vm2331_vm0, %v2330_v1 }
 0x1a3   : > { %2104 = vmatprep.subr.bf16.mxu1 %v2330_v1 }
 0x1a9   : > { %2095 = vmatmul.mubr.msk.bf16.vlgmr.msra.gmra.mrb[24].mxu1 %vm558_vm2, %v1365_v34 }
 0x1aa   : > { %2108 = vmatprep.mubr.msk.bf16.mxu1 %vm2331_vm0, %v2330_v1 }
 0x248   : > { %v599_v36 = vpop.f32.mrb[4].mxu0 }
 0x249   : > { %v2581_v37 = vadd.f32 %v1908_v35, %v599_v36  ;;  %v2012_v38 = vpop.f32.mrb[5].mxu0 }
 0x24a   : > { %v602_v39 = vpop.f32.mrb[6].mxu0 }
 0x24b   : > { %v2013_v40 = vpop.f32.mrb[7].mxu0  ;;  %v606_v41 = vsel %vm605_vm3, %v2581_v37, -inf }
 0x24c   : > { %v712_v42 = vpop.f32.mrb[0].mxu1  ;;  %607 = vmax.xlane.f32.xlu1 %v606_v41 }
 0x24d   : > { %v713_v43 = vadd.f32 %v1908_v35, %v712_v42  ;;  %v2024_v44 = vpop.f32.mrb[1].mxu1 }
 0x24e   : > { %v715_v45 = vpop.f32.mrb[2].mxu1 }
 0x24f   : > { %v2025_v46 = vpop.f32.mrb[3].mxu1  ;;  %v718_v47 = vsel %vm605_vm3, %v713_v43, -inf }
 0x250   : > { %719 = vmax.xlane.f32.xlu0 %v718_v47 }
 0x254   : > { %v828_v48 = vpop.f32.mrb[4].mxu1 }
 0x255   : > { %v829_v49 = vadd.f32 %v1908_v35, %v828_v48  ;;  %v2036_v50 = vpop.f32.mrb[5].mxu1 }
 0x256   : > { %v831_v51 = vpop.f32.mrb[6].mxu1 }
 0x257   : > { %v2037_v52 = vpop.f32.mrb[7].mxu1  ;;  %v834_v53 = vsel %vm605_vm3, %v829_v49, -inf }
 0x258   : > { %835 = vmax.xlane.f32.xlu0 %v834_v53 }
 0x25c   : > { %v944_v54 = vpop.f32.mrb[8].mxu1 }
 0x25d   : > { %v945_v55 = vadd.f32 %v1908_v35, %v944_v54  ;;  %v2048_v56 = vpop.f32.mrb[9].mxu1 }
 0x25e   : > { %v947_v57 = vpop.f32.mrb[10].mxu1 }
 0x25f   : > { %v2049_v58 = vpop.f32.mrb[11].mxu1  ;;  %v950_v59 = vsel %vm605_vm3, %v945_v55, -inf }
 0x260   : > { %951 = vmax.xlane.f32.xlu1 %v950_v59 }
 0x264   : > { %v1060_v60 = vpop.f32.mrb[12].mxu1 }
 0x265   : > { %v1061_v61 = vadd.f32 %v1908_v35, %v1060_v60  ;;  %v2060_v62 = vpop.f32.mrb[13].mxu1 }
 0x266   : > { %v1063_v63 = vpop.f32.mrb[14].mxu1 }
 0x267   : > { %v2061_v0 = vpop.f32.mrb[15].mxu1  ;;  %v1066_v2 = vsel %vm605_vm3, %v1061_v61, -inf }
 0x268   : > { %1067 = vmax.xlane.f32.xlu0 %v1066_v2 }
 0x26c   : > { %v1176_v4 = vpop.f32.mrb[16].mxu1 }
 0x26d   : > { %v2589_v5 = vadd.f32 %v1908_v35, %v1176_v4  ;;  %v2072_v6 = vpop.f32.mrb[17].mxu1 }
 0x26e   : > { %v1179_v7 = vpop.f32.mrb[18].mxu1 }
 0x26f   : > { %v2073_v8 = vpop.f32.mrb[19].mxu1  ;;  %v1182_v9 = vsel %vm605_vm3, %v2589_v5, -inf }
 0x270   : > { %1183 = vmax.xlane.f32.xlu1 %v1182_v9 }
 0x274   : > { %v1292_v11 = vpop.f32.mrb[20].mxu1 }
 0x275   : > { %v1293_v12 = vadd.f32 %v1908_v35, %v1292_v11  ;;  %v2084_v13 = vpop.f32.mrb[21].mxu1 }
 0x276   : > { %v1295_v14 = vpop.f32.mrb[22].mxu1 }
 0x277   : > { %v2085_v15 = vpop.f32.mrb[23].mxu1  ;;  %v1298_v16 = vsel %vm605_vm3, %v1293_v12, -inf }
 0x278   : > { %1299 = vmax.xlane.f32.xlu0 %v1298_v16 }
 0x27c   : > { %v1408_v17 = vpop.f32.mrb[24].mxu1 }
 0x27d   : > { %v2594_v18 = vadd.f32 %v1908_v35, %v1408_v17  ;;  %v2096_v19 = vpop.f32.mrb[25].mxu1 }
 0x27e   : > { %v1411_v20 = vpop.f32.mrb[26].mxu1 }
 0x27f   : > { %v2097_v21 = vpop.f32.mrb[27].mxu1  ;;  %v1414_v22 = vsel %vm605_vm3, %v2594_v18, -inf }
 0x281   : > { %730 = vrot.lane.b32.xlu1 %v2519_v10, %s2347_s18  ;;  %s2356_s18 = smov 8  }
 0x28e   : > { %618 = vrot.lane.b32.xlu0 %v2519_v10, %s2348_s25  ;;  %s2357_s25 = smov 12  }
 0x2a5   : > { %1415 = vmax.xlane.f32.xlu1 %v1414_v22 }
 0x2b6   : > { %846 = vrot.lane.b32.xlu1 %v2519_v10, %s2349_s26  ;;  %s2358_s26 = smov 16  }
 0x2d9   : > { %v608_v23 = vpop.xlane.xlu1 %607 }
 0x2da   : > { %v609_v24 = vsub.f32 %v2581_v37, %v608_v23 }
 0x2dc   : > { %v610_v25 = vmul.f32 1.442695, %v609_v24 }
 0x2dd   : > { %v720_v26 = vpop.xlane.xlu0 %719 }
 0x2de   : > { %2226 = vpow2.f32 %v610_v25  ;;  %v721_v27 = vsub.f32 %v713_v43, %v720_v26 }
 0x2e0   : > { %v722_v28 = vmul.f32 1.442695, %v721_v27 }
 0x2e2   : > { %2228 = vpow2.f32 %v722_v28 }
 0x2e5   : > { %v836_v29 = vpop.xlane.xlu0 %835 }
 0x2e6   : > { %v837_v30 = vsub.f32 %v829_v49, %v836_v29 }
 0x2e8   : > { %v2602_v31 = vpop.eup %2226  ;;  %v838_v32 = vmul.f32 1.442695, %v837_v30 }
 0x2e9   : > { %v612_v33 = vsel %vm605_vm3, %v2602_v31, 0.0 }
 0x2ea   : > { %2230 = vpow2.f32 %v838_v32  ;;  %613 = vadd.xlane.f32.xlu0 %v612_v33 }
 0x2ec   : > { %v2606_v34 = vpop.eup %2228 }
 0x2ed   : > { %v952_v35 = vpop.xlane.xlu1 %951  ;;  %v724_v36 = vsel %vm605_vm3, %v2606_v34, 0.0 }
 0x2ee   : > { %v953_v37 = vsub.f32 %v945_v55, %v952_v35  ;;  %725 = vadd.xlane.f32.xlu1 %v724_v36 }
 0x2f0   : > { %v954_v38 = vmul.f32 1.442695, %v953_v37 }
 0x2f2   : > { %2232 = vpow2.f32 %v954_v38 }
 0x2f4   : > { %v2610_v39 = vpop.eup %2230 }
 0x2f5   : > { %v1068_v40 = vpop.xlane.xlu0 %1067  ;;  %v840_v41 = vsel %vm605_vm3, %v2610_v39, 0.0 }
 0x2f6   : > { %v1069_v42 = vsub.f32 %v1061_v61, %v1068_v40  ;;  %841 = vadd.xlane.f32.xlu0 %v840_v41 }
 0x2f8   : > { %v1070_v43 = vmul.f32 1.442695, %v1069_v42 }
 0x2fa   : > { %2234 = vpow2.f32 %v1070_v43 }
 0x2fc   : > { %v2614_v44 = vpop.eup %2232 }
 0x2fd   : > { %v956_v45 = vsel %vm605_vm3, %v2614_v44, 0.0  ;;  %v1184_v53 = vpop.xlane.xlu1 %1183 }
 0x2fe   : > { %957 = vadd.xlane.f32.xlu1 %v956_v45  ;;  %v1185_v55 = vsub.f32 %v2589_v5, %v1184_v53 }
 0x300   : > { %v1186_v57 = vmul.f32 1.442695, %v1185_v55 }
 0x301   : > { %v731_v60 = vpop.permute.xlu1 %730 }
 0x302   : > { %v736_v13 = vsel %vm623_vm4, %v731_v60, 0 }
 0x304   : > { %v2618_v46 = vpop.eup %2234 }
 0x305   : > { %v1300_v47 = vpop.xlane.xlu0 %1299  ;;  %v1072_v48 = vsel %vm605_vm3, %v2618_v46, 0.0 }
 0x306   : > { %v1301_v49 = vsub.f32 %v1293_v12, %v1300_v47  ;;  %1073 = vadd.xlane.f32.xlu1 %v1072_v48 }
 0x308   : > { %v1302_v50 = vmul.f32 1.442695, %v1301_v49 }
 0x309   : > { %v619_v51 = vpop.permute.xlu0 %618 }
 0x30a   : > { %2236 = vpow2.f32 %v1302_v50  ;;  %v625_v52 = vsel %vm623_vm4, %v619_v51, 0 }
 0x30b   : > { %2015 = vmatpush3.bf16.msra.mxu0 %v625_v52  ;;  %2238 = vpow2.f32 %v1186_v57 }
 0x30c   : > { %962 = vrot.lane.b32.xlu0 %v2519_v10, %s2350_s27  ;;  %2026 = vmatprep.subr.bf16.mxu0 %v2330_v1  ;;  %s2359_s27 = smov 20  }
 0x314   : > { %v2625_v54 = vpop.eup %2236 }
 0x315   : > { %v1304_v56 = vsel %vm605_vm3, %v2625_v54, 0.0  ;;  %v2630_v58 = vpop.eup %2238 }
 0x316   : > { %1305 = vadd.xlane.f32.xlu1 %v1304_v56  ;;  %v1188_v59 = vsel %vm605_vm3, %v2630_v58, 0.0 }
 0x32b   : > { %1189 = vadd.xlane.f32.xlu0 %v1188_v59 }
 0x332   : > { %v1416_v61 = vpop.xlane.xlu1 %1415 }
 0x333   : > { %v1417_v62 = vsub.f32 %v2594_v18, %v1416_v61 }
 0x335   : > { %v1418_v63 = vmul.f32 1.442695, %v1417_v62 }
 0x336   : > { %v847_v4 = vpop.permute.xlu1 %846 }
 0x337   : > { %2240 = vpow2.f32 %v1418_v63  ;;  %v852_v17 = vsel %vm623_vm4, %v847_v4, 0 }
 0x341   : > { %v2635_v0 = vpop.eup %2240  ;;  %1194 = vrot.lane.b32.xlu0 %v2519_v10, %s2351_s28  ;;  %s467_s28 = sand.u32 1, %s2320_s30  }
 0x342   : > { %v1420_v2 = vsel %vm605_vm3, %v2635_v0, 0.0 }
 0x343   : > { %1421 = vadd.xlane.f32.xlu1 %v1420_v2 }
 0x345   : > { %1310 = vrot.lane.b32.xlu0 %v2519_v10, %s2352_s0  ;;  %s1902_s0 = sshll.u32 %s467_s28, 3 }
 0x349   : > { %1426 = vrot.lane.b32.xlu0 %v2519_v10, %s2353_s2  ;;  %s1817_s2 = scalar_lea.sflag [#allocation4], %s467_s28 }
 0x354   : > { %1078 = vrot.lane.b32.xlu1 %v2519_v10, %s2354_s20 }
 0x377   : > { %v614_v5 = vpop.xlane.xlu0 %613 }
 0x378   : > { %2242 = vrcp.f32 %v614_v5 }
 0x37b   : > { %v726_v6 = vpop.xlane.xlu1 %725 }
 0x37c   : > { %2244 = vrcp.f32 %v726_v6 }
 0x382   : > { %v2243_v7 = vpop.eup %2242 }
 0x383   : > { %v616_v8 = vmul.f32 %v2243_v7, %v2602_v31  ;;  %v842_v9 = vpop.xlane.xlu0 %841 }
 0x384   : > { %2246 = vrcp.f32 %v842_v9 }
 0x385   : > { %v617_v11 = vpack.c.bf16 %v616_v8, %v616_v8 }
 0x386   : > { %v2245_v12 = vpop.eup %2244 }
 0x387   : > { %2017 = vmatmul.mubr.msk.bf16.vlgmr.msra.gmra.mrb[8].mxu0 %vm605_vm3, %v617_v11  ;;  %v728_v10 = vmul.f32 %v2245_v12, %v2606_v34  ;;  %v963_v19 = vpop.permute.xlu0 %962  ;;  %v2214_v12 = vld [vmem:[%s2845_s4] sm:$0xff]  }
 0x388   : > { %2027 = vmatpush3.bf16.msra.mxu0 %v736_v13  ;;  %2028 = vmatprep.mubr.msk.bf16.mxu0 %vm2331_vm0, %v2330_v1  ;;  %v968_v22 = vsel %vm623_vm4, %v963_v19, 0  ;;  %v2215_v13 = vld [vmem:[%s2845_s4 + $0x8] sm:$0xff]  }
 0x389   : > { %2038 = vmatprep.subr.bf16.mxu0 %v2330_v1  ;;  %v729_v15 = vpack.c.bf16 %v728_v10, %v728_v10  ;;  %2105 = vmatpush3.bf16.msra.mxu1 %v2214_v12 }
 0x38a   : > { %2106 = vmatprep.subr.bf16.mxu1 %v2330_v1 }
 0x38b   : > { %v958_v14 = vpop.xlane.xlu1 %957 }
 0x38c   : > { %2248 = vrcp.f32 %v958_v14 }
 0x38d   : > { %2107 = vmatpush3.bf16.msra.mxu1 %v2215_v13 }
 0x38e   : > { %v2247_v16 = vpop.eup %2246  ;;  %2120 = vmatprep.subr.bf16.mxu1 %v2330_v1 }
 0x38f   : > { %2029 = vmatmul.mubr.msk.bf16.vlgmr.msra.gmra.mrb[12].mxu0 %vm605_vm3, %v729_v15  ;;  %v844_v18 = vmul.f32 %v2247_v16, %v2610_v39 }
 0x390   : > { %2039 = vmatpush3.bf16.msra.mxu0 %v852_v17  ;;  %2040 = vmatprep.mubr.msk.bf16.mxu0 %vm2331_vm0, %v2330_v1 }
 0x391   : > { %2050 = vmatprep.subr.bf16.mxu0 %v2330_v1  ;;  %v845_v20 = vpack.c.bf16 %v844_v18, %v844_v18 }
 0x393   : > { %v1074_v25 = vpop.xlane.xlu1 %1073 }
 0x394   : > { %2250 = vrcp.f32 %v1074_v25 }
 0x396   : > { %v2249_v21 = vpop.eup %2248 }
 0x397   : > { %2041 = vmatmul.mubr.msk.bf16.vlgmr.msra.gmra.mrb[16].mxu0 %vm605_vm3, %v845_v20  ;;  %v960_v23 = vmul.f32 %v2249_v21, %v2614_v44 }
 0x398   : > { %2051 = vmatpush3.bf16.msra.mxu0 %v968_v22  ;;  %2052 = vmatprep.mubr.msk.bf16.mxu0 %vm2331_vm0, %v2330_v1 }
 0x399   : > { %2062 = vmatprep.subr.bf16.mxu0 %v2330_v1  ;;  %v961_v24 = vpack.c.bf16 %v960_v23, %v960_v23 }
 0x39e   : > { %v2251_v28 = vpop.eup %2250 }
 0x39f   : > { %2053 = vmatmul.mubr.msk.bf16.vlgmr.msra.gmra.mrb[20].mxu0 %vm605_vm3, %v961_v24  ;;  %v1076_v30 = vmul.f32 %v2251_v28, %v2618_v46 }
 0x3a0   : > { %2064 = vmatprep.mubr.msk.bf16.mxu0 %vm2331_vm0, %v2330_v1 }
 0x3a1   : > { %v1077_v34 = vpack.c.bf16 %v1076_v30, %v1076_v30  ;;  %v1925_v30 = vld [vmem:[%s2824_s5] ss:$0 sm:$0xff] }
 0x3a3   : > { %v1306_v27 = vpop.xlane.xlu1 %1305 }
 0x3b8   : > { %v1190_v26 = vpop.xlane.xlu0 %1189 }
 0x3b9   : > { %2252 = vrcp.f32 %v1190_v26 }
 0x3ba   : > { %2254 = vrcp.f32 %v1306_v27 }
 0x3bc   : > { %v1195_v33 = vpop.permute.xlu0 %1194 }
 0x3bd   : > { %v1200_v36 = vsel %vm623_vm4, %v1195_v33, 0 }
 0x3c0   : > { %v1311_v38 = vpop.permute.xlu0 %1310 }
 0x3c1   : > { %v1316_v41 = vsel %vm623_vm4, %v1311_v38, 0 }
 0x3c3   : > { %v2253_v35 = vpop.eup %2252 }
 0x3c4   : > { %v1192_v37 = vmul.f32 %v2253_v35, %v2630_v58  ;;  %v2255_v40 = vpop.eup %2254  ;;  %v1427_v43 = vpop.permute.xlu0 %1426 }
 0x3c5   : > { %v1308_v42 = vmul.f32 %v2255_v40, %v2625_v54  ;;  %v1432_v46 = vsel %vm623_vm4, %v1427_v43, 0  ;;  %v2216_v43 = vld [vmem:[%s2827_s8] sm:$0xff]  }
 0x3c6   : > { %v1193_v39 = vpack.c.bf16 %v1192_v37, %v1192_v37 }
 0x3c7   : > { %v1309_v44 = vpack.c.bf16 %v1308_v42, %v1308_v42 }
 0x3d0   : > { %v1422_v29 = vpop.xlane.xlu1 %1421 }
 0x3d1   : > { %2256 = vrcp.f32 %v1422_v29 }
 0x3d4   : > { %v1079_v31 = vpop.permute.xlu1 %1078 }
 0x3d5   : > { %v1084_v32 = vsel %vm623_vm4, %v1079_v31, 0 }
 0x3d6   : > { %2063 = vmatpush3.bf16.msra.mxu0 %v1084_v32 }
 0x3d7   : > { %2074 = vmatprep.subr.bf16.mxu0 %v2330_v1 }
 0x3d9   : > { %2065 = vmatmul.mubr.msk.bf16.vlgmr.msra.gmra.mrb[24].mxu0 %vm605_vm3, %v1077_v34 }
 0x3da   : > { %2075 = vmatpush3.bf16.msra.mxu0 %v1200_v36  ;;  %2076 = vmatprep.mubr.msk.bf16.mxu0 %vm2331_vm0, %v2330_v1 }
 0x3db   : > { %2086 = vmatprep.subr.bf16.mxu0 %v2330_v1  ;;  %v2257_v45 = vpop.eup %2256 }
 0x3dc   : > { %v1424_v47 = vmul.f32 %v2257_v45, %v2635_v0 }
 0x3de   : > { %v1425_v48 = vpack.c.bf16 %v1424_v47, %v1424_v47 }
 0x3e1   : > { %2077 = vmatmul.mubr.msk.bf16.vlgmr.msra.gmra.mrb[28].mxu0 %vm605_vm3, %v1193_v39 }
 0x3e2   : > { %2087 = vmatpush3.bf16.msra.mxu0 %v1316_v41  ;;  %2088 = vmatprep.mubr.msk.bf16.mxu0 %vm2331_vm0, %v2330_v1 }
 0x3e3   : > { %2098 = vmatprep.subr.bf16.mxu0 %v2330_v1 }
 0x3e9   : > { %2089 = vmatmul.mubr.msk.bf16.vlgmr.msra.gmra.mrb[32].mxu0 %vm605_vm3, %v1309_v44  ;;  %v2217_v44 = vld [vmem:[%s2827_s8 + $0x8] sm:$0xff]  }
 0x3ea   : > { %2099 = vmatpush3.bf16.msra.mxu0 %v1432_v46  ;;  %2100 = vmatprep.mubr.msk.bf16.mxu0 %vm2331_vm0, %v2330_v1 }
 0x3eb   : > { %2112 = vmatprep.subr.bf16.mxu0 %v2330_v1 }
 0x3f1   : > { %2101 = vmatmul.mubr.msk.bf16.vlgmr.msra.gmra.mrb[36].mxu0 %vm605_vm3, %v1425_v48  ;;  %v1929_v48 = vld [vmem:[%s2825_s6] ss:$0 sm:$0xff] }
 0x3f2   : > { %2116 = vmatprep.mubr.msk.bf16.mxu0 %vm2331_vm0, %v2330_v1  ;;  %2113 = vmatpush3.bf16.msra.mxu0 %v2216_v43 }
 0x3f3   : > { %2114 = vmatprep.subr.bf16.mxu0 %v2330_v1 }
 0x3f6   : > { %2115 = vmatpush3.bf16.msra.mxu0 %v2217_v44 }
 0x45a   : > { %v661_v49 = vpop.f32.mrb[8].mxu0 }
 0x45b   : > { %667 = vst.msk [vmem:[#allocation2] sm:$0xff] %vm558_vm2, %v661_v49  ;;  %v2018_v50 = vpop.f32.mrb[9].mxu0 }
 0x45c   : > { %v664_v51 = vpop.f32.mrb[10].mxu0  ;;  %v1930_v50 = vld [vmem:[%s2826_s7] ss:$0 sm:$0xff] }
 0x45d   : > { %v2019_v52 = vpop.f32.mrb[11].mxu0 }
 0x462   : > { %v772_v53 = vpop.f32.mrb[12].mxu0 }
 0x463   : > { %779 = vrot.lane.b32.xlu1 %v772_v53, %s2355_s21  ;;  %v2030_v54 = vpop.f32.mrb[13].mxu0  ;;  %s2360_s21 = smov 24  }
 0x464   : > { %v775_v55 = vpop.f32.mrb[14].mxu0  ;;  %v2218_v54 = vld [vmem:[%s2829_s10] sm:$0xff]  }
 0x465   : > { %v2031_v56 = vpop.f32.mrb[15].mxu0  ;;  %v2219_v55 = vld [vmem:[%s2829_s10 + $0x8] sm:$0xff]  }
 0x466   : > { %v2220_v56 = vld [vmem:[%s2829_s10 + $0x10] sm:$0xff]  }
 0x46a   : > { %v888_v57 = vpop.f32.mrb[16].mxu0 }
 0x46b   : > { %895 = vrot.lane.b32.xlu0 %v888_v57, %s2356_s18  ;;  %v2042_v58 = vpop.f32.mrb[17].mxu0  ;;  %s2361_s18 = smov 28   ;;  %v2221_v57 = vld [vmem:[%s2829_s10 + $0x18] sm:$0xff]  }
 0x46c   : > { %v891_v59 = vpop.f32.mrb[18].mxu0  ;;  %v2222_v58 = vld [vmem:[%s2829_s10 + $0x20] sm:$0xff]  }
 0x46d   : > { %v2043_v60 = vpop.f32.mrb[19].mxu0  ;;  %v2223_v59 = vld [vmem:[%s2829_s10 + $0x28] sm:$0xff]  }
 0x46e   : > { %v2224_v60 = vld [vmem:[%s2829_s10 + $0x30] sm:$0xff]  }
 0x472   : > { %v1004_v61 = vpop.f32.mrb[20].mxu0 }
 0x473   : > { %1011 = vrot.lane.b32.xlu1 %v1004_v61, %s2357_s25  ;;  %v2054_v62 = vpop.f32.mrb[21].mxu0  ;;  %v2225_v61 = vld [vmem:[%s2829_s10 + $0x38] sm:$0xff]   ;;  %s1947_s25 = sshll.u32 %s2460_s17, 7  ;;  %s2363_s17 = smov [#allocation3]  }
 0x474   : > { %v1007_v63 = vpop.f32.mrb[22].mxu0  ;;  %v1931_v62 = vld [vmem:[%s2828_s9] ss:$0 sm:$0xff]  ;;  %s2776_s4 = scalar_lea.hbm %s2833_s14, %s1947_s25 }
 0x475   : > { %v2055_v0 = vpop.f32.mrb[23].mxu0 }
 0x4ac   : > { %v1120_v2 = vpop.f32.mrb[24].mxu0 }
 0x4ad   : > { %1127 = vrot.lane.b32.xlu0 %v1120_v2, %s2358_s26  ;;  %v2066_v4 = vpop.f32.mrb[25].mxu0  ;;  %s469_s26 = scalar_lea.vmem [#allocation3], %s1902_s0  ;;  %s2270_s0 = sshll.u32 %s2363_s17, 4  ;;  %s2271_s0 = int_to_ptr.vmem [resolvable:$false] %s2270_s0 }
 0x4ae   : > { %v1123_v5 = vpop.f32.mrb[26].mxu0 }
 0x4af   : > { %v2067_v6 = vpop.f32.mrb[27].mxu0 }
 0x4b4   : > { %v1236_v7 = vpop.f32.mrb[28].mxu0 }
 0x4b5   : > { %1243 = vrot.lane.b32.xlu1 %v1236_v7, %s2359_s27  ;;  %v2078_v8 = vpop.f32.mrb[29].mxu0  ;;  %s1830_s27 = sshll.u32 %s469_s26, 4  ;;  %s2778_s27 = int_to_ptr.vmem [resolvable:$true] %s1830_s27 }
 0x4b6   : > { %v1239_v9 = vpop.f32.mrb[30].mxu0  ;;  %s2266_s20 = scalar_lea.vmem %s2778_s27, 128  ;;  %p2273_p0 = scmp.lt.s32.totalorder %s2778_s27, %s2271_s0 }
 0x4b7   : > { %v2079_v11 = vpop.f32.mrb[31].mxu0  ;;  %p2267_p11 = scmp.ne.s32.totalorder %s2778_s27, %s2266_s20 }
 0x4b9   : > { %p2268_p12 = pnand %p2267_p11, %p2477_p5 }
 0x4bb   : > { %p2269_p13 = pneg %p2268_p12 }
 0x4bc   : > { %v1352_v10 = vpop.f32.mrb[32].mxu0 }
 0x4bd   : > { %1359 = vrot.lane.b32.xlu0 %v1352_v10, %s2360_s21  ;;  %v2090_v14 = vpop.f32.mrb[33].mxu0  ;;  %s2272_s21 = scalar_lea.vmem %s2271_s0, 256 }
 0x4be   : > { %v1355_v15 = vpop.f32.mrb[34].mxu0  ;;  %p2274_p1 = scmp.lt.s32.totalorder %s2272_s21, %s2266_s20 }
 0x4bf   : > { %v2091_v16 = vpop.f32.mrb[35].mxu0 }
 0x4c0   : > { %p2275_p2 = por %p2274_p1, %p2273_p0 }
 0x4c2   : > { %p2276_p3 = pnand %p2275_p2, %p2269_p13 }
 0x4c4   : > { %v1468_v17 = vpop.f32.mrb[36].mxu0 }
 0x4c5   : > { %1475 = vrot.lane.b32.xlu1 %v1468_v17, %s2361_s18  ;;  %v2102_v18 = vpop.f32.mrb[37].mxu0 }
 0x4c6   : > { %v1471_v19 = vpop.f32.mrb[38].mxu0 }
 0x4c7   : > { %v2103_v20 = vpop.f32.mrb[39].mxu0 }
 0x4d5   : > { %v780_v21 = vpop.permute.xlu1 %779 }
 0x4d6   : > { %783 = vst.msk [vmem:[#allocation2] sm:$0xff] %vm782_vm5, %v780_v21 }
 0x4dd   : > { %v896_v22 = vpop.permute.xlu0 %895 }
 0x4de   : > { %899 = vst.msk [vmem:[#allocation2] sm:$0xff] %vm898_vm6, %v896_v22 }
 0x4e5   : > { %v1012_v23 = vpop.permute.xlu1 %1011 }
 0x4e6   : > { %1015 = vst.msk [vmem:[#allocation2] sm:$0xff] %vm1014_vm7, %v1012_v23 }
 0x51f   : > { %v1128_v24 = vpop.permute.xlu0 %1127 }
 0x520   : > { %1131 = vst.msk [vmem:[#allocation2] sm:$0xff] %vm1130_vm8, %v1128_v24 }
 0x527   : > { %v1244_v25 = vpop.permute.xlu1 %1243 }
 0x528   : > { %1247 = vst.msk [vmem:[#allocation2] sm:$0xff] %vm1246_vm9, %v1244_v25  ;;  %v2362_v25 = vmov -1.0  }
 0x52f   : > { %v1360_v26 = vpop.permute.xlu0 %1359 }
 0x530   : > { %1363 = vst.msk [vmem:[#allocation2] sm:$0xff] %vm1362_vm10, %v1360_v26 }
 0x537   : > { %v1476_v27 = vpop.permute.xlu1 %1475 }
 0x538   : > { %1479 = vst.msk [vmem:[#allocation2] sm:$0xff] %vm1478_vm11, %v1476_v27 }
 0x53f   : > { %v1480_v28 = vld [vmem:[#allocation2] sm:$0xff] }
 0x540   : > { %v1481_v29 = vpack.c.bf16 %v1480_v28, %v1480_v28 }
 0x542   : > { %2109 = vmatmul.mubr.msk.bf16.vlgmr.msra.gmra.mrb[28].mxu1 %vm504_vm1, %v1481_v29 }
 0x543   : > { %2136 = vmatprep.mubr.msk.bf16.mxu1 %vm2331_vm0, %v2330_v1  ;;  %2121 = vmatpush3.bf16.msra.mxu1 %v2218_v54 }
 0x544   : > { %2122 = vmatprep.subr.bf16.mxu1 %v2330_v1 }
 0x547   : > { %2123 = vmatpush3.bf16.msra.mxu1 %v2219_v55 }
 0x548   : > { %2124 = vmatprep.subr.bf16.mxu1 %v2330_v1 }
 0x54b   : > { %2125 = vmatpush3.bf16.msra.mxu1 %v2220_v56 }
 0x54c   : > { %2126 = vmatprep.subr.bf16.mxu1 %v2330_v1 }
 0x54f   : > { %2127 = vmatpush3.bf16.msra.mxu1 %v2221_v57 }
 0x550   : > { %2128 = vmatprep.subr.bf16.mxu1 %v2330_v1 }
 0x553   : > { %2129 = vmatpush3.bf16.msra.mxu1 %v2222_v58 }
 0x554   : > { %2130 = vmatprep.subr.bf16.mxu1 %v2330_v1 }
 0x557   : > { %2131 = vmatpush3.bf16.msra.mxu1 %v2223_v59 }
 0x558   : > { %2132 = vmatprep.subr.bf16.mxu1 %v2330_v1 }
 0x55b   : > { %2133 = vmatpush3.bf16.msra.mxu1 %v2224_v60 }
 0x55c   : > { %2134 = vmatprep.subr.bf16.mxu1 %v2330_v1 }
 0x55f   : > { %2135 = vmatpush3.bf16.msra.mxu1 %v2225_v61 }
 0x615   : > { %v1542_v31 = vpop.f32.mrb[28].mxu1 }
 0x616   : > { %v1543_v32 = vadd.f32 %v1925_v30, %v1542_v31  ;;  %v2110_v33 = vpop.f32.mrb[29].mxu1 }
 0x617   : > { %v1545_v34 = vpop.f32.mrb[30].mxu1 }
 0x618   : > { %v2111_v35 = vpop.f32.mrb[31].mxu1  ;;  %v1548_v36 = vadd.f32 %v1543_v32, %v2509_v3  ;;  %v1935_v32 = vld [vmem:[%s2830_s11] ss:$0 sm:$0xff] }
 0x61a   : > { %v1551_v37 = vsel %vm504_vm1, %v1548_v36, 0.0 }
 0x61b   : > { %1552 = vadd.xlane.f32.xlu0 %v1551_v37 }
 0x6a8   : > { %v1553_v38 = vpop.xlane.xlu0 %1552 }
 0x6a9   : > { %v1555_v39 = vmul.f32 0.03125, %v1553_v38 }
 0x6ab   : > { %v1556_v40 = vsub.f32 %v1548_v36, %v1555_v39 }
 0x6ad   : > { %v1557_v41 = vmul.f32 %v1556_v40, %v1556_v40 }
 0x6af   : > { %v1558_v42 = vsel %vm504_vm1, %v1557_v41, 0.0 }
 0x6b0   : > { %1559 = vadd.xlane.f32.xlu1 %v1558_v42 }
 0x73d   : > { %v1560_v3 = vpop.xlane.xlu1 %1559 }
 0x73e   : > { %v1561_v45 = vmul.f32 0.03125, %v1560_v3 }
 0x740   : > { %v1562_v46 = vadd.f32 1e-05, %v1561_v45 }
 0x742   : > { %2258 = vrsqrt.f32 %v1562_v46 }
 0x74c   : > { %v2259_v47 = vpop.eup %2258 }
 0x74d   : > { %v1564_v49 = vmul.f32 %v2259_v47, %v1556_v40 }
 0x74f   : > { %v1571_v51 = vmul.f32 %v1929_v48, %v1564_v49  ;;  %v1944_v48 = vld [vmem:[%s2831_s12] ss:$0 sm:$0xff] }
 0x751   : > { %v2720_v52 = vadd.f32 %v1930_v50, %v1571_v51  ;;  %v1945_v50 = vld [vmem:[%s2832_s13] ss:$0 sm:$0xff] }
 0x753   : > { %v1579_v53 = vpack.c.bf16 %v2720_v52, %v2720_v52 }
 0x755   : > { %2117 = vmatmul.mubr.msk.bf16.vlgmr.msra.gmra.mrb[40].mxu0 %vm504_vm1, %v1579_v53 }
 0x828   : > { %v1640_v63 = vpop.f32.mrb[40].mxu0 }
 0x829   : > { %v1641_v0 = vadd.f32 %v1931_v62, %v1640_v63  ;;  %v2118_v2 = vpop.f32.mrb[41].mxu0 }
 0x82a   : > { %v1643_v4 = vpop.f32.mrb[42].mxu0 }
 0x82b   : > { %v1646_v5 = vmul.f32 0.70710677, %v1641_v0  ;;  %v2119_v6 = vpop.f32.mrb[43].mxu0  ;;  %v1670_v28 = vmul.f32 0.5, %v1641_v0 }
 0x82d   : > { %v1649_v7 = vand.u32 2147483647, %v1646_v5  ;;  %vm1647_vm12 = vcmp.ge.f32.partialorder %v1646_v5, 0.0 }
 0x82e   : > { %v1648_v26 = vsel %vm1647_vm12, 1.0, %v2362_v25 }
 0x82f   : > { %v1650_v8 = vmul.f32 0.3275911, %v1649_v7  ;;  %v1663_v1 = vsub.f32 0.0, %v1649_v7 }
 0x831   : > { %v1651_v9 = vadd.f32 1.0, %v1650_v8  ;;  %v1664_v12 = vmul.f32 %v1663_v1, %v1649_v7 }
 0x833   : > { %2260 = vrcp.f32 %v1651_v9  ;;  %v1665_v14 = vmul.f32 1.442695, %v1664_v12 }
 0x835   : > { %2262 = vpow2.f32 %v1665_v14 }
 0x83d   : > { %v2261_v11 = vpop.eup %2260 }
 0x83e   : > { %v1654_v13 = vmul.f32 1.0614054, %v2261_v11 }
 0x83f   : > { %v2263_v22 = vpop.eup %2262 }
 0x840   : > { %v1655_v10 = vadd.f32 -1.4531521, %v1654_v13 }
 0x842   : > { %v1656_v15 = vmul.f32 %v2261_v11, %v1655_v10 }
 0x844   : > { %v1657_v16 = vadd.f32 1.4214138, %v1656_v15 }
 0x846   : > { %v1658_v17 = vmul.f32 %v2261_v11, %v1657_v16 }
 0x848   : > { %v1659_v18 = vadd.f32 -0.28449672, %v1658_v17 }
 0x84a   : > { %v1660_v19 = vmul.f32 %v2261_v11, %v1659_v18 }
 0x84c   : > { %v1661_v20 = vadd.f32 0.2548296, %v1660_v19 }
 0x84e   : > { %v1662_v21 = vmul.f32 %v2261_v11, %v1661_v20 }
 0x850   : > { %v1667_v23 = vmul.f32 %v2263_v22, %v1662_v21 }
 0x852   : > { %v1668_v24 = vsub.f32 1.0, %v1667_v23 }
 0x854   : > { %v1669_v27 = vmul.f32 %v1668_v24, %v1648_v26 }
 0x856   : > { %v1671_v29 = vadd.f32 1.0, %v1669_v27 }
 0x858   : > { %v1672_v30 = vmul.f32 %v1671_v29, %v1670_v28 }
 0x85a   : > { %v1673_v31 = vpack.c.bf16 %v1672_v30, %v1672_v30 }
 0x85c   : > { %2137 = vmatmul.mubr.bf16.vlgmr.msra.gmra.mrb[32].mxu1 %v1673_v31 }
 0x92f   : > { %v1779_v33 = vpop.f32.mrb[32].mxu1 }
 0x930   : > { %v1780_v34 = vadd.f32 %v1935_v32, %v1779_v33  ;;  %v2138_v35 = vpop.f32.mrb[33].mxu1 }
 0x931   : > { %v1782_v36 = vpop.f32.mrb[34].mxu1 }
 0x932   : > { %v2139_v37 = vpop.f32.mrb[35].mxu1  ;;  %v1785_v38 = vadd.f32 %v1780_v34, %v2720_v52 }
 0x934   : > { %v1788_v39 = vsel %vm504_vm1, %v1785_v38, 0.0 }
 0x935   : > { %1789 = vadd.xlane.f32.xlu0 %v1788_v39 }
 0x9c2   : > { %v1790_v40 = vpop.xlane.xlu0 %1789 }
 0x9c3   : > { %v1791_v41 = vmul.f32 0.03125, %v1790_v40 }
 0x9c5   : > { %v1792_v42 = vsub.f32 %v1785_v38, %v1791_v41 }
 0x9c7   : > { %v1793_v43 = vmul.f32 %v1792_v42, %v1792_v42 }
 0x9c9   : > { %v1794_v44 = vsel %vm504_vm1, %v1793_v43, 0.0 }
 0x9ca   : > { %1795 = vadd.xlane.f32.xlu0 %v1794_v44 }
 0xa57   : > { %v1796_v3 = vpop.xlane.xlu0 %1795 }
 0xa58   : > { %v1797_v45 = vmul.f32 0.03125, %v1796_v3 }
 0xa5a   : > { %v1798_v46 = vadd.f32 1e-05, %v1797_v45 }
 0xa5c   : > { %2264 = vrsqrt.f32 %v1798_v46 }
 0xa66   : > { %v2265_v47 = vpop.eup %2264 }
 0xa67   : > { %v1800_v49 = vmul.f32 %v2265_v47, %v1792_v42 }
 0xa69   : > { %v1807_v51 = vmul.f32 %v1944_v48, %v1800_v49 }
 0xa6b   : > { %v1814_v52 = vadd.f32 %v1945_v50, %v1807_v51 }
 0xa6d   : > { %1815 = vst.msk [vmem:[%s469_s26] sm:$0xff] %vm504_vm1, %v1814_v52 }
 0xa6e   : > { %2279 = shalt.err (!%p2276_p3)
}
 0xa6f   : > { %s2280_s1 = scalar_lea.hbm %s2776_s4, 128  ;;  %s2284_s18 = scalar_lea.hbm %s2833_s14, 256 }
 0xa70   : > { %p2281_p4 = scmp.ne.s32.totalorder %s2776_s4, %s2280_s1  ;;  %p2285_p9 = scmp.lt.u32.totalorder %s2776_s4, %s2833_s14 }
 0xa71   : > { %p2286_p10 = scmp.lt.u32.totalorder %s2284_s18, %s2280_s1  ;;  %p2288_p12 = scmp.lt.u32.totalorder %s2280_s1, %s2776_s4 }
 0xa72   : > { %p2282_p7 = pnand %p2281_p4, %p2477_p5 }
 0xa73   : > { %p2287_p11 = por %p2286_p10, %p2285_p9 }
 0xa74   : > { %p2283_p8 = pneg %p2282_p7 }
 0xa75   : > { %p2289_p13 = por %p2288_p12, %p2287_p11 }
 0xa77   : > { %p2290_p0 = pnand %p2289_p13, %p2283_p8 }
 0xa79   : > { %2293 = shalt.err (!%p2290_p0)
}
 0xa7a   : > { %2140 = dma.vmem_to_hbm [thread:$0]  (%p2477_p5), %s2778_s27, 128, %s2776_s4, %s1817_s2  }
 0xa7b PF: > { %p2146_p1 = scmp.ge.s32.totalorder %s2328_s16, 2  ;;  %s1842_s20 = sand.u32 1, %s2316_s29  }
 0xa7c   : > { %s1843_s17 = scalar_lea.sflag [#allocation4], %s1842_s20 }
 0xa7d   : > { %p2143_p2 = pnand %p2146_p1, %p2481_p6 }
 0xa7f   : > { %2311 = dma.done.wait (!%p2143_p2), %s1843_s17, 128  }
 0xa80   : > { %2313 = vsyncadd (!%p2143_p2), %s1843_s17, 4294967168  ;;  %p24_p3 = scmp.ge.s32.totalorder %s2464_s19, 4   ;;  %s2846_s29 = smov %s2320_s30 }
 0xa81   : > { %s2847_s30 = smov %s2324_s15  ;;  %s2848_s15 = smov %s2475_s22 }
 0xa82   : > { %s2849_s16 = smov %s2464_s19  ;;  %26 = sbr.rel (!%p24_p3) target bundleno = 9 (0x9), region = 114 }
 0xa89   :  { %1848 = vsyncpa [#allocation4], 1 }
 0xa8a   :  { %1850 = vsyncpa [#allocation4 + $0x1], 1 }

</bundles_post_ra>
